<compile_context>
chip_gen: v7x
topology: tpu7x:2x2x1
jax: 0.10.0
libtpu: 0.0.40
codegen_flags: <defaults>
</compile_context>

<pallas_src>
import jax
import jax.numpy as jnp
from jax.experimental import pallas as pl
from jax.experimental.pallas import tpu as pltpu

C_IN = 20                 # config['in_channels']
C_HALF = 10
H = 112                   # conv kernel height == full input height
W = 112                   # output spatial width -> 32 * 1 * 112 features/encoder
CO = 32
N_ACTIONS = 3             # config['action']
CH_HALF = C_HALF * H      # 1120
CH_FULL = C_IN * H        # 2240
LATENT = 2 * CO * W       # 7168
HID1, HID2 = 1024, 60


# ------------------- fused ego+obs conv encoder (1 launch) ------------------ #
def _encoder_kernel(x_ref, w_ref, b_ref, o_ref):
    # x_ref: (1, 2240, 112) f32   w_ref: (64, 2240) bf16
    # b_ref: (64, 1) f32          o_ref: (1, 64, 112) bf16
    x = x_ref[0].astype(jnp.bfloat16)                                # VPU cast
    acc = jnp.dot(w_ref[...], x, preferred_element_type=jnp.float32)  # (64, 112)
    acc = acc + b_ref[...]
    o_ref[0] = jnp.maximum(acc, 0.0).astype(o_ref.dtype)            # ReLU


def fused_encoder(x_flat, w_packed, b_packed):
    # x_flat: (N, 2240, 112) f32, w_packed: (64, 2240) bf16, b_packed: (64, 1)
    n = x_flat.shape[0]
    co2 = w_packed.shape[0]
    return pl.pallas_call(
        _encoder_kernel,
        out_shape=jax.ShapeDtypeStruct((n, co2, W), jnp.bfloat16),
        grid_spec=pltpu.PrefetchScalarGridSpec(
            num_scalar_prefetch=0,
            grid=(n,),
            in_specs=[
                pl.BlockSpec((1, CH_FULL, W), lambda i: (i, 0, 0)),
                pl.BlockSpec((co2, CH_FULL), lambda i: (0, 0)),
                pl.BlockSpec((co2, 1), lambda i: (0, 0)),
            ],
            out_specs=pl.BlockSpec((1, co2, W), lambda i: (i, 0, 0)),
        ),
        compiler_params=pltpu.CompilerParams(
            dimension_semantics=("parallel",)),
    )(x_flat, w_packed, b_packed)


# ----------------------- linear1: 7168 -> 1024 (+ReLU) ---------------------- #
def _linear1_kernel(x_ref, w_ref, b_ref, o_ref):
    y = jnp.dot(x_ref[...], w_ref[...], preferred_element_type=jnp.float32)
    y = y + b_ref[...]
    o_ref[...] = jnp.maximum(y, 0.0).astype(o_ref.dtype)


def linear1(x, w, b, *, tile_n=512):
    # x: (B, 7168) bf16, w: (7168, 1024) bf16, b: (1, 1024) f32 -> (B, 1024) bf16
    bsz, k = x.shape
    n = w.shape[1]
    assert n % tile_n == 0
    flops = 2 * bsz * k * n
    bytes_accessed = (x.size * x.dtype.itemsize + w.size * w.dtype.itemsize
                      + b.size * b.dtype.itemsize + bsz * n * 2)
    return pl.pallas_call(
        _linear1_kernel,
        out_shape=jax.ShapeDtypeStruct((bsz, n), jnp.bfloat16),
        grid_spec=pltpu.PrefetchScalarGridSpec(
            num_scalar_prefetch=0,
            grid=(n // tile_n,),   # 2 tiles -> both v7x TensorCores stream w1
            in_specs=[
                pl.BlockSpec((bsz, k), lambda j: (0, 0)),
                pl.BlockSpec((k, tile_n), lambda j: (0, j)),
                pl.BlockSpec((1, tile_n), lambda j: (0, j)),
            ],
            out_specs=pl.BlockSpec((bsz, tile_n), lambda j: (0, j)),
        ),
        compiler_params=pltpu.CompilerParams(
            dimension_semantics=("parallel",),
            vmem_limit_bytes=40 << 20),   # headroom for 2x7.3MB bf16 w1 buffers
        cost_estimate=pl.CostEstimate(
            flops=flops, transcendentals=0, bytes_accessed=bytes_accessed),
    )(x, w, b)


# -------------- fused MLP tail: (1024->60, ReLU) then (60->3) --------------- #
def _mlp_tail_kernel(h1_ref, w2_ref, b2_ref, w3_ref, b3_ref, o_ref):
    h2 = jnp.dot(h1_ref[...], w2_ref[...], preferred_element_type=jnp.float32)
    h2 = jnp.maximum(h2 + b2_ref[...], 0.0)                          # (B, 60)
    out = jnp.dot(h2.astype(jnp.bfloat16), w3_ref[...],
                  preferred_element_type=jnp.float32)                # (B, 3)
    o_ref[...] = (out + b3_ref[...]).astype(o_ref.dtype)


def mlp_tail(h1, w2, b2, w3, b3):
    bsz = h1.shape[0]
    return pl.pallas_call(
        _mlp_tail_kernel,
        out_shape=jax.ShapeDtypeStruct((bsz, N_ACTIONS), jnp.float32),
        grid_spec=pltpu.PrefetchScalarGridSpec(
            num_scalar_prefetch=0,
            grid=(1,),
            in_specs=[
                pl.BlockSpec((bsz, HID1), lambda i: (0, 0)),
                pl.BlockSpec((HID1, HID2), lambda i: (0, 0)),
                pl.BlockSpec((1, HID2), lambda i: (0, 0)),
                pl.BlockSpec((HID2, N_ACTIONS), lambda i: (0, 0)),
                pl.BlockSpec((1, N_ACTIONS), lambda i: (0, 0)),
            ],
            out_specs=pl.BlockSpec((bsz, N_ACTIONS), lambda i: (0, 0)),
        ),
        compiler_params=pltpu.CompilerParams(
            dimension_semantics=("arbitrary",)),
    )(h1, w2, b2, w3, b3)


# ------------------------------ parameters ---------------------------------- #
def _xavier(key, shape, fan_in, fan_out, dtype=jnp.float32):
    limit = (6.0 / (fan_in + fan_out)) ** 0.5
    return jax.random.uniform(key, shape, jnp.float32, -limit, limit).astype(dtype)


def init_params(key):
    ks = jax.random.split(key, 5)
    # PyTorch conv weights (32, 10, 112, 1) flattened row-major to (32, 1120)
    w_ego = _xavier(ks[0], (CO, CH_HALF), fan_in=CH_HALF, fan_out=CO * H)
    w_obs = _xavier(ks[1], (CO, CH_HALF), fan_in=CH_HALF, fan_out=CO * H)
    # Block-diagonal packing: ego rows see channels 0-9, obs rows see 10-19.
    w_enc = jnp.zeros((2 * CO, CH_FULL), jnp.float32)
    w_enc = w_enc.at[:CO, :CH_HALF].set(w_ego)
    w_enc = w_enc.at[CO:, CH_HALF:].set(w_obs)
    return {
        "w_enc": w_enc.astype(jnp.bfloat16),
        "b_enc": jnp.zeros((2 * CO, 1), jnp.float32),
        # Linear weights stored already transposed: (in_features, out_features)
        "w1": _xavier(ks[2], (LATENT, HID1), LATENT, HID1, jnp.bfloat16),
        "b1": jnp.zeros((1, HID1), jnp.float32),
        "w2": _xavier(ks[3], (HID1, HID2), HID1, HID2, jnp.bfloat16),
        "b2": jnp.zeros((1, HID2), jnp.float32),
        "w3": _xavier(ks[4], (HID2, N_ACTIONS), HID2, N_ACTIONS, jnp.bfloat16),
        "b3": jnp.zeros((1, N_ACTIONS), jnp.float32),
    }


# -------------------------------- forward ----------------------------------- #
def trajectory_fcn(x, params):
    n, c, h, w = x.shape
    assert c == C_IN and h == H and w == W
    # Channel-major flatten (contiguous -> free): rows 0-1119 ego, 1120-2239 obs.
    x_flat = x.reshape(n, CH_FULL, w)

    lat = fused_encoder(x_flat, params["w_enc"], params["b_enc"])  # (n, 64, 112)
    # Contiguous reshape == torch.cat((latent_ego, latent_obs), 1) ordering.
    latent = lat.reshape(n, LATENT)                                # (n, 7168) bf16

    h1 = linear1(latent, params["w1"], params["b1"], tile_n=512)   # (n, 1024) bf16
    # TODO(synk): nn.Dropout is identity at inference; train-mode random masking not implemented.
    out = mlp_tail(h1, params["w2"], params["b2"], params["w3"], params["b3"])
    return out                                                     # (n, 3) f32


if __name__ == "__main__":
    key = jax.random.PRNGKey(0)
    pkey, xkey = jax.random.split(key)
    params = init_params(pkey)
    x = jax.random.normal(xkey, (2, C_IN, H, W), dtype=jnp.float32)

    fwd = jax.jit(trajectory_fcn)
    out = jax.block_until_ready(fwd(x, params))
    assert out.shape == (2, N_ACTIONS), out.shape
    assert bool(jnp.isfinite(out).all())
    print("KERNEL_OK")
</pallas_src>

<mosaic_0001>
module attributes {stable_mosaic.version = 11 : i64} {
  func.func @_encoder_kernel(%arg0: i32, %arg1: memref<1x2240x112xf32, #tpu.memory_space<vmem>>, %arg2: memref<64x2240xbf16, #tpu.memory_space<vmem>>, %arg3: memref<64x1xf32, #tpu.memory_space<vmem>>, %arg4: memref<1x64x112xbf16, #tpu.memory_space<vmem>>) attributes {dimension_semantics = [#tpu.dimension_semantics<parallel>], iteration_bounds = array<i64: 2>, scalar_prefetch = 0 : i64, scratch_operands = 0 : i64, tpu.core_type = #tpu.core_type<tc>, window_params = [{transform_indices = @transform_0, window_bounds = array<i64: 1, 2240, 112>}, {pipeline_mode = #tpu.pipeline_mode<synchronous>, transform_indices = @transform_1, window_bounds = array<i64: 64, 2240>}, {pipeline_mode = #tpu.pipeline_mode<synchronous>, transform_indices = @transform_2, window_bounds = array<i64: 64, 1>}, {transform_indices = @transform_3, window_bounds = array<i64: 1, 64, 112>}]} {
    %c0 = arith.constant 0 : index
    %c0_0 = arith.constant 0 : index
    %c0_1 = arith.constant 0 : index
    %0 = vector.load %arg1[%c0, %c0_0, %c0_1] : memref<1x2240x112xf32, #tpu.memory_space<vmem>>, vector<1x2240x112xf32>
    %1 = vector.shape_cast %0 : vector<1x2240x112xf32> to vector<2240x112xf32>
    %2 = arith.truncf %1 : vector<2240x112xf32> to vector<2240x112xbf16>
    %c0_2 = arith.constant 0 : index
    %c0_3 = arith.constant 0 : index
    %3 = vector.load %arg2[%c0_2, %c0_3] : memref<64x2240xbf16, #tpu.memory_space<vmem>>, vector<64x2240xbf16>
    %cst = arith.constant dense<0.000000e+00> : vector<64x112xf32>
    %4 = tpu.matmul %3, %2, %cst {dimension_numbers = #tpu.dot_dimension_numbers<[1], [0], [0], [1], [0, 0, 1, 1], [], []>} : vector<64x2240xbf16>, vector<2240x112xbf16>, vector<64x112xf32> -> vector<64x112xf32>
    %c0_4 = arith.constant 0 : index
    %c0_5 = arith.constant 0 : index
    %5 = vector.load %arg3[%c0_4, %c0_5] : memref<64x1xf32, #tpu.memory_space<vmem>>, vector<64x1xf32>
    %6 = vector.broadcast %5 : vector<64x1xf32> to vector<64x112xf32>
    %7 = arith.addf %4, %6 : vector<64x112xf32>
    %cst_6 = arith.constant 0.000000e+00 : f32
    %8 = vector.broadcast %cst_6 : f32 to vector<64x112xf32>
    %9 = arith.maximumf %7, %8 : vector<64x112xf32>
    %10 = arith.truncf %9 : vector<64x112xf32> to vector<64x112xbf16>
    %c0_7 = arith.constant 0 : index
    %c0_8 = arith.constant 0 : index
    %c0_9 = arith.constant 0 : index
    %11 = vector.load %arg4[%c0_7, %c0_8, %c0_9] : memref<1x64x112xbf16, #tpu.memory_space<vmem>>, vector<1x64x112xbf16>
    %12 = vector.shape_cast %11 : vector<1x64x112xbf16> to vector<64x112xbf16>
    %13 = vector.shape_cast %10 : vector<64x112xbf16> to vector<1x64x112xbf16>
    tpu.vector_store %arg4[%c0_7, %c0_8, %c0_9], %13 {strides = array<i32>} : memref<1x64x112xbf16, #tpu.memory_space<vmem>>, vector<1x64x112xbf16>,
    return
  }
  func.func @transform_0(%arg0: i32) -> (i32, i32, i32) {
    %c0_i32 = arith.constant 0 : i32
    %c0_i32_0 = arith.constant 0 : i32
    %c0_i32_1 = arith.constant 0 : i32
    return %arg0, %c0_i32, %c0_i32_0 : i32, i32, i32
  }
  func.func @transform_1(%arg0: i32) -> (i32, i32) {
    %c0_i32 = arith.constant 0 : i32
    %c0_i32_0 = arith.constant 0 : i32
    %c0_i32_1 = arith.constant 0 : i32
    return %c0_i32, %c0_i32_0 : i32, i32
  }
  func.func @transform_2(%arg0: i32) -> (i32, i32) {
    %c0_i32 = arith.constant 0 : i32
    %c0_i32_0 = arith.constant 0 : i32
    %c0_i32_1 = arith.constant 0 : i32
    return %c0_i32, %c0_i32_0 : i32, i32
  }
  func.func @transform_3(%arg0: i32) -> (i32, i32, i32) {
    %c0_i32 = arith.constant 0 : i32
    %c0_i32_0 = arith.constant 0 : i32
    %c0_i32_1 = arith.constant 0 : i32
    return %arg0, %c0_i32, %c0_i32_0 : i32, i32, i32
  }
}

module attributes {stable_mosaic.version = 11 : i64} {
  func.func @_mlp_tail_kernel(%arg0: i32, %arg1: memref<2x1024xbf16, #tpu.memory_space<vmem>>, %arg2: memref<1024x60xbf16, #tpu.memory_space<vmem>>, %arg3: memref<1x60xf32, #tpu.memory_space<vmem>>, %arg4: memref<60x3xbf16, #tpu.memory_space<vmem>>, %arg5: memref<1x3xf32, #tpu.memory_space<vmem>>, %arg6: memref<2x3xf32, #tpu.memory_space<vmem>>) attributes {dimension_semantics = [#tpu.dimension_semantics<arbitrary>], iteration_bounds = array<i64: 1>, scalar_prefetch = 0 : i64, scratch_operands = 0 : i64, tpu.core_type = #tpu.core_type<tc>, window_params = [{pipeline_mode = #tpu.pipeline_mode<synchronous>, transform_indices = @transform_0, window_bounds = array<i64: 2, 1024>}, {pipeline_mode = #tpu.pipeline_mode<synchronous>, transform_indices = @transform_1, window_bounds = array<i64: 1024, 60>}, {pipeline_mode = #tpu.pipeline_mode<synchronous>, transform_indices = @transform_2, window_bounds = array<i64: 1, 60>}, {pipeline_mode = #tpu.pipeline_mode<synchronous>, transform_indices = @transform_3, window_bounds = array<i64: 60, 3>}, {pipeline_mode = #tpu.pipeline_mode<synchronous>, transform_indices = @transform_4, window_bounds = array<i64: 1, 3>}, {pipeline_mode = #tpu.pipeline_mode<synchronous>, transform_indices = @transform_5, window_bounds = array<i64: 2, 3>}]} {
    %c0 = arith.constant 0 : index
    %c0_0 = arith.constant 0 : index
    %0 = vector.load %arg1[%c0, %c0_0] : memref<2x1024xbf16, #tpu.memory_space<vmem>>, vector<2x1024xbf16>
    %c0_1 = arith.constant 0 : index
    %c0_2 = arith.constant 0 : index
    %1 = vector.load %arg2[%c0_1, %c0_2] : memref<1024x60xbf16, #tpu.memory_space<vmem>>, vector<1024x60xbf16>
    %cst = arith.constant dense<0.000000e+00> : vector<2x60xf32>
    %2 = tpu.matmul %0, %1, %cst {dimension_numbers = #tpu.dot_dimension_numbers<[1], [0], [0], [1], [0, 0, 1, 1], [], []>} : vector<2x1024xbf16>, vector<1024x60xbf16>, vector<2x60xf32> -> vector<2x60xf32>
    %c0_3 = arith.constant 0 : index
    %c0_4 = arith.constant 0 : index
    %3 = vector.load %arg3[%c0_3, %c0_4] : memref<1x60xf32, #tpu.memory_space<vmem>>, vector<1x60xf32>
    %4 = vector.broadcast %3 : vector<1x60xf32> to vector<2x60xf32>
    %5 = arith.addf %2, %4 : vector<2x60xf32>
    %cst_5 = arith.constant 0.000000e+00 : f32
    %6 = vector.broadcast %cst_5 : f32 to vector<2x60xf32>
    %7 = arith.maximumf %5, %6 : vector<2x60xf32>
    %8 = arith.truncf %7 : vector<2x60xf32> to vector<2x60xbf16>
    %c0_6 = arith.constant 0 : index
    %c0_7 = arith.constant 0 : index
    %9 = vector.load %arg4[%c0_6, %c0_7] : memref<60x3xbf16, #tpu.memory_space<vmem>>, vector<60x3xbf16>
    %cst_8 = arith.constant dense<0.000000e+00> : vector<2x3xf32>
    %10 = tpu.matmul %8, %9, %cst_8 {dimension_numbers = #tpu.dot_dimension_numbers<[1], [0], [0], [1], [0, 0, 1, 1], [], []>} : vector<2x60xbf16>, vector<60x3xbf16>, vector<2x3xf32> -> vector<2x3xf32>
    %c0_9 = arith.constant 0 : index
    %c0_10 = arith.constant 0 : index
    %11 = vector.load %arg5[%c0_9, %c0_10] : memref<1x3xf32, #tpu.memory_space<vmem>>, vector<1x3xf32>
    %12 = vector.broadcast %11 : vector<1x3xf32> to vector<2x3xf32>
    %13 = arith.addf %10, %12 : vector<2x3xf32>
    %c0_11 = arith.constant 0 : index
    %c0_12 = arith.constant 0 : index
    %14 = vector.load %arg6[%c0_11, %c0_12] : memref<2x3xf32, #tpu.memory_space<vmem>>, vector<2x3xf32>
    tpu.vector_store %arg6[%c0_11, %c0_12], %13 {strides = array<i32>} : memref<2x3xf32, #tpu.memory_space<vmem>>, vector<2x3xf32>,
    return
  }
  func.func @transform_0(%arg0: i32) -> (i32, i32) {
    %c0_i32 = arith.constant 0 : i32
    %c0_i32_0 = arith.constant 0 : i32
    %c0_i32_1 = arith.constant 0 : i32
    return %c0_i32, %c0_i32_0 : i32, i32
  }
  func.func @transform_1(%arg0: i32) -> (i32, i32) {
    %c0_i32 = arith.constant 0 : i32
    %c0_i32_0 = arith.constant 0 : i32
    %c0_i32_1 = arith.constant 0 : i32
    return %c0_i32, %c0_i32_0 : i32, i32
  }
  func.func @transform_2(%arg0: i32) -> (i32, i32) {
    %c0_i32 = arith.constant 0 : i32
    %c0_i32_0 = arith.constant 0 : i32
    %c0_i32_1 = arith.constant 0 : i32
    return %c0_i32, %c0_i32_0 : i32, i32
  }
  func.func @transform_3(%arg0: i32) -> (i32, i32) {
    %c0_i32 = arith.constant 0 : i32
    %c0_i32_0 = arith.constant 0 : i32
    %c0_i32_1 = arith.constant 0 : i32
    return %c0_i32, %c0_i32_0 : i32, i32
  }
  func.func @transform_4(%arg0: i32) -> (i32, i32) {
    %c0_i32 = arith.constant 0 : i32
    %c0_i32_0 = arith.constant 0 : i32
    %c0_i32_1 = arith.constant 0 : i32
    return %c0_i32, %c0_i32_0 : i32, i32
  }
  func.func @transform_5(%arg0: i32) -> (i32, i32) {
    %c0_i32 = arith.constant 0 : i32
    %c0_i32_0 = arith.constant 0 : i32
    %c0_i32_1 = arith.constant 0 : i32
    return %c0_i32, %c0_i32_0 : i32, i32
  }
}

module attributes {stable_mosaic.version = 11 : i64} {
  func.func @_linear1_kernel(%arg0: i32, %arg1: memref<2x7168xbf16, #tpu.memory_space<vmem>>, %arg2: memref<7168x512xbf16, #tpu.memory_space<vmem>>, %arg3: memref<1x512xf32, #tpu.memory_space<vmem>>, %arg4: memref<2x512xbf16, #tpu.memory_space<vmem>>) attributes {dimension_semantics = [#tpu.dimension_semantics<parallel>], iteration_bounds = array<i64: 2>, scalar_prefetch = 0 : i64, scratch_operands = 0 : i64, tpu.core_type = #tpu.core_type<tc>, window_params = [{pipeline_mode = #tpu.pipeline_mode<synchronous>, transform_indices = @transform_0, window_bounds = array<i64: 2, 7168>}, {transform_indices = @transform_1, window_bounds = array<i64: 7168, 512>}, {transform_indices = @transform_2, window_bounds = array<i64: 1, 512>}, {transform_indices = @transform_3, window_bounds = array<i64: 2, 512>}]} {
    %c0 = arith.constant 0 : index
    %c0_0 = arith.constant 0 : index
    %0 = vector.load %arg1[%c0, %c0_0] : memref<2x7168xbf16, #tpu.memory_space<vmem>>, vector<2x7168xbf16>
    %c0_1 = arith.constant 0 : index
    %c0_2 = arith.constant 0 : index
    %1 = vector.load %arg2[%c0_1, %c0_2] : memref<7168x512xbf16, #tpu.memory_space<vmem>>, vector<7168x512xbf16>
    %cst = arith.constant dense<0.000000e+00> : vector<2x512xf32>
    %2 = tpu.matmul %0, %1, %cst {dimension_numbers = #tpu.dot_dimension_numbers<[1], [0], [0], [1], [0, 0, 1, 1], [], []>} : vector<2x7168xbf16>, vector<7168x512xbf16>, vector<2x512xf32> -> vector<2x512xf32>
    %c0_3 = arith.constant 0 : index
    %c0_4 = arith.constant 0 : index
    %3 = vector.load %arg3[%c0_3, %c0_4] : memref<1x512xf32, #tpu.memory_space<vmem>>, vector<1x512xf32>
    %4 = vector.broadcast %3 : vector<1x512xf32> to vector<2x512xf32>
    %5 = arith.addf %2, %4 : vector<2x512xf32>
    %cst_5 = arith.constant 0.000000e+00 : f32
    %6 = vector.broadcast %cst_5 : f32 to vector<2x512xf32>
    %7 = arith.maximumf %5, %6 : vector<2x512xf32>
    %8 = arith.truncf %7 : vector<2x512xf32> to vector<2x512xbf16>
    %c0_6 = arith.constant 0 : index
    %c0_7 = arith.constant 0 : index
    %9 = vector.load %arg4[%c0_6, %c0_7] : memref<2x512xbf16, #tpu.memory_space<vmem>>, vector<2x512xbf16>
    tpu.vector_store %arg4[%c0_6, %c0_7], %8 {strides = array<i32>} : memref<2x512xbf16, #tpu.memory_space<vmem>>, vector<2x512xbf16>,
    return
  }
  func.func @transform_0(%arg0: i32) -> (i32, i32) {
    %c0_i32 = arith.constant 0 : i32
    %c0_i32_0 = arith.constant 0 : i32
    %c0_i32_1 = arith.constant 0 : i32
    return %c0_i32, %c0_i32_0 : i32, i32
  }
  func.func @transform_1(%arg0: i32) -> (i32, i32) {
    %c0_i32 = arith.constant 0 : i32
    %c0_i32_0 = arith.constant 0 : i32
    return %c0_i32, %arg0 : i32, i32
  }
  func.func @transform_2(%arg0: i32) -> (i32, i32) {
    %c0_i32 = arith.constant 0 : i32
    %c0_i32_0 = arith.constant 0 : i32
    return %c0_i32, %arg0 : i32, i32
  }
  func.func @transform_3(%arg0: i32) -> (i32, i32) {
    %c0_i32 = arith.constant 0 : i32
    %c0_i32_0 = arith.constant 0 : i32
    return %c0_i32, %arg0 : i32, i32
  }
}

</mosaic_0001>

<bundles_post_ra>
// kernel: trajectory_fcn.5
= control target key start
LH: loop header
LB: loop body
LE: loop exit
PB: predicated region body
PF: predicated region fallthrough
CT: control target
= control target key end

     0   :  { %v163_v28 = vlaneseq  ;;  %v1137_v36 = vmov 1966171168   ;;  %s1409_s0 = inlined_call_operand.vmem [shape: bf16[2,1024], index: 0, kind: input, shape index: {}]   ;;  %s1410_s1 = inlined_call_operand.vmem [shape: bf16[1024,60], index: 1, kind: input, shape index: {}]   ;;  %s1411_s2 = inlined_call_operand.vmem [shape: f32[1,60], index: 2, kind: input, shape index: {}]   ;;  %s1412_s3 = inlined_call_operand.vmem [shape: bf16[60,3], index: 3, kind: input, shape index: {}]   ;;  %s1413_s4 = inlined_call_operand.vmem [shape: f32[1,3], index: 4, kind: input, shape index: {}]   ;;  %s1414_s5 = inlined_call_operand.hbm [shape: f32[2,3], index: 5, kind: output, shape index: {}]  }
   0x1   :  { %v1044_v0 = vld [vmem:[%s1410_s1 + $0x40] sm:$0xff]   ;;  %v1048_v4 = vld [vmem:[%s1410_s1 + $0x48] sm:$0xff]   ;;  %v1052_v8 = vld [vmem:[%s1410_s1 + $0x50] sm:$0xff]   ;;  %v161_v37 = vunpack.c.l.s4 %v1137_v36 }
   0x2   :  { %v1045_v1 = vld [vmem:[%s1410_s1 + $0xc0] sm:$0xff]   ;;  %935 = vmatprep.subr.bf16.mxu0 %v1044_v0  ;;  %v1049_v5 = vld [vmem:[%s1410_s1 + $0xc8] sm:$0xff]   ;;  %v1053_v9 = vld [vmem:[%s1410_s1 + $0xd0] sm:$0xff]   ;;  %v164_v33 = vshrl.u32 %v163_v28, 7 }
   0x3   :  { %v1046_v2 = vld [vmem:[%s1410_s1] sm:$0xff]   ;;  %957 = vmatprep.subr.bf16.mxu1 %v1045_v1  ;;  %v1050_v6 = vld [vmem:[%s1410_s1 + $0x8] sm:$0xff]   ;;  %v1054_v10 = vld [vmem:[%s1410_s1 + $0x10] sm:$0xff]   ;;  %v162_v40 = vunpack.c.0.s8 %v161_v37 }
   0x4   :  { %v1047_v3 = vld [vmem:[%s1410_s1 + $0x80] sm:$0xff]   ;;  %936 = vmatpush3.bf16.msra.mxu0 %v1046_v2  ;;  %v1051_v7 = vld [vmem:[%s1410_s1 + $0x88] sm:$0xff]   ;;  %v1055_v11 = vld [vmem:[%s1410_s1 + $0x90] sm:$0xff]  }
   0x5   :  { %958 = vmatpush3.bf16.msra.mxu1 %v1047_v3  ;;  %937 = vmatprep.subr.bf16.mxu0 %v1048_v4  ;;  %v1056_v12 = vld [vmem:[%s1410_s1 + $0x58] sm:$0xff]   ;;  %v1060_v16 = vld [vmem:[%s1410_s1 + $0x60] sm:$0xff]   ;;  %v1064_v20 = vld [vmem:[%s1410_s1 + $0x68] sm:$0xff]   ;;  %v1276_v41 = vsub.s32 %v162_v40, %v164_v33 }
   0x6   :  { %959 = vmatprep.subr.bf16.mxu1 %v1049_v5  ;;  %v1057_v13 = vld [vmem:[%s1410_s1 + $0xd8] sm:$0xff]   ;;  %v1061_v17 = vld [vmem:[%s1410_s1 + $0xe0] sm:$0xff]   ;;  %v1065_v21 = vld [vmem:[%s1410_s1 + $0xe8] sm:$0xff]  }
   0x7   :  { %v1058_v14 = vld [vmem:[%s1410_s1 + $0x18] sm:$0xff]   ;;  %v1062_v18 = vld [vmem:[%s1410_s1 + $0x20] sm:$0xff]   ;;  %v1066_v22 = vld [vmem:[%s1410_s1 + $0x28] sm:$0xff]  }
   0x8   :  { %938 = vmatpush3.bf16.msra.mxu0 %v1050_v6  ;;  %v1059_v15 = vld [vmem:[%s1410_s1 + $0x98] sm:$0xff]   ;;  %v1063_v19 = vld [vmem:[%s1410_s1 + $0xa0] sm:$0xff]   ;;  %v1067_v23 = vld [vmem:[%s1410_s1 + $0xa8] sm:$0xff]  }
   0x9   :  { %960 = vmatpush3.bf16.msra.mxu1 %v1051_v7  ;;  %939 = vmatprep.subr.bf16.mxu0 %v1052_v8  ;;  %v1068_v24 = vld [vmem:[%s1410_s1 + $0x70] sm:$0xff]   ;;  %v1072_v29 = vld [vmem:[%s1410_s1 + $0x78] sm:$0xff]   ;;  %v22_v34 = vld [vmem:[%s1409_s0] sm:$0xff] }
   0xa   :  { %961 = vmatprep.subr.bf16.mxu1 %v1053_v9  ;;  %v1069_v25 = vld [vmem:[%s1410_s1 + $0xf0] sm:$0xff]   ;;  %v1073_v30 = vld [vmem:[%s1410_s1 + $0xf8] sm:$0xff]   ;;  %v1077_v35 = vld [vmem:[%s1410_s1 + $0x140] sm:$0xff]   ;;  %v159_v39 = vcombine.high %v22_v34, %v22_v34  ;;  %v166_v42 = vrot.slane %v22_v34, %v1276_v41 }
   0xb   :  { %v1070_v26 = vld [vmem:[%s1410_s1 + $0x30] sm:$0xff]   ;;  %v1074_v31 = vld [vmem:[%s1410_s1 + $0x38] sm:$0xff]   ;;  %v1078_v38 = vld [vmem:[%s1410_s1 + $0x1c0] sm:$0xff]  }
   0xc   :  { %940 = vmatpush3.bf16.msra.mxu0 %v1054_v10  ;;  %v1071_v27 = vld [vmem:[%s1410_s1 + $0xb0] sm:$0xff]   ;;  %v1075_v32 = vld [vmem:[%s1410_s1 + $0xb8] sm:$0xff]   ;;  %v1280_v43 = vrot.slane %v159_v39, %v1276_v41  ;;  %v174_v44 = vcombine.high %v166_v42, %v166_v42  ;;  %v182_v45 = vrot.slane %v166_v42, %v1276_v41  ;;  %v1079_v47 = vld [vmem:[%s1410_s1 + $0x100] sm:$0xff]  }
   0xd   :  { %962 = vmatpush3.bf16.msra.mxu1 %v1055_v11  ;;  %941 = vmatprep.subr.bf16.mxu0 %v1056_v12  ;;  %v1080_v49 = vld [vmem:[%s1410_s1 + $0x180] sm:$0xff]   ;;  %v1081_v52 = vld [vmem:[%s1410_s1 + $0x148] sm:$0xff]   ;;  %v1085_v58 = vld [vmem:[%s1410_s1 + $0x150] sm:$0xff]  }
   0xe   :  { %963 = vmatprep.subr.bf16.mxu1 %v1057_v13  ;;  %v175_v46 = vcombine.high %v1280_v43, %v1280_v43  ;;  %v196_v48 = vrot.slane %v174_v44, %v1276_v41  ;;  %v204_v51 = vcombine.high %v182_v45, %v182_v45  ;;  %v1082_v54 = vld [vmem:[%s1410_s1 + $0x1c8] sm:$0xff]   ;;  %v1086_v59 = vld [vmem:[%s1410_s1 + $0x1d0] sm:$0xff]   ;;  %v1089_v62 = vld [vmem:[%s1410_s1 + $0x158] sm:$0xff]  }
   0xf   :  { %v1083_v55 = vld [vmem:[%s1410_s1 + $0x108] sm:$0xff]   ;;  %v1087_v60 = vld [vmem:[%s1410_s1 + $0x110] sm:$0xff]   ;;  %v1090_v63 = vld [vmem:[%s1410_s1 + $0x1d8] sm:$0xff]  }
  0x10   :  { %942 = vmatpush3.bf16.msra.mxu0 %v1058_v14  ;;  %v203_v50 = vrot.slane %v175_v46, %v1276_v41  ;;  %632 = vmatprep.mubr.bf16.mxu0 %v196_v48  ;;  %v206_v53 = vcombine.high %v196_v48, %v196_v48  ;;  %v1084_v57 = vld [vmem:[%s1410_s1 + $0x188] sm:$0xff]   ;;  %v1088_v61 = vld [vmem:[%s1410_s1 + $0x190] sm:$0xff]   ;;  %v1091_v0 = vld [vmem:[%s1410_s1 + $0x118] sm:$0xff]  }
  0x11   :  { %964 = vmatpush3.bf16.msra.mxu1 %v1059_v15  ;;  %943 = vmatprep.subr.bf16.mxu0 %v1060_v16  ;;  %v1092_v1 = vld [vmem:[%s1410_s1 + $0x198] sm:$0xff]   ;;  %v1093_v2 = vld [vmem:[%s1410_s1 + $0x160] sm:$0xff]   ;;  %v1097_v6 = vld [vmem:[%s1410_s1 + $0x168] sm:$0xff]  }
  0x12   :  { %965 = vmatprep.subr.bf16.mxu1 %v1061_v17  ;;  %v207_v56 = vcombine.high %v203_v50, %v203_v50  ;;  %672 = vmatprep.mubr.bf16.mxu1 %v206_v53  ;;  %v1094_v3 = vld [vmem:[%s1410_s1 + $0x1e0] sm:$0xff]   ;;  %v1098_v7 = vld [vmem:[%s1410_s1 + $0x1e8] sm:$0xff]   ;;  %v1101_v10 = vld [vmem:[%s1410_s1 + $0x170] sm:$0xff]  }
  0x13   :  { %v1095_v4 = vld [vmem:[%s1410_s1 + $0x120] sm:$0xff]   ;;  %v1099_v8 = vld [vmem:[%s1410_s1 + $0x128] sm:$0xff]   ;;  %v1102_v11 = vld [vmem:[%s1410_s1 + $0x1f0] sm:$0xff]  }
  0x14   :  { %944 = vmatpush3.bf16.msra.mxu0 %v1062_v18  ;;  %v1096_v5 = vld [vmem:[%s1410_s1 + $0x1a0] sm:$0xff]   ;;  %v1100_v9 = vld [vmem:[%s1410_s1 + $0x1a8] sm:$0xff]   ;;  %v1103_v12 = vld [vmem:[%s1410_s1 + $0x130] sm:$0xff]  }
  0x15   :  { %966 = vmatpush3.bf16.msra.mxu1 %v1063_v19  ;;  %945 = vmatprep.subr.bf16.mxu0 %v1064_v20 }
  0x16   :  { %967 = vmatprep.subr.bf16.mxu1 %v1065_v21 }
  0x18   :  { %946 = vmatpush3.bf16.msra.mxu0 %v1066_v22 }
  0x19   :  { %968 = vmatpush3.bf16.msra.mxu1 %v1067_v23  ;;  %947 = vmatprep.subr.bf16.mxu0 %v1068_v24 }
  0x1a   :  { %969 = vmatprep.subr.bf16.mxu1 %v1069_v25 }
  0x1c   :  { %948 = vmatpush3.bf16.msra.mxu0 %v1070_v26 }
  0x1d   :  { %970 = vmatpush3.bf16.msra.mxu1 %v1071_v27  ;;  %949 = vmatprep.subr.bf16.mxu0 %v1072_v29 }
  0x1e   :  { %971 = vmatprep.subr.bf16.mxu1 %v1073_v30 }
  0x20   :  { %950 = vmatpush3.bf16.msra.mxu0 %v1074_v31 }
  0x21   :  { %972 = vmatpush3.bf16.msra.mxu1 %v1075_v32  ;;  %979 = vmatprep.subr.bf16.mxu0 %v1077_v35 }
  0x22   :  { %1001 = vmatprep.subr.bf16.mxu1 %v1078_v38 }
  0x23   :  { %633 = vmatmul.mubr.bf16.vlgmr.msra.gmra.mrb[0].mxu0 %v182_v45 }
  0x24   :  { %980 = vmatpush3.bf16.msra.mxu0 %v1079_v47  ;;  %673 = vmatmul.mubr.bf16.vlgmr.msra.gmra.mrb[0].mxu1 %v204_v51 }
  0x25   :  { %981 = vmatprep.subr.bf16.mxu0 %v1081_v52  ;;  %1002 = vmatpush3.bf16.msra.mxu1 %v1080_v49 }
  0x26   :  { %712 = vmatprep.mubr.bf16.mxu0 %v203_v50  ;;  %1003 = vmatprep.subr.bf16.mxu1 %v1082_v54 }
  0x27   :  { %752 = vmatprep.mubr.bf16.mxu1 %v207_v56 }
  0x28   :  { %982 = vmatpush3.bf16.msra.mxu0 %v1083_v55 }
  0x29   :  { %983 = vmatprep.subr.bf16.mxu0 %v1085_v58  ;;  %1004 = vmatpush3.bf16.msra.mxu1 %v1084_v57 }
  0x2a   :  { %1005 = vmatprep.subr.bf16.mxu1 %v1086_v59 }
  0x2c   :  { %984 = vmatpush3.bf16.msra.mxu0 %v1087_v60 }
  0x2d   :  { %985 = vmatprep.subr.bf16.mxu0 %v1089_v62  ;;  %1006 = vmatpush3.bf16.msra.mxu1 %v1088_v61 }
  0x2e   :  { %1007 = vmatprep.subr.bf16.mxu1 %v1090_v63 }
  0x30   :  { %986 = vmatpush3.bf16.msra.mxu0 %v1091_v0 }
  0x31   :  { %987 = vmatprep.subr.bf16.mxu0 %v1093_v2  ;;  %1008 = vmatpush3.bf16.msra.mxu1 %v1092_v1 }
  0x32   :  { %1009 = vmatprep.subr.bf16.mxu1 %v1094_v3 }
  0x34   :  { %988 = vmatpush3.bf16.msra.mxu0 %v1095_v4 }
  0x35   :  { %989 = vmatprep.subr.bf16.mxu0 %v1097_v6  ;;  %1010 = vmatpush3.bf16.msra.mxu1 %v1096_v5 }
  0x36   :  { %1011 = vmatprep.subr.bf16.mxu1 %v1098_v7 }
  0x38   :  { %990 = vmatpush3.bf16.msra.mxu0 %v1099_v8 }
  0x39   :  { %10 = vsyncpa [#allocation3], 0  ;;  %991 = vmatprep.subr.bf16.mxu0 %v1101_v10  ;;  %v1105_v13 = vld [vmem:[%s1410_s1 + $0x178] sm:$0xff]   ;;  %1012 = vmatpush3.bf16.msra.mxu1 %v1100_v9  ;;  %v1104_v14 = vld [vmem:[%s1410_s1 + $0x1b0] sm:$0xff]   ;;  %v189_v17 = vrot.slane %v1280_v43, %v1276_v41  ;;  %v1138_v21 = vmov 0.0   ;;  %vm804_vm0 = vcmask 1045504  }
  0x3a   :  { %1013 = vmatprep.subr.bf16.mxu1 %v1102_v11  ;;  %v1106_v15 = vld [vmem:[%s1410_s1 + $0x1f8] sm:$0xff]   ;;  %v1109_v20 = vld [vmem:[%s1412_s3] sm:$0xff]   ;;  %v1110_v22 = vld [vmem:[%s1412_s3 + $0x8] sm:$0xff]   ;;  %vm1139_vm1 = vmmov 0   ;;  %vm800_vm2 = vcmask 490496   ;;  %s1140_s29 = smov [#allocation2]  }
  0x3b   :  { %v1107_v16 = vld [vmem:[%s1410_s1 + $0x138] sm:$0xff]   ;;  %v205_v19 = vcombine.high %v189_v17, %v189_v17  ;;  %v1111_v23 = vld [vmem:[%s1412_s3 + $0x10] sm:$0xff]   ;;  %v864_v27 = vld [vmem:[%s1411_s2] ss:$0 sm:$0xff]  ;;  %s856_s30 = sshll.u32 %s1140_s29, 4  ;;  %vm848_vm3 = vcmask 17408   ;;  %s857_s30 = int_to_ptr.vmem [resolvable:$true] %s856_s30 }
  0x3c   :  { %992 = vmatpush3.bf16.msra.mxu0 %v1103_v12  ;;  %v1108_v18 = vld [vmem:[%s1410_s1 + $0x1b8] sm:$0xff]   ;;  %v929_v53 = vld [vmem:[%s1413_s4] ss:$0 sm:$0xff]  ;;  %s1113_s6 = scalar_lea.vmem %s857_s30, 32  ;;  %p1118_p1 = scmp.lt.s32.totalorder %s857_s30, %s857_s30 }
  0x3d   :  { %993 = vmatprep.subr.bf16.mxu0 %v1105_v13  ;;  %1014 = vmatpush3.bf16.msra.mxu1 %v1104_v14  ;;  %v1112_v24 = vld [vmem:[%s1412_s3 + $0x18] sm:$0x3f]   ;;  %p1114_p0 = scmp.ne.s32.totalorder %s857_s30, %s1113_s6  ;;  %p1119_p2 = scmp.lt.s32.totalorder %s1113_s6, %s1113_s6 }
  0x3e   :  { %1015 = vmatprep.subr.bf16.mxu1 %v1106_v15  ;;  %v806_v25 = vsel %vm804_vm0, %v1112_v24, 0 }
  0x3f   :  { %p1120_p3 = por %p1119_p2, %p1118_p1 }
  0x40   :  { %994 = vmatpush3.bf16.msra.mxu0 %v1107_v16 }
  0x41   :  { %1016 = vmatpush3.bf16.msra.mxu1 %v1108_v18  ;;  %1028 = vmatprep.subr.bf16.mxu0 %v1138_v21  ;;  %p1121_p4 = pnand %p1120_p3, %p1114_p0 }
  0x43   :  { %713 = vmatmul.mubr.bf16.vlgmr.msra.gmra.mrb[4].mxu0 %v189_v17 }
  0x44   :  { %753 = vmatmul.mubr.bf16.vlgmr.msra.gmra.mrb[4].mxu1 %v205_v19  ;;  %1029 = vmatpush3.bf16.msra.mxu0 %v1109_v20 }
  0x45   :  { %1030 = vmatprep.subr.bf16.mxu0 %v1138_v21  ;;  %1036 = vmatprep.mubr.msk.bf16.mxu0 %vm1139_vm1, %v1138_v21 }
  0x48   :  { %1031 = vmatpush3.bf16.msra.mxu0 %v1110_v22 }
  0x49   :  { %1032 = vmatprep.subr.bf16.mxu0 %v1138_v21 }
  0x4c   :  { %1033 = vmatpush3.bf16.msra.mxu0 %v1111_v23 }
  0x4d   :  { %1034 = vmatprep.subr.bf16.mxu0 %v1138_v21 }
  0x50   :  { %1035 = vmatpush3.bf16.msra.mxu0 %v806_v25 }
  0xf6   :  { %v951_v26 = vpop.f32.mrb[0].mxu0 }
  0xf7   :  { %v952_v28 = vpop.f32.mrb[1].mxu0  ;;  %v973_v29 = vpop.f32.mrb[0].mxu1 }
  0xf8   :  { %v953_v30 = vadd.f32 %v952_v28, %v951_v26  ;;  %v954_v31 = vpop.f32.mrb[2].mxu0  ;;  %v974_v32 = vpop.f32.mrb[1].mxu1 }
  0xf9   :  { %v955_v33 = vpop.f32.mrb[3].mxu0  ;;  %v975_v35 = vadd.f32 %v974_v32, %v973_v29  ;;  %v976_v36 = vpop.f32.mrb[2].mxu1 }
  0xfa   :  { %v635_v34 = vadd.f32 %v953_v30, %v864_v27  ;;  %v977_v37 = vpop.f32.mrb[3].mxu1 }
  0xfc   :  { %v675_v38 = vadd.f32 %v975_v35, %v635_v34 }
 0x116   :  { %v995_v39 = vpop.f32.mrb[4].mxu0 }
 0x117   :  { %v996_v40 = vpop.f32.mrb[5].mxu0  ;;  %v1017_v41 = vpop.f32.mrb[4].mxu1 }
 0x118   :  { %v997_v42 = vadd.f32 %v996_v40, %v995_v39  ;;  %v998_v43 = vpop.f32.mrb[6].mxu0  ;;  %v1018_v44 = vpop.f32.mrb[5].mxu1 }
 0x119   :  { %v999_v45 = vpop.f32.mrb[7].mxu0  ;;  %v1019_v47 = vadd.f32 %v1018_v44, %v1017_v41  ;;  %v1020_v48 = vpop.f32.mrb[6].mxu1 }
 0x11a   :  { %v715_v46 = vadd.f32 %v997_v42, %v675_v38  ;;  %v1021_v49 = vpop.f32.mrb[7].mxu1 }
 0x11c   :  { %v755_v50 = vadd.f32 %v1019_v47, %v715_v46 }
 0x11e   :  { %v760_v51 = vmax.f32 %v755_v50, 0.0 }
 0x120   :  { %v761_v52 = vpack.c.bf16 %v760_v51, %v760_v51 }
 0x122   :  { %1037 = vmatmul.mubr.msk.bf16.vlgmr.msra.gmra.mrb[8].mxu0 %vm800_vm2, %v761_v52 }
 0x1f5   :  { %v842_v54 = vpop.f32.mrb[8].mxu0 }
 0x1f6   :  { %v843_v55 = vadd.f32 %v929_v53, %v842_v54  ;;  %v1038_v56 = vpop.f32.mrb[9].mxu0 }
 0x1f7   :  { %v845_v57 = vpop.f32.mrb[10].mxu0 }
 0x1f8   :  { %v1039_v58 = vpop.f32.mrb[11].mxu0  ;;  %849 = vst.msk [vmem:[#allocation2] sm:$0x3] %vm848_vm3, %v843_v55 }
 0x1f9   :  { %1124 = shalt.err (!%p1121_p4)
}
 0x1fa   :  { %s1125_s4 = scalar_lea.hbm %s1414_s5, 32 }
 0x1fb   :  { %p1126_p5 = scmp.ne.s32.totalorder %s1414_s5, %s1125_s4  ;;  %p1129_p6 = scmp.lt.u32.totalorder %s1125_s4, %s1414_s5 }
 0x1fd   :  { %p1131_p7 = pnand %p1129_p6, %p1126_p5 }
 0x1ff   :  { %1134 = shalt.err (!%p1131_p7)
}
 0x200   :  { %859 = dma.vmem_to_hbm [thread:$0]  %s857_s30, 32, %s1414_s5, [#allocation3]  }
 0x201   :  { %1135 = dma.done.wait [#allocation3], 32  }
 0x202   :  { %1136 = vsyncadd [#allocation3], 4294967264 }
 0x203   :  { %863 = vsyncpa [#allocation3], 1 }

// kernel: trajectory_fcn.3
= control target key start
LH: loop header
LB: loop body
LE: loop exit
PB: predicated region body
PF: predicated region fallthrough
CT: control target
= control target key end

     0   :  { %8 = vsyncpa [#allocation3], 0  ;;  %s3085_s0 = inlined_call_operand.hbm [shape: f32[2,2240,112], index: 0, kind: input, shape index: {}]   ;;  %s3086_s1 = inlined_call_operand.hbm [shape: bf16[64,2240], index: 1, kind: input, shape index: {}]   ;;  %s3087_s2 = inlined_call_operand.vmem [shape: f32[64,1], index: 2, kind: input, shape index: {}]   ;;  %s3088_s3 = inlined_call_operand.vmem [shape: bf16[2,64,112], index: 3, kind: output, shape index: {}]  }
   0x1   :  { %10 = vsyncpa [#allocation3 + $0x1], 0 }
   0x2   :  { %11 = vsyncpa [#allocation5], 0  ;;  %s2544_s12 = smov 0   ;;  %s2546_s13 = smov 0  }
   0x3   :  { %s2548_s14 = smov 0   ;;  %s2550_s15 = smov 0  }
   0x4 LB: > { %s2563_s16 = sadd.s32 4294967295, %s2515_s15   ;;  %p37_p0 = scmp.ne.s32.totalorder %s2507_s13, %s2503_s12  ;;  %s2515_s15 = sphi %s2550_s15, %s3103_s15   ;;  %s2511_s14 = sphi %s2548_s14, %s3102_s14   ;;  %s2507_s13 = sphi %s2546_s13, %s3101_s13   ;;  %s2503_s12 = sphi %s2544_s12, %s3100_s12  }
   0x5   : > { %p3089_p1 = scmp.eq.s32.totalorder %s2563_s16, 0  ;;  %p1828_p2 = scmp.ge.s32.totalorder %s2515_s15, 1 }
   0x6   : > { %p116_p3 = scmp.lt.s32.totalorder %s2515_s15, 3  ;;  %s2517_s19 = smov [#allocation4]  }
   0x7   : > { %p2571_p4 = por %p3089_p1, %p37_p0  ;;  %s128_s20 = sshll.u32 %s2517_s19, 4  ;;  %s129_s20 = int_to_ptr.vmem [resolvable:$true] %s128_s20 }
   0x8   : > { %p2575_p5 = pnand %p1828_p2, %p116_p3  ;;  %s2588_s22 = sadd.s32 1, %s2515_s15  }
   0x9   : > { %s3092_s17 = scalar_select %p2571_p4, 1, 0 }
   0xa   : > { %s3093_s18 = scalar_select %p2575_p5, 1, 0 }
   0xb   : > { %p2260_p6 = pneg %p2575_p5  ;;  %s24_s23 = sadd.s32 1, %s2511_s14 }
   0xc   : > { %s21_s24 = ssub.s32 %s2515_s15, %s2588_s22  ;;  %s2419_s27 = scalar_lea.hbm %s3086_s1, 9216 }
   0xd   : > { %p2583_p7 = pnand %p2260_p6, %p3089_p1  ;;  %p2420_p8 = scmp.ne.s32.totalorder %s3086_s1, %s2419_s27 }
   0xe   : > { %p2426_p12 = scmp.lt.u32.totalorder %s2419_s27, %s3086_s1 }
   0xf   : > { %p2421_p9 = pneg %p2583_p7 }
  0x11   : > { %p2422_p10 = pnand %p2421_p9, %p2420_p8 }
  0x13   : > { %p2423_p11 = pneg %p2422_p10 }
  0x15   : > { %p2428_p13 = pnand %p2426_p12, %p2423_p11 }
  0x17   : > { %2431 = shalt.err (!%p2428_p13)
}
  0x18   : > { %s2432_s5 = scalar_lea.vmem %s129_s20, 9216  ;;  %p2440_p6 = scmp.lt.s32.totalorder %s129_s20, %s129_s20 }
  0x19   : > { %p2433_p0 = scmp.ne.s32.totalorder %s129_s20, %s2432_s5  ;;  %p2441_p1 = scmp.lt.s32.totalorder %s2432_s5, %s2432_s5 }
  0x1b   : > { %p2435_p2 = pnand %p2433_p0, %p2421_p9  ;;  %p2442_p4 = por %p2441_p1, %p2440_p6 }
  0x1d   : > { %p2436_p3 = pneg %p2435_p2 }
  0x1f   : > { %p2443_p5 = pnand %p2442_p4, %p2436_p3 }
  0x21   : > { %2446 = shalt.err (!%p2443_p5)
}
  0x22   : > { %s2518_s6 = smov 1152   ;;  %s2519_s7 = smov 72  }
  0x23   : > { %2263 = dma.hbm_to_vmem [thread:$0]  (!%p2583_p7), %s3086_s1, 9216, %s129_s20, [#allocation5], %s2518_s6, %s2518_s6, %s2519_s7  }
  0x24   : > { %p22_p8 = scmp.eq.s32.totalorder %s21_s24, 0  ;;  %p31_p9 = scmp.ne.s32.totalorder %s2511_s14, %s2507_s13 }
  0x25   : > { %p32_p1 = scmp.eq.s32.totalorder %s2515_s15, 0  ;;  %p2269_p4 = scmp.lt.s32.totalorder %s2515_s15, 2 }
  0x26   : > { %s2614_s10 = scalar_select %p22_p8, %s2511_s14, %s24_s23  }
  0x27   : > { %p33_p5 = por %p32_p1, %p31_p9  ;;  %s145_s11 = sand.u32 1, %s2511_s14  }
  0x28   : > { %s2251_s12 = smul.u32 2240, %s145_s11  ;;  %s2452_s30 = scalar_lea.hbm %s3085_s0, 71680 }
  0x29   : > { %s2252_s19 = smul.u32 35840, %s2515_s15  ;;  %p2618_p10 = pnand %p2269_p4, %p33_p5 }
  0x2a   : > { %s149_s23 = scalar_lea.vmem [#allocation2], %s2251_s12  ;;  %s2629_s15 = scalar_lea.sflag [#allocation3], %s145_s11 }
  0x2b   : > { %s2625_s20 = scalar_lea.hbm %s3085_s0, %s2252_s19  ;;  %s156_s24 = sshll.u32 %s149_s23, 4  ;;  %s2627_s24 = int_to_ptr.vmem [resolvable:$true] %s156_s24 }
  0x2c   : > { %s2447_s27 = scalar_lea.hbm %s2625_s20, 35840  ;;  %p2449_p11 = pneg %p2618_p10 }
  0x2d   : > { %p2448_p7 = scmp.ne.s32.totalorder %s2625_s20, %s2447_s27  ;;  %p2453_p0 = scmp.lt.u32.totalorder %s2625_s20, %s3085_s0 }
  0x2e   : > { %p2454_p2 = scmp.lt.u32.totalorder %s2452_s30, %s2447_s27  ;;  %p2456_p6 = scmp.lt.u32.totalorder %s2447_s27, %s2625_s20 }
  0x2f   : > { %p2450_p12 = pnand %p2449_p11, %p2448_p7 }
  0x30   : > { %p2455_p3 = por %p2454_p2, %p2453_p0 }
  0x31   : > { %p2451_p13 = pneg %p2450_p12 }
  0x32   : > { %p2457_p8 = por %p2456_p6, %p2455_p3 }
  0x34   : > { %p2458_p9 = pnand %p2457_p8, %p2451_p13 }
  0x36   : > { %2461 = shalt.err (!%p2458_p9)
}
  0x37   : > { %s2462_s6 = scalar_lea.vmem %s2627_s24, 35840  ;;  %s2520_s7 = smov [#allocation2]  }
  0x38   : > { %p2463_p1 = scmp.ne.s32.totalorder %s2627_s24, %s2462_s6  ;;  %s2467_s8 = sshll.u32 %s2520_s7, 4  ;;  %s2468_s8 = int_to_ptr.vmem [resolvable:$false] %s2467_s8 }
  0x39   : > { %s2469_s9 = scalar_lea.vmem %s2468_s8, 71680  ;;  %p2470_p7 = scmp.lt.s32.totalorder %s2627_s24, %s2468_s8 }
  0x3a   : > { %p2465_p4 = pnand %p2463_p1, %p2449_p11  ;;  %p2471_p12 = scmp.lt.s32.totalorder %s2469_s9, %s2462_s6 }
  0x3c   : > { %p2466_p5 = pneg %p2465_p4  ;;  %p2472_p0 = por %p2471_p12, %p2470_p7 }
  0x3e   : > { %p2473_p2 = pnand %p2472_p0, %p2466_p5 }
  0x40   : > { %2476 = shalt.err (!%p2473_p2)
}
  0x41   : > { %s2521_s11 = smov 128   ;;  %s2522_s12 = smov 8  }
  0x42   : > { %2267 = dma.hbm_to_vmem [thread:$0]  (!%p2618_p10), %s2625_s20, 35840, %s2627_s24, %s2629_s15, %s2521_s11, %s2521_s11, %s2522_s12  }
  0x43   : > { %p3096_p11 = scmp.ne.s32.totalorder %s3093_s18, 0 }
  0x44   : > { %s170_s19 = sand.u32 (!%p3096_p11), 1, %s2507_s13   ;;  %p3097_p13 = scmp.ne.s32.totalorder (!%p3096_p11), %s3092_s17, 0 }
  0x45   : > { %168 = sbr.rel (%p3096_p11) target bundleno = 493 (0x1ed), region = 32  ;;  %s171_s21 = scalar_lea.sflag (!%p3096_p11), [#allocation3], %s170_s19 }
  0x46   : > { %s2253_s26 = smul.u32 (!%p3096_p11), 2240, %s170_s19 }
  0x48   : > { %s2660_s23 = scalar_lea.vmem (!%p3096_p11), [#allocation2], %s2253_s26 }
  0x4c   : > { %2494 = dma.done.wait (%p3097_p13), %s171_s21, 35840  }
  0x4d   : > { %2496 = vsyncadd (%p3097_p13), %s171_s21, 4294931456  ;;  %p3098_p3 = scmp.eq.s32.totalorder %s2563_s16, 0 }
  0x4f   : > { %2498 = dma.done.wait (%p3098_p3), [#allocation5], 9216   ;;  %p3099_p10 = pmov %p3098_p3 }
  0x50   : > { %v2523_v0 = vmov 0   ;;  %v223_v1 = vld [vmem:[%s2660_s23 + $0x80] sm:$0xff]  ;;  %v224_v2 = vld [vmem:[%s2660_s23 + $0x88] sm:$0xff]  ;;  %v225_v6 = vld [vmem:[%s2660_s23 + $0x90] sm:$0xff]  ;;  %vm1103_vm0 = vcmask 523264   ;;  %p201_p6 = scmp.lt.s32.totalorder %s2563_s16, 1 }
  0x51   : > { %2500 = vsyncadd (%p3099_p10), [#allocation5], 4294958080  ;;  %2309 = vset.pattern.permute.xlu0 %v2523_v0  ;;  %2310 = vset.pattern.permute.xlu1 %v2523_v0  ;;  %v207_v3 = vld [vmem:[%s2660_s23] sm:$0xff]  ;;  %v495_v4 = vpack.c.bf16 %v224_v2, %v223_v1  ;;  %v208_v5 = vld [vmem:[%s2660_s23 + $0x8] sm:$0xff]  ;;  %vm1741_vm1 = vcmask 912384  }
  0x52   : > { %v226_v7 = vld [vmem:[%s2660_s23 + $0x98] sm:$0xff]  ;;  %v487_v8 = vpack.c.bf16 %v208_v5, %v207_v3  ;;  %v209_v10 = vld [vmem:[%s2660_s23 + $0x10] sm:$0xff]  ;;  %v227_v12 = vld [vmem:[%s2660_s23 + $0xa0] sm:$0xff]  ;;  %s3105_s16 = smov (!%p201_p6, %s2563_s16), 1 }
  0x53   : > { %v496_v9 = vpack.c.bf16 %v226_v7, %v225_v6  ;;  %v210_v11 = vld [vmem:[%s2660_s23 + $0x18] sm:$0xff]  ;;  %1931 = vmatprep.subr.bf16.mxu1 %v495_v4  ;;  %v228_v13 = vld [vmem:[%s2660_s23 + $0xa8] sm:$0xff]  ;;  %v211_v16 = vld [vmem:[%s2660_s23 + $0x20] sm:$0xff]  ;;  %s1922_s11 = sshll.u32 %s3105_s16, 5 }
  0x54   : > { %1932 = vmatpush3.bf16.msra.mxu1 %v487_v8  ;;  %v488_v14 = vpack.c.bf16 %v210_v11, %v209_v10  ;;  %v497_v15 = vpack.c.bf16 %v228_v13, %v227_v12  ;;  %v212_v17 = vld [vmem:[%s2660_s23 + $0x28] sm:$0xff]  ;;  %v229_v18 = vld [vmem:[%s2660_s23 + $0xb0] sm:$0xff]  ;;  %v230_v19 = vld [vmem:[%s2660_s23 + $0xb8] sm:$0xff]  ;;  %s3050_s26 = scalar_lea.vmem %s3088_s3, %s1922_s11 }
  0x55   : > { %1933 = vmatprep.subr.bf16.mxu1 %v496_v9  ;;  %v287_v20 = vld [vmem:[%s2660_s23 + $0x280] sm:$0xff]  ;;  %v288_v21 = vld [vmem:[%s2660_s23 + $0x288] sm:$0xff]  ;;  %v489_v22 = vpack.c.bf16 %v212_v17, %v211_v16  ;;  %v213_v23 = vld [vmem:[%s2660_s23 + $0x30] sm:$0xff]  ;;  %v498_v27 = vpack.c.bf16 %v230_v19, %v229_v18 }
  0x56   : > { %v527_v24 = vpack.c.bf16 %v288_v21, %v287_v20  ;;  %v271_v25 = vld [vmem:[%s2660_s23 + $0x200] sm:$0xff]  ;;  %v272_v26 = vld [vmem:[%s2660_s23 + $0x208] sm:$0xff]  ;;  %v214_v28 = vld [vmem:[%s2660_s23 + $0x38] sm:$0xff] }
  0x57   : > { %v519_v29 = vpack.c.bf16 %v272_v26, %v271_v25  ;;  %v289_v30 = vld [vmem:[%s2660_s23 + $0x290] sm:$0xff]  ;;  %v290_v31 = vld [vmem:[%s2660_s23 + $0x298] sm:$0xff]  ;;  %v231_v32 = vld [vmem:[%s2660_s23 + $0xc0] sm:$0xff]  ;;  %v490_v37 = vpack.c.bf16 %v214_v28, %v213_v23 }
  0x58   : > { %1934 = vmatpush3.bf16.msra.mxu1 %v488_v14  ;;  %v232_v33 = vld [vmem:[%s2660_s23 + $0xc8] sm:$0xff]  ;;  %2011 = vmatprep.subr.bf16.mxu0 %v527_v24  ;;  %v528_v34 = vpack.c.bf16 %v290_v31, %v289_v30  ;;  %v273_v35 = vld [vmem:[%s2660_s23 + $0x210] sm:$0xff]  ;;  %v274_v36 = vld [vmem:[%s2660_s23 + $0x218] sm:$0xff] }
  0x59   : > { %1935 = vmatprep.subr.bf16.mxu1 %v497_v15  ;;  %2012 = vmatpush3.bf16.msra.mxu0 %v519_v29  ;;  %v215_v38 = vld [vmem:[%s2660_s23 + $0x40] sm:$0xff]  ;;  %v520_v39 = vpack.c.bf16 %v274_v36, %v273_v35  ;;  %v292_v41 = vld [vmem:[%s2660_s23 + $0x2a8] sm:$0xff]  ;;  %v499_v42 = vpack.c.bf16 %v232_v33, %v231_v32  ;;  %v233_v47 = vld [vmem:[%s2660_s23 + $0xd0] sm:$0xff] }
  0x5a   : > { %2013 = vmatprep.subr.bf16.mxu0 %v528_v34  ;;  %v291_v40 = vld [vmem:[%s2660_s23 + $0x2a0] sm:$0xff]  ;;  %v216_v43 = vld [vmem:[%s2660_s23 + $0x48] sm:$0xff]  ;;  %v234_v48 = vld [vmem:[%s2660_s23 + $0xd8] sm:$0xff] }
  0x5b   : > { %v529_v44 = vpack.c.bf16 %v292_v41, %v291_v40  ;;  %v275_v45 = vld [vmem:[%s2660_s23 + $0x220] sm:$0xff]  ;;  %v276_v46 = vld [vmem:[%s2660_s23 + $0x228] sm:$0xff]  ;;  %v491_v51 = vpack.c.bf16 %v216_v43, %v215_v38  ;;  %v217_v52 = vld [vmem:[%s2660_s23 + $0x50] sm:$0xff]  ;;  %v500_v55 = vpack.c.bf16 %v234_v48, %v233_v47 }
  0x5c   : > { %1936 = vmatpush3.bf16.msra.mxu1 %v489_v22  ;;  %v521_v49 = vpack.c.bf16 %v276_v46, %v275_v45  ;;  %v2313_v50 = vld [vmem:[#allocation4 + $0x4] ss:$72 sps:$4 sm:$0xff]   ;;  %v293_v53 = vld [vmem:[%s2660_s23 + $0x2b0] sm:$0xff]  ;;  %v294_v54 = vld [vmem:[%s2660_s23 + $0x2b8] sm:$0xff] }
  0x5d   : > { %1937 = vmatprep.subr.bf16.mxu1 %v498_v27  ;;  %2014 = vmatpush3.bf16.msra.mxu0 %v520_v39  ;;  %v218_v56 = vld [vmem:[%s2660_s23 + $0x58] sm:$0xff]  ;;  %v530_v57 = vpack.c.bf16 %v294_v54, %v293_v53  ;;  %v277_v58 = vld [vmem:[%s2660_s23 + $0x230] sm:$0xff]  ;;  %v235_v60 = vld [vmem:[%s2660_s23 + $0xe0] sm:$0xff] }
  0x5e   : > { %2015 = vmatprep.subr.bf16.mxu0 %v529_v44  ;;  %1148 = vmatprep.mubr.bf16.mxu1 %v2313_v50  ;;  %v278_v59 = vld [vmem:[%s2660_s23 + $0x238] sm:$0xff]  ;;  %v236_v61 = vld [vmem:[%s2660_s23 + $0xe8] sm:$0xff]  ;;  %v295_v62 = vld [vmem:[%s2660_s23 + $0x2c0] sm:$0xff]  ;;  %v492_v3 = vpack.c.bf16 %v218_v56, %v217_v52 }
  0x5f   : > { %v219_v63 = vld [vmem:[%s2660_s23 + $0x60] sm:$0xff]  ;;  %v522_v1 = vpack.c.bf16 %v278_v59, %v277_v58  ;;  %v296_v2 = vld [vmem:[%s2660_s23 + $0x2c8] sm:$0xff]  ;;  %v501_v8 = vpack.c.bf16 %v236_v61, %v235_v60  ;;  %v237_v9 = vld [vmem:[%s2660_s23 + $0xf0] sm:$0xff] }
  0x60   : > { %1938 = vmatpush3.bf16.msra.mxu1 %v490_v37  ;;  %v220_v4 = vld [vmem:[%s2660_s23 + $0x68] sm:$0xff]  ;;  %v531_v5 = vpack.c.bf16 %v296_v2, %v295_v62  ;;  %v279_v6 = vld [vmem:[%s2660_s23 + $0x240] sm:$0xff]  ;;  %v238_v10 = vld [vmem:[%s2660_s23 + $0xf8] sm:$0xff] }
  0x61   : > { %1939 = vmatprep.subr.bf16.mxu1 %v499_v42  ;;  %2016 = vmatpush3.bf16.msra.mxu0 %v521_v49  ;;  %v280_v7 = vld [vmem:[%s2660_s23 + $0x248] sm:$0xff]  ;;  %v297_v11 = vld [vmem:[%s2660_s23 + $0x2d0] sm:$0xff]  ;;  %v298_v12 = vld [vmem:[%s2660_s23 + $0x2d8] sm:$0xff]  ;;  %v493_v14 = vpack.c.bf16 %v220_v4, %v219_v63  ;;  %v502_v19 = vpack.c.bf16 %v238_v10, %v237_v9 }
  0x62   : > { %2017 = vmatprep.subr.bf16.mxu0 %v530_v57  ;;  %v523_v13 = vpack.c.bf16 %v280_v7, %v279_v6  ;;  %v221_v15 = vld [vmem:[%s2660_s23 + $0x70] sm:$0xff]  ;;  %v532_v16 = vpack.c.bf16 %v298_v12, %v297_v11  ;;  %v282_v18 = vld [vmem:[%s2660_s23 + $0x258] sm:$0xff]  ;;  %v299_v21 = vld [vmem:[%s2660_s23 + $0x2e0] sm:$0xff] }
  0x63   : > { %v281_v17 = vld [vmem:[%s2660_s23 + $0x250] sm:$0xff]  ;;  %v222_v20 = vld [vmem:[%s2660_s23 + $0x78] sm:$0xff]  ;;  %v300_v22 = vld [vmem:[%s2660_s23 + $0x2e8] sm:$0xff] }
  0x64   : > { %1940 = vmatpush3.bf16.msra.mxu1 %v491_v51  ;;  %v255_v23 = vld [vmem:[%s2660_s23 + $0x180] sm:$0xff]  ;;  %v256_v24 = vld [vmem:[%s2660_s23 + $0x188] sm:$0xff]  ;;  %v524_v25 = vpack.c.bf16 %v282_v18, %v281_v17  ;;  %v494_v27 = vpack.c.bf16 %v222_v20, %v221_v15  ;;  %v533_v28 = vpack.c.bf16 %v300_v22, %v299_v21  ;;  %v257_v34 = vld [vmem:[%s2660_s23 + $0x190] sm:$0xff] }
  0x65   : > { %1941 = vmatprep.subr.bf16.mxu1 %v500_v55  ;;  %2018 = vmatpush3.bf16.msra.mxu0 %v522_v1  ;;  %v283_v26 = vld [vmem:[%s2660_s23 + $0x260] sm:$0xff]  ;;  %v284_v29 = vld [vmem:[%s2660_s23 + $0x268] sm:$0xff]  ;;  %v511_v31 = vpack.c.bf16 %v256_v24, %v255_v23  ;;  %v258_v35 = vld [vmem:[%s2660_s23 + $0x198] sm:$0xff] }
  0x66   : > { %2019 = vmatprep.subr.bf16.mxu0 %v531_v5  ;;  %v2311_v30 = vld [vmem:[#allocation4] ss:$72 sps:$4 sm:$0xff]   ;;  %v301_v36 = vld [vmem:[%s2660_s23 + $0x2f0] sm:$0xff]  ;;  %v302_v37 = vld [vmem:[%s2660_s23 + $0x2f8] sm:$0xff]  ;;  %v525_v40 = vpack.c.bf16 %v284_v29, %v283_v26  ;;  %v512_v44 = vpack.c.bf16 %v258_v35, %v257_v34 }
  0x67   : > { %v239_v32 = vld [vmem:[%s2660_s23 + $0x100] sm:$0xff]  ;;  %v240_v33 = vld [vmem:[%s2660_s23 + $0x108] sm:$0xff]  ;;  %v241_v38 = vld [vmem:[%s2660_s23 + $0x110] sm:$0xff]  ;;  %v534_v46 = vpack.c.bf16 %v302_v37, %v301_v36 }
  0x68   : > { %1942 = vmatpush3.bf16.msra.mxu1 %v492_v3  ;;  %v2314_v39 = vld [vmem:[#allocation4 + $0x94] ss:$72 sps:$4 sm:$0xff]   ;;  %v503_v42 = vpack.c.bf16 %v240_v33, %v239_v32  ;;  %v351_v47 = vld [vmem:[%s2660_s23 + $0x480] sm:$0xff]  ;;  %v352_v48 = vld [vmem:[%s2660_s23 + $0x488] sm:$0xff] }
  0x69   : > { %1943 = vmatprep.subr.bf16.mxu1 %v501_v8  ;;  %2020 = vmatpush3.bf16.msra.mxu0 %v523_v13  ;;  %v285_v41 = vld [vmem:[%s2660_s23 + $0x270] sm:$0xff]  ;;  %v286_v43 = vld [vmem:[%s2660_s23 + $0x278] sm:$0xff]  ;;  %v259_v49 = vld [vmem:[%s2660_s23 + $0x1a0] sm:$0xff]  ;;  %v559_v56 = vpack.c.bf16 %v352_v48, %v351_v47 }
  0x6a   : > { %2021 = vmatprep.subr.bf16.mxu0 %v532_v16  ;;  %v242_v45 = vld [vmem:[%s2660_s23 + $0x118] sm:$0xff]  ;;  %v260_v50 = vld [vmem:[%s2660_s23 + $0x1a8] sm:$0xff]  ;;  %v243_v52 = vld [vmem:[%s2660_s23 + $0x120] sm:$0xff]  ;;  %v526_v53 = vpack.c.bf16 %v286_v43, %v285_v41 }
  0x6b   : > { %v2322_v51 = vld [vmem:[#allocation4 + $0x14] ss:$72 sps:$4 sm:$0xff]   ;;  %v335_v54 = vld [vmem:[%s2660_s23 + $0x400] sm:$0xff]  ;;  %v504_v55 = vpack.c.bf16 %v242_v45, %v241_v38  ;;  %v336_v57 = vld [vmem:[%s2660_s23 + $0x408] sm:$0xff]  ;;  %v513_v59 = vpack.c.bf16 %v260_v50, %v259_v49 }
  0x6c   : > { %1944 = vmatpush3.bf16.msra.mxu1 %v493_v14  ;;  %v2316_v58 = vld [vmem:[#allocation4 + $0x90] ss:$72 sps:$4 sm:$0xff]   ;;  %v244_v60 = vld [vmem:[%s2660_s23 + $0x128] sm:$0xff]  ;;  %1278 = vmatprep.mubr.bf16.mxu0 %v2322_v51  ;;  %v551_v5 = vpack.c.bf16 %v336_v57, %v335_v54  ;;  %v355_v12 = vld [vmem:[%s2660_s23 + $0x4a0] sm:$0xff] }
  0x6d   : > { %1945 = vmatprep.subr.bf16.mxu1 %v502_v19  ;;  %2022 = vmatpush3.bf16.msra.mxu0 %v524_v25  ;;  %v261_v61 = vld [vmem:[%s2660_s23 + $0x1b0] sm:$0xff]  ;;  %v262_v62 = vld [vmem:[%s2660_s23 + $0x1b8] sm:$0xff]  ;;  %v2317_v4 = vld [vmem:[#allocation4 + $0x124] ss:$72 sps:$4 sm:$0xff]   ;;  %v505_v7 = vpack.c.bf16 %v244_v60, %v243_v52 }
  0x6e   : > { %2023 = vmatprep.subr.bf16.mxu0 %v533_v28  ;;  %v2320_v63 = vld [vmem:[#allocation4 + $0x10] ss:$72 sps:$4 sm:$0xff]   ;;  %v514_v9 = vpack.c.bf16 %v262_v62, %v261_v61  ;;  %v356_v13 = vld [vmem:[%s2660_s23 + $0x4a8] sm:$0xff]  ;;  %v263_v14 = vld [vmem:[%s2660_s23 + $0x1c0] sm:$0xff] }
  0x6f   : > { %v353_v1 = vld [vmem:[%s2660_s23 + $0x490] sm:$0xff]  ;;  %v354_v2 = vld [vmem:[%s2660_s23 + $0x498] sm:$0xff]  ;;  %v264_v15 = vld [vmem:[%s2660_s23 + $0x1c8] sm:$0xff]  ;;  %v561_v21 = vpack.c.bf16 %v356_v13, %v355_v12 }
  0x70   : > { %1946 = vmatpush3.bf16.msra.mxu1 %v494_v27  ;;  %v245_v3 = vld [vmem:[%s2660_s23 + $0x130] sm:$0xff]  ;;  %v338_v8 = vld [vmem:[%s2660_s23 + $0x418] sm:$0xff]  ;;  %v560_v11 = vpack.c.bf16 %v354_v2, %v353_v1  ;;  %v2326_v16 = vld [vmem:[#allocation4 + $0xa4] ss:$72 sps:$4 sm:$0xff]   ;;  %v515_v24 = vpack.c.bf16 %v264_v15, %v263_v14 }
  0x71   : > { %1971 = vmatprep.subr.bf16.mxu1 %v511_v31  ;;  %2024 = vmatpush3.bf16.msra.mxu0 %v525_v40  ;;  %v337_v6 = vld [vmem:[%s2660_s23 + $0x410] sm:$0xff]  ;;  %v246_v10 = vld [vmem:[%s2660_s23 + $0x138] sm:$0xff]  ;;  %v247_v17 = vld [vmem:[%s2660_s23 + $0x140] sm:$0xff] }
  0x72   : > { %2025 = vmatprep.subr.bf16.mxu0 %v534_v46  ;;  %v552_v18 = vpack.c.bf16 %v338_v8, %v337_v6  ;;  %v339_v19 = vld [vmem:[%s2660_s23 + $0x420] sm:$0xff]  ;;  %v506_v20 = vpack.c.bf16 %v246_v10, %v245_v3  ;;  %v340_v22 = vld [vmem:[%s2660_s23 + $0x428] sm:$0xff]  ;;  %v265_v26 = vld [vmem:[%s2660_s23 + $0x1d0] sm:$0xff] }
  0x73   : > { %1149 = vmatmul.mubr.bf16.vlgmr.msra.gmra.mrb[0].mxu1 %v2311_v30  ;;  %v2319_v23 = vld [vmem:[#allocation4 + $0x120] ss:$72 sps:$4 sm:$0xff]   ;;  %v266_v27 = vld [vmem:[%s2660_s23 + $0x1d8] sm:$0xff]  ;;  %v357_v29 = vld [vmem:[%s2660_s23 + $0x4b0] sm:$0xff]  ;;  %v553_v33 = vpack.c.bf16 %v340_v22, %v339_v19 }
  0x74   : > { %1972 = vmatpush3.bf16.msra.mxu1 %v503_v42  ;;  %1156 = vmatprep.mubr.bf16.mxu1 %v2314_v39  ;;  %v248_v25 = vld [vmem:[%s2660_s23 + $0x148] sm:$0xff]  ;;  %v358_v30 = vld [vmem:[%s2660_s23 + $0x4b8] sm:$0xff]  ;;  %v249_v31 = vld [vmem:[%s2660_s23 + $0x150] sm:$0xff]  ;;  %v516_v37 = vpack.c.bf16 %v266_v27, %v265_v26 }
  0x75   : > { %1973 = vmatprep.subr.bf16.mxu1 %v512_v44  ;;  %2026 = vmatpush3.bf16.msra.mxu0 %v526_v53  ;;  %v2328_v28 = vld [vmem:[#allocation4 + $0xa0] ss:$72 sps:$4 sm:$0xff]   ;;  %v2323_v32 = vld [vmem:[#allocation4 + $0x1b4] ss:$72 sps:$4 sm:$0xff]   ;;  %v507_v35 = vpack.c.bf16 %v248_v25, %v247_v17  ;;  %v562_v39 = vpack.c.bf16 %v358_v30, %v357_v29  ;;  %v2325_v51 = vld [vmem:[#allocation4 + $0x1b0] ss:$72 sps:$4 sm:$0xff]  }
  0x76   : > { %2091 = vmatprep.subr.bf16.mxu0 %v559_v56  ;;  %v341_v34 = vld [vmem:[%s2660_s23 + $0x430] sm:$0xff]  ;;  %v342_v36 = vld [vmem:[%s2660_s23 + $0x438] sm:$0xff]  ;;  %v359_v40 = vld [vmem:[%s2660_s23 + $0x4c0] sm:$0xff] }
  0x77   : > { %v250_v38 = vld [vmem:[%s2660_s23 + $0x158] sm:$0xff]  ;;  %v360_v41 = vld [vmem:[%s2660_s23 + $0x4c8] sm:$0xff]  ;;  %v267_v42 = vld [vmem:[%s2660_s23 + $0x1e0] sm:$0xff]  ;;  %v554_v46 = vpack.c.bf16 %v342_v36, %v341_v34 }
  0x78   : > { %1974 = vmatpush3.bf16.msra.mxu1 %v504_v55  ;;  %1279 = vmatmul.mubr.bf16.vlgmr.msra.gmra.mrb[0].mxu0 %v2320_v63  ;;  %v268_v43 = vld [vmem:[%s2660_s23 + $0x1e8] sm:$0xff]  ;;  %v2332_v44 = vld [vmem:[#allocation4 + $0x134] ss:$72 sps:$4 sm:$0xff]   ;;  %v251_v45 = vld [vmem:[%s2660_s23 + $0x160] sm:$0xff]  ;;  %v508_v48 = vpack.c.bf16 %v250_v38, %v249_v31  ;;  %v563_v49 = vpack.c.bf16 %v360_v41, %v359_v40 }
  0x79   : > { %1975 = vmatprep.subr.bf16.mxu1 %v513_v59  ;;  %2092 = vmatpush3.bf16.msra.mxu0 %v551_v5  ;;  %v343_v47 = vld [vmem:[%s2660_s23 + $0x440] sm:$0xff]  ;;  %v344_v50 = vld [vmem:[%s2660_s23 + $0x448] sm:$0xff]  ;;  %v517_v52 = vpack.c.bf16 %v268_v43, %v267_v42  ;;  %v269_v54 = vld [vmem:[%s2660_s23 + $0x1f0] sm:$0xff] }
  0x7a   : > { %2093 = vmatprep.subr.bf16.mxu0 %v560_v11  ;;  %1286 = vmatprep.mubr.bf16.mxu0 %v2326_v16  ;;  %v252_v53 = vld [vmem:[%s2660_s23 + $0x168] sm:$0xff]  ;;  %v270_v55 = vld [vmem:[%s2660_s23 + $0x1f8] sm:$0xff]  ;;  %v361_v57 = vld [vmem:[%s2660_s23 + $0x4d0] sm:$0xff]  ;;  %v555_v61 = vpack.c.bf16 %v344_v50, %v343_v47 }
  0x7b   : > { %1157 = vmatmul.mubr.bf16.gmra.mrb[4].mxu1 %v2316_v58  ;;  %v2334_v56 = vld [vmem:[#allocation4 + $0x130] ss:$72 sps:$4 sm:$0xff]   ;;  %v2331_v60 = vld [vmem:[#allocation4 + $0xc] ss:$72 sps:$4 sm:$0xff]   ;;  %v509_v63 = vpack.c.bf16 %v252_v53, %v251_v45  ;;  %v518_v2 = vpack.c.bf16 %v270_v55, %v269_v54  ;;  %v363_v5 = vld [vmem:[%s2660_s23 + $0x4e0] sm:$0xff] }
  0x7c   : > { %1976 = vmatpush3.bf16.msra.mxu1 %v505_v7  ;;  %1164 = vmatprep.mubr.bf16.mxu1 %v2317_v4  ;;  %v362_v58 = vld [vmem:[%s2660_s23 + $0x4d8] sm:$0xff]  ;;  %v253_v59 = vld [vmem:[%s2660_s23 + $0x170] sm:$0xff]  ;;  %v364_v6 = vld [vmem:[%s2660_s23 + $0x4e8] sm:$0xff] }
  0x7d   : > { %1977 = vmatprep.subr.bf16.mxu1 %v514_v9  ;;  %2094 = vmatpush3.bf16.msra.mxu0 %v552_v18  ;;  %v345_v62 = vld [vmem:[%s2660_s23 + $0x450] sm:$0xff]  ;;  %v346_v1 = vld [vmem:[%s2660_s23 + $0x458] sm:$0xff]  ;;  %v564_v4 = vpack.c.bf16 %v362_v58, %v361_v57  ;;  %v319_v7 = vld [vmem:[%s2660_s23 + $0x380] sm:$0xff]  ;;  %v565_v14 = vpack.c.bf16 %v364_v6, %v363_v5 }
  0x7e   : > { %2095 = vmatprep.subr.bf16.mxu0 %v561_v21  ;;  %v254_v3 = vld [vmem:[%s2660_s23 + $0x178] sm:$0xff]  ;;  %v320_v8 = vld [vmem:[%s2660_s23 + $0x388] sm:$0xff]  ;;  %v303_v10 = vld [vmem:[%s2660_s23 + $0x300] sm:$0xff]  ;;  %v556_v11 = vpack.c.bf16 %v346_v1, %v345_v62 }
  0x7f   : > { %v2338_v9 = vld [vmem:[#allocation4 + $0x1c4] ss:$72 sps:$4 sm:$0xff]   ;;  %v510_v13 = vpack.c.bf16 %v254_v3, %v253_v59  ;;  %v2329_v16 = vld [vmem:[#allocation4 + $0x8] ss:$72 sps:$4 sm:$0xff]   ;;  %v543_v17 = vpack.c.bf16 %v320_v8, %v319_v7  ;;  %v350_v29 = vld [vmem:[%s2660_s23 + $0x478] sm:$0xff] }
  0x80   : > { %1978 = vmatpush3.bf16.msra.mxu1 %v506_v20  ;;  %1287 = vmatmul.mubr.bf16.gmra.mrb[4].mxu0 %v2328_v28  ;;  %v347_v12 = vld [vmem:[%s2660_s23 + $0x460] sm:$0xff]  ;;  %v348_v15 = vld [vmem:[%s2660_s23 + $0x468] sm:$0xff]  ;;  %v321_v19 = vld [vmem:[%s2660_s23 + $0x390] sm:$0xff] }
  0x81   : > { %1979 = vmatprep.subr.bf16.mxu1 %v515_v24  ;;  %2096 = vmatpush3.bf16.msra.mxu0 %v553_v33  ;;  %v304_v18 = vld [vmem:[%s2660_s23 + $0x308] sm:$0xff]  ;;  %v322_v20 = vld [vmem:[%s2660_s23 + $0x398] sm:$0xff]  ;;  %v365_v22 = vld [vmem:[%s2660_s23 + $0x4f0] sm:$0xff]  ;;  %v557_v26 = vpack.c.bf16 %v348_v15, %v347_v12 }
  0x82   : > { %2097 = vmatprep.subr.bf16.mxu0 %v562_v39  ;;  %1294 = vmatprep.mubr.bf16.mxu0 %v2332_v44  ;;  %v2340_v21 = vld [vmem:[#allocation4 + $0x1c0] ss:$72 sps:$4 sm:$0xff]   ;;  %v305_v24 = vld [vmem:[%s2660_s23 + $0x310] sm:$0xff]  ;;  %v2335_v25 = vld [vmem:[#allocation4 + $0x9c] ss:$72 sps:$4 sm:$0xff]   ;;  %v535_v28 = vpack.c.bf16 %v304_v18, %v303_v10  ;;  %v544_v30 = vpack.c.bf16 %v322_v20, %v321_v19 }
  0x83   : > { %1165 = vmatmul.mubr.bf16.gmra.mrb[8].mxu1 %v2319_v23  ;;  %v366_v23 = vld [vmem:[%s2660_s23 + $0x4f8] sm:$0xff]  ;;  %v349_v27 = vld [vmem:[%s2660_s23 + $0x470] sm:$0xff]  ;;  %v415_v33 = vld [vmem:[%s2660_s23 + $0x680] sm:$0xff] }
  0x84   : > { %1980 = vmatpush3.bf16.msra.mxu1 %v507_v35  ;;  %1172 = vmatprep.mubr.bf16.mxu1 %v2323_v32  ;;  %v306_v31 = vld [vmem:[%s2660_s23 + $0x318] sm:$0xff]  ;;  %v566_v32 = vpack.c.bf16 %v366_v23, %v365_v22  ;;  %v416_v34 = vld [vmem:[%s2660_s23 + $0x688] sm:$0xff]  ;;  %v323_v35 = vld [vmem:[%s2660_s23 + $0x3a0] sm:$0xff]  ;;  %v558_v39 = vpack.c.bf16 %v350_v29, %v349_v27 }
  0x85   : > { %1981 = vmatprep.subr.bf16.mxu1 %v516_v37  ;;  %2098 = vmatpush3.bf16.msra.mxu0 %v554_v46  ;;  %v324_v36 = vld [vmem:[%s2660_s23 + $0x3a8] sm:$0xff]  ;;  %v307_v38 = vld [vmem:[%s2660_s23 + $0x320] sm:$0xff]  ;;  %v536_v41 = vpack.c.bf16 %v306_v31, %v305_v24  ;;  %v591_v42 = vpack.c.bf16 %v416_v34, %v415_v33  ;;  %v325_v47 = vld [vmem:[%s2660_s23 + $0x3b0] sm:$0xff] }
  0x86   : > { %2099 = vmatprep.subr.bf16.mxu0 %v563_v49  ;;  %v2346_v37 = vld [vmem:[#allocation4 + $0x24] ss:$72 sps:$4 sm:$0xff]   ;;  %v2337_v44 = vld [vmem:[#allocation4 + $0x98] ss:$72 sps:$4 sm:$0xff]   ;;  %v545_v45 = vpack.c.bf16 %v324_v36, %v323_v35  ;;  %v417_v50 = vld [vmem:[%s2660_s23 + $0x690] sm:$0xff] }
  0x87   : > { %v399_v40 = vld [vmem:[%s2660_s23 + $0x600] sm:$0xff]  ;;  %v400_v43 = vld [vmem:[%s2660_s23 + $0x608] sm:$0xff]  ;;  %v401_v55 = vld [vmem:[%s2660_s23 + $0x610] sm:$0xff] }
  0x88   : > { %1982 = vmatpush3.bf16.msra.mxu1 %v508_v48  ;;  %1295 = vmatmul.mubr.bf16.gmra.mrb[8].mxu0 %v2334_v56  ;;  %v308_v46 = vld [vmem:[%s2660_s23 + $0x328] sm:$0xff]  ;;  %v326_v48 = vld [vmem:[%s2660_s23 + $0x3b8] sm:$0xff]  ;;  %v583_v54 = vpack.c.bf16 %v400_v43, %v399_v40  ;;  %v311_v3 = vld [vmem:[%s2660_s23 + $0x340] sm:$0xff] }
  0x89   : > { %1983 = vmatprep.subr.bf16.mxu1 %v517_v52  ;;  %2100 = vmatpush3.bf16.msra.mxu0 %v555_v61  ;;  %v2344_v49 = vld [vmem:[#allocation4 + $0x20] ss:$72 sps:$4 sm:$0xff]   ;;  %v309_v52 = vld [vmem:[%s2660_s23 + $0x330] sm:$0xff]  ;;  %v537_v56 = vpack.c.bf16 %v308_v46, %v307_v38  ;;  %v402_v57 = vld [vmem:[%s2660_s23 + $0x618] sm:$0xff]  ;;  %v546_v58 = vpack.c.bf16 %v326_v48, %v325_v47 }
  0x8a   : > { %2101 = vmatprep.subr.bf16.mxu0 %v564_v4  ;;  %1302 = vmatprep.mubr.bf16.mxu0 %v2338_v9  ;;  %v2341_v53 = vld [vmem:[#allocation4 + $0x12c] ss:$72 sps:$4 sm:$0xff]   ;;  %v310_v59 = vld [vmem:[%s2660_s23 + $0x338] sm:$0xff]  ;;  %v419_v61 = vld [vmem:[%s2660_s23 + $0x6a0] sm:$0xff]  ;;  %v584_v4 = vpack.c.bf16 %v402_v57, %v401_v55 }
  0x8b   : > { %1173 = vmatmul.mubr.bf16.gmra.mrb[12].mxu1 %v2325_v51  ;;  %v418_v51 = vld [vmem:[%s2660_s23 + $0x698] sm:$0xff]  ;;  %v420_v62 = vld [vmem:[%s2660_s23 + $0x6a8] sm:$0xff]  ;;  %v403_v5 = vld [vmem:[%s2660_s23 + $0x620] sm:$0xff]  ;;  %v538_v6 = vpack.c.bf16 %v310_v59, %v309_v52 }
  0x8c   : > { %1984 = vmatpush3.bf16.msra.mxu1 %v509_v63  ;;  %1213 = vmatprep.mubr.bf16.mxu1 %v2331_v60  ;;  %v592_v60 = vpack.c.bf16 %v418_v51, %v417_v50  ;;  %v327_v63 = vld [vmem:[%s2660_s23 + $0x3c0] sm:$0xff]  ;;  %v328_v1 = vld [vmem:[%s2660_s23 + $0x3c8] sm:$0xff]  ;;  %v593_v7 = vpack.c.bf16 %v420_v62, %v419_v61  ;;  %v329_v12 = vld [vmem:[%s2660_s23 + $0x3d0] sm:$0xff] }
  0x8d   : > { %1985 = vmatprep.subr.bf16.mxu1 %v518_v2  ;;  %2102 = vmatpush3.bf16.msra.mxu0 %v556_v11  ;;  %v2350_v2 = vld [vmem:[#allocation4 + $0xb4] ss:$72 sps:$4 sm:$0xff]   ;;  %v404_v8 = vld [vmem:[%s2660_s23 + $0x628] sm:$0xff]  ;;  %v547_v10 = vpack.c.bf16 %v328_v1, %v327_v63  ;;  %v315_v31 = vld [vmem:[%s2660_s23 + $0x360] sm:$0xff] }
  0x8e   : > { %2103 = vmatprep.subr.bf16.mxu0 %v565_v14  ;;  %v2343_v9 = vld [vmem:[#allocation4 + $0x128] ss:$72 sps:$4 sm:$0xff]   ;;  %v2347_v18 = vld [vmem:[#allocation4 + $0x1bc] ss:$72 sps:$4 sm:$0xff]   ;;  %v585_v19 = vpack.c.bf16 %v404_v8, %v403_v5 }
  0x8f   : > { %v312_v11 = vld [vmem:[%s2660_s23 + $0x348] sm:$0xff]  ;;  %v2352_v14 = vld [vmem:[#allocation4 + $0xb0] ss:$72 sps:$4 sm:$0xff]   ;;  %v407_v33 = vld [vmem:[%s2660_s23 + $0x640] sm:$0xff] }
  0x90   : > { %1986 = vmatpush3.bf16.msra.mxu1 %v510_v13  ;;  %1303 = vmatmul.mubr.bf16.gmra.mrb[12].mxu0 %v2340_v21  ;;  %v330_v13 = vld [vmem:[%s2660_s23 + $0x3d8] sm:$0xff]  ;;  %v421_v15 = vld [vmem:[%s2660_s23 + $0x6b0] sm:$0xff]  ;;  %v539_v21 = vpack.c.bf16 %v312_v11, %v311_v3  ;;  %v424_v27 = vld [vmem:[%s2660_s23 + $0x6c8] sm:$0xff] }
  0x91   : > { %2051 = vmatprep.subr.bf16.mxu1 %v543_v17  ;;  %2104 = vmatpush3.bf16.msra.mxu0 %v557_v26  ;;  %v313_v17 = vld [vmem:[%s2660_s23 + $0x350] sm:$0xff]  ;;  %v406_v22 = vld [vmem:[%s2660_s23 + $0x638] sm:$0xff]  ;;  %v548_v23 = vpack.c.bf16 %v330_v13, %v329_v12  ;;  %v423_v26 = vld [vmem:[%s2660_s23 + $0x6c0] sm:$0xff] }
  0x92   : > { %2105 = vmatprep.subr.bf16.mxu0 %v566_v32  ;;  %1408 = vmatprep.mubr.bf16.mxu0 %v2346_v37  ;;  %v405_v20 = vld [vmem:[%s2660_s23 + $0x630] sm:$0xff]  ;;  %v314_v24 = vld [vmem:[%s2660_s23 + $0x358] sm:$0xff]  ;;  %v332_v29 = vld [vmem:[%s2660_s23 + $0x3e8] sm:$0xff]  ;;  %v595_v35 = vpack.c.bf16 %v424_v27, %v423_v26 }
  0x93   : > { %1214 = vmatmul.mubr.bf16.vlgmr.msra.gmra.mrb[16].mxu1 %v2329_v16  ;;  %v422_v16 = vld [vmem:[%s2660_s23 + $0x6b8] sm:$0xff]  ;;  %v586_v32 = vpack.c.bf16 %v406_v22, %v405_v20  ;;  %v540_v34 = vpack.c.bf16 %v314_v24, %v313_v17  ;;  %v408_v36 = vld [vmem:[%s2660_s23 + $0x648] sm:$0xff]  ;;  %v333_v40 = vld [vmem:[%s2660_s23 + $0x3f0] sm:$0xff] }
  0x94   : > { %2052 = vmatpush3.bf16.msra.mxu1 %v535_v28  ;;  %1221 = vmatprep.mubr.bf16.mxu1 %v2335_v25  ;;  %v594_v25 = vpack.c.bf16 %v422_v16, %v421_v15  ;;  %v331_v28 = vld [vmem:[%s2660_s23 + $0x3e0] sm:$0xff]  ;;  %v425_v43 = vld [vmem:[%s2660_s23 + $0x6d0] sm:$0xff]  ;;  %v587_v47 = vpack.c.bf16 %v408_v36, %v407_v33  ;;  %v410_v50 = vld [vmem:[%s2660_s23 + $0x658] sm:$0xff] }
  0x95   : > { %2053 = vmatprep.subr.bf16.mxu1 %v544_v30  ;;  %2106 = vmatpush3.bf16.msra.mxu0 %v558_v39  ;;  %v2356_v30 = vld [vmem:[#allocation4 + $0x144] ss:$72 sps:$4 sm:$0xff]   ;;  %v2349_v37 = vld [vmem:[#allocation4 + $0x1b8] ss:$72 sps:$4 sm:$0xff]   ;;  %v549_v38 = vpack.c.bf16 %v332_v29, %v331_v28  ;;  %v409_v48 = vld [vmem:[%s2660_s23 + $0x650] sm:$0xff] }
  0x96   : > { %2171 = vmatprep.subr.bf16.mxu0 %v591_v42  ;;  %v316_v39 = vld [vmem:[%s2660_s23 + $0x368] sm:$0xff]  ;;  %v2355_v46 = vld [vmem:[#allocation4 + $0x1c] ss:$72 sps:$4 sm:$0xff]   ;;  %v413_v12 = vld [vmem:[%s2660_s23 + $0x670] sm:$0xff] }
  0x97   : > { %v2358_v42 = vld [vmem:[#allocation4 + $0x140] ss:$72 sps:$4 sm:$0xff]   ;;  %v318_v52 = vld [vmem:[%s2660_s23 + $0x378] sm:$0xff]  ;;  %v369_v16 = vld [vmem:[%s2660_s23 + $0x510] sm:$0xff] }
  0x98   : > { %2054 = vmatpush3.bf16.msra.mxu1 %v536_v41  ;;  %1409 = vmatmul.mubr.bf16.vlgmr.msra.gmra.mrb[16].mxu0 %v2344_v49  ;;  %v334_v41 = vld [vmem:[%s2660_s23 + $0x3f8] sm:$0xff]  ;;  %v541_v49 = vpack.c.bf16 %v316_v39, %v315_v31  ;;  %v428_v55 = vld [vmem:[%s2660_s23 + $0x6e8] sm:$0xff]  ;;  %v367_v59 = vld [vmem:[%s2660_s23 + $0x500] sm:$0xff] }
  0x99   : > { %2055 = vmatprep.subr.bf16.mxu1 %v545_v45  ;;  %2172 = vmatpush3.bf16.msra.mxu0 %v583_v54  ;;  %v317_v45 = vld [vmem:[%s2660_s23 + $0x370] sm:$0xff]  ;;  %v550_v51 = vpack.c.bf16 %v334_v41, %v333_v40  ;;  %v427_v54 = vld [vmem:[%s2660_s23 + $0x6e0] sm:$0xff]  ;;  %v384_v57 = vld [vmem:[%s2660_s23 + $0x588] sm:$0xff] }
  0x9a   : > { %2173 = vmatprep.subr.bf16.mxu0 %v592_v60  ;;  %1416 = vmatprep.mubr.bf16.mxu0 %v2350_v2  ;;  %v588_v60 = vpack.c.bf16 %v410_v50, %v409_v48  ;;  %v411_v61 = vld [vmem:[%s2660_s23 + $0x660] sm:$0xff]  ;;  %v542_v62 = vpack.c.bf16 %v318_v52, %v317_v45  ;;  %v597_v63 = vpack.c.bf16 %v428_v55, %v427_v54  ;;  %v412_v1 = vld [vmem:[%s2660_s23 + $0x668] sm:$0xff]  ;;  %v386_v5 = vld [vmem:[%s2660_s23 + $0x598] sm:$0xff] }
  0x9b   : > { %1222 = vmatmul.mubr.bf16.gmra.mrb[20].mxu1 %v2337_v44  ;;  %v426_v44 = vld [vmem:[%s2660_s23 + $0x6d8] sm:$0xff]  ;;  %v368_v3 = vld [vmem:[%s2660_s23 + $0x508] sm:$0xff]  ;;  %v589_v11 = vpack.c.bf16 %v412_v1, %v411_v61  ;;  %v371_v28 = vld [vmem:[%s2660_s23 + $0x520] sm:$0xff] }
  0x9c   : > { %2056 = vmatpush3.bf16.msra.mxu1 %v537_v56  ;;  %1229 = vmatprep.mubr.bf16.mxu1 %v2341_v53  ;;  %v596_v53 = vpack.c.bf16 %v426_v44, %v425_v43  ;;  %v383_v56 = vld [vmem:[%s2660_s23 + $0x580] sm:$0xff]  ;;  %v430_v8 = vld [vmem:[%s2660_s23 + $0x6f8] sm:$0xff]  ;;  %v567_v13 = vpack.c.bf16 %v368_v3, %v367_v59  ;;  %v388_v20 = vld [vmem:[%s2660_s23 + $0x5a8] sm:$0xff] }
  0x9d   : > { %2057 = vmatprep.subr.bf16.mxu1 %v546_v58  ;;  %2174 = vmatpush3.bf16.msra.mxu0 %v584_v4  ;;  %v2362_v58 = vld [vmem:[#allocation4 + $0x1d4] ss:$72 sps:$4 sm:$0xff]   ;;  %v575_v2 = vpack.c.bf16 %v384_v57, %v383_v56  ;;  %v464_v26 = vld [vmem:[%s2660_s23 + $0x808] sm:$0xff]  ;;  %v391_v44 = vld [vmem:[%s2660_s23 + $0x5c0] sm:$0xff] }
  0x9e   : > { %2175 = vmatprep.subr.bf16.mxu0 %v593_v7  ;;  %v385_v4 = vld [vmem:[%s2660_s23 + $0x590] sm:$0xff]  ;;  %v370_v17 = vld [vmem:[%s2660_s23 + $0x518] sm:$0xff]  ;;  %v372_v29 = vld [vmem:[%s2660_s23 + $0x528] sm:$0xff] }
  0x9f   : > { %v429_v7 = vld [vmem:[%s2660_s23 + $0x6f0] sm:$0xff]  ;;  %v576_v15 = vpack.c.bf16 %v386_v5, %v385_v4  ;;  %v568_v24 = vpack.c.bf16 %v370_v17, %v369_v16  ;;  %v390_v31 = vld [vmem:[%s2660_s23 + $0x5b8] sm:$0xff]  ;;  %v700_v36 = vld [vmem:[%s3087_s2 + $0x8] sm:$0xff] }
  0xa0   : > { %2058 = vmatpush3.bf16.msra.mxu1 %v538_v6  ;;  %1417 = vmatmul.mubr.bf16.gmra.mrb[20].mxu0 %v2352_v14  ;;  %v2364_v6 = vld [vmem:[#allocation4 + $0x1d0] ss:$72 sps:$4 sm:$0xff]   ;;  %v392_v45 = vld [vmem:[%s2660_s23 + $0x5c8] sm:$0xff]  ;;  %v467_v48 = vld [vmem:[%s2660_s23 + $0x820] sm:$0xff] }
  0xa1   : > { %2059 = vmatprep.subr.bf16.mxu1 %v547_v10  ;;  %2176 = vmatpush3.bf16.msra.mxu0 %v585_v19  ;;  %v2359_v10 = vld [vmem:[#allocation4 + $0xac] ss:$72 sps:$4 sm:$0xff]   ;;  %v414_v14 = vld [vmem:[%s2660_s23 + $0x678] sm:$0xff]  ;;  %v387_v19 = vld [vmem:[%s2660_s23 + $0x5a0] sm:$0xff] }
  0xa2   : > { %2177 = vmatprep.subr.bf16.mxu0 %v594_v25  ;;  %1424 = vmatprep.mubr.bf16.mxu0 %v2356_v30  ;;  %v590_v22 = vpack.c.bf16 %v414_v14, %v413_v12  ;;  %v463_v25 = vld [vmem:[%s2660_s23 + $0x800] sm:$0xff]  ;;  %v577_v27 = vpack.c.bf16 %v388_v20, %v387_v19  ;;  %v389_v30 = vld [vmem:[%s2660_s23 + $0x5b0] sm:$0xff]  ;;  %v466_v39 = vld [vmem:[%s2660_s23 + $0x818] sm:$0xff] }
  0xa3   : > { %1230 = vmatmul.mubr.bf16.gmra.mrb[24].mxu1 %v2343_v9  ;;  %v2353_v9 = vld [vmem:[#allocation4 + $0x18] ss:$72 sps:$4 sm:$0xff]   ;;  %v2361_v33 = vld [vmem:[#allocation4 + $0xa8] ss:$72 sps:$4 sm:$0xff]   ;;  %v578_v41 = vpack.c.bf16 %v390_v31, %v389_v30  ;;  %v2371_v57 = vld [vmem:[#allocation4 + $0x1cc] ss:$72 sps:$4 sm:$0xff]  }
  0xa4   : > { %2060 = vmatpush3.bf16.msra.mxu1 %v539_v21  ;;  %1237 = vmatprep.mubr.bf16.mxu1 %v2347_v18  ;;  %v598_v18 = vpack.c.bf16 %v430_v8, %v429_v7  ;;  %v2370_v21 = vld [vmem:[#allocation4 + $0x34] ss:$72 sps:$4 sm:$0xff]   ;;  %v375_v52 = vld [vmem:[%s2660_s23 + $0x540] sm:$0xff]  ;;  %v396_v4 = vld [vmem:[%s2660_s23 + $0x5e8] sm:$0xff] }
  0xa5   : > { %2061 = vmatprep.subr.bf16.mxu1 %v548_v23  ;;  %2178 = vmatpush3.bf16.msra.mxu0 %v586_v32  ;;  %v699_v23 = vld [vmem:[%s3087_s2] sm:$0xff]  ;;  %v2368_v32 = vld [vmem:[#allocation4 + $0x30] ss:$72 sps:$4 sm:$0xff]   ;;  %v380_v14 = vld [vmem:[%s2660_s23 + $0x568] sm:$0xff] }
  0xa6   : > { %2179 = vmatprep.subr.bf16.mxu0 %v595_v35  ;;  %709 = vperm.xlu0 %2309, %v699_v23   ;;  %v615_v35 = vpack.c.bf16 %v464_v26, %v463_v25  ;;  %v701_v40 = vld [vmem:[%s3087_s2 + $0x10] sm:$0xff]  ;;  %v374_v43 = vld [vmem:[%s2660_s23 + $0x538] sm:$0xff]  ;;  %v703_v59 = vld [vmem:[%s3087_s2 + $0x20] sm:$0xff] }
  0xa7   : > { %719 = vperm.xlu1 %2310, %v701_v40   ;;  %v702_v50 = vld [vmem:[%s3087_s2 + $0x18] sm:$0xff]  ;;  %v393_v55 = vld [vmem:[%s2660_s23 + $0x5d0] sm:$0xff]  ;;  %v395_v3 = vld [vmem:[%s2660_s23 + $0x5e0] sm:$0xff] }
  0xa8   : > { %2062 = vmatpush3.bf16.msra.mxu1 %v540_v34  ;;  %1425 = vmatmul.mubr.bf16.gmra.mrb[24].mxu0 %v2358_v42  ;;  %v2365_v34 = vld [vmem:[#allocation4 + $0x13c] ss:$72 sps:$4 sm:$0xff]   ;;  %v373_v42 = vld [vmem:[%s2660_s23 + $0x530] sm:$0xff]  ;;  %v2367_v54 = vld [vmem:[#allocation4 + $0x138] ss:$72 sps:$4 sm:$0xff]   ;;  %v581_v12 = vpack.c.bf16 %v396_v4, %v395_v3 }
  0xa9   : > { %2063 = vmatprep.subr.bf16.mxu1 %v549_v38  ;;  %2180 = vmatpush3.bf16.msra.mxu0 %v587_v47  ;;  %v465_v38 = vld [vmem:[%s2660_s23 + $0x810] sm:$0xff]  ;;  %v570_v47 = vpack.c.bf16 %v374_v43, %v373_v42  ;;  %v394_v56 = vld [vmem:[%s2660_s23 + $0x5d8] sm:$0xff]  ;;  %v2380_v7 = vld [vmem:[#allocation4 + $0xc4] ss:$72 sps:$4 sm:$0xff]  }
  0xaa   : > { %2181 = vmatprep.subr.bf16.mxu0 %v596_v53  ;;  %1432 = vmatprep.mubr.bf16.mxu0 %v2362_v58  ;;  %v376_v53 = vld [vmem:[%s2660_s23 + $0x548] sm:$0xff]  ;;  %v469_v61 = vld [vmem:[%s2660_s23 + $0x830] sm:$0xff]  ;;  %v398_v17 = vld [vmem:[%s2660_s23 + $0x5f8] sm:$0xff] }
  0xab   : > { %1238 = vmatmul.mubr.bf16.gmra.mrb[28].mxu1 %v2349_v37  ;;  %v569_v37 = vpack.c.bf16 %v372_v29, %v371_v28  ;;  %714 = vperm.xlu0 %2309, %v700_v36   ;;  %v377_v1 = vld [vmem:[%s2660_s23 + $0x550] sm:$0xff]  ;;  %v382_v20 = vld [vmem:[%s2660_s23 + $0x578] sm:$0xff]  ;;  %v448_v28 = vld [vmem:[%s2660_s23 + $0x788] sm:$0xff] }
  0xac   : > { %2064 = vmatpush3.bf16.msra.mxu1 %v541_v49  ;;  %1343 = vmatprep.mubr.bf16.mxu1 %v2355_v46  ;;  %v616_v46 = vpack.c.bf16 %v466_v39, %v465_v38  ;;  %v468_v49 = vld [vmem:[%s2660_s23 + $0x828] sm:$0xff]  ;;  %v397_v16 = vld [vmem:[%s2660_s23 + $0x5f0] sm:$0xff]  ;;  %v474_v25 = vld [vmem:[%s2660_s23 + $0x858] sm:$0xff] }
  0xad   : > { %2065 = vmatprep.subr.bf16.mxu1 %v550_v51  ;;  %2182 = vmatpush3.bf16.msra.mxu0 %v588_v60  ;;  %v579_v51 = vpack.c.bf16 %v392_v45, %v391_v44  ;;  %v617_v58 = vpack.c.bf16 %v468_v49, %v467_v48  ;;  %v571_v60 = vpack.c.bf16 %v376_v53, %v375_v52  ;;  %v381_v19 = vld [vmem:[%s2660_s23 + $0x570] sm:$0xff]  ;;  %v706_v29 = vld [vmem:[%s3087_s2 + $0x38] sm:$0xff]  ;;  %v2392_v52 = vld [vmem:[#allocation4 + $0x1e4] ss:$72 sps:$4 sm:$0xff]  }
  0xae   : > { %2183 = vmatprep.subr.bf16.mxu0 %v597_v63  ;;  %724 = vperm.xlu1 %2310, %v702_v50   ;;  %v580_v63 = vpack.c.bf16 %v394_v56, %v393_v55  ;;  %v2376_v23 = vld [vmem:[#allocation4 + $0x2c] ss:$72 sps:$4 sm:$0xff]   ;;  %v582_v26 = vpack.c.bf16 %v398_v17, %v397_v16  ;;  %v2388_v39 = vld [vmem:[#allocation4 + $0x150] ss:$72 sps:$4 sm:$0xff]   ;;  %v2377_v42 = vld [vmem:[#allocation4 + $0xbc] ss:$72 sps:$4 sm:$0xff]  }
  0xaf   : > { %729 = vperm.xlu0 %2309, %v703_v59   ;;  %v2386_v30 = vld [vmem:[#allocation4 + $0x154] ss:$72 sps:$4 sm:$0xff]   ;;  %v451_v50 = vld [vmem:[%s2660_s23 + $0x7a0] sm:$0xff]  ;;  %v484_v16 = vld [vmem:[%s2660_s23 + $0x8a8] sm:$0xff] }
  0xb0   : > { %2066 = vmatpush3.bf16.msra.mxu1 %v542_v62  ;;  %1433 = vmatmul.mubr.bf16.gmra.mrb[28].mxu0 %v2364_v6  ;;  %v470_v62 = vld [vmem:[%s2660_s23 + $0x838] sm:$0xff]  ;;  %v704_v6 = vld [vmem:[%s3087_s2 + $0x28] sm:$0xff]  ;;  %v449_v38 = vld [vmem:[%s2660_s23 + $0x790] sm:$0xff] }
  0xb1   : > { %2131 = vmatprep.subr.bf16.mxu1 %v575_v2  ;;  %2184 = vmatpush3.bf16.msra.mxu0 %v589_v11  ;;  %v378_v2 = vld [vmem:[%s2660_s23 + $0x558] sm:$0xff]  ;;  %v618_v5 = vpack.c.bf16 %v470_v62, %v469_v61  ;;  %v2373_v11 = vld [vmem:[#allocation4 + $0x1c8] ss:$72 sps:$4 sm:$0xff]   ;;  %v435_v53 = vld [vmem:[%s2660_s23 + $0x720] sm:$0xff] }
  0xb2   : > { %2185 = vmatprep.subr.bf16.mxu0 %v598_v18  ;;  %1538 = vmatprep.mubr.bf16.mxu0 %v2370_v21  ;;  %v572_v8 = vpack.c.bf16 %v378_v2, %v377_v1  ;;  %v705_v18 = vld [vmem:[%s3087_s2 + $0x30] sm:$0xff]  ;;  %v450_v40 = vld [vmem:[%s2660_s23 + $0x798] sm:$0xff]  ;;  %v2394_v62 = vld [vmem:[#allocation4 + $0x1e0] ss:$72 sps:$4 sm:$0xff]  }
  0xb3   : > { %1344 = vmatmul.mubr.bf16.vlgmr.msra.gmra.mrb[32].mxu1 %v2353_v9  ;;  %v471_v9 = vld [vmem:[%s2660_s23 + $0x840] sm:$0xff]  ;;  %734 = vperm.xlu1 %2310, %v704_v6   ;;  %v477_v45 = vld [vmem:[%s2660_s23 + $0x870] sm:$0xff]  ;;  %v434_v49 = vld [vmem:[%s2660_s23 + $0x718] sm:$0xff] }
  0xb4   : > { %2132 = vmatpush3.bf16.msra.mxu1 %v567_v13  ;;  %1351 = vmatprep.mubr.bf16.mxu1 %v2359_v10  ;;  %v472_v10 = vld [vmem:[%s2660_s23 + $0x848] sm:$0xff]  ;;  %v379_v13 = vld [vmem:[%s2660_s23 + $0x560] sm:$0xff]  ;;  %v433_v48 = vld [vmem:[%s2660_s23 + $0x710] sm:$0xff] }
  0xb5   : > { %2133 = vmatprep.subr.bf16.mxu1 %v576_v15  ;;  %2186 = vmatpush3.bf16.msra.mxu0 %v590_v22  ;;  %v2382_v15 = vld [vmem:[#allocation4 + $0xc0] ss:$72 sps:$4 sm:$0xff]   ;;  %v619_v21 = vpack.c.bf16 %v472_v10, %v471_v9  ;;  %v573_v22 = vpack.c.bf16 %v380_v14, %v379_v13  ;;  %v600_v56 = vpack.c.bf16 %v434_v49, %v433_v48  ;;  %v453_v61 = vld [vmem:[%s2660_s23 + $0x7b0] sm:$0xff]  ;;  %v438_v9 = vld [vmem:[%s2660_s23 + $0x738] sm:$0xff] }
  0xb6   : > { %1636 = vmatprep.subr.bf16.mxu0 %v2523_v0  ;;  %739 = vperm.xlu0 %2309, %v705_v18   ;;  %v2379_v59 = vld [vmem:[#allocation4 + $0xb8] ss:$72 sps:$4 sm:$0xff]   ;;  %v2383_v1 = vld [vmem:[#allocation4 + $0x14c] ss:$72 sps:$4 sm:$0xff]  }
  0xb7   : > { %744 = vperm.xlu1 %2310, %v706_v29   ;;  %v437_v2 = vld [vmem:[%s2660_s23 + $0x730] sm:$0xff]  ;;  %v455_v10 = vld [vmem:[%s2660_s23 + $0x7c0] sm:$0xff]  ;;  %v440_v18 = vld [vmem:[%s2660_s23 + $0x748] sm:$0xff] }
  0xb8   : > { %2134 = vmatpush3.bf16.msra.mxu1 %v568_v24  ;;  %1539 = vmatmul.mubr.bf16.vlgmr.msra.gmra.mrb[32].mxu0 %v2368_v32  ;;  %v473_v24 = vld [vmem:[%s2660_s23 + $0x850] sm:$0xff]  ;;  %v574_v32 = vpack.c.bf16 %v382_v20, %v381_v19  ;;  %v483_v14 = vld [vmem:[%s2660_s23 + $0x8a0] sm:$0xff]  ;;  %v458_v20 = vld [vmem:[%s2660_s23 + $0x7d8] sm:$0xff] }
  0xb9   : > { %2135 = vmatprep.subr.bf16.mxu1 %v577_v27  ;;  %1637 = vmatpush1.bf16.msra.mxu0 %v615_v35  ;;  %v447_v27 = vld [vmem:[%s2660_s23 + $0x780] sm:$0xff]  ;;  %v620_v31 = vpack.c.bf16 %v474_v25, %v473_v24  ;;  %v476_v35 = vld [vmem:[%s2660_s23 + $0x868] sm:$0xff]  ;;  %v481_v4 = vld [vmem:[%s2660_s23 + $0x890] sm:$0xff] }
  0xba   : > { %1638 = vmatprep.subr.bf16.mxu0 %v2523_v0  ;;  %1546 = vmatprep.mubr.bf16.mxu0 %v2380_v7  ;;  %v607_v36 = vpack.c.bf16 %v448_v28, %v447_v27  ;;  %v482_v7 = vld [vmem:[%s2660_s23 + $0x898] sm:$0xff]  ;;  %v457_v19 = vld [vmem:[%s2660_s23 + $0x7d0] sm:$0xff]  ;;  %v2410_v49 = vld [vmem:[#allocation4 + $0x164] ss:$72 sps:$4 sm:$0xff]  }
  0xbb   : > { %1352 = vmatmul.mubr.bf16.gmra.mrb[36].mxu1 %v2361_v33  ;;  %v431_v33 = vld [vmem:[%s2660_s23 + $0x700] sm:$0xff]  ;;  %v624_v13 = vpack.c.bf16 %v482_v7, %v481_v4  ;;  %v485_v25 = vld [vmem:[%s2660_s23 + $0x8b0] sm:$0xff]  ;;  %v612_v27 = vpack.c.bf16 %v458_v20, %v457_v19  ;;  %v442_v29 = vld [vmem:[%s2660_s23 + $0x758] sm:$0xff] }
  0xbc   : > { %2136 = vmatpush3.bf16.msra.mxu1 %v569_v37  ;;  %1359 = vmatprep.mubr.bf16.mxu1 %v2365_v34  ;;  %v475_v34 = vld [vmem:[%s2660_s23 + $0x860] sm:$0xff]  ;;  %v432_v37 = vld [vmem:[%s2660_s23 + $0x708] sm:$0xff]  ;;  %v441_v28 = vld [vmem:[%s2660_s23 + $0x750] sm:$0xff] }
  0xbd   : > { %2137 = vmatprep.subr.bf16.mxu1 %v578_v41  ;;  %1639 = vmatpush1.bf16.msra.mxu0 %v616_v46  ;;  %v2374_v41 = vld [vmem:[#allocation4 + $0x28] ss:$72 sps:$4 sm:$0xff]   ;;  %v621_v43 = vpack.c.bf16 %v476_v35, %v475_v34  ;;  %v599_v44 = vpack.c.bf16 %v432_v37, %v431_v33  ;;  %v478_v46 = vld [vmem:[%s2660_s23 + $0x878] sm:$0xff]  ;;  %v604_v33 = vpack.c.bf16 %v442_v29, %v441_v28  ;;  %v443_v35 = vld [vmem:[%s2660_s23 + $0x760] sm:$0xff] }
  0xbe   : > { %1640 = vmatprep.subr.bf16.mxu0 %v2523_v0  ;;  %v622_v55 = vpack.c.bf16 %v478_v46, %v477_v45  ;;  %v2389_v24 = vld [vmem:[#allocation4 + $0x1dc] ss:$72 sps:$4 sm:$0xff]   ;;  %v461_v37 = vld [vmem:[%s2660_s23 + $0x7f0] sm:$0xff]  ;;  %v2395_v48 = vld [vmem:[#allocation4 + $0x38] ss:$72 sps:$4 sm:$0xff]  }
  0xbf   : > { %v445_v45 = vld [vmem:[%s2660_s23 + $0x770] sm:$0xff]  ;;  %v446_v46 = vld [vmem:[%s2660_s23 + $0x778] sm:$0xff] }
  0xc0   : > { %2138 = vmatpush3.bf16.msra.mxu1 %v570_v47  ;;  %1547 = vmatmul.mubr.bf16.gmra.mrb[36].mxu0 %v2382_v15  ;;  %v608_v47 = vpack.c.bf16 %v450_v40, %v449_v38  ;;  %v602_v15 = vpack.c.bf16 %v438_v9, %v437_v2  ;;  %v462_v38 = vld [vmem:[%s2660_s23 + $0x7f8] sm:$0xff] }
  0xc1   : > { %2139 = vmatprep.subr.bf16.mxu1 %v579_v51  ;;  %1641 = vmatpush1.bf16.msra.mxu0 %v617_v58  ;;  %v452_v51 = vld [vmem:[%s2660_s23 + $0x7a8] sm:$0xff]  ;;  %v2391_v40 = vld [vmem:[#allocation4 + $0x1d8] ss:$72 sps:$4 sm:$0xff]  }
  0xc2   : > { %1642 = vmatprep.subr.bf16.mxu0 %v2523_v0  ;;  %1554 = vmatprep.mubr.bf16.mxu0 %v2386_v30  ;;  %v480_v58 = vld [vmem:[%s2660_s23 + $0x888] sm:$0xff]  ;;  %v459_v30 = vld [vmem:[%s2660_s23 + $0x7e0] sm:$0xff] }
  0xc3   : > { %1360 = vmatmul.mubr.bf16.gmra.mrb[40].mxu1 %v2367_v54  ;;  %v436_v54 = vld [vmem:[%s2660_s23 + $0x728] sm:$0xff] }
  0xc4   : > { %2140 = vmatpush3.bf16.msra.mxu1 %v571_v60  ;;  %1367 = vmatprep.mubr.bf16.mxu1 %v2371_v57  ;;  %v479_v57 = vld [vmem:[%s2660_s23 + $0x880] sm:$0xff]  ;;  %v609_v60 = vpack.c.bf16 %v452_v51, %v451_v50  ;;  %v601_v6 = vpack.c.bf16 %v436_v54, %v435_v53  ;;  %v2401_v50 = vld [vmem:[#allocation4 + $0xcc] ss:$72 sps:$4 sm:$0xff]  }
  0xc5   : > { %2141 = vmatprep.subr.bf16.mxu1 %v580_v63  ;;  %1643 = vmatpush1.bf16.msra.mxu0 %v618_v5  ;;  %v454_v63 = vld [vmem:[%s2660_s23 + $0x7b8] sm:$0xff]  ;;  %v623_v3 = vpack.c.bf16 %v480_v58, %v479_v57  ;;  %v2400_v5 = vld [vmem:[#allocation4 + $0x44] ss:$72 sps:$4 sm:$0xff]   ;;  %v2412_v51 = vld [vmem:[#allocation4 + $0x160] ss:$72 sps:$4 sm:$0xff]  }
  0xc6   : > { %1644 = vmatprep.subr.bf16.mxu0 %v2523_v0  ;;  %v2416_v53 = vld [vmem:[#allocation4 + $0x1f4] ss:$72 sps:$4 sm:$0xff]   ;;  %v2415_v58 = vld [vmem:[#allocation4 + $0x1e8] ss:$72 sps:$4 sm:$0xff]  }
  0xc7   : > { %v2407_v54 = vld [vmem:[#allocation4 + $0x15c] ss:$72 sps:$4 sm:$0xff]   ;;  %v2413_v57 = vld [vmem:[#allocation4 + $0x1ec] ss:$72 sps:$4 sm:$0xff]  }
  0xc8   : > { %2142 = vmatpush3.bf16.msra.mxu1 %v572_v8  ;;  %1555 = vmatmul.mubr.bf16.gmra.mrb[40].mxu0 %v2388_v39  ;;  %v610_v8 = vpack.c.bf16 %v454_v63, %v453_v61  ;;  %v2398_v39 = vld [vmem:[#allocation4 + $0x40] ss:$72 sps:$4 sm:$0xff]  }
  0xc9   : > { %2143 = vmatprep.subr.bf16.mxu1 %v581_v12  ;;  %1645 = vmatpush1.bf16.msra.mxu0 %v619_v21  ;;  %v439_v12 = vld [vmem:[%s2660_s23 + $0x740] sm:$0xff]  ;;  %v2385_v21 = vld [vmem:[#allocation4 + $0x148] ss:$72 sps:$4 sm:$0xff]  }
  0xca   : > { %1646 = vmatprep.subr.bf16.mxu0 %v2523_v0  ;;  %1562 = vmatprep.mubr.bf16.mxu0 %v2392_v52  ;;  %v2403_v52 = vld [vmem:[#allocation4 + $0xc8] ss:$72 sps:$4 sm:$0xff]  }
  0xcb   : > { %1368 = vmatmul.mubr.bf16.gmra.mrb[44].mxu1 %v2373_v11  ;;  %v456_v11 = vld [vmem:[%s2660_s23 + $0x7c8] sm:$0xff] }
  0xcc   : > { %2144 = vmatpush3.bf16.msra.mxu1 %v573_v22  ;;  %1473 = vmatprep.mubr.bf16.mxu1 %v2376_v23  ;;  %v611_v17 = vpack.c.bf16 %v456_v11, %v455_v10  ;;  %v625_v22 = vpack.c.bf16 %v484_v16, %v483_v14  ;;  %v603_v23 = vpack.c.bf16 %v440_v18, %v439_v12 }
  0xcd   : > { %2145 = vmatprep.subr.bf16.mxu1 %v582_v26  ;;  %1647 = vmatpush1.bf16.msra.mxu0 %v620_v31  ;;  %v486_v26 = vld [vmem:[%s2660_s23 + $0x8b8] sm:$0xff]  ;;  %v460_v31 = vld [vmem:[%s2660_s23 + $0x7e8] sm:$0xff] }
  0xce   : > { %1648 = vmatprep.subr.bf16.mxu0 %v2523_v0  ;;  %v613_v34 = vpack.c.bf16 %v460_v31, %v459_v30 }
  0xd0   : > { %2146 = vmatpush3.bf16.msra.mxu1 %v574_v32  ;;  %1563 = vmatmul.mubr.bf16.gmra.mrb[44].mxu0 %v2394_v62  ;;  %v626_v32 = vpack.c.bf16 %v486_v26, %v485_v25 }
  0xd1   : > { %2211 = vmatprep.subr.bf16.mxu1 %v607_v36  ;;  %1649 = vmatpush1.bf16.msra.mxu0 %v621_v43  ;;  %v444_v36 = vld [vmem:[%s2660_s23 + $0x768] sm:$0xff]  ;;  %v2397_v43 = vld [vmem:[#allocation4 + $0x3c] ss:$72 sps:$4 sm:$0xff]  }
  0xd2   : > { %1650 = vmatprep.subr.bf16.mxu0 %v2523_v0  ;;  %1908 = vmatprep.mubr.msk.bf16.mxu0 %vm1103_vm0, %v2400_v5 }
  0xd3   : > { %1474 = vmatmul.mubr.bf16.vlgmr.msra.gmra.mrb[48].mxu1 %v2374_v41  ;;  %v2404_v41 = vld [vmem:[#allocation4 + $0xd4] ss:$72 sps:$4 sm:$0xff]  }
  0xd4   : > { %2212 = vmatpush3.bf16.msra.mxu1 %v599_v44  ;;  %1481 = vmatprep.mubr.bf16.mxu1 %v2377_v42  ;;  %v605_v42 = vpack.c.bf16 %v444_v36, %v443_v35  ;;  %v614_v44 = vpack.c.bf16 %v462_v38, %v461_v37 }
  0xd5   : > { %2213 = vmatprep.subr.bf16.mxu1 %v608_v47  ;;  %1651 = vmatpush1.bf16.msra.mxu0 %v622_v55  ;;  %v606_v47 = vpack.c.bf16 %v446_v46, %v445_v45  ;;  %v2418_v55 = vld [vmem:[#allocation4 + $0x1f0] ss:$72 sps:$4 sm:$0xff]  }
  0xd6   : > { %1652 = vmatprep.subr.bf16.mxu0 %v2523_v0 }
  0xd8   : > { %2214 = vmatpush3.bf16.msra.mxu1 %v600_v56  ;;  %v2409_v56 = vld [vmem:[#allocation4 + $0x158] ss:$72 sps:$4 sm:$0xff]  }
  0xd9   : > { %2215 = vmatprep.subr.bf16.mxu1 %v609_v60  ;;  %1653 = vmatpush1.bf16.msra.mxu0 %v623_v3 }
  0xda   : > { %1654 = vmatprep.subr.bf16.mxu0 %v2523_v0 }
  0xdb   : > { %1482 = vmatmul.mubr.bf16.gmra.mrb[52].mxu1 %v2379_v59 }
  0xdc   : > { %2216 = vmatpush3.bf16.msra.mxu1 %v601_v6  ;;  %1489 = vmatprep.mubr.bf16.mxu1 %v2383_v1 }
  0xdd   : > { %2217 = vmatprep.subr.bf16.mxu1 %v610_v8  ;;  %1655 = vmatpush1.bf16.msra.mxu0 %v624_v13 }
  0xde   : > { %1656 = vmatprep.subr.bf16.mxu0 %v2523_v0 }
  0xe0   : > { %2218 = vmatpush3.bf16.msra.mxu1 %v602_v15 }
  0xe1   : > { %2219 = vmatprep.subr.bf16.mxu1 %v611_v17  ;;  %1657 = vmatpush1.bf16.msra.mxu0 %v625_v22 }
  0xe2   : > { %1658 = vmatprep.subr.bf16.mxu0 %v2523_v0  ;;  %v2406_v0 = vld [vmem:[#allocation4 + $0xd0] ss:$72 sps:$4 sm:$0xff]  }
  0xe3   : > { %1490 = vmatmul.mubr.bf16.gmra.mrb[56].mxu1 %v2385_v21 }
  0xe4   : > { %2220 = vmatpush3.bf16.msra.mxu1 %v603_v23  ;;  %1497 = vmatprep.mubr.bf16.mxu1 %v2389_v24 }
  0xe5   : > { %2221 = vmatprep.subr.bf16.mxu1 %v612_v27  ;;  %1659 = vmatpush1.bf16.msra.mxu0 %v626_v32 }
  0xe8   : > { %2222 = vmatpush3.bf16.msra.mxu1 %v604_v33  ;;  %1669 = vmatmul.mubr.bf16.vlgmr.msra.gmra.mrb[48].mxu0 %v2398_v39 }
  0xe9   : > { %2223 = vmatprep.subr.bf16.mxu1 %v613_v34  ;;  %1909 = vmatprep.mubr.msk.bf16.mxu0 %vm1103_vm0, %v2404_v41 }
  0xeb   : > { %1498 = vmatmul.mubr.bf16.gmra.mrb[60].mxu1 %v2391_v40 }
  0xec   : > { %2224 = vmatpush3.bf16.msra.mxu1 %v605_v42  ;;  %1603 = vmatprep.mubr.bf16.mxu1 %v2397_v43 }
  0xed   : > { %2225 = vmatprep.subr.bf16.mxu1 %v614_v44 }
  0xf0   : > { %2226 = vmatpush3.bf16.msra.mxu1 %v606_v47  ;;  %1677 = vmatmul.mubr.bf16.gmra.mrb[52].mxu0 %v2406_v0 }
  0xf1   : > { %1910 = vmatprep.mubr.msk.bf16.mxu0 %vm1103_vm0, %v2410_v49 }
  0xf3   : > { %1604 = vmatmul.mubr.bf16.vlgmr.msra.gmra.mrb[64].mxu1 %v2395_v48 }
  0xf4   : > { %1611 = vmatprep.mubr.bf16.mxu1 %v2401_v50 }
  0xf8   : > { %1685 = vmatmul.mubr.bf16.gmra.mrb[56].mxu0 %v2412_v51 }
  0xf9   : > { %1911 = vmatprep.mubr.msk.bf16.mxu0 %vm1103_vm0, %v2416_v53 }
  0xfb   : > { %1612 = vmatmul.mubr.bf16.gmra.mrb[68].mxu1 %v2403_v52 }
  0xfc   : > { %1619 = vmatprep.mubr.bf16.mxu1 %v2407_v54 }
 0x100   : > { %1693 = vmatmul.mubr.bf16.gmra.mrb[60].mxu0 %v2418_v55 }
 0x103   : > { %1620 = vmatmul.mubr.bf16.gmra.mrb[72].mxu1 %v2409_v56 }
 0x104   : > { %1627 = vmatprep.mubr.bf16.mxu1 %v2413_v57 }
 0x10b   : > { %1628 = vmatmul.mubr.bf16.gmra.mrb[76].mxu1 %v2415_v58 }
 0x125   : > { %v710_v26 = vpop.permute.xlu0 %709 }
 0x126   : > { %v720_v39 = vpop.permute.xlu1 %719 }
 0x12a   : > { %v715_v40 = vpop.permute.xlu0 %714 }
 0x12d   : > { %v725_v57 = vpop.permute.xlu1 %724 }
 0x146   : > { %v1947_v59 = vpop.f32.mrb[0].mxu1 }
 0x147   : > { %v1948_v60 = vpop.f32.mrb[1].mxu1 }
 0x148   : > { %v1949_v61 = vadd.f32 %v1948_v60, %v1947_v59  ;;  %v1950_v62 = vpop.f32.mrb[2].mxu1 }
 0x149   : > { %v1951_v63 = vpop.f32.mrb[3].mxu1 }
 0x14a   : > { %v1952_v1 = vadd.f32 %v1951_v63, %v1950_v62  ;;  %v1151_v47 = vadd.f32 %v1949_v61, %v710_v26 }
 0x14b   : > { %v2027_v2 = vpop.f32.mrb[0].mxu0 }
 0x14c   : > { %v2028_v4 = vpop.f32.mrb[1].mxu0  ;;  %v1154_v52 = vadd.f32 %v1952_v1, %v715_v40 }
 0x14d   : > { %v2029_v6 = vadd.f32 %v2028_v4, %v2027_v2  ;;  %v2030_v7 = vpop.f32.mrb[2].mxu0 }
 0x14e   : > { %v1953_v3 = vpop.f32.mrb[4].mxu1  ;;  %v2031_v10 = vpop.f32.mrb[3].mxu0 }
 0x14f   : > { %v1954_v5 = vpop.f32.mrb[5].mxu1  ;;  %v2032_v12 = vadd.f32 %v2031_v10, %v2030_v7 }
 0x150   : > { %v1955_v8 = vadd.f32 %v1954_v5, %v1953_v3  ;;  %v1956_v9 = vpop.f32.mrb[6].mxu1 }
 0x151   : > { %v1957_v11 = vpop.f32.mrb[7].mxu1 }
 0x152   : > { %v1958_v13 = vadd.f32 %v1957_v11, %v1956_v9  ;;  %v1159_v3 = vadd.f32 %v1955_v8, %v720_v39 }
 0x153   : > { %v2033_v14 = vpop.f32.mrb[4].mxu0 }
 0x154   : > { %v2034_v16 = vpop.f32.mrb[5].mxu0  ;;  %v1162_v10 = vadd.f32 %v1958_v13, %v725_v57 }
 0x155   : > { %v2035_v18 = vadd.f32 %v2034_v16, %v2033_v14  ;;  %v2036_v19 = vpop.f32.mrb[6].mxu0  ;;  %v730_v14 = vpop.permute.xlu0 %729 }
 0x156   : > { %v1959_v15 = vpop.f32.mrb[8].mxu1  ;;  %v2037_v22 = vpop.f32.mrb[7].mxu0 }
 0x157   : > { %v1960_v17 = vpop.f32.mrb[9].mxu1  ;;  %v2038_v24 = vadd.f32 %v2037_v22, %v2036_v19 }
 0x158   : > { %v2992_v20 = vadd.f32 %v1960_v17, %v1959_v15  ;;  %v1962_v21 = vpop.f32.mrb[10].mxu1 }
 0x159   : > { %v1963_v23 = vpop.f32.mrb[11].mxu1 }
 0x15a   : > { %v2994_v25 = vadd.f32 %v1963_v23, %v1962_v21 }
 0x15b   : > { %v2039_v27 = vpop.f32.mrb[8].mxu0 }
 0x15c   : > { %v2040_v29 = vpop.f32.mrb[9].mxu0 }
 0x15d   : > { %v2996_v31 = vadd.f32 %v2040_v29, %v2039_v27  ;;  %v2042_v32 = vpop.f32.mrb[10].mxu0  ;;  %v1167_v27 = vadd.f32 %v2992_v20, %v730_v14 }
 0x15e   : > { %v1965_v28 = vpop.f32.mrb[12].mxu1  ;;  %v2043_v35 = vpop.f32.mrb[11].mxu0 }
 0x15f   : > { %v1966_v30 = vpop.f32.mrb[13].mxu1  ;;  %v3000_v37 = vadd.f32 %v2043_v35, %v2042_v32 }
 0x160   : > { %v2998_v33 = vadd.f32 %v1966_v30, %v1965_v28  ;;  %v1968_v34 = vpop.f32.mrb[14].mxu1 }
 0x161   : > { %v1969_v36 = vpop.f32.mrb[15].mxu1 }
 0x162   : > { %v3002_v38 = vadd.f32 %v1969_v36, %v1968_v34  ;;  %v740_v36 = vpop.permute.xlu0 %739 }
 0x163   : > { %v2045_v41 = vpop.f32.mrb[12].mxu0 }
 0x164   : > { %v2046_v43 = vpop.f32.mrb[13].mxu0 }
 0x165   : > { %v3004_v45 = vadd.f32 %v2046_v43, %v2045_v41  ;;  %v2048_v46 = vpop.f32.mrb[14].mxu0 }
 0x166   : > { %v1987_v42 = vpop.f32.mrb[16].mxu1  ;;  %v2049_v49 = vpop.f32.mrb[15].mxu0 }
 0x167   : > { %v1988_v44 = vpop.f32.mrb[17].mxu1  ;;  %v3006_v51 = vadd.f32 %v2049_v49, %v2048_v46 }
 0x168   : > { %v1989_v0 = vadd.f32 %v1988_v44, %v1987_v42  ;;  %v1990_v48 = vpop.f32.mrb[18].mxu1 }
 0x169   : > { %v1991_v50 = vpop.f32.mrb[19].mxu1 }
 0x16a   : > { %v1216_v53 = vadd.f32 %v1989_v0, %v1151_v47  ;;  %v1992_v54 = vadd.f32 %v1991_v50, %v1990_v48  ;;  %v1175_v0 = vadd.f32 %v2998_v33, %v740_v36 }
 0x16b   : > { %v2107_v58 = vpop.f32.mrb[16].mxu0 }
 0x16c   : > { %v1219_v55 = vadd.f32 %v1992_v54, %v1154_v52  ;;  %v3008_v56 = vadd.f32 %v2029_v6, %v1216_v53  ;;  %v2108_v60 = vpop.f32.mrb[17].mxu0 }
 0x16d   : > { %v3012_v61 = vadd.f32 %v2108_v60, %v2107_v58  ;;  %v2110_v2 = vpop.f32.mrb[18].mxu0 }
 0x16e   : > { %v1993_v59 = vpop.f32.mrb[20].mxu1  ;;  %v3010_v62 = vadd.f32 %v2032_v12, %v1219_v55  ;;  %v2111_v7 = vpop.f32.mrb[19].mxu0 }
 0x16f   : > { %v1994_v63 = vpop.f32.mrb[21].mxu1  ;;  %v3014_v9 = vadd.f32 %v2111_v7, %v2110_v2  ;;  %v735_v12 = vpop.permute.xlu1 %734 }
 0x170   : > { %v1995_v4 = vadd.f32 %v1994_v63, %v1993_v59  ;;  %v1996_v5 = vpop.f32.mrb[22].mxu1 }
 0x171   : > { %v1997_v1 = vpop.f32.mrb[23].mxu1 }
 0x172   : > { %v1224_v6 = vadd.f32 %v1995_v4, %v1159_v3  ;;  %v1998_v11 = vadd.f32 %v1997_v1, %v1996_v5 }
 0x173   : > { %v2113_v17 = vpop.f32.mrb[20].mxu0  ;;  %v745_v40 = vpop.permute.xlu1 %744 }
 0x174   : > { %v1227_v15 = vadd.f32 %v1998_v11, %v1162_v10  ;;  %v3016_v16 = vadd.f32 %v2035_v18, %v1224_v6  ;;  %v2114_v21 = vpop.f32.mrb[21].mxu0  ;;  %v1170_v18 = vadd.f32 %v2994_v25, %v735_v12  ;;  %v1178_v53 = vadd.f32 %v3002_v38, %v745_v40 }
 0x175   : > { %v3020_v23 = vadd.f32 %v2114_v21, %v2113_v17  ;;  %v2116_v26 = vpop.f32.mrb[22].mxu0 }
 0x176   : > { %v1999_v19 = vpop.f32.mrb[24].mxu1  ;;  %v3018_v22 = vadd.f32 %v2038_v24, %v1227_v15  ;;  %v2117_v29 = vpop.f32.mrb[23].mxu0 }
 0x177   : > { %v2000_v8 = vpop.f32.mrb[25].mxu1  ;;  %v2118_v32 = vadd.f32 %v2117_v29, %v2116_v26 }
 0x178   : > { %v2001_v28 = vadd.f32 %v2000_v8, %v1999_v19  ;;  %v2002_v13 = vpop.f32.mrb[26].mxu1 }
 0x179   : > { %v2003_v30 = vpop.f32.mrb[27].mxu1 }
 0x17a   : > { %v1232_v34 = vadd.f32 %v2001_v28, %v1167_v27  ;;  %v2004_v35 = vadd.f32 %v2003_v30, %v2002_v13 }
 0x17b   : > { %v2119_v41 = vpop.f32.mrb[24].mxu0 }
 0x17c   : > { %v1235_v39 = vadd.f32 %v2004_v35, %v1170_v18  ;;  %v1297_v24 = vadd.f32 %v2996_v31, %v1232_v34  ;;  %v2120_v43 = vpop.f32.mrb[25].mxu0 }
 0x17d   : > { %v2121_v46 = vadd.f32 %v2120_v43, %v2119_v41  ;;  %v2122_v47 = vpop.f32.mrb[26].mxu0 }
 0x17e   : > { %v2005_v42 = vpop.f32.mrb[28].mxu1  ;;  %v1300_v44 = vadd.f32 %v3000_v37, %v1235_v39  ;;  %v2123_v25 = vpop.f32.mrb[27].mxu0 }
 0x17f   : > { %v2006_v20 = vpop.f32.mrb[29].mxu1  ;;  %v2124_v52 = vadd.f32 %v2123_v25, %v2122_v47 }
 0x180   : > { %v2007_v48 = vadd.f32 %v2006_v20, %v2005_v42  ;;  %v2008_v49 = vpop.f32.mrb[30].mxu1 }
 0x181   : > { %v2009_v50 = vpop.f32.mrb[31].mxu1 }
 0x182   : > { %v1240_v54 = vadd.f32 %v2007_v48, %v1175_v0  ;;  %v2010_v31 = vadd.f32 %v2009_v50, %v2008_v49 }
 0x183   : > { %v2125_v58 = vpop.f32.mrb[28].mxu0 }
 0x184   : > { %v1243_v55 = vadd.f32 %v2010_v31, %v1178_v53  ;;  %v1305_v57 = vadd.f32 %v3004_v45, %v1240_v54  ;;  %v2126_v37 = vpop.f32.mrb[29].mxu0 }
 0x185   : > { %v2127_v2 = vadd.f32 %v2126_v37, %v2125_v58  ;;  %v2128_v33 = vpop.f32.mrb[30].mxu0 }
 0x186   : > { %v2067_v59 = vpop.f32.mrb[32].mxu1  ;;  %v1308_v60 = vadd.f32 %v3006_v51, %v1243_v55  ;;  %v2129_v5 = vpop.f32.mrb[31].mxu0 }
 0x187   : > { %v2068_v63 = vpop.f32.mrb[33].mxu1  ;;  %v2130_v1 = vadd.f32 %v2129_v5, %v2128_v33 }
 0x188   : > { %v2069_v3 = vadd.f32 %v2068_v63, %v2067_v59  ;;  %v2070_v4 = vpop.f32.mrb[34].mxu1 }
 0x189   : > { %v2071_v7 = vpop.f32.mrb[35].mxu1 }
 0x18a   : > { %v1346_v38 = vadd.f32 %v2069_v3, %v3008_v56  ;;  %v2072_v10 = vadd.f32 %v2071_v7, %v2070_v4 }
 0x18b   : > { %v2187_v11 = vpop.f32.mrb[32].mxu0 }
 0x18c   : > { %v1349_v6 = vadd.f32 %v2072_v10, %v3010_v62  ;;  %v1411_v45 = vadd.f32 %v3012_v61, %v1346_v38  ;;  %v2188_v15 = vpop.f32.mrb[33].mxu0 }
 0x18d   : > { %v2189_v17 = vadd.f32 %v2188_v15, %v2187_v11  ;;  %v2190_v19 = vpop.f32.mrb[34].mxu0 }
 0x18e   : > { %v2073_v14 = vpop.f32.mrb[36].mxu1  ;;  %v1414_v51 = vadd.f32 %v3014_v9, %v1349_v6  ;;  %v2191_v26 = vpop.f32.mrb[35].mxu0 }
 0x18f   : > { %v2074_v12 = vpop.f32.mrb[37].mxu1  ;;  %v2192_v28 = vadd.f32 %v2191_v26, %v2190_v19 }
 0x190   : > { %v2075_v21 = vadd.f32 %v2074_v12, %v2073_v14  ;;  %v2076_v8 = vpop.f32.mrb[38].mxu1 }
 0x191   : > { %v2077_v27 = vpop.f32.mrb[39].mxu1 }
 0x192   : > { %v1354_v56 = vadd.f32 %v2075_v21, %v3016_v16  ;;  %v2078_v13 = vadd.f32 %v2077_v27, %v2076_v8 }
 0x193   : > { %v2193_v41 = vpop.f32.mrb[36].mxu0 }
 0x194   : > { %v1357_v62 = vadd.f32 %v2078_v13, %v3018_v22  ;;  %v1419_v61 = vadd.f32 %v3020_v23, %v1354_v56  ;;  %v2194_v43 = vpop.f32.mrb[37].mxu0 }
 0x195   : > { %v2195_v47 = vadd.f32 %v2194_v43, %v2193_v41  ;;  %v2196_v16 = vpop.f32.mrb[38].mxu0 }
 0x196   : > { %v2079_v29 = vpop.f32.mrb[40].mxu1  ;;  %v1422_v30 = vadd.f32 %v2118_v32, %v1357_v62  ;;  %v2197_v22 = vpop.f32.mrb[39].mxu0 }
 0x197   : > { %v2080_v18 = vpop.f32.mrb[41].mxu1  ;;  %v2198_v25 = vadd.f32 %v2197_v22, %v2196_v16 }
 0x198   : > { %v2081_v34 = vadd.f32 %v2080_v18, %v2079_v29  ;;  %v2082_v9 = vpop.f32.mrb[42].mxu1 }
 0x199   : > { %v2083_v35 = vpop.f32.mrb[43].mxu1 }
 0x19a   : > { %v1362_v36 = vadd.f32 %v2081_v34, %v1297_v24  ;;  %v2084_v39 = vadd.f32 %v2083_v35, %v2082_v9 }
 0x19b   : > { %v2199_v31 = vpop.f32.mrb[40].mxu0 }
 0x19c   : > { %v1365_v40 = vadd.f32 %v2084_v39, %v1300_v44  ;;  %v1427_v42 = vadd.f32 %v2121_v46, %v1362_v36  ;;  %v2200_v55 = vpop.f32.mrb[41].mxu0 }
 0x19d   : > { %v2201_v58 = vadd.f32 %v2200_v55, %v2199_v31  ;;  %v2202_v46 = vpop.f32.mrb[42].mxu0 }
 0x19e   : > { %v2085_v20 = vpop.f32.mrb[44].mxu1  ;;  %v1430_v0 = vadd.f32 %v2124_v52, %v1365_v40  ;;  %v2203_v63 = vpop.f32.mrb[43].mxu0 }
 0x19f   : > { %v2086_v48 = vpop.f32.mrb[45].mxu1  ;;  %v2204_v3 = vadd.f32 %v2203_v63, %v2202_v46 }
 0x1a0   : > { %v2087_v49 = vadd.f32 %v2086_v48, %v2085_v20  ;;  %v2088_v23 = vpop.f32.mrb[46].mxu1 }
 0x1a1   : > { %v2089_v32 = vpop.f32.mrb[47].mxu1 }
 0x1a2   : > { %v1370_v50 = vadd.f32 %v2087_v49, %v1305_v57  ;;  %v2090_v53 = vadd.f32 %v2089_v32, %v2088_v23 }
 0x1a3   : > { %v2205_v10 = vpop.f32.mrb[44].mxu0 }
 0x1a4   : > { %v1373_v54 = vadd.f32 %v2090_v53, %v1308_v60  ;;  %v1435_v24 = vadd.f32 %v2127_v2, %v1370_v50  ;;  %v2206_v6 = vpop.f32.mrb[45].mxu0 }
 0x1a5   : > { %v2207_v11 = vadd.f32 %v2206_v6, %v2205_v10  ;;  %v2208_v2 = vpop.f32.mrb[46].mxu0 }
 0x1a6   : > { %v2147_v44 = vpop.f32.mrb[48].mxu1  ;;  %v1438_v59 = vadd.f32 %v2130_v1, %v1373_v54  ;;  %v2209_v12 = vpop.f32.mrb[47].mxu0 }
 0x1a7   : > { %v2148_v37 = vpop.f32.mrb[49].mxu1  ;;  %v2210_v21 = vadd.f32 %v2209_v12, %v2208_v2 }
 0x1a8   : > { %v2149_v33 = vadd.f32 %v2148_v37, %v2147_v44  ;;  %v2150_v52 = vpop.f32.mrb[50].mxu1 }
 0x1a9   : > { %v2151_v4 = vpop.f32.mrb[51].mxu1 }
 0x1aa   : > { %v1476_v5 = vadd.f32 %v2149_v33, %v1411_v45  ;;  %v2152_v7 = vadd.f32 %v2151_v4, %v2150_v52 }
 0x1ac   : > { %v1479_v38 = vadd.f32 %v2152_v7, %v1414_v51  ;;  %v1541_v57 = vadd.f32 %v2189_v17, %v1476_v5 }
 0x1ae   : > { %v2153_v60 = vpop.f32.mrb[52].mxu1  ;;  %v1544_v14 = vadd.f32 %v2192_v28, %v1479_v38 }
 0x1af   : > { %v2154_v15 = vpop.f32.mrb[53].mxu1 }
 0x1b0   : > { %v2155_v19 = vadd.f32 %v2154_v15, %v2153_v60  ;;  %v2156_v1 = vpop.f32.mrb[54].mxu1 }
 0x1b1   : > { %v2157_v8 = vpop.f32.mrb[55].mxu1 }
 0x1b2   : > { %v1484_v26 = vadd.f32 %v2155_v19, %v1419_v61  ;;  %v2158_v27 = vadd.f32 %v2157_v8, %v2156_v1 }
 0x1b4   : > { %v1487_v56 = vadd.f32 %v2158_v27, %v1422_v30  ;;  %v1549_v13 = vadd.f32 %v2195_v47, %v1484_v26 }
 0x1b6   : > { %v1552_v45 = vadd.f32 %v2198_v25, %v1487_v56  ;;  %v2159_v62 = vpop.f32.mrb[56].mxu1 }
 0x1b7   : > { %v2160_v51 = vpop.f32.mrb[57].mxu1 }
 0x1b8   : > { %v2161_v29 = vadd.f32 %v2160_v51, %v2159_v62  ;;  %v2162_v17 = vpop.f32.mrb[58].mxu1 }
 0x1b9   : > { %v2163_v18 = vpop.f32.mrb[59].mxu1 }
 0x1ba   : > { %v1492_v34 = vadd.f32 %v2161_v29, %v1427_v42  ;;  %v2164_v9 = vadd.f32 %v2163_v18, %v2162_v17 }
 0x1bb   : > { %v1670_v36 = vpop.f32.mrb[48].mxu0 }
 0x1bc   : > { %v1495_v35 = vadd.f32 %v2164_v9, %v1430_v0  ;;  %v3037_v28 = vadd.f32 %v2201_v58, %v1492_v34  ;;  %v1672_v61 = vpop.f32.mrb[49].mxu0 }
 0x1bd   : > { %v1673_v30 = vpop.f32.mrb[50].mxu0 }
 0x1be   : > { %v3039_v39 = vadd.f32 %v2204_v3, %v1495_v35  ;;  %v2165_v40 = vpop.f32.mrb[60].mxu1  ;;  %v1675_v47 = vpop.f32.mrb[51].mxu0 }
 0x1bf   : > { %v2166_v41 = vpop.f32.mrb[61].mxu1 }
 0x1c0   : > { %v2167_v43 = vadd.f32 %v2166_v41, %v2165_v40  ;;  %v2168_v20 = vpop.f32.mrb[62].mxu1 }
 0x1c1   : > { %v2169_v16 = vpop.f32.mrb[63].mxu1 }
 0x1c2   : > { %v1500_v48 = vadd.f32 %v2167_v43, %v1435_v24  ;;  %v2170_v22 = vadd.f32 %v2169_v16, %v2168_v20 }
 0x1c3   : > { %v1678_v0 = vpop.f32.mrb[52].mxu0 }
 0x1c4   : > { %v1503_v42 = vadd.f32 %v2170_v22, %v1438_v59  ;;  %v3041_v49 = vadd.f32 %v2207_v11, %v1500_v48  ;;  %v1680_v32 = vpop.f32.mrb[53].mxu0 }
 0x1c5   : > { %v1681_v53 = vpop.f32.mrb[54].mxu0 }
 0x1c6   : > { %v3044_v23 = vadd.f32 %v2210_v21, %v1503_v42  ;;  %v2227_v25 = vpop.f32.mrb[64].mxu1  ;;  %v1683_v55 = vpop.f32.mrb[55].mxu0 }
 0x1c7   : > { %v2228_v50 = vpop.f32.mrb[65].mxu1 }
 0x1c8   : > { %v2229_v54 = vadd.f32 %v2228_v50, %v2227_v25  ;;  %v2230_v31 = vpop.f32.mrb[66].mxu1 }
 0x1c9   : > { %v2231_v44 = vpop.f32.mrb[67].mxu1 }
 0x1ca   : > { %v2232_v58 = vadd.f32 %v2231_v44, %v2230_v31  ;;  %v1606_v46 = vadd.f32 %v2229_v54, %v1541_v57 }
 0x1cb   : > { %v1686_v37 = vpop.f32.mrb[56].mxu0 }
 0x1cc   : > { %v1671_v24 = vadd.f32 %v1670_v36, %v1606_v46  ;;  %v1609_v59 = vadd.f32 %v2232_v58, %v1544_v14  ;;  %v1688_v3 = vpop.f32.mrb[57].mxu0 }
 0x1cd   : > { %v1689_v5 = vpop.f32.mrb[58].mxu0 }
 0x1ce   : > { %v1701_v63 = vmax.f32 %v1671_v24, 0.0  ;;  %v1674_v33 = vadd.f32 %v1673_v30, %v1609_v59  ;;  %v2233_v52 = vpop.f32.mrb[68].mxu1  ;;  %v1691_v6 = vpop.f32.mrb[59].mxu0 }
 0x1cf   : > { %v2234_v4 = vpop.f32.mrb[69].mxu1 }
 0x1d0   : > { %v1923_v7 = vpack.c.bf16 %v1701_v63, %v1701_v63  ;;  %v1702_v38 = vmax.f32 %v1674_v33, 0.0  ;;  %v2235_v10 = vadd.f32 %v2234_v4, %v2233_v52  ;;  %v2236_v57 = vpop.f32.mrb[70].mxu1 }
 0x1d1   : > { %v2237_v60 = vpop.f32.mrb[71].mxu1 }
 0x1d2   : > { %1742 = vst.msk [vmem:[%s3050_s26] sm:$0xf] %vm1741_vm1, %v1923_v7  ;;  %v1924_v11 = vpack.c.bf16 %v1702_v38, %v1702_v38  ;;  %v2238_v2 = vadd.f32 %v2237_v60, %v2236_v57  ;;  %v1614_v14 = vadd.f32 %v2235_v10, %v1549_v13 }
 0x1d3   : > { %v1694_v19 = vpop.f32.mrb[60].mxu0 }
 0x1d4   : > { %1743 = vst.msk [vmem:[%s3050_s26 + $0x4] sm:$0xf] %vm1741_vm1, %v1924_v11  ;;  %v1679_v15 = vadd.f32 %v1678_v0, %v1614_v14  ;;  %v1617_v12 = vadd.f32 %v2238_v2, %v1552_v45  ;;  %v1696_v26 = vpop.f32.mrb[61].mxu0 }
 0x1d5   : > { %v1697_v56 = vpop.f32.mrb[62].mxu0 }
 0x1d6   : > { %v1703_v1 = vmax.f32 %v1679_v15, 0.0  ;;  %v1682_v21 = vadd.f32 %v1681_v53, %v1617_v12  ;;  %v2239_v8 = vpop.f32.mrb[72].mxu1  ;;  %v1699_v18 = vpop.f32.mrb[63].mxu0 }
 0x1d7   : > { %v2240_v27 = vpop.f32.mrb[73].mxu1 }
 0x1d8   : > { %v1925_v62 = vpack.c.bf16 %v1703_v1, %v1703_v1  ;;  %v1704_v51 = vmax.f32 %v1682_v21, 0.0  ;;  %v2241_v29 = vadd.f32 %v2240_v27, %v2239_v8  ;;  %v2242_v17 = vpop.f32.mrb[74].mxu1 }
 0x1d9   : > { %v2243_v34 = vpop.f32.mrb[75].mxu1 }
 0x1da   : > { %1744 = vst.msk [vmem:[%s3050_s26 + $0x8] sm:$0xf] %vm1741_vm1, %v1925_v62  ;;  %v1926_v13 = vpack.c.bf16 %v1704_v51, %v1704_v51  ;;  %v2244_v9 = vadd.f32 %v2243_v34, %v2242_v17  ;;  %v1622_v45 = vadd.f32 %v2241_v29, %v3037_v28 }
 0x1dc   : > { %1745 = vst.msk [vmem:[%s3050_s26 + $0xc] sm:$0xf] %vm1741_vm1, %v1926_v13  ;;  %v1687_v35 = vadd.f32 %v1686_v37, %v1622_v45  ;;  %v1625_v36 = vadd.f32 %v2244_v9, %v3039_v39 }
 0x1de   : > { %v1705_v40 = vmax.f32 %v1687_v35, 0.0  ;;  %v1690_v61 = vadd.f32 %v1689_v5, %v1625_v36  ;;  %v2245_v41 = vpop.f32.mrb[76].mxu1 }
 0x1df   : > { %v2246_v30 = vpop.f32.mrb[77].mxu1 }
 0x1e0   : > { %v1927_v43 = vpack.c.bf16 %v1705_v40, %v1705_v40  ;;  %v1706_v20 = vmax.f32 %v1690_v61, 0.0  ;;  %v2247_v47 = vadd.f32 %v2246_v30, %v2245_v41  ;;  %v2248_v16 = vpop.f32.mrb[78].mxu1 }
 0x1e1   : > { %v2249_v48 = vpop.f32.mrb[79].mxu1 }
 0x1e2   : > { %1746 = vst.msk [vmem:[%s3050_s26 + $0x10] sm:$0xf] %vm1741_vm1, %v1927_v43  ;;  %v1928_v28 = vpack.c.bf16 %v1706_v20, %v1706_v20  ;;  %v2250_v22 = vadd.f32 %v2249_v48, %v2248_v16  ;;  %v1630_v42 = vadd.f32 %v2247_v47, %v3041_v49 }
 0x1e4   : > { %1747 = vst.msk [vmem:[%s3050_s26 + $0x14] sm:$0xf] %vm1741_vm1, %v1928_v28  ;;  %v1695_v39 = vadd.f32 %v1694_v19, %v1630_v42  ;;  %v1633_v0 = vadd.f32 %v2250_v22, %v3044_v23 }
 0x1e6   : > { %v1707_v25 = vmax.f32 %v1695_v39, 0.0  ;;  %v1698_v32 = vadd.f32 %v1697_v56, %v1633_v0 }
 0x1e8   : > { %v1929_v50 = vpack.c.bf16 %v1707_v25, %v1707_v25  ;;  %v1708_v53 = vmax.f32 %v1698_v32, 0.0 }
 0x1ea   : > { %1748 = vst.msk [vmem:[%s3050_s26 + $0x18] sm:$0xf] %vm1741_vm1, %v1929_v50  ;;  %v1930_v54 = vpack.c.bf16 %v1708_v53, %v1708_v53 }
 0x1ec   : > { %1749 = vst.msk [vmem:[%s3050_s26 + $0x1c] sm:$0xf] %vm1741_vm1, %v1930_v54 }
 0x1ed PF: > { %p14_p8 = scmp.ge.s32.totalorder %s2588_s22, 4   ;;  %s3100_s12 = smov %s2507_s13 }
 0x1ee   : > { %s3101_s13 = smov %s2511_s14  ;;  %s3102_s14 = smov %s2614_s10 }
 0x1ef   : > { %s3103_s15 = smov %s2588_s22  ;;  %16 = sbr.rel (!%p14_p8) target bundleno = 4 (0x4), region = 76 }
 0x1f6   :  { %1771 = vsyncpa [#allocation3], 1 }
 0x1f7   :  { %1773 = vsyncpa [#allocation3 + $0x1], 1 }
 0x1f8   :  { %1774 = vsyncpa [#allocation5], 1 }

// kernel: trajectory_fcn.4
= control target key start
LH: loop header
LB: loop body
LE: loop exit
PB: predicated region body
PF: predicated region fallthrough
CT: control target
= control target key end

     0   :  { %8 = vsyncpa [#allocation3], 0  ;;  %s21012_s0 = inlined_call_operand.vmem [shape: bf16[2,7168], index: 0, kind: input, shape index: {}]   ;;  %s21013_s1 = inlined_call_operand.hbm [shape: bf16[7168,1024], index: 1, kind: input, shape index: {}]   ;;  %s21014_s2 = inlined_call_operand.hbm [shape: f32[1,1024], index: 2, kind: input, shape index: {}]   ;;  %s21015_s3 = inlined_call_operand.vmem [shape: bf16[2,1024], index: 3, kind: output, shape index: {}]  }
   0x1   :  { %10 = vsyncpa [#allocation3 + $0x1], 0 }
   0x2   :  { %11 = vsyncpa [#allocation5], 0 }
   0x3   :  { %13 = vsyncpa [#allocation5 + $0x1], 0  ;;  %s18743_s12 = smov 0   ;;  %s18745_s13 = smov 0  }
   0x4   :  { %s18747_s14 = smov 0   ;;  %s18749_s15 = smov 0  }
   0x5 LB: > { %s13835_s16 = sadd.s32 4294967295, %s18715_s15   ;;  %s18763_s17 = sadd.s32 1, %s18715_s15   ;;  %s18715_s15 = sphi %s18749_s15, %s21025_s15   ;;  %s18711_s14 = sphi %s18747_s14, %s21024_s14   ;;  %s18707_s13 = sphi %s18745_s13, %s21023_s13   ;;  %s18703_s12 = sphi %s18743_s12, %s21022_s12  }
   0x6   : > { %s44_s18 = ssub.s32 %s18715_s15, %s18763_s17  ;;  %s47_s19 = sadd.s32 1, %s18711_s14 }
   0x7   : > { %p45_p0 = scmp.eq.s32.totalorder %s44_s18, 0  ;;  %p54_p1 = scmp.ne.s32.totalorder %s18711_s14, %s18707_s13 }
   0x8   : > { %p55_p2 = scmp.eq.s32.totalorder %s18715_s15, 0  ;;  %p60_p3 = scmp.ne.s32.totalorder %s18707_s13, %s18703_s12 }
   0x9   : > { %s18773_s20 = scalar_select %p45_p0, %s18711_s14, %s47_s19  }
   0xa   : > { %p56_p4 = por %p55_p2, %p54_p1  ;;  %p61_p5 = scmp.eq.s32.totalorder %s13835_s16, 0 }
   0xb   : > { %p15879_p6 = scmp.lt.s32.totalorder %s18715_s15, 2  ;;  %s18783_s22 = sand.u32 1, %s18711_s14  }
   0xc   : > { %p18778_p7 = por %p61_p5, %p60_p3  ;;  %s15866_s23 = smul.u32 14336, %s18783_s22 }
   0xd   : > { %s15644_s24 = sshll.u32 %s18715_s15, 8  ;;  %p18787_p8 = pnand %p15879_p6, %p56_p4 }
   0xe   : > { %s21017_s21 = scalar_select %p18778_p7, 1, 0 }
   0xf   : > { %s18794_s28 = scalar_lea.hbm %s21013_s1, %s15644_s24  ;;  %s143_s29 = scalar_lea.vmem [#allocation2], %s15866_s23 }
  0x10   : > { %s150_s30 = sshll.u32 %s143_s29, 4  ;;  %s140_s4 = scalar_lea.sflag [#allocation3], %s18783_s22  ;;  %s18796_s30 = int_to_ptr.vmem [resolvable:$true] %s150_s30 }
  0x11   : > { %s18617_s5 = scalar_lea.hbm %s18794_s28, 229376  ;;  %p18619_p10 = pneg %p18787_p8 }
  0x12   : > { %p18618_p9 = scmp.ne.s32.totalorder %s18794_s28, %s18617_s5  ;;  %s18622_s8 = scalar_lea.hbm %s21013_s1, 458752 }
  0x13   : > { %p18623_p13 = scmp.lt.u32.totalorder %s18794_s28, %s21013_s1  ;;  %p18624_p0 = scmp.lt.u32.totalorder %s18622_s8, %s18617_s5 }
  0x14   : > { %p18620_p11 = pnand %p18619_p10, %p18618_p9  ;;  %p18626_p2 = scmp.lt.u32.totalorder %s18617_s5, %s18794_s28 }
  0x15   : > { %p18625_p1 = por %p18624_p0, %p18623_p13 }
  0x16   : > { %p18621_p12 = pneg %p18620_p11 }
  0x17   : > { %p18627_p3 = por %p18626_p2, %p18625_p1 }
  0x19   : > { %p18628_p4 = pnand %p18627_p3, %p18621_p12 }
  0x1b   : > { %18631 = shalt.err (!%p18628_p4)
}
  0x1c   : > { %s18632_s11 = scalar_lea.vmem %s18796_s30, 229376  ;;  %s18717_s12 = smov [#allocation2]  }
  0x1d   : > { %p18633_p5 = scmp.ne.s32.totalorder %s18796_s30, %s18632_s11  ;;  %s18637_s18 = sshll.u32 %s18717_s12, 4  ;;  %s18638_s18 = int_to_ptr.vmem [resolvable:$false] %s18637_s18 }
  0x1e   : > { %s18639_s19 = scalar_lea.vmem %s18638_s18, 458752  ;;  %p18640_p11 = scmp.lt.s32.totalorder %s18796_s30, %s18638_s18 }
  0x1f   : > { %p18635_p6 = pnand %p18633_p5, %p18619_p10  ;;  %p18641_p13 = scmp.lt.s32.totalorder %s18639_s19, %s18632_s11 }
  0x21   : > { %p18636_p9 = pneg %p18635_p6  ;;  %p18642_p0 = por %p18641_p13, %p18640_p11 }
  0x23   : > { %p18643_p1 = pnand %p18642_p0, %p18636_p9 }
  0x25   : > { %18646 = shalt.err (!%p18643_p1)
}
  0x26   : > { %s18718_s23 = smov 512   ;;  %s18719_s24 = smov 256  }
  0x27   : > { %s18720_s26 = smov 16   ;;  %p13844_p12 = scmp.ge.s32.totalorder %s18715_s15, 1 }
  0x28   : > { %15875 = dma.hbm_to_vmem [thread:$0]  (!%p18787_p8), %s18794_s28, 229376, %s18796_s30, %s140_s4, %s18718_s23, %s18719_s24, %s18720_s26  }
  0x29   : > { %p177_p2 = scmp.lt.s32.totalorder %s18715_s15, 3  ;;  %s13841_s27 = sshll.u32 %s18783_s22, 2 }
  0x2a   : > { %s15645_s5 = sshll.u32 %s18715_s15, 6  ;;  %s164_s6 = scalar_lea.vmem [#allocation4], %s13841_s27 }
  0x2b   : > { %p18829_p3 = pnand %p13844_p12, %p177_p2  ;;  %s172_s7 = sshll.u32 %s164_s6, 4  ;;  %s173_s7 = int_to_ptr.vmem [resolvable:$true] %s172_s7 }
  0x2c   : > { %s18837_s10 = scalar_lea.hbm %s21014_s2, %s15645_s5  ;;  %s161_s28 = scalar_lea.sflag [#allocation5], %s18783_s22 }
  0x2d   : > { %s21019_s29 = scalar_select %p18829_p3, 1, 0 }
  0x2e   : > { %s18647_s30 = scalar_lea.hbm %s18837_s10, 64  ;;  %s18652_s12 = scalar_lea.hbm %s21014_s2, 128 }
  0x2f   : > { %p18648_p4 = scmp.ne.s32.totalorder %s18837_s10, %s18647_s30  ;;  %p18653_p9 = scmp.lt.u32.totalorder %s18837_s10, %s21014_s2 }
  0x30   : > { %p18654_p11 = scmp.lt.u32.totalorder %s18652_s12, %s18647_s30  ;;  %p18656_p0 = scmp.lt.u32.totalorder %s18647_s30, %s18837_s10 }
  0x31   : > { %p18650_p5 = pnand %p18648_p4, %p18619_p10 }
  0x32   : > { %p18655_p13 = por %p18654_p11, %p18653_p9 }
  0x33   : > { %p18651_p6 = pneg %p18650_p5 }
  0x34   : > { %p18657_p1 = por %p18656_p0, %p18655_p13 }
  0x36   : > { %p18658_p12 = pnand %p18657_p1, %p18651_p6 }
  0x38   : > { %18661 = shalt.err (!%p18658_p12)
}
  0x39   : > { %s18662_s22 = scalar_lea.vmem %s173_s7, 64  ;;  %s18721_s23 = smov [#allocation4]  }
  0x3a   : > { %p18663_p2 = scmp.ne.s32.totalorder %s173_s7, %s18662_s22  ;;  %s18667_s24 = sshll.u32 %s18721_s23, 4  ;;  %s18668_s24 = int_to_ptr.vmem [resolvable:$false] %s18667_s24 }
  0x3b   : > { %s18669_s26 = scalar_lea.vmem %s18668_s24, 128  ;;  %p18670_p7 = scmp.lt.s32.totalorder %s173_s7, %s18668_s24 }
  0x3c   : > { %p18665_p4 = pnand %p18663_p2, %p18619_p10  ;;  %p18671_p3 = scmp.lt.s32.totalorder %s18669_s26, %s18662_s22 }
  0x3e   : > { %p18666_p5 = pneg %p18665_p4  ;;  %p18672_p9 = por %p18671_p3, %p18670_p7 }
  0x40   : > { %p18673_p11 = pnand %p18672_p9, %p18666_p5 }
  0x42   : > { %18676 = shalt.err (!%p18673_p11)
}
  0x43   : > { %15878 = dma.hbm_to_vmem [thread:$0]  (!%p18787_p8), %s18837_s10, 64, %s173_s7, %s161_s28  }
  0x44   : > { %p21020_p6 = scmp.ne.s32.totalorder %s21019_s29, 0 }
  0x45   : > { %s183_s27 = sand.u32 (!%p21020_p6), 1, %s18707_s13   ;;  %p21021_p10 = scmp.ne.s32.totalorder (!%p21020_p6), %s21017_s21, 0 }
  0x46   : > { %181 = sbr.rel (%p21020_p6) target bundleno = 2098 (0x832), region = 32  ;;  %s184_s6 = scalar_lea.sflag (!%p21020_p6), [#allocation3], %s183_s27 }
  0x47   : > { %s15867_s5 = smul.u32 (!%p21020_p6), 14336, %s183_s27 }
  0x49   : > { %s18862_s8 = scalar_lea.vmem (!%p21020_p6), [#allocation2], %s15867_s5 }
  0x4d   : > { %18694 = dma.done.wait (%p21021_p10), %s184_s6, 229376  }
  0x4e   : > { %18696 = vsyncadd (%p21021_p10), %s184_s6, 4294737920  ;;  %s13845_s9 = sshll.u32 %s183_s27, 2  ;;  %s193_s25 = scalar_lea.sflag [#allocation5], %s183_s27 }
  0x4f   : > { %s18868_s30 = scalar_lea.vmem [#allocation4], %s13845_s9 }
  0x50   : > { %18698 = dma.done.wait (%p21021_p10), %s193_s25, 64  }
  0x51   : > { %18700 = vsyncadd (%p21021_p10), %s193_s25, 4294967232  ;;  %v15916_v0 = vld [vmem:[%s18862_s8 + $0x4] ss:$16 sps:$4 sm:$0xff]   ;;  %v15918_v1 = vld [vmem:[%s18862_s8 + $0xc] ss:$16 sps:$4 sm:$0xff]   ;;  %v2031_v36 = vlaneseq }
  0x52   : > { %11417 = vmatprep.subr.bf16.mxu0 %v15916_v0  ;;  %v15920_v2 = vld [vmem:[%s18862_s8] ss:$16 sps:$4 sm:$0xff]   ;;  %v15921_v3 = vld [vmem:[%s18862_s8 + $0x8] ss:$16 sps:$4 sm:$0xff]   ;;  %12565 = vmatprep.subr.bf16.mxu1 %v15918_v1  ;;  %v15922_v4 = vld [vmem:[%s18862_s8 + $0x24] ss:$16 sps:$4 sm:$0xff]  }
  0x53   : > { %11418 = vmatpush1.bf16.msra.mxu0 %v15920_v2  ;;  %12566 = vmatpush1.bf16.msra.mxu1 %v15921_v3  ;;  %v15924_v5 = vld [vmem:[%s18862_s8 + $0x2c] ss:$16 sps:$4 sm:$0xff]   ;;  %v15926_v6 = vld [vmem:[%s18862_s8 + $0x20] ss:$16 sps:$4 sm:$0xff]   ;;  %v15927_v7 = vld [vmem:[%s18862_s8 + $0x28] ss:$16 sps:$4 sm:$0xff]  }
  0x54   : > { %11419 = vmatprep.subr.bf16.mxu0 %v15922_v4  ;;  %12567 = vmatprep.subr.bf16.mxu1 %v15924_v5  ;;  %v15928_v8 = vld [vmem:[%s18862_s8 + $0x44] ss:$16 sps:$4 sm:$0xff]   ;;  %v15930_v9 = vld [vmem:[%s18862_s8 + $0x4c] ss:$16 sps:$4 sm:$0xff]   ;;  %v15932_v10 = vld [vmem:[%s18862_s8 + $0x40] ss:$16 sps:$4 sm:$0xff]  }
  0x55   : > { %v15933_v11 = vld [vmem:[%s18862_s8 + $0x48] ss:$16 sps:$4 sm:$0xff]   ;;  %v15934_v12 = vld [vmem:[%s18862_s8 + $0x64] ss:$16 sps:$4 sm:$0xff]   ;;  %v15936_v13 = vld [vmem:[%s18862_s8 + $0x6c] ss:$16 sps:$4 sm:$0xff]  }
  0x56   : > { %v15938_v14 = vld [vmem:[%s18862_s8 + $0x60] ss:$16 sps:$4 sm:$0xff]   ;;  %v15939_v15 = vld [vmem:[%s18862_s8 + $0x68] ss:$16 sps:$4 sm:$0xff]   ;;  %v15940_v16 = vld [vmem:[%s18862_s8 + $0x84] ss:$16 sps:$4 sm:$0xff]  }
  0x57   : > { %11420 = vmatpush1.bf16.msra.mxu0 %v15926_v6  ;;  %12568 = vmatpush1.bf16.msra.mxu1 %v15927_v7  ;;  %v15942_v17 = vld [vmem:[%s18862_s8 + $0x8c] ss:$16 sps:$4 sm:$0xff]   ;;  %v15944_v18 = vld [vmem:[%s18862_s8 + $0x80] ss:$16 sps:$4 sm:$0xff]   ;;  %v15945_v19 = vld [vmem:[%s18862_s8 + $0x88] ss:$16 sps:$4 sm:$0xff]  }
  0x58   : > { %11421 = vmatprep.subr.bf16.mxu0 %v15928_v8  ;;  %12569 = vmatprep.subr.bf16.mxu1 %v15930_v9  ;;  %v15946_v20 = vld [vmem:[%s18862_s8 + $0xa4] ss:$16 sps:$4 sm:$0xff]   ;;  %v15948_v21 = vld [vmem:[%s18862_s8 + $0xac] ss:$16 sps:$4 sm:$0xff]   ;;  %v15950_v22 = vld [vmem:[%s18862_s8 + $0xa0] ss:$16 sps:$4 sm:$0xff]  }
  0x59   : > { %v15951_v23 = vld [vmem:[%s18862_s8 + $0xa8] ss:$16 sps:$4 sm:$0xff]   ;;  %v15952_v24 = vld [vmem:[%s18862_s8 + $0xc4] ss:$16 sps:$4 sm:$0xff]   ;;  %v15954_v25 = vld [vmem:[%s18862_s8 + $0xcc] ss:$16 sps:$4 sm:$0xff]  }
  0x5a   : > { %v15956_v26 = vld [vmem:[%s18862_s8 + $0xc0] ss:$16 sps:$4 sm:$0xff]   ;;  %v15957_v27 = vld [vmem:[%s18862_s8 + $0xc8] ss:$16 sps:$4 sm:$0xff]   ;;  %v15958_v28 = vld [vmem:[%s18862_s8 + $0xe4] ss:$16 sps:$4 sm:$0xff]  }
  0x5b   : > { %11422 = vmatpush1.bf16.msra.mxu0 %v15932_v10  ;;  %12570 = vmatpush1.bf16.msra.mxu1 %v15933_v11  ;;  %v15960_v29 = vld [vmem:[%s18862_s8 + $0xec] ss:$16 sps:$4 sm:$0xff]   ;;  %v15962_v30 = vld [vmem:[%s18862_s8 + $0xe0] ss:$16 sps:$4 sm:$0xff]   ;;  %v15963_v31 = vld [vmem:[%s18862_s8 + $0xe8] ss:$16 sps:$4 sm:$0xff]  }
  0x5c   : > { %11423 = vmatprep.subr.bf16.mxu0 %v15934_v12  ;;  %12571 = vmatprep.subr.bf16.mxu1 %v15936_v13  ;;  %v15964_v32 = vld [vmem:[%s18862_s8 + $0x104] ss:$16 sps:$4 sm:$0xff]   ;;  %v15966_v33 = vld [vmem:[%s18862_s8 + $0x10c] ss:$16 sps:$4 sm:$0xff]   ;;  %v15968_v34 = vld [vmem:[%s18862_s8 + $0x100] ss:$16 sps:$4 sm:$0xff]  }
  0x5d   : > { %v15969_v35 = vld [vmem:[%s18862_s8 + $0x108] ss:$16 sps:$4 sm:$0xff]   ;;  %v18722_v37 = vmov 1966171168   ;;  %v15970_v39 = vld [vmem:[%s18862_s8 + $0x124] ss:$16 sps:$4 sm:$0xff]  }
  0x5e   : > { %v2060_v38 = vunpack.c.l.s4 %v18722_v37  ;;  %v15972_v40 = vld [vmem:[%s18862_s8 + $0x12c] ss:$16 sps:$4 sm:$0xff]   ;;  %v15974_v41 = vld [vmem:[%s18862_s8 + $0x120] ss:$16 sps:$4 sm:$0xff]   ;;  %v18913_v42 = vshrl.u32 %v2031_v36, 7 }
  0x5f   : > { %11424 = vmatpush1.bf16.msra.mxu0 %v15938_v14  ;;  %12572 = vmatpush1.bf16.msra.mxu1 %v15939_v15  ;;  %v15975_v44 = vld [vmem:[%s18862_s8 + $0x128] ss:$16 sps:$4 sm:$0xff]   ;;  %v15976_v45 = vld [vmem:[%s18862_s8 + $0x144] ss:$16 sps:$4 sm:$0xff]   ;;  %v15978_v46 = vld [vmem:[%s18862_s8 + $0x14c] ss:$16 sps:$4 sm:$0xff]  }
  0x60   : > { %11425 = vmatprep.subr.bf16.mxu0 %v15940_v16  ;;  %12573 = vmatprep.subr.bf16.mxu1 %v15942_v17  ;;  %v2061_v43 = vunpack.c.0.s8 %v2060_v38  ;;  %v15980_v47 = vld [vmem:[%s18862_s8 + $0x140] ss:$16 sps:$4 sm:$0xff]   ;;  %v15981_v48 = vld [vmem:[%s18862_s8 + $0x148] ss:$16 sps:$4 sm:$0xff]   ;;  %v15982_v50 = vld [vmem:[%s18862_s8 + $0x164] ss:$16 sps:$4 sm:$0xff]  }
  0x61   : > { %v15984_v51 = vld [vmem:[%s18862_s8 + $0x16c] ss:$16 sps:$4 sm:$0xff]   ;;  %v18928_v52 = vld [vmem:[%s21012_s0] sm:$0xff]  ;;  %v15987_v55 = vld [vmem:[%s18862_s8 + $0x168] ss:$16 sps:$4 sm:$0xff]  }
  0x62   : > { %v18921_v49 = vsub.s32 %v2061_v43, %v18913_v42  ;;  %v15986_v53 = vld [vmem:[%s18862_s8 + $0x160] ss:$16 sps:$4 sm:$0xff]   ;;  %v15988_v56 = vld [vmem:[%s18862_s8 + $0x184] ss:$16 sps:$4 sm:$0xff]   ;;  %v15990_v57 = vld [vmem:[%s18862_s8 + $0x18c] ss:$16 sps:$4 sm:$0xff]  }
  0x63   : > { %11426 = vmatpush1.bf16.msra.mxu0 %v15944_v18  ;;  %12574 = vmatpush1.bf16.msra.mxu1 %v15945_v19  ;;  %v15992_v59 = vld [vmem:[%s18862_s8 + $0x180] ss:$16 sps:$4 sm:$0xff]   ;;  %v15993_v61 = vld [vmem:[%s18862_s8 + $0x188] ss:$16 sps:$4 sm:$0xff]   ;;  %v15994_v62 = vld [vmem:[%s18862_s8 + $0x1a4] ss:$16 sps:$4 sm:$0xff]  }
  0x64   : > { %11427 = vmatprep.subr.bf16.mxu0 %v15946_v20  ;;  %12575 = vmatprep.subr.bf16.mxu1 %v15948_v21  ;;  %v2065_v54 = vrot.slane %v18928_v52, %v18921_v49  ;;  %v15996_v63 = vld [vmem:[%s18862_s8 + $0x1ac] ss:$16 sps:$4 sm:$0xff]   ;;  %v15998_v0 = vld [vmem:[%s18862_s8 + $0x1a0] ss:$16 sps:$4 sm:$0xff]   ;;  %v15999_v1 = vld [vmem:[%s18862_s8 + $0x1a8] ss:$16 sps:$4 sm:$0xff]  }
  0x65   : > { %v16000_v2 = vld [vmem:[%s18862_s8 + $0x1c4] ss:$16 sps:$4 sm:$0xff]   ;;  %v16002_v3 = vld [vmem:[%s18862_s8 + $0x1cc] ss:$16 sps:$4 sm:$0xff]   ;;  %v16004_v4 = vld [vmem:[%s18862_s8 + $0x1c0] ss:$16 sps:$4 sm:$0xff]  }
  0x66   : > { %v2073_v58 = vcombine.high %v2065_v54, %v2065_v54  ;;  %v16005_v5 = vld [vmem:[%s18862_s8 + $0x1c8] ss:$16 sps:$4 sm:$0xff]   ;;  %v16006_v6 = vld [vmem:[%s18862_s8 + $0x1e4] ss:$16 sps:$4 sm:$0xff]   ;;  %v16008_v7 = vld [vmem:[%s18862_s8 + $0x1ec] ss:$16 sps:$4 sm:$0xff]   ;;  %v18955_v13 = vrot.slane %v2065_v54, %v18921_v49 }
  0x67   : > { %11428 = vmatpush1.bf16.msra.mxu0 %v15950_v22  ;;  %12576 = vmatpush1.bf16.msra.mxu1 %v15951_v23  ;;  %v16010_v8 = vld [vmem:[%s18862_s8 + $0x1e0] ss:$16 sps:$4 sm:$0xff]   ;;  %v16011_v9 = vld [vmem:[%s18862_s8 + $0x1e8] ss:$16 sps:$4 sm:$0xff]   ;;  %v16014_v10 = vld [vmem:[%s18862_s8 + $0x204] ss:$16 sps:$4 sm:$0xff]  }
  0x68   : > { %11429 = vmatprep.subr.bf16.mxu0 %v15952_v24  ;;  %12577 = vmatprep.subr.bf16.mxu1 %v15954_v25  ;;  %v2095_v60 = vrot.slane %v2073_v58, %v18921_v49  ;;  %v16017_v11 = vld [vmem:[%s18862_s8 + $0x20c] ss:$16 sps:$4 sm:$0xff]   ;;  %v16012_v12 = vld [vmem:[%s18862_s8 + $0x200] ss:$16 sps:$4 sm:$0xff]   ;;  %v16015_v14 = vld [vmem:[%s18862_s8 + $0x208] ss:$16 sps:$4 sm:$0xff]  }
  0x69   : > { %v16020_v15 = vld [vmem:[%s18862_s8 + $0x224] ss:$16 sps:$4 sm:$0xff]   ;;  %v16023_v16 = vld [vmem:[%s18862_s8 + $0x22c] ss:$16 sps:$4 sm:$0xff]   ;;  %v16018_v18 = vld [vmem:[%s18862_s8 + $0x220] ss:$16 sps:$4 sm:$0xff]  }
  0x6a   : > { %11449 = vmatprep.mubr.bf16.mxu0 %v2095_v60  ;;  %12597 = vmatprep.mubr.bf16.mxu1 %v2095_v60  ;;  %v2105_v17 = vcombine.high %v2095_v60, %v2095_v60  ;;  %v16021_v19 = vld [vmem:[%s18862_s8 + $0x228] ss:$16 sps:$4 sm:$0xff]   ;;  %v16026_v20 = vld [vmem:[%s18862_s8 + $0x244] ss:$16 sps:$4 sm:$0xff]   ;;  %v16029_v21 = vld [vmem:[%s18862_s8 + $0x24c] ss:$16 sps:$4 sm:$0xff]  }
  0x6b   : > { %11430 = vmatpush1.bf16.msra.mxu0 %v15956_v26  ;;  %12578 = vmatpush1.bf16.msra.mxu1 %v15957_v27  ;;  %v16024_v22 = vld [vmem:[%s18862_s8 + $0x240] ss:$16 sps:$4 sm:$0xff]   ;;  %v16027_v23 = vld [vmem:[%s18862_s8 + $0x248] ss:$16 sps:$4 sm:$0xff]   ;;  %v16032_v24 = vld [vmem:[%s18862_s8 + $0x264] ss:$16 sps:$4 sm:$0xff]  }
  0x6c   : > { %11431 = vmatprep.subr.bf16.mxu0 %v15958_v28  ;;  %12579 = vmatprep.subr.bf16.mxu1 %v15960_v29  ;;  %v16035_v25 = vld [vmem:[%s18862_s8 + $0x26c] ss:$16 sps:$4 sm:$0xff]   ;;  %v16030_v26 = vld [vmem:[%s18862_s8 + $0x260] ss:$16 sps:$4 sm:$0xff]   ;;  %v16033_v27 = vld [vmem:[%s18862_s8 + $0x268] ss:$16 sps:$4 sm:$0xff]  }
  0x6d   : > { %v16038_v28 = vld [vmem:[%s18862_s8 + $0x284] ss:$16 sps:$4 sm:$0xff]   ;;  %v16041_v29 = vld [vmem:[%s18862_s8 + $0x28c] ss:$16 sps:$4 sm:$0xff]   ;;  %v16048_v38 = vld [vmem:[%s18862_s8 + $0x2c0] ss:$16 sps:$4 sm:$0xff]  }
  0x6e   : > { %v16050_v36 = vld [vmem:[%s18862_s8 + $0x2c4] ss:$16 sps:$4 sm:$0xff]   ;;  %v16053_v37 = vld [vmem:[%s18862_s8 + $0x2cc] ss:$16 sps:$4 sm:$0xff]   ;;  %v16054_v43 = vld [vmem:[%s18862_s8 + $0x2e0] ss:$16 sps:$4 sm:$0xff]  }
  0x6f   : > { %11432 = vmatpush1.bf16.msra.mxu0 %v15962_v30  ;;  %12580 = vmatpush1.bf16.msra.mxu1 %v15963_v31  ;;  %v16036_v30 = vld [vmem:[%s18862_s8 + $0x280] ss:$16 sps:$4 sm:$0xff]   ;;  %v16039_v31 = vld [vmem:[%s18862_s8 + $0x288] ss:$16 sps:$4 sm:$0xff]   ;;  %v16083_v60 = vld [vmem:[%s18862_s8 + $0x36c] ss:$16 sps:$4 sm:$0xff]  }
  0x70   : > { %11433 = vmatprep.subr.bf16.mxu0 %v15964_v32  ;;  %12581 = vmatprep.subr.bf16.mxu1 %v15966_v33  ;;  %v16044_v32 = vld [vmem:[%s18862_s8 + $0x2a4] ss:$16 sps:$4 sm:$0xff]   ;;  %v16047_v33 = vld [vmem:[%s18862_s8 + $0x2ac] ss:$16 sps:$4 sm:$0xff]   ;;  %v16069_v54 = vld [vmem:[%s18862_s8 + $0x328] ss:$16 sps:$4 sm:$0xff]  }
  0x71   : > { %v16075_v58 = vld [vmem:[%s18862_s8 + $0x348] ss:$16 sps:$4 sm:$0xff]  }
  0x73   : > { %11434 = vmatpush1.bf16.msra.mxu0 %v15968_v34  ;;  %12582 = vmatpush1.bf16.msra.mxu1 %v15969_v35  ;;  %v16042_v34 = vld [vmem:[%s18862_s8 + $0x2a0] ss:$16 sps:$4 sm:$0xff]   ;;  %v16045_v35 = vld [vmem:[%s18862_s8 + $0x2a8] ss:$16 sps:$4 sm:$0xff]  }
  0x74   : > { %11435 = vmatprep.subr.bf16.mxu0 %v15970_v39  ;;  %12583 = vmatprep.subr.bf16.mxu1 %v15972_v40  ;;  %v16051_v39 = vld [vmem:[%s18862_s8 + $0x2c8] ss:$16 sps:$4 sm:$0xff]   ;;  %v16056_v40 = vld [vmem:[%s18862_s8 + $0x2e4] ss:$16 sps:$4 sm:$0xff]  }
  0x77   : > { %11436 = vmatpush1.bf16.msra.mxu0 %v15974_v41  ;;  %12584 = vmatpush1.bf16.msra.mxu1 %v15975_v44  ;;  %v16059_v41 = vld [vmem:[%s18862_s8 + $0x2ec] ss:$16 sps:$4 sm:$0xff]   ;;  %v16057_v44 = vld [vmem:[%s18862_s8 + $0x2e8] ss:$16 sps:$4 sm:$0xff]  }
  0x78   : > { %11437 = vmatprep.subr.bf16.mxu0 %v15976_v45  ;;  %12585 = vmatprep.subr.bf16.mxu1 %v15978_v46  ;;  %v16062_v45 = vld [vmem:[%s18862_s8 + $0x304] ss:$16 sps:$4 sm:$0xff]   ;;  %v16065_v46 = vld [vmem:[%s18862_s8 + $0x30c] ss:$16 sps:$4 sm:$0xff]  }
  0x7b   : > { %11438 = vmatpush1.bf16.msra.mxu0 %v15980_v47  ;;  %12586 = vmatpush1.bf16.msra.mxu1 %v15981_v48  ;;  %v16060_v47 = vld [vmem:[%s18862_s8 + $0x300] ss:$16 sps:$4 sm:$0xff]   ;;  %v16063_v48 = vld [vmem:[%s18862_s8 + $0x308] ss:$16 sps:$4 sm:$0xff]  }
  0x7c   : > { %11439 = vmatprep.subr.bf16.mxu0 %v15982_v50  ;;  %12587 = vmatprep.subr.bf16.mxu1 %v15984_v51  ;;  %v16068_v50 = vld [vmem:[%s18862_s8 + $0x324] ss:$16 sps:$4 sm:$0xff]   ;;  %v16071_v51 = vld [vmem:[%s18862_s8 + $0x32c] ss:$16 sps:$4 sm:$0xff]  }
  0x7f   : > { %11440 = vmatpush1.bf16.msra.mxu0 %v15986_v53  ;;  %12588 = vmatpush1.bf16.msra.mxu1 %v15987_v55  ;;  %v16066_v53 = vld [vmem:[%s18862_s8 + $0x320] ss:$16 sps:$4 sm:$0xff]   ;;  %v16074_v55 = vld [vmem:[%s18862_s8 + $0x344] ss:$16 sps:$4 sm:$0xff]  }
  0x80   : > { %11441 = vmatprep.subr.bf16.mxu0 %v15988_v56  ;;  %12589 = vmatprep.subr.bf16.mxu1 %v15990_v57  ;;  %v16077_v56 = vld [vmem:[%s18862_s8 + $0x34c] ss:$16 sps:$4 sm:$0xff]   ;;  %v16072_v57 = vld [vmem:[%s18862_s8 + $0x340] ss:$16 sps:$4 sm:$0xff]  }
  0x83   : > { %11442 = vmatpush1.bf16.msra.mxu0 %v15992_v59  ;;  %12590 = vmatpush1.bf16.msra.mxu1 %v15993_v61  ;;  %v16080_v59 = vld [vmem:[%s18862_s8 + $0x364] ss:$16 sps:$4 sm:$0xff]   ;;  %v16078_v61 = vld [vmem:[%s18862_s8 + $0x360] ss:$16 sps:$4 sm:$0xff]  }
  0x84   : > { %11443 = vmatprep.subr.bf16.mxu0 %v15994_v62  ;;  %12591 = vmatprep.subr.bf16.mxu1 %v15996_v63  ;;  %v16081_v62 = vld [vmem:[%s18862_s8 + $0x368] ss:$16 sps:$4 sm:$0xff]   ;;  %v16086_v63 = vld [vmem:[%s18862_s8 + $0x384] ss:$16 sps:$4 sm:$0xff]  }
  0x87   : > { %11444 = vmatpush1.bf16.msra.mxu0 %v15998_v0  ;;  %12592 = vmatpush1.bf16.msra.mxu1 %v15999_v1  ;;  %v16089_v0 = vld [vmem:[%s18862_s8 + $0x38c] ss:$16 sps:$4 sm:$0xff]   ;;  %v16084_v1 = vld [vmem:[%s18862_s8 + $0x380] ss:$16 sps:$4 sm:$0xff]  }
  0x88   : > { %11445 = vmatprep.subr.bf16.mxu0 %v16000_v2  ;;  %12593 = vmatprep.subr.bf16.mxu1 %v16002_v3  ;;  %v16087_v2 = vld [vmem:[%s18862_s8 + $0x388] ss:$16 sps:$4 sm:$0xff]   ;;  %v16092_v3 = vld [vmem:[%s18862_s8 + $0x3a4] ss:$16 sps:$4 sm:$0xff]  }
  0x8b   : > { %11446 = vmatpush1.bf16.msra.mxu0 %v16004_v4  ;;  %12594 = vmatpush1.bf16.msra.mxu1 %v16005_v5  ;;  %v16095_v4 = vld [vmem:[%s18862_s8 + $0x3ac] ss:$16 sps:$4 sm:$0xff]   ;;  %v16090_v5 = vld [vmem:[%s18862_s8 + $0x3a0] ss:$16 sps:$4 sm:$0xff]  }
  0x8c   : > { %11447 = vmatprep.subr.bf16.mxu0 %v16006_v6  ;;  %12595 = vmatprep.subr.bf16.mxu1 %v16008_v7  ;;  %v16093_v6 = vld [vmem:[%s18862_s8 + $0x3a8] ss:$16 sps:$4 sm:$0xff]   ;;  %v16098_v7 = vld [vmem:[%s18862_s8 + $0x3c4] ss:$16 sps:$4 sm:$0xff]  }
  0x8f   : > { %11448 = vmatpush1.bf16.msra.mxu0 %v16010_v8  ;;  %12596 = vmatpush1.bf16.msra.mxu1 %v16011_v9  ;;  %v16101_v8 = vld [vmem:[%s18862_s8 + $0x3cc] ss:$16 sps:$4 sm:$0xff]   ;;  %v2058_v9 = vcombine.high %v18928_v52, %v18928_v52  ;;  %v16105_v52 = vld [vmem:[%s18862_s8 + $0x3e8] ss:$16 sps:$4 sm:$0xff]  }
  0x90   : > { %11458 = vmatprep.subr.bf16.mxu0 %v16014_v10  ;;  %12606 = vmatprep.subr.bf16.mxu1 %v16017_v11  ;;  %v16096_v10 = vld [vmem:[%s18862_s8 + $0x3c0] ss:$16 sps:$4 sm:$0xff]   ;;  %v16099_v11 = vld [vmem:[%s18862_s8 + $0x3c8] ss:$16 sps:$4 sm:$0xff]  }
  0x92   : > { %11450 = vmatmul.mubr.bf16.vlgmr.msra.gmra.mrb[0].mxu0 %v18955_v13  ;;  %12598 = vmatmul.mubr.bf16.vlgmr.msra.gmra.mrb[0].mxu1 %v18955_v13 }
  0x93   : > { %11459 = vmatpush1.bf16.msra.mxu0 %v16012_v12  ;;  %12607 = vmatpush1.bf16.msra.mxu1 %v16015_v14  ;;  %v16104_v12 = vld [vmem:[%s18862_s8 + $0x3e4] ss:$16 sps:$4 sm:$0xff]   ;;  %v16107_v14 = vld [vmem:[%s18862_s8 + $0x3ec] ss:$16 sps:$4 sm:$0xff]  }
  0x94   : > { %11460 = vmatprep.subr.bf16.mxu0 %v16020_v15  ;;  %12608 = vmatprep.subr.bf16.mxu1 %v16023_v16  ;;  %v19021_v15 = vrot.slane %v2058_v9, %v18921_v49  ;;  %v16102_v16 = vld [vmem:[%s18862_s8 + $0x3e0] ss:$16 sps:$4 sm:$0xff]   ;;  %v16183_v9 = vld [vmem:[%s18862_s8 + $0x588] ss:$16 sps:$4 sm:$0xff]  }
  0x95   : > { %11490 = vmatprep.mubr.bf16.mxu0 %v2105_v17  ;;  %12638 = vmatprep.mubr.bf16.mxu1 %v2105_v17  ;;  %v16110_v17 = vld [vmem:[%s18862_s8 + $0x404] ss:$16 sps:$4 sm:$0xff]  }
  0x97   : > { %11461 = vmatpush1.bf16.msra.mxu0 %v16018_v18  ;;  %12609 = vmatpush1.bf16.msra.mxu1 %v16021_v19  ;;  %v16113_v18 = vld [vmem:[%s18862_s8 + $0x40c] ss:$16 sps:$4 sm:$0xff]   ;;  %v2074_v19 = vcombine.high %v19021_v15, %v19021_v15 }
  0x98   : > { %11462 = vmatprep.subr.bf16.mxu0 %v16026_v20  ;;  %12610 = vmatprep.subr.bf16.mxu1 %v16029_v21  ;;  %v16108_v20 = vld [vmem:[%s18862_s8 + $0x400] ss:$16 sps:$4 sm:$0xff]   ;;  %v2103_v21 = vcombine.high %v18955_v13, %v18955_v13  ;;  %v16117_v13 = vld [vmem:[%s18862_s8 + $0x428] ss:$16 sps:$4 sm:$0xff]  }
  0x9b   : > { %11463 = vmatpush1.bf16.msra.mxu0 %v16024_v22  ;;  %12611 = vmatpush1.bf16.msra.mxu1 %v16027_v23  ;;  %v16111_v22 = vld [vmem:[%s18862_s8 + $0x408] ss:$16 sps:$4 sm:$0xff]   ;;  %v16116_v23 = vld [vmem:[%s18862_s8 + $0x424] ss:$16 sps:$4 sm:$0xff]  }
  0x9c   : > { %11464 = vmatprep.subr.bf16.mxu0 %v16032_v24  ;;  %12612 = vmatprep.subr.bf16.mxu1 %v16035_v25  ;;  %v16119_v24 = vld [vmem:[%s18862_s8 + $0x42c] ss:$16 sps:$4 sm:$0xff]   ;;  %v19036_v25 = vrot.slane %v2074_v19, %v18921_v49  ;;  %v16200_v19 = vld [vmem:[%s18862_s8 + $0x5e4] ss:$16 sps:$4 sm:$0xff]  }
  0x9f   : > { %11465 = vmatpush1.bf16.msra.mxu0 %v16030_v26  ;;  %12613 = vmatpush1.bf16.msra.mxu1 %v16033_v27  ;;  %v16114_v26 = vld [vmem:[%s18862_s8 + $0x420] ss:$16 sps:$4 sm:$0xff]   ;;  %v16122_v27 = vld [vmem:[%s18862_s8 + $0x444] ss:$16 sps:$4 sm:$0xff]  }
  0xa0   : > { %11466 = vmatprep.subr.bf16.mxu0 %v16038_v28  ;;  %12614 = vmatprep.subr.bf16.mxu1 %v16041_v29  ;;  %v16125_v28 = vld [vmem:[%s18862_s8 + $0x44c] ss:$16 sps:$4 sm:$0xff]   ;;  %v16120_v29 = vld [vmem:[%s18862_s8 + $0x440] ss:$16 sps:$4 sm:$0xff]  }
  0xa3   : > { %11467 = vmatpush1.bf16.msra.mxu0 %v16036_v30  ;;  %12615 = vmatpush1.bf16.msra.mxu1 %v16039_v31  ;;  %v16123_v30 = vld [vmem:[%s18862_s8 + $0x448] ss:$16 sps:$4 sm:$0xff]   ;;  %v16128_v31 = vld [vmem:[%s18862_s8 + $0x464] ss:$16 sps:$4 sm:$0xff]  }
  0xa4   : > { %11468 = vmatprep.subr.bf16.mxu0 %v16044_v32  ;;  %12616 = vmatprep.subr.bf16.mxu1 %v16047_v33  ;;  %v16131_v32 = vld [vmem:[%s18862_s8 + $0x46c] ss:$16 sps:$4 sm:$0xff]   ;;  %v16126_v33 = vld [vmem:[%s18862_s8 + $0x460] ss:$16 sps:$4 sm:$0xff]  }
  0xa7   : > { %11469 = vmatpush1.bf16.msra.mxu0 %v16042_v34  ;;  %12617 = vmatpush1.bf16.msra.mxu1 %v16045_v35  ;;  %v16129_v34 = vld [vmem:[%s18862_s8 + $0x468] ss:$16 sps:$4 sm:$0xff]   ;;  %v16134_v35 = vld [vmem:[%s18862_s8 + $0x484] ss:$16 sps:$4 sm:$0xff]  }
  0xa8   : > { %11470 = vmatprep.subr.bf16.mxu0 %v16050_v36  ;;  %12618 = vmatprep.subr.bf16.mxu1 %v16053_v37  ;;  %v16137_v36 = vld [vmem:[%s18862_s8 + $0x48c] ss:$16 sps:$4 sm:$0xff]   ;;  %v16132_v37 = vld [vmem:[%s18862_s8 + $0x480] ss:$16 sps:$4 sm:$0xff]  }
  0xab   : > { %11471 = vmatpush1.bf16.msra.mxu0 %v16048_v38  ;;  %12619 = vmatpush1.bf16.msra.mxu1 %v16051_v39  ;;  %v16135_v38 = vld [vmem:[%s18862_s8 + $0x488] ss:$16 sps:$4 sm:$0xff]   ;;  %v16140_v39 = vld [vmem:[%s18862_s8 + $0x4a4] ss:$16 sps:$4 sm:$0xff]  }
  0xac   : > { %11472 = vmatprep.subr.bf16.mxu0 %v16056_v40  ;;  %12620 = vmatprep.subr.bf16.mxu1 %v16059_v41  ;;  %v16143_v40 = vld [vmem:[%s18862_s8 + $0x4ac] ss:$16 sps:$4 sm:$0xff]   ;;  %v16138_v41 = vld [vmem:[%s18862_s8 + $0x4a0] ss:$16 sps:$4 sm:$0xff]  }
  0xaf   : > { %11473 = vmatpush1.bf16.msra.mxu0 %v16054_v43  ;;  %12621 = vmatpush1.bf16.msra.mxu1 %v16057_v44  ;;  %v16141_v43 = vld [vmem:[%s18862_s8 + $0x4a8] ss:$16 sps:$4 sm:$0xff]   ;;  %v16146_v44 = vld [vmem:[%s18862_s8 + $0x4c4] ss:$16 sps:$4 sm:$0xff]  }
  0xb0   : > { %11474 = vmatprep.subr.bf16.mxu0 %v16062_v45  ;;  %12622 = vmatprep.subr.bf16.mxu1 %v16065_v46  ;;  %v16149_v45 = vld [vmem:[%s18862_s8 + $0x4cc] ss:$16 sps:$4 sm:$0xff]   ;;  %v16144_v46 = vld [vmem:[%s18862_s8 + $0x4c0] ss:$16 sps:$4 sm:$0xff]  }
  0xb3   : > { %11475 = vmatpush1.bf16.msra.mxu0 %v16060_v47  ;;  %12623 = vmatpush1.bf16.msra.mxu1 %v16063_v48  ;;  %v16147_v47 = vld [vmem:[%s18862_s8 + $0x4c8] ss:$16 sps:$4 sm:$0xff]   ;;  %v16152_v48 = vld [vmem:[%s18862_s8 + $0x4e4] ss:$16 sps:$4 sm:$0xff]  }
  0xb4   : > { %11476 = vmatprep.subr.bf16.mxu0 %v16068_v50  ;;  %12624 = vmatprep.subr.bf16.mxu1 %v16071_v51  ;;  %v16155_v50 = vld [vmem:[%s18862_s8 + $0x4ec] ss:$16 sps:$4 sm:$0xff]   ;;  %v16150_v51 = vld [vmem:[%s18862_s8 + $0x4e0] ss:$16 sps:$4 sm:$0xff]  }
  0xb7   : > { %11477 = vmatpush1.bf16.msra.mxu0 %v16066_v53  ;;  %12625 = vmatpush1.bf16.msra.mxu1 %v16069_v54  ;;  %v16153_v53 = vld [vmem:[%s18862_s8 + $0x4e8] ss:$16 sps:$4 sm:$0xff]   ;;  %v16158_v54 = vld [vmem:[%s18862_s8 + $0x504] ss:$16 sps:$4 sm:$0xff]  }
  0xb8   : > { %11478 = vmatprep.subr.bf16.mxu0 %v16074_v55  ;;  %12626 = vmatprep.subr.bf16.mxu1 %v16077_v56  ;;  %v16161_v55 = vld [vmem:[%s18862_s8 + $0x50c] ss:$16 sps:$4 sm:$0xff]   ;;  %v16156_v56 = vld [vmem:[%s18862_s8 + $0x500] ss:$16 sps:$4 sm:$0xff]  }
  0xbb   : > { %11479 = vmatpush1.bf16.msra.mxu0 %v16072_v57  ;;  %12627 = vmatpush1.bf16.msra.mxu1 %v16075_v58  ;;  %v16159_v57 = vld [vmem:[%s18862_s8 + $0x508] ss:$16 sps:$4 sm:$0xff]   ;;  %v16164_v58 = vld [vmem:[%s18862_s8 + $0x524] ss:$16 sps:$4 sm:$0xff]  }
  0xbc   : > { %11480 = vmatprep.subr.bf16.mxu0 %v16080_v59  ;;  %12628 = vmatprep.subr.bf16.mxu1 %v16083_v60  ;;  %v16167_v59 = vld [vmem:[%s18862_s8 + $0x52c] ss:$16 sps:$4 sm:$0xff]   ;;  %v16162_v60 = vld [vmem:[%s18862_s8 + $0x520] ss:$16 sps:$4 sm:$0xff]  }
  0xbf   : > { %11481 = vmatpush1.bf16.msra.mxu0 %v16078_v61  ;;  %12629 = vmatpush1.bf16.msra.mxu1 %v16081_v62  ;;  %v16165_v61 = vld [vmem:[%s18862_s8 + $0x528] ss:$16 sps:$4 sm:$0xff]   ;;  %v16170_v62 = vld [vmem:[%s18862_s8 + $0x544] ss:$16 sps:$4 sm:$0xff]  }
  0xc0   : > { %11482 = vmatprep.subr.bf16.mxu0 %v16086_v63  ;;  %12630 = vmatprep.subr.bf16.mxu1 %v16089_v0  ;;  %v16173_v63 = vld [vmem:[%s18862_s8 + $0x54c] ss:$16 sps:$4 sm:$0xff]   ;;  %v16168_v0 = vld [vmem:[%s18862_s8 + $0x540] ss:$16 sps:$4 sm:$0xff]  }
  0xc3   : > { %11483 = vmatpush1.bf16.msra.mxu0 %v16084_v1  ;;  %12631 = vmatpush1.bf16.msra.mxu1 %v16087_v2  ;;  %v16171_v1 = vld [vmem:[%s18862_s8 + $0x548] ss:$16 sps:$4 sm:$0xff]   ;;  %v16176_v2 = vld [vmem:[%s18862_s8 + $0x564] ss:$16 sps:$4 sm:$0xff]  }
  0xc4   : > { %11484 = vmatprep.subr.bf16.mxu0 %v16092_v3  ;;  %12632 = vmatprep.subr.bf16.mxu1 %v16095_v4  ;;  %v16179_v3 = vld [vmem:[%s18862_s8 + $0x56c] ss:$16 sps:$4 sm:$0xff]   ;;  %v16174_v4 = vld [vmem:[%s18862_s8 + $0x560] ss:$16 sps:$4 sm:$0xff]  }
  0xc7   : > { %11485 = vmatpush1.bf16.msra.mxu0 %v16090_v5  ;;  %12633 = vmatpush1.bf16.msra.mxu1 %v16093_v6  ;;  %v16177_v5 = vld [vmem:[%s18862_s8 + $0x568] ss:$16 sps:$4 sm:$0xff]   ;;  %v16182_v6 = vld [vmem:[%s18862_s8 + $0x584] ss:$16 sps:$4 sm:$0xff]  }
  0xc8   : > { %11486 = vmatprep.subr.bf16.mxu0 %v16098_v7  ;;  %12634 = vmatprep.subr.bf16.mxu1 %v16101_v8  ;;  %v16185_v7 = vld [vmem:[%s18862_s8 + $0x58c] ss:$16 sps:$4 sm:$0xff]   ;;  %v16180_v8 = vld [vmem:[%s18862_s8 + $0x580] ss:$16 sps:$4 sm:$0xff]  }
  0xcb   : > { %11487 = vmatpush1.bf16.msra.mxu0 %v16096_v10  ;;  %12635 = vmatpush1.bf16.msra.mxu1 %v16099_v11  ;;  %v16188_v10 = vld [vmem:[%s18862_s8 + $0x5a4] ss:$16 sps:$4 sm:$0xff]   ;;  %v16191_v11 = vld [vmem:[%s18862_s8 + $0x5ac] ss:$16 sps:$4 sm:$0xff]  }
  0xcc   : > { %11488 = vmatprep.subr.bf16.mxu0 %v16104_v12  ;;  %12636 = vmatprep.subr.bf16.mxu1 %v16107_v14  ;;  %v16186_v12 = vld [vmem:[%s18862_s8 + $0x5a0] ss:$16 sps:$4 sm:$0xff]   ;;  %v16189_v14 = vld [vmem:[%s18862_s8 + $0x5a8] ss:$16 sps:$4 sm:$0xff]  }
  0xcf   : > { %11489 = vmatpush1.bf16.msra.mxu0 %v16102_v16  ;;  %12637 = vmatpush1.bf16.msra.mxu1 %v16105_v52  ;;  %v16194_v16 = vld [vmem:[%s18862_s8 + $0x5c4] ss:$16 sps:$4 sm:$0xff]   ;;  %v16197_v52 = vld [vmem:[%s18862_s8 + $0x5cc] ss:$16 sps:$4 sm:$0xff]  }
  0xd0   : > { %11499 = vmatprep.subr.bf16.mxu0 %v16110_v17  ;;  %12647 = vmatprep.subr.bf16.mxu1 %v16113_v18  ;;  %v16192_v17 = vld [vmem:[%s18862_s8 + $0x5c0] ss:$16 sps:$4 sm:$0xff]   ;;  %v16195_v18 = vld [vmem:[%s18862_s8 + $0x5c8] ss:$16 sps:$4 sm:$0xff]  }
  0xd2   : > { %11491 = vmatmul.mubr.bf16.vlgmr.msra.gmra.mrb[0].mxu0 %v2103_v21  ;;  %12639 = vmatmul.mubr.bf16.vlgmr.msra.gmra.mrb[0].mxu1 %v2103_v21  ;;  %v16198_v21 = vld [vmem:[%s18862_s8 + $0x5e0] ss:$16 sps:$4 sm:$0xff]  }
  0xd3   : > { %11500 = vmatpush1.bf16.msra.mxu0 %v16108_v20  ;;  %12648 = vmatpush1.bf16.msra.mxu1 %v16111_v22  ;;  %v16203_v20 = vld [vmem:[%s18862_s8 + $0x5ec] ss:$16 sps:$4 sm:$0xff]   ;;  %v16201_v22 = vld [vmem:[%s18862_s8 + $0x5e8] ss:$16 sps:$4 sm:$0xff]  }
  0xd4   : > { %11501 = vmatprep.subr.bf16.mxu0 %v16116_v23  ;;  %12649 = vmatprep.subr.bf16.mxu1 %v16119_v24  ;;  %v16207_v23 = vld [vmem:[%s18862_s8 + $0x604] ss:$16 sps:$4 sm:$0xff]   ;;  %v16210_v24 = vld [vmem:[%s18862_s8 + $0x60c] ss:$16 sps:$4 sm:$0xff]  }
  0xd5   : > { %11531 = vmatprep.mubr.bf16.mxu0 %v19036_v25  ;;  %12679 = vmatprep.mubr.bf16.mxu1 %v19036_v25 }
  0xd7   : > { %11502 = vmatpush1.bf16.msra.mxu0 %v16114_v26  ;;  %12650 = vmatpush1.bf16.msra.mxu1 %v16117_v13  ;;  %v16205_v26 = vld [vmem:[%s18862_s8 + $0x600] ss:$16 sps:$4 sm:$0xff]   ;;  %v19103_v13 = vrot.slane %v19021_v15, %v18921_v49 }
  0xd8   : > { %11503 = vmatprep.subr.bf16.mxu0 %v16122_v27  ;;  %12651 = vmatprep.subr.bf16.mxu1 %v16125_v28  ;;  %v16208_v27 = vld [vmem:[%s18862_s8 + $0x608] ss:$16 sps:$4 sm:$0xff]   ;;  %v16213_v28 = vld [vmem:[%s18862_s8 + $0x624] ss:$16 sps:$4 sm:$0xff]   ;;  %v16211_v15 = vld [vmem:[%s18862_s8 + $0x620] ss:$16 sps:$4 sm:$0xff]  }
  0xdb   : > { %11504 = vmatpush1.bf16.msra.mxu0 %v16120_v29  ;;  %12652 = vmatpush1.bf16.msra.mxu1 %v16123_v30  ;;  %v16216_v29 = vld [vmem:[%s18862_s8 + $0x62c] ss:$16 sps:$4 sm:$0xff]   ;;  %v2106_v30 = vcombine.high %v19036_v25, %v19036_v25  ;;  %v16217_v25 = vld [vmem:[%s18862_s8 + $0x640] ss:$16 sps:$4 sm:$0xff]  }
  0xdc   : > { %11505 = vmatprep.subr.bf16.mxu0 %v16128_v31  ;;  %12653 = vmatprep.subr.bf16.mxu1 %v16131_v32  ;;  %v16214_v31 = vld [vmem:[%s18862_s8 + $0x628] ss:$16 sps:$4 sm:$0xff]   ;;  %v16219_v32 = vld [vmem:[%s18862_s8 + $0x644] ss:$16 sps:$4 sm:$0xff]  }
  0xdf   : > { %11506 = vmatpush1.bf16.msra.mxu0 %v16126_v33  ;;  %12654 = vmatpush1.bf16.msra.mxu1 %v16129_v34  ;;  %v16222_v33 = vld [vmem:[%s18862_s8 + $0x64c] ss:$16 sps:$4 sm:$0xff]   ;;  %v16220_v34 = vld [vmem:[%s18862_s8 + $0x648] ss:$16 sps:$4 sm:$0xff]  }
  0xe0   : > { %11507 = vmatprep.subr.bf16.mxu0 %v16134_v35  ;;  %12655 = vmatprep.subr.bf16.mxu1 %v16137_v36  ;;  %v16225_v35 = vld [vmem:[%s18862_s8 + $0x664] ss:$16 sps:$4 sm:$0xff]   ;;  %v16228_v36 = vld [vmem:[%s18862_s8 + $0x66c] ss:$16 sps:$4 sm:$0xff]  }
  0xe3   : > { %11508 = vmatpush1.bf16.msra.mxu0 %v16132_v37  ;;  %12656 = vmatpush1.bf16.msra.mxu1 %v16135_v38  ;;  %v16223_v37 = vld [vmem:[%s18862_s8 + $0x660] ss:$16 sps:$4 sm:$0xff]   ;;  %v16226_v38 = vld [vmem:[%s18862_s8 + $0x668] ss:$16 sps:$4 sm:$0xff]  }
  0xe4   : > { %11509 = vmatprep.subr.bf16.mxu0 %v16140_v39  ;;  %12657 = vmatprep.subr.bf16.mxu1 %v16143_v40  ;;  %v16231_v39 = vld [vmem:[%s18862_s8 + $0x684] ss:$16 sps:$4 sm:$0xff]   ;;  %v16234_v40 = vld [vmem:[%s18862_s8 + $0x68c] ss:$16 sps:$4 sm:$0xff]  }
  0xe7   : > { %11510 = vmatpush1.bf16.msra.mxu0 %v16138_v41  ;;  %12658 = vmatpush1.bf16.msra.mxu1 %v16141_v43  ;;  %v16229_v41 = vld [vmem:[%s18862_s8 + $0x680] ss:$16 sps:$4 sm:$0xff]   ;;  %v16232_v43 = vld [vmem:[%s18862_s8 + $0x688] ss:$16 sps:$4 sm:$0xff]  }
  0xe8   : > { %11511 = vmatprep.subr.bf16.mxu0 %v16146_v44  ;;  %12659 = vmatprep.subr.bf16.mxu1 %v16149_v45  ;;  %v16237_v44 = vld [vmem:[%s18862_s8 + $0x6a4] ss:$16 sps:$4 sm:$0xff]   ;;  %v16240_v45 = vld [vmem:[%s18862_s8 + $0x6ac] ss:$16 sps:$4 sm:$0xff]  }
  0xeb   : > { %11512 = vmatpush1.bf16.msra.mxu0 %v16144_v46  ;;  %12660 = vmatpush1.bf16.msra.mxu1 %v16147_v47  ;;  %v16235_v46 = vld [vmem:[%s18862_s8 + $0x6a0] ss:$16 sps:$4 sm:$0xff]   ;;  %v16238_v47 = vld [vmem:[%s18862_s8 + $0x6a8] ss:$16 sps:$4 sm:$0xff]  }
  0xec   : > { %11513 = vmatprep.subr.bf16.mxu0 %v16152_v48  ;;  %12661 = vmatprep.subr.bf16.mxu1 %v16155_v50  ;;  %v16243_v48 = vld [vmem:[%s18862_s8 + $0x6c4] ss:$16 sps:$4 sm:$0xff]   ;;  %v16246_v50 = vld [vmem:[%s18862_s8 + $0x6cc] ss:$16 sps:$4 sm:$0xff]  }
  0xef   : > { %11514 = vmatpush1.bf16.msra.mxu0 %v16150_v51  ;;  %12662 = vmatpush1.bf16.msra.mxu1 %v16153_v53  ;;  %v16241_v51 = vld [vmem:[%s18862_s8 + $0x6c0] ss:$16 sps:$4 sm:$0xff]   ;;  %v16244_v53 = vld [vmem:[%s18862_s8 + $0x6c8] ss:$16 sps:$4 sm:$0xff]  }
  0xf0   : > { %11515 = vmatprep.subr.bf16.mxu0 %v16158_v54  ;;  %12663 = vmatprep.subr.bf16.mxu1 %v16161_v55  ;;  %v16249_v54 = vld [vmem:[%s18862_s8 + $0x6e4] ss:$16 sps:$4 sm:$0xff]   ;;  %v16252_v55 = vld [vmem:[%s18862_s8 + $0x6ec] ss:$16 sps:$4 sm:$0xff]  }
  0xf3   : > { %11516 = vmatpush1.bf16.msra.mxu0 %v16156_v56  ;;  %12664 = vmatpush1.bf16.msra.mxu1 %v16159_v57  ;;  %v16247_v56 = vld [vmem:[%s18862_s8 + $0x6e0] ss:$16 sps:$4 sm:$0xff]   ;;  %v16250_v57 = vld [vmem:[%s18862_s8 + $0x6e8] ss:$16 sps:$4 sm:$0xff]  }
  0xf4   : > { %11517 = vmatprep.subr.bf16.mxu0 %v16164_v58  ;;  %12665 = vmatprep.subr.bf16.mxu1 %v16167_v59  ;;  %v16255_v58 = vld [vmem:[%s18862_s8 + $0x704] ss:$16 sps:$4 sm:$0xff]   ;;  %v16258_v59 = vld [vmem:[%s18862_s8 + $0x70c] ss:$16 sps:$4 sm:$0xff]  }
  0xf7   : > { %11518 = vmatpush1.bf16.msra.mxu0 %v16162_v60  ;;  %12666 = vmatpush1.bf16.msra.mxu1 %v16165_v61  ;;  %v16253_v60 = vld [vmem:[%s18862_s8 + $0x700] ss:$16 sps:$4 sm:$0xff]   ;;  %v16256_v61 = vld [vmem:[%s18862_s8 + $0x708] ss:$16 sps:$4 sm:$0xff]  }
  0xf8   : > { %11519 = vmatprep.subr.bf16.mxu0 %v16170_v62  ;;  %12667 = vmatprep.subr.bf16.mxu1 %v16173_v63  ;;  %v16261_v62 = vld [vmem:[%s18862_s8 + $0x724] ss:$16 sps:$4 sm:$0xff]   ;;  %v16264_v63 = vld [vmem:[%s18862_s8 + $0x72c] ss:$16 sps:$4 sm:$0xff]  }
  0xfb   : > { %11520 = vmatpush1.bf16.msra.mxu0 %v16168_v0  ;;  %12668 = vmatpush1.bf16.msra.mxu1 %v16171_v1  ;;  %v16259_v0 = vld [vmem:[%s18862_s8 + $0x720] ss:$16 sps:$4 sm:$0xff]   ;;  %v16262_v1 = vld [vmem:[%s18862_s8 + $0x728] ss:$16 sps:$4 sm:$0xff]  }
  0xfc   : > { %11521 = vmatprep.subr.bf16.mxu0 %v16176_v2  ;;  %12669 = vmatprep.subr.bf16.mxu1 %v16179_v3  ;;  %v16267_v2 = vld [vmem:[%s18862_s8 + $0x744] ss:$16 sps:$4 sm:$0xff]   ;;  %v16270_v3 = vld [vmem:[%s18862_s8 + $0x74c] ss:$16 sps:$4 sm:$0xff]  }
  0xff   : > { %11522 = vmatpush1.bf16.msra.mxu0 %v16174_v4  ;;  %12670 = vmatpush1.bf16.msra.mxu1 %v16177_v5  ;;  %v16265_v4 = vld [vmem:[%s18862_s8 + $0x740] ss:$16 sps:$4 sm:$0xff]   ;;  %v16268_v5 = vld [vmem:[%s18862_s8 + $0x748] ss:$16 sps:$4 sm:$0xff]  }
 0x100   : > { %11523 = vmatprep.subr.bf16.mxu0 %v16182_v6  ;;  %12671 = vmatprep.subr.bf16.mxu1 %v16185_v7  ;;  %v16273_v6 = vld [vmem:[%s18862_s8 + $0x764] ss:$16 sps:$4 sm:$0xff]   ;;  %v16276_v7 = vld [vmem:[%s18862_s8 + $0x76c] ss:$16 sps:$4 sm:$0xff]  }
 0x103   : > { %11524 = vmatpush1.bf16.msra.mxu0 %v16180_v8  ;;  %12672 = vmatpush1.bf16.msra.mxu1 %v16183_v9  ;;  %v16271_v8 = vld [vmem:[%s18862_s8 + $0x760] ss:$16 sps:$4 sm:$0xff]   ;;  %v16274_v9 = vld [vmem:[%s18862_s8 + $0x768] ss:$16 sps:$4 sm:$0xff]  }
 0x104   : > { %11525 = vmatprep.subr.bf16.mxu0 %v16188_v10  ;;  %12673 = vmatprep.subr.bf16.mxu1 %v16191_v11  ;;  %v16279_v10 = vld [vmem:[%s18862_s8 + $0x784] ss:$16 sps:$4 sm:$0xff]   ;;  %v16282_v11 = vld [vmem:[%s18862_s8 + $0x78c] ss:$16 sps:$4 sm:$0xff]  }
 0x107   : > { %11526 = vmatpush1.bf16.msra.mxu0 %v16186_v12  ;;  %12674 = vmatpush1.bf16.msra.mxu1 %v16189_v14  ;;  %v16277_v12 = vld [vmem:[%s18862_s8 + $0x780] ss:$16 sps:$4 sm:$0xff]   ;;  %v16280_v14 = vld [vmem:[%s18862_s8 + $0x788] ss:$16 sps:$4 sm:$0xff]  }
 0x108   : > { %11527 = vmatprep.subr.bf16.mxu0 %v16194_v16  ;;  %12675 = vmatprep.subr.bf16.mxu1 %v16197_v52  ;;  %v16285_v16 = vld [vmem:[%s18862_s8 + $0x7a4] ss:$16 sps:$4 sm:$0xff]   ;;  %v16288_v52 = vld [vmem:[%s18862_s8 + $0x7ac] ss:$16 sps:$4 sm:$0xff]  }
 0x10b   : > { %11528 = vmatpush1.bf16.msra.mxu0 %v16192_v17  ;;  %12676 = vmatpush1.bf16.msra.mxu1 %v16195_v18  ;;  %v16283_v17 = vld [vmem:[%s18862_s8 + $0x7a0] ss:$16 sps:$4 sm:$0xff]   ;;  %v16286_v18 = vld [vmem:[%s18862_s8 + $0x7a8] ss:$16 sps:$4 sm:$0xff]  }
 0x10c   : > { %11529 = vmatprep.subr.bf16.mxu0 %v16200_v19  ;;  %12677 = vmatprep.subr.bf16.mxu1 %v16203_v20  ;;  %v16291_v19 = vld [vmem:[%s18862_s8 + $0x7c4] ss:$16 sps:$4 sm:$0xff]   ;;  %v16294_v20 = vld [vmem:[%s18862_s8 + $0x7cc] ss:$16 sps:$4 sm:$0xff]  }
 0x10f   : > { %11530 = vmatpush1.bf16.msra.mxu0 %v16198_v21  ;;  %12678 = vmatpush1.bf16.msra.mxu1 %v16201_v22  ;;  %v19167_v21 = vld.sshfl [vmem:[%s21012_s0 + $0x8] sm:$0xff pattern:$0x75316420]  ;;  %v16289_v22 = vld [vmem:[%s18862_s8 + $0x7c0] ss:$16 sps:$4 sm:$0xff]  }
 0x110   : > { %11540 = vmatprep.subr.bf16.mxu0 %v16207_v23  ;;  %12688 = vmatprep.subr.bf16.mxu1 %v16210_v24  ;;  %v16292_v23 = vld [vmem:[%s18862_s8 + $0x7c8] ss:$16 sps:$4 sm:$0xff]   ;;  %v16297_v24 = vld [vmem:[%s18862_s8 + $0x7e4] ss:$16 sps:$4 sm:$0xff]  }
 0x112   : > { %11532 = vmatmul.mubr.bf16.vlgmr.msra.gmra.mrb[0].mxu0 %v19103_v13  ;;  %12680 = vmatmul.mubr.bf16.vlgmr.msra.gmra.mrb[0].mxu1 %v19103_v13 }
 0x113   : > { %11541 = vmatpush1.bf16.msra.mxu0 %v16205_v26  ;;  %12689 = vmatpush1.bf16.msra.mxu1 %v16208_v27  ;;  %v16300_v26 = vld [vmem:[%s18862_s8 + $0x7ec] ss:$16 sps:$4 sm:$0xff]   ;;  %v16295_v27 = vld [vmem:[%s18862_s8 + $0x7e0] ss:$16 sps:$4 sm:$0xff]  }
 0x114   : > { %11542 = vmatprep.subr.bf16.mxu0 %v16213_v28  ;;  %12690 = vmatprep.subr.bf16.mxu1 %v16216_v29  ;;  %v16298_v28 = vld [vmem:[%s18862_s8 + $0x7e8] ss:$16 sps:$4 sm:$0xff]   ;;  %v16303_v29 = vld [vmem:[%s18862_s8 + $0x804] ss:$16 sps:$4 sm:$0xff]  }
 0x115   : > { %11572 = vmatprep.mubr.bf16.mxu0 %v2106_v30  ;;  %12720 = vmatprep.mubr.bf16.mxu1 %v2106_v30  ;;  %v16306_v30 = vld [vmem:[%s18862_s8 + $0x80c] ss:$16 sps:$4 sm:$0xff]  }
 0x117   : > { %11543 = vmatpush1.bf16.msra.mxu0 %v16211_v15  ;;  %12691 = vmatpush1.bf16.msra.mxu1 %v16214_v31  ;;  %v2122_v15 = vcombine.high %v19167_v21, %v19167_v21  ;;  %v2104_v31 = vcombine.high %v19103_v13, %v19103_v13  ;;  %v16307_v13 = vld [vmem:[%s18862_s8 + $0x820] ss:$16 sps:$4 sm:$0xff]  }
 0x118   : > { %11544 = vmatprep.subr.bf16.mxu0 %v16219_v32  ;;  %12692 = vmatprep.subr.bf16.mxu1 %v16222_v33  ;;  %v16301_v32 = vld [vmem:[%s18862_s8 + $0x800] ss:$16 sps:$4 sm:$0xff]   ;;  %v16304_v33 = vld [vmem:[%s18862_s8 + $0x808] ss:$16 sps:$4 sm:$0xff]  }
 0x11b   : > { %11545 = vmatpush1.bf16.msra.mxu0 %v16217_v25  ;;  %12693 = vmatpush1.bf16.msra.mxu1 %v16220_v34  ;;  %v16309_v25 = vld [vmem:[%s18862_s8 + $0x824] ss:$16 sps:$4 sm:$0xff]   ;;  %v16312_v34 = vld [vmem:[%s18862_s8 + $0x82c] ss:$16 sps:$4 sm:$0xff]  }
 0x11c   : > { %11546 = vmatprep.subr.bf16.mxu0 %v16225_v35  ;;  %12694 = vmatprep.subr.bf16.mxu1 %v16228_v36  ;;  %v19186_v35 = vrot.slane %v2122_v15, %v18921_v49  ;;  %v16310_v36 = vld [vmem:[%s18862_s8 + $0x828] ss:$16 sps:$4 sm:$0xff]   ;;  %v16393_v15 = vld [vmem:[%s18862_s8 + $0x9e4] ss:$16 sps:$4 sm:$0xff]  }
 0x11f   : > { %11547 = vmatpush1.bf16.msra.mxu0 %v16223_v37  ;;  %12695 = vmatpush1.bf16.msra.mxu1 %v16226_v38  ;;  %v16315_v37 = vld [vmem:[%s18862_s8 + $0x844] ss:$16 sps:$4 sm:$0xff]   ;;  %v16318_v38 = vld [vmem:[%s18862_s8 + $0x84c] ss:$16 sps:$4 sm:$0xff]  }
 0x120   : > { %11548 = vmatprep.subr.bf16.mxu0 %v16231_v39  ;;  %12696 = vmatprep.subr.bf16.mxu1 %v16234_v40  ;;  %v16313_v39 = vld [vmem:[%s18862_s8 + $0x840] ss:$16 sps:$4 sm:$0xff]   ;;  %v16316_v40 = vld [vmem:[%s18862_s8 + $0x848] ss:$16 sps:$4 sm:$0xff]  }
 0x123   : > { %11549 = vmatpush1.bf16.msra.mxu0 %v16229_v41  ;;  %12697 = vmatpush1.bf16.msra.mxu1 %v16232_v43  ;;  %v16321_v41 = vld [vmem:[%s18862_s8 + $0x864] ss:$16 sps:$4 sm:$0xff]   ;;  %v16324_v43 = vld [vmem:[%s18862_s8 + $0x86c] ss:$16 sps:$4 sm:$0xff]  }
 0x124   : > { %11550 = vmatprep.subr.bf16.mxu0 %v16237_v44  ;;  %12698 = vmatprep.subr.bf16.mxu1 %v16240_v45  ;;  %v16319_v44 = vld [vmem:[%s18862_s8 + $0x860] ss:$16 sps:$4 sm:$0xff]   ;;  %v16322_v45 = vld [vmem:[%s18862_s8 + $0x868] ss:$16 sps:$4 sm:$0xff]  }
 0x127   : > { %11551 = vmatpush1.bf16.msra.mxu0 %v16235_v46  ;;  %12699 = vmatpush1.bf16.msra.mxu1 %v16238_v47  ;;  %v16327_v46 = vld [vmem:[%s18862_s8 + $0x884] ss:$16 sps:$4 sm:$0xff]   ;;  %v16330_v47 = vld [vmem:[%s18862_s8 + $0x88c] ss:$16 sps:$4 sm:$0xff]  }
 0x128   : > { %11552 = vmatprep.subr.bf16.mxu0 %v16243_v48  ;;  %12700 = vmatprep.subr.bf16.mxu1 %v16246_v50  ;;  %v16325_v48 = vld [vmem:[%s18862_s8 + $0x880] ss:$16 sps:$4 sm:$0xff]   ;;  %v16328_v50 = vld [vmem:[%s18862_s8 + $0x888] ss:$16 sps:$4 sm:$0xff]  }
 0x12b   : > { %11553 = vmatpush1.bf16.msra.mxu0 %v16241_v51  ;;  %12701 = vmatpush1.bf16.msra.mxu1 %v16244_v53  ;;  %v16333_v51 = vld [vmem:[%s18862_s8 + $0x8a4] ss:$16 sps:$4 sm:$0xff]   ;;  %v16336_v53 = vld [vmem:[%s18862_s8 + $0x8ac] ss:$16 sps:$4 sm:$0xff]  }
 0x12c   : > { %11554 = vmatprep.subr.bf16.mxu0 %v16249_v54  ;;  %12702 = vmatprep.subr.bf16.mxu1 %v16252_v55  ;;  %v16331_v54 = vld [vmem:[%s18862_s8 + $0x8a0] ss:$16 sps:$4 sm:$0xff]   ;;  %v16334_v55 = vld [vmem:[%s18862_s8 + $0x8a8] ss:$16 sps:$4 sm:$0xff]  }
 0x12f   : > { %11555 = vmatpush1.bf16.msra.mxu0 %v16247_v56  ;;  %12703 = vmatpush1.bf16.msra.mxu1 %v16250_v57  ;;  %v16339_v56 = vld [vmem:[%s18862_s8 + $0x8c4] ss:$16 sps:$4 sm:$0xff]   ;;  %v16342_v57 = vld [vmem:[%s18862_s8 + $0x8cc] ss:$16 sps:$4 sm:$0xff]  }
 0x130   : > { %11556 = vmatprep.subr.bf16.mxu0 %v16255_v58  ;;  %12704 = vmatprep.subr.bf16.mxu1 %v16258_v59  ;;  %v16337_v58 = vld [vmem:[%s18862_s8 + $0x8c0] ss:$16 sps:$4 sm:$0xff]   ;;  %v16340_v59 = vld [vmem:[%s18862_s8 + $0x8c8] ss:$16 sps:$4 sm:$0xff]  }
 0x133   : > { %11557 = vmatpush1.bf16.msra.mxu0 %v16253_v60  ;;  %12705 = vmatpush1.bf16.msra.mxu1 %v16256_v61  ;;  %v16345_v60 = vld [vmem:[%s18862_s8 + $0x8e4] ss:$16 sps:$4 sm:$0xff]   ;;  %v16348_v61 = vld [vmem:[%s18862_s8 + $0x8ec] ss:$16 sps:$4 sm:$0xff]  }
 0x134   : > { %11558 = vmatprep.subr.bf16.mxu0 %v16261_v62  ;;  %12706 = vmatprep.subr.bf16.mxu1 %v16264_v63  ;;  %v16343_v62 = vld [vmem:[%s18862_s8 + $0x8e0] ss:$16 sps:$4 sm:$0xff]   ;;  %v16346_v63 = vld [vmem:[%s18862_s8 + $0x8e8] ss:$16 sps:$4 sm:$0xff]  }
 0x137   : > { %11559 = vmatpush1.bf16.msra.mxu0 %v16259_v0  ;;  %12707 = vmatpush1.bf16.msra.mxu1 %v16262_v1  ;;  %v16351_v0 = vld [vmem:[%s18862_s8 + $0x904] ss:$16 sps:$4 sm:$0xff]   ;;  %v16354_v1 = vld [vmem:[%s18862_s8 + $0x90c] ss:$16 sps:$4 sm:$0xff]  }
 0x138   : > { %11560 = vmatprep.subr.bf16.mxu0 %v16267_v2  ;;  %12708 = vmatprep.subr.bf16.mxu1 %v16270_v3  ;;  %v16349_v2 = vld [vmem:[%s18862_s8 + $0x900] ss:$16 sps:$4 sm:$0xff]   ;;  %v16352_v3 = vld [vmem:[%s18862_s8 + $0x908] ss:$16 sps:$4 sm:$0xff]  }
 0x13b   : > { %11561 = vmatpush1.bf16.msra.mxu0 %v16265_v4  ;;  %12709 = vmatpush1.bf16.msra.mxu1 %v16268_v5  ;;  %v16357_v4 = vld [vmem:[%s18862_s8 + $0x924] ss:$16 sps:$4 sm:$0xff]   ;;  %v16360_v5 = vld [vmem:[%s18862_s8 + $0x92c] ss:$16 sps:$4 sm:$0xff]  }
 0x13c   : > { %11562 = vmatprep.subr.bf16.mxu0 %v16273_v6  ;;  %12710 = vmatprep.subr.bf16.mxu1 %v16276_v7  ;;  %v16355_v6 = vld [vmem:[%s18862_s8 + $0x920] ss:$16 sps:$4 sm:$0xff]   ;;  %v16358_v7 = vld [vmem:[%s18862_s8 + $0x928] ss:$16 sps:$4 sm:$0xff]  }
 0x13f   : > { %11563 = vmatpush1.bf16.msra.mxu0 %v16271_v8  ;;  %12711 = vmatpush1.bf16.msra.mxu1 %v16274_v9  ;;  %v16363_v8 = vld [vmem:[%s18862_s8 + $0x944] ss:$16 sps:$4 sm:$0xff]   ;;  %v16366_v9 = vld [vmem:[%s18862_s8 + $0x94c] ss:$16 sps:$4 sm:$0xff]  }
 0x140   : > { %11564 = vmatprep.subr.bf16.mxu0 %v16279_v10  ;;  %12712 = vmatprep.subr.bf16.mxu1 %v16282_v11  ;;  %v16361_v10 = vld [vmem:[%s18862_s8 + $0x940] ss:$16 sps:$4 sm:$0xff]   ;;  %v16364_v11 = vld [vmem:[%s18862_s8 + $0x948] ss:$16 sps:$4 sm:$0xff]  }
 0x143   : > { %11565 = vmatpush1.bf16.msra.mxu0 %v16277_v12  ;;  %12713 = vmatpush1.bf16.msra.mxu1 %v16280_v14  ;;  %v16369_v12 = vld [vmem:[%s18862_s8 + $0x964] ss:$16 sps:$4 sm:$0xff]   ;;  %v16372_v14 = vld [vmem:[%s18862_s8 + $0x96c] ss:$16 sps:$4 sm:$0xff]  }
 0x144   : > { %11566 = vmatprep.subr.bf16.mxu0 %v16285_v16  ;;  %12714 = vmatprep.subr.bf16.mxu1 %v16288_v52  ;;  %v16367_v16 = vld [vmem:[%s18862_s8 + $0x960] ss:$16 sps:$4 sm:$0xff]   ;;  %v16370_v52 = vld [vmem:[%s18862_s8 + $0x968] ss:$16 sps:$4 sm:$0xff]  }
 0x147   : > { %11567 = vmatpush1.bf16.msra.mxu0 %v16283_v17  ;;  %12715 = vmatpush1.bf16.msra.mxu1 %v16286_v18  ;;  %v16375_v17 = vld [vmem:[%s18862_s8 + $0x984] ss:$16 sps:$4 sm:$0xff]   ;;  %v16378_v18 = vld [vmem:[%s18862_s8 + $0x98c] ss:$16 sps:$4 sm:$0xff]  }
 0x148   : > { %11568 = vmatprep.subr.bf16.mxu0 %v16291_v19  ;;  %12716 = vmatprep.subr.bf16.mxu1 %v16294_v20  ;;  %v16373_v19 = vld [vmem:[%s18862_s8 + $0x980] ss:$16 sps:$4 sm:$0xff]   ;;  %v16376_v20 = vld [vmem:[%s18862_s8 + $0x988] ss:$16 sps:$4 sm:$0xff]  }
 0x14b   : > { %11569 = vmatpush1.bf16.msra.mxu0 %v16289_v22  ;;  %12717 = vmatpush1.bf16.msra.mxu1 %v16292_v23  ;;  %v16381_v22 = vld [vmem:[%s18862_s8 + $0x9a4] ss:$16 sps:$4 sm:$0xff]   ;;  %v16384_v23 = vld [vmem:[%s18862_s8 + $0x9ac] ss:$16 sps:$4 sm:$0xff]  }
 0x14c   : > { %11570 = vmatprep.subr.bf16.mxu0 %v16297_v24  ;;  %12718 = vmatprep.subr.bf16.mxu1 %v16300_v26  ;;  %v16379_v24 = vld [vmem:[%s18862_s8 + $0x9a0] ss:$16 sps:$4 sm:$0xff]   ;;  %v16382_v26 = vld [vmem:[%s18862_s8 + $0x9a8] ss:$16 sps:$4 sm:$0xff]  }
 0x14f   : > { %11571 = vmatpush1.bf16.msra.mxu0 %v16295_v27  ;;  %12719 = vmatpush1.bf16.msra.mxu1 %v16298_v28  ;;  %v16387_v27 = vld [vmem:[%s18862_s8 + $0x9c4] ss:$16 sps:$4 sm:$0xff]   ;;  %v16390_v28 = vld [vmem:[%s18862_s8 + $0x9cc] ss:$16 sps:$4 sm:$0xff]  }
 0x150   : > { %11581 = vmatprep.subr.bf16.mxu0 %v16303_v29  ;;  %12729 = vmatprep.subr.bf16.mxu1 %v16306_v30  ;;  %v16385_v29 = vld [vmem:[%s18862_s8 + $0x9c0] ss:$16 sps:$4 sm:$0xff]   ;;  %v16388_v30 = vld [vmem:[%s18862_s8 + $0x9c8] ss:$16 sps:$4 sm:$0xff]  }
 0x152   : > { %11573 = vmatmul.mubr.bf16.vlgmr.msra.gmra.mrb[0].mxu0 %v2104_v31  ;;  %12721 = vmatmul.mubr.bf16.vlgmr.msra.gmra.mrb[0].mxu1 %v2104_v31  ;;  %v16396_v31 = vld [vmem:[%s18862_s8 + $0x9ec] ss:$16 sps:$4 sm:$0xff]  }
 0x153   : > { %11582 = vmatpush1.bf16.msra.mxu0 %v16301_v32  ;;  %12730 = vmatpush1.bf16.msra.mxu1 %v16304_v33  ;;  %v16391_v32 = vld [vmem:[%s18862_s8 + $0x9e0] ss:$16 sps:$4 sm:$0xff]   ;;  %v16394_v33 = vld [vmem:[%s18862_s8 + $0x9e8] ss:$16 sps:$4 sm:$0xff]  }
 0x154   : > { %11583 = vmatprep.subr.bf16.mxu0 %v16309_v25  ;;  %12731 = vmatprep.subr.bf16.mxu1 %v16312_v34  ;;  %v16399_v25 = vld [vmem:[%s18862_s8 + $0xa04] ss:$16 sps:$4 sm:$0xff]   ;;  %v16402_v34 = vld [vmem:[%s18862_s8 + $0xa0c] ss:$16 sps:$4 sm:$0xff]  }
 0x155   : > { %11613 = vmatprep.mubr.bf16.mxu0 %v19186_v35  ;;  %12761 = vmatprep.mubr.bf16.mxu1 %v19186_v35 }
 0x157   : > { %11584 = vmatpush1.bf16.msra.mxu0 %v16307_v13  ;;  %12732 = vmatpush1.bf16.msra.mxu1 %v16310_v36  ;;  %v19252_v13 = vrot.slane %v19167_v21, %v18921_v49  ;;  %v16397_v36 = vld [vmem:[%s18862_s8 + $0xa00] ss:$16 sps:$4 sm:$0xff]  }
 0x158   : > { %11585 = vmatprep.subr.bf16.mxu0 %v16315_v37  ;;  %12733 = vmatprep.subr.bf16.mxu1 %v16318_v38  ;;  %v16400_v37 = vld [vmem:[%s18862_s8 + $0xa08] ss:$16 sps:$4 sm:$0xff]   ;;  %v16405_v38 = vld [vmem:[%s18862_s8 + $0xa24] ss:$16 sps:$4 sm:$0xff]   ;;  %v16403_v21 = vld [vmem:[%s18862_s8 + $0xa20] ss:$16 sps:$4 sm:$0xff]  }
 0x15b   : > { %11586 = vmatpush1.bf16.msra.mxu0 %v16313_v39  ;;  %12734 = vmatpush1.bf16.msra.mxu1 %v16316_v40  ;;  %v16408_v39 = vld [vmem:[%s18862_s8 + $0xa2c] ss:$16 sps:$4 sm:$0xff]   ;;  %v2154_v40 = vcombine.high %v19186_v35, %v19186_v35  ;;  %v16409_v35 = vld [vmem:[%s18862_s8 + $0xa40] ss:$16 sps:$4 sm:$0xff]  }
 0x15c   : > { %11587 = vmatprep.subr.bf16.mxu0 %v16321_v41  ;;  %12735 = vmatprep.subr.bf16.mxu1 %v16324_v43  ;;  %v16406_v41 = vld [vmem:[%s18862_s8 + $0xa28] ss:$16 sps:$4 sm:$0xff]   ;;  %v16411_v43 = vld [vmem:[%s18862_s8 + $0xa44] ss:$16 sps:$4 sm:$0xff]  }
 0x15f   : > { %11588 = vmatpush1.bf16.msra.mxu0 %v16319_v44  ;;  %12736 = vmatpush1.bf16.msra.mxu1 %v16322_v45  ;;  %v16414_v44 = vld [vmem:[%s18862_s8 + $0xa4c] ss:$16 sps:$4 sm:$0xff]   ;;  %v16412_v45 = vld [vmem:[%s18862_s8 + $0xa48] ss:$16 sps:$4 sm:$0xff]  }
 0x160   : > { %11589 = vmatprep.subr.bf16.mxu0 %v16327_v46  ;;  %12737 = vmatprep.subr.bf16.mxu1 %v16330_v47  ;;  %v16417_v46 = vld [vmem:[%s18862_s8 + $0xa64] ss:$16 sps:$4 sm:$0xff]   ;;  %v16420_v47 = vld [vmem:[%s18862_s8 + $0xa6c] ss:$16 sps:$4 sm:$0xff]  }
 0x163   : > { %11590 = vmatpush1.bf16.msra.mxu0 %v16325_v48  ;;  %12738 = vmatpush1.bf16.msra.mxu1 %v16328_v50  ;;  %v16415_v48 = vld [vmem:[%s18862_s8 + $0xa60] ss:$16 sps:$4 sm:$0xff]   ;;  %v16418_v50 = vld [vmem:[%s18862_s8 + $0xa68] ss:$16 sps:$4 sm:$0xff]  }
 0x164   : > { %11591 = vmatprep.subr.bf16.mxu0 %v16333_v51  ;;  %12739 = vmatprep.subr.bf16.mxu1 %v16336_v53  ;;  %v16423_v51 = vld [vmem:[%s18862_s8 + $0xa84] ss:$16 sps:$4 sm:$0xff]   ;;  %v16426_v53 = vld [vmem:[%s18862_s8 + $0xa8c] ss:$16 sps:$4 sm:$0xff]  }
 0x167   : > { %11592 = vmatpush1.bf16.msra.mxu0 %v16331_v54  ;;  %12740 = vmatpush1.bf16.msra.mxu1 %v16334_v55  ;;  %v16421_v54 = vld [vmem:[%s18862_s8 + $0xa80] ss:$16 sps:$4 sm:$0xff]   ;;  %v16424_v55 = vld [vmem:[%s18862_s8 + $0xa88] ss:$16 sps:$4 sm:$0xff]  }
 0x168   : > { %11593 = vmatprep.subr.bf16.mxu0 %v16339_v56  ;;  %12741 = vmatprep.subr.bf16.mxu1 %v16342_v57  ;;  %v16429_v56 = vld [vmem:[%s18862_s8 + $0xaa4] ss:$16 sps:$4 sm:$0xff]   ;;  %v16432_v57 = vld [vmem:[%s18862_s8 + $0xaac] ss:$16 sps:$4 sm:$0xff]  }
 0x16b   : > { %11594 = vmatpush1.bf16.msra.mxu0 %v16337_v58  ;;  %12742 = vmatpush1.bf16.msra.mxu1 %v16340_v59  ;;  %v16427_v58 = vld [vmem:[%s18862_s8 + $0xaa0] ss:$16 sps:$4 sm:$0xff]   ;;  %v16430_v59 = vld [vmem:[%s18862_s8 + $0xaa8] ss:$16 sps:$4 sm:$0xff]  }
 0x16c   : > { %11595 = vmatprep.subr.bf16.mxu0 %v16345_v60  ;;  %12743 = vmatprep.subr.bf16.mxu1 %v16348_v61  ;;  %v16435_v60 = vld [vmem:[%s18862_s8 + $0xac4] ss:$16 sps:$4 sm:$0xff]   ;;  %v16438_v61 = vld [vmem:[%s18862_s8 + $0xacc] ss:$16 sps:$4 sm:$0xff]  }
 0x16f   : > { %11596 = vmatpush1.bf16.msra.mxu0 %v16343_v62  ;;  %12744 = vmatpush1.bf16.msra.mxu1 %v16346_v63  ;;  %v16433_v62 = vld [vmem:[%s18862_s8 + $0xac0] ss:$16 sps:$4 sm:$0xff]   ;;  %v16436_v63 = vld [vmem:[%s18862_s8 + $0xac8] ss:$16 sps:$4 sm:$0xff]  }
 0x170   : > { %11597 = vmatprep.subr.bf16.mxu0 %v16351_v0  ;;  %12745 = vmatprep.subr.bf16.mxu1 %v16354_v1  ;;  %v16441_v0 = vld [vmem:[%s18862_s8 + $0xae4] ss:$16 sps:$4 sm:$0xff]   ;;  %v16444_v1 = vld [vmem:[%s18862_s8 + $0xaec] ss:$16 sps:$4 sm:$0xff]  }
 0x173   : > { %11598 = vmatpush1.bf16.msra.mxu0 %v16349_v2  ;;  %12746 = vmatpush1.bf16.msra.mxu1 %v16352_v3  ;;  %v16439_v2 = vld [vmem:[%s18862_s8 + $0xae0] ss:$16 sps:$4 sm:$0xff]   ;;  %v16442_v3 = vld [vmem:[%s18862_s8 + $0xae8] ss:$16 sps:$4 sm:$0xff]  }
 0x174   : > { %11599 = vmatprep.subr.bf16.mxu0 %v16357_v4  ;;  %12747 = vmatprep.subr.bf16.mxu1 %v16360_v5  ;;  %v16447_v4 = vld [vmem:[%s18862_s8 + $0xb04] ss:$16 sps:$4 sm:$0xff]   ;;  %v16450_v5 = vld [vmem:[%s18862_s8 + $0xb0c] ss:$16 sps:$4 sm:$0xff]  }
 0x177   : > { %11600 = vmatpush1.bf16.msra.mxu0 %v16355_v6  ;;  %12748 = vmatpush1.bf16.msra.mxu1 %v16358_v7  ;;  %v16445_v6 = vld [vmem:[%s18862_s8 + $0xb00] ss:$16 sps:$4 sm:$0xff]   ;;  %v16448_v7 = vld [vmem:[%s18862_s8 + $0xb08] ss:$16 sps:$4 sm:$0xff]  }
 0x178   : > { %11601 = vmatprep.subr.bf16.mxu0 %v16363_v8  ;;  %12749 = vmatprep.subr.bf16.mxu1 %v16366_v9  ;;  %v16453_v8 = vld [vmem:[%s18862_s8 + $0xb24] ss:$16 sps:$4 sm:$0xff]   ;;  %v16456_v9 = vld [vmem:[%s18862_s8 + $0xb2c] ss:$16 sps:$4 sm:$0xff]  }
 0x17b   : > { %11602 = vmatpush1.bf16.msra.mxu0 %v16361_v10  ;;  %12750 = vmatpush1.bf16.msra.mxu1 %v16364_v11  ;;  %v16451_v10 = vld [vmem:[%s18862_s8 + $0xb20] ss:$16 sps:$4 sm:$0xff]   ;;  %v16454_v11 = vld [vmem:[%s18862_s8 + $0xb28] ss:$16 sps:$4 sm:$0xff]  }
 0x17c   : > { %11603 = vmatprep.subr.bf16.mxu0 %v16369_v12  ;;  %12751 = vmatprep.subr.bf16.mxu1 %v16372_v14  ;;  %v16459_v12 = vld [vmem:[%s18862_s8 + $0xb44] ss:$16 sps:$4 sm:$0xff]   ;;  %v16462_v14 = vld [vmem:[%s18862_s8 + $0xb4c] ss:$16 sps:$4 sm:$0xff]  }
 0x17f   : > { %11604 = vmatpush1.bf16.msra.mxu0 %v16367_v16  ;;  %12752 = vmatpush1.bf16.msra.mxu1 %v16370_v52  ;;  %v16457_v16 = vld [vmem:[%s18862_s8 + $0xb40] ss:$16 sps:$4 sm:$0xff]   ;;  %v16460_v52 = vld [vmem:[%s18862_s8 + $0xb48] ss:$16 sps:$4 sm:$0xff]  }
 0x180   : > { %11605 = vmatprep.subr.bf16.mxu0 %v16375_v17  ;;  %12753 = vmatprep.subr.bf16.mxu1 %v16378_v18  ;;  %v16465_v17 = vld [vmem:[%s18862_s8 + $0xb64] ss:$16 sps:$4 sm:$0xff]   ;;  %v16468_v18 = vld [vmem:[%s18862_s8 + $0xb6c] ss:$16 sps:$4 sm:$0xff]  }
 0x183   : > { %11606 = vmatpush1.bf16.msra.mxu0 %v16373_v19  ;;  %12754 = vmatpush1.bf16.msra.mxu1 %v16376_v20  ;;  %v16463_v19 = vld [vmem:[%s18862_s8 + $0xb60] ss:$16 sps:$4 sm:$0xff]   ;;  %v16466_v20 = vld [vmem:[%s18862_s8 + $0xb68] ss:$16 sps:$4 sm:$0xff]  }
 0x184   : > { %11607 = vmatprep.subr.bf16.mxu0 %v16381_v22  ;;  %12755 = vmatprep.subr.bf16.mxu1 %v16384_v23  ;;  %v16471_v22 = vld [vmem:[%s18862_s8 + $0xb84] ss:$16 sps:$4 sm:$0xff]   ;;  %v16474_v23 = vld [vmem:[%s18862_s8 + $0xb8c] ss:$16 sps:$4 sm:$0xff]  }
 0x187   : > { %11608 = vmatpush1.bf16.msra.mxu0 %v16379_v24  ;;  %12756 = vmatpush1.bf16.msra.mxu1 %v16382_v26  ;;  %v16469_v24 = vld [vmem:[%s18862_s8 + $0xb80] ss:$16 sps:$4 sm:$0xff]   ;;  %v16472_v26 = vld [vmem:[%s18862_s8 + $0xb88] ss:$16 sps:$4 sm:$0xff]  }
 0x188   : > { %11609 = vmatprep.subr.bf16.mxu0 %v16387_v27  ;;  %12757 = vmatprep.subr.bf16.mxu1 %v16390_v28  ;;  %v16477_v27 = vld [vmem:[%s18862_s8 + $0xba4] ss:$16 sps:$4 sm:$0xff]   ;;  %v16480_v28 = vld [vmem:[%s18862_s8 + $0xbac] ss:$16 sps:$4 sm:$0xff]  }
 0x18b   : > { %11610 = vmatpush1.bf16.msra.mxu0 %v16385_v29  ;;  %12758 = vmatpush1.bf16.msra.mxu1 %v16388_v30  ;;  %v16475_v29 = vld [vmem:[%s18862_s8 + $0xba0] ss:$16 sps:$4 sm:$0xff]   ;;  %v16478_v30 = vld [vmem:[%s18862_s8 + $0xba8] ss:$16 sps:$4 sm:$0xff]  }
 0x18c   : > { %11611 = vmatprep.subr.bf16.mxu0 %v16393_v15  ;;  %12759 = vmatprep.subr.bf16.mxu1 %v16396_v31  ;;  %v16483_v15 = vld [vmem:[%s18862_s8 + $0xbc4] ss:$16 sps:$4 sm:$0xff]   ;;  %v16486_v31 = vld [vmem:[%s18862_s8 + $0xbcc] ss:$16 sps:$4 sm:$0xff]  }
 0x18f   : > { %11612 = vmatpush1.bf16.msra.mxu0 %v16391_v32  ;;  %12760 = vmatpush1.bf16.msra.mxu1 %v16394_v33  ;;  %v18611_v32 = vld [vmem:[%s21012_s0 + $0x8] sm:$0xff] }
 0x190   : > { %11622 = vmatprep.subr.bf16.mxu0 %v16399_v25  ;;  %12770 = vmatprep.subr.bf16.mxu1 %v16402_v34  ;;  %v2107_v33 = vcombine.high %v18611_v32, %v18611_v32  ;;  %v16481_v25 = vld [vmem:[%s18862_s8 + $0xbc0] ss:$16 sps:$4 sm:$0xff]   ;;  %v16484_v34 = vld [vmem:[%s18862_s8 + $0xbc8] ss:$16 sps:$4 sm:$0xff]  }
 0x191   : > { %v16565_v32 = vld [vmem:[%s18862_s8 + $0xd80] ss:$16 sps:$4 sm:$0xff]  }
 0x192   : > { %11614 = vmatmul.mubr.bf16.vlgmr.msra.gmra.mrb[0].mxu0 %v19252_v13  ;;  %12762 = vmatmul.mubr.bf16.vlgmr.msra.gmra.mrb[0].mxu1 %v19252_v13 }
 0x193   : > { %11623 = vmatpush1.bf16.msra.mxu0 %v16397_v36  ;;  %12771 = vmatpush1.bf16.msra.mxu1 %v16400_v37  ;;  %v16489_v36 = vld [vmem:[%s18862_s8 + $0xbe4] ss:$16 sps:$4 sm:$0xff]   ;;  %v16492_v37 = vld [vmem:[%s18862_s8 + $0xbec] ss:$16 sps:$4 sm:$0xff]  }
 0x194   : > { %11624 = vmatprep.subr.bf16.mxu0 %v16405_v38  ;;  %12772 = vmatprep.subr.bf16.mxu1 %v16408_v39  ;;  %v19322_v38 = vrot.slane %v2107_v33, %v18921_v49  ;;  %v16487_v39 = vld [vmem:[%s18862_s8 + $0xbe0] ss:$16 sps:$4 sm:$0xff]   ;;  %v16568_v33 = vld [vmem:[%s18862_s8 + $0xd88] ss:$16 sps:$4 sm:$0xff]  }
 0x195   : > { %11654 = vmatprep.mubr.bf16.mxu0 %v2154_v40  ;;  %12802 = vmatprep.mubr.bf16.mxu1 %v2154_v40  ;;  %v16490_v40 = vld [vmem:[%s18862_s8 + $0xbe8] ss:$16 sps:$4 sm:$0xff]  }
 0x197   : > { %11625 = vmatpush1.bf16.msra.mxu0 %v16403_v21  ;;  %12773 = vmatpush1.bf16.msra.mxu1 %v16406_v41  ;;  %v16495_v21 = vld [vmem:[%s18862_s8 + $0xc04] ss:$16 sps:$4 sm:$0xff]   ;;  %v16498_v41 = vld [vmem:[%s18862_s8 + $0xc0c] ss:$16 sps:$4 sm:$0xff]  }
 0x198   : > { %11626 = vmatprep.subr.bf16.mxu0 %v16411_v43  ;;  %12774 = vmatprep.subr.bf16.mxu1 %v16414_v44  ;;  %v2123_v43 = vcombine.high %v19322_v38, %v19322_v38  ;;  %v2152_v44 = vcombine.high %v19252_v13, %v19252_v13  ;;  %v16499_v13 = vld [vmem:[%s18862_s8 + $0xc20] ss:$16 sps:$4 sm:$0xff]  }
 0x19b   : > { %11627 = vmatpush1.bf16.msra.mxu0 %v16409_v35  ;;  %12775 = vmatpush1.bf16.msra.mxu1 %v16412_v45  ;;  %v16493_v35 = vld [vmem:[%s18862_s8 + $0xc00] ss:$16 sps:$4 sm:$0xff]   ;;  %v16496_v45 = vld [vmem:[%s18862_s8 + $0xc08] ss:$16 sps:$4 sm:$0xff]  }
 0x19c   : > { %11628 = vmatprep.subr.bf16.mxu0 %v16417_v46  ;;  %12776 = vmatprep.subr.bf16.mxu1 %v16420_v47  ;;  %v16501_v46 = vld [vmem:[%s18862_s8 + $0xc24] ss:$16 sps:$4 sm:$0xff]   ;;  %v16504_v47 = vld [vmem:[%s18862_s8 + $0xc2c] ss:$16 sps:$4 sm:$0xff]  }
 0x19f   : > { %11629 = vmatpush1.bf16.msra.mxu0 %v16415_v48  ;;  %12777 = vmatpush1.bf16.msra.mxu1 %v16418_v50  ;;  %v19337_v48 = vrot.slane %v2123_v43, %v18921_v49  ;;  %v16502_v50 = vld [vmem:[%s18862_s8 + $0xc28] ss:$16 sps:$4 sm:$0xff]   ;;  %v16585_v43 = vld [vmem:[%s18862_s8 + $0xde4] ss:$16 sps:$4 sm:$0xff]  }
 0x1a0   : > { %11630 = vmatprep.subr.bf16.mxu0 %v16423_v51  ;;  %12778 = vmatprep.subr.bf16.mxu1 %v16426_v53  ;;  %v16507_v51 = vld [vmem:[%s18862_s8 + $0xc44] ss:$16 sps:$4 sm:$0xff]   ;;  %v16510_v53 = vld [vmem:[%s18862_s8 + $0xc4c] ss:$16 sps:$4 sm:$0xff]  }
 0x1a3   : > { %11631 = vmatpush1.bf16.msra.mxu0 %v16421_v54  ;;  %12779 = vmatpush1.bf16.msra.mxu1 %v16424_v55  ;;  %v16505_v54 = vld [vmem:[%s18862_s8 + $0xc40] ss:$16 sps:$4 sm:$0xff]   ;;  %v16508_v55 = vld [vmem:[%s18862_s8 + $0xc48] ss:$16 sps:$4 sm:$0xff]  }
 0x1a4   : > { %11632 = vmatprep.subr.bf16.mxu0 %v16429_v56  ;;  %12780 = vmatprep.subr.bf16.mxu1 %v16432_v57  ;;  %v16513_v56 = vld [vmem:[%s18862_s8 + $0xc64] ss:$16 sps:$4 sm:$0xff]   ;;  %v16516_v57 = vld [vmem:[%s18862_s8 + $0xc6c] ss:$16 sps:$4 sm:$0xff]  }
 0x1a7   : > { %11633 = vmatpush1.bf16.msra.mxu0 %v16427_v58  ;;  %12781 = vmatpush1.bf16.msra.mxu1 %v16430_v59  ;;  %v16511_v58 = vld [vmem:[%s18862_s8 + $0xc60] ss:$16 sps:$4 sm:$0xff]   ;;  %v16514_v59 = vld [vmem:[%s18862_s8 + $0xc68] ss:$16 sps:$4 sm:$0xff]  }
 0x1a8   : > { %11634 = vmatprep.subr.bf16.mxu0 %v16435_v60  ;;  %12782 = vmatprep.subr.bf16.mxu1 %v16438_v61  ;;  %v16519_v60 = vld [vmem:[%s18862_s8 + $0xc84] ss:$16 sps:$4 sm:$0xff]   ;;  %v16522_v61 = vld [vmem:[%s18862_s8 + $0xc8c] ss:$16 sps:$4 sm:$0xff]  }
 0x1ab   : > { %11635 = vmatpush1.bf16.msra.mxu0 %v16433_v62  ;;  %12783 = vmatpush1.bf16.msra.mxu1 %v16436_v63  ;;  %v16517_v62 = vld [vmem:[%s18862_s8 + $0xc80] ss:$16 sps:$4 sm:$0xff]   ;;  %v16520_v63 = vld [vmem:[%s18862_s8 + $0xc88] ss:$16 sps:$4 sm:$0xff]  }
 0x1ac   : > { %11636 = vmatprep.subr.bf16.mxu0 %v16441_v0  ;;  %12784 = vmatprep.subr.bf16.mxu1 %v16444_v1  ;;  %v16525_v0 = vld [vmem:[%s18862_s8 + $0xca4] ss:$16 sps:$4 sm:$0xff]   ;;  %v16528_v1 = vld [vmem:[%s18862_s8 + $0xcac] ss:$16 sps:$4 sm:$0xff]  }
 0x1af   : > { %11637 = vmatpush1.bf16.msra.mxu0 %v16439_v2  ;;  %12785 = vmatpush1.bf16.msra.mxu1 %v16442_v3  ;;  %v16523_v2 = vld [vmem:[%s18862_s8 + $0xca0] ss:$16 sps:$4 sm:$0xff]   ;;  %v16526_v3 = vld [vmem:[%s18862_s8 + $0xca8] ss:$16 sps:$4 sm:$0xff]  }
 0x1b0   : > { %11638 = vmatprep.subr.bf16.mxu0 %v16447_v4  ;;  %12786 = vmatprep.subr.bf16.mxu1 %v16450_v5  ;;  %v16531_v4 = vld [vmem:[%s18862_s8 + $0xcc4] ss:$16 sps:$4 sm:$0xff]   ;;  %v16534_v5 = vld [vmem:[%s18862_s8 + $0xccc] ss:$16 sps:$4 sm:$0xff]  }
 0x1b3   : > { %11639 = vmatpush1.bf16.msra.mxu0 %v16445_v6  ;;  %12787 = vmatpush1.bf16.msra.mxu1 %v16448_v7  ;;  %v16529_v6 = vld [vmem:[%s18862_s8 + $0xcc0] ss:$16 sps:$4 sm:$0xff]   ;;  %v16532_v7 = vld [vmem:[%s18862_s8 + $0xcc8] ss:$16 sps:$4 sm:$0xff]  }
 0x1b4   : > { %11640 = vmatprep.subr.bf16.mxu0 %v16453_v8  ;;  %12788 = vmatprep.subr.bf16.mxu1 %v16456_v9  ;;  %v16537_v8 = vld [vmem:[%s18862_s8 + $0xce4] ss:$16 sps:$4 sm:$0xff]   ;;  %v16540_v9 = vld [vmem:[%s18862_s8 + $0xcec] ss:$16 sps:$4 sm:$0xff]  }
 0x1b7   : > { %11641 = vmatpush1.bf16.msra.mxu0 %v16451_v10  ;;  %12789 = vmatpush1.bf16.msra.mxu1 %v16454_v11  ;;  %v16535_v10 = vld [vmem:[%s18862_s8 + $0xce0] ss:$16 sps:$4 sm:$0xff]   ;;  %v16538_v11 = vld [vmem:[%s18862_s8 + $0xce8] ss:$16 sps:$4 sm:$0xff]  }
 0x1b8   : > { %11642 = vmatprep.subr.bf16.mxu0 %v16459_v12  ;;  %12790 = vmatprep.subr.bf16.mxu1 %v16462_v14  ;;  %v16543_v12 = vld [vmem:[%s18862_s8 + $0xd04] ss:$16 sps:$4 sm:$0xff]   ;;  %v16546_v14 = vld [vmem:[%s18862_s8 + $0xd0c] ss:$16 sps:$4 sm:$0xff]  }
 0x1bb   : > { %11643 = vmatpush1.bf16.msra.mxu0 %v16457_v16  ;;  %12791 = vmatpush1.bf16.msra.mxu1 %v16460_v52  ;;  %v16541_v16 = vld [vmem:[%s18862_s8 + $0xd00] ss:$16 sps:$4 sm:$0xff]   ;;  %v16544_v52 = vld [vmem:[%s18862_s8 + $0xd08] ss:$16 sps:$4 sm:$0xff]  }
 0x1bc   : > { %11644 = vmatprep.subr.bf16.mxu0 %v16465_v17  ;;  %12792 = vmatprep.subr.bf16.mxu1 %v16468_v18  ;;  %v16549_v17 = vld [vmem:[%s18862_s8 + $0xd24] ss:$16 sps:$4 sm:$0xff]   ;;  %v16552_v18 = vld [vmem:[%s18862_s8 + $0xd2c] ss:$16 sps:$4 sm:$0xff]  }
 0x1bf   : > { %11645 = vmatpush1.bf16.msra.mxu0 %v16463_v19  ;;  %12793 = vmatpush1.bf16.msra.mxu1 %v16466_v20  ;;  %v16547_v19 = vld [vmem:[%s18862_s8 + $0xd20] ss:$16 sps:$4 sm:$0xff]   ;;  %v16550_v20 = vld [vmem:[%s18862_s8 + $0xd28] ss:$16 sps:$4 sm:$0xff]  }
 0x1c0   : > { %11646 = vmatprep.subr.bf16.mxu0 %v16471_v22  ;;  %12794 = vmatprep.subr.bf16.mxu1 %v16474_v23  ;;  %v16555_v22 = vld [vmem:[%s18862_s8 + $0xd44] ss:$16 sps:$4 sm:$0xff]   ;;  %v16558_v23 = vld [vmem:[%s18862_s8 + $0xd4c] ss:$16 sps:$4 sm:$0xff]  }
 0x1c3   : > { %11647 = vmatpush1.bf16.msra.mxu0 %v16469_v24  ;;  %12795 = vmatpush1.bf16.msra.mxu1 %v16472_v26  ;;  %v16553_v24 = vld [vmem:[%s18862_s8 + $0xd40] ss:$16 sps:$4 sm:$0xff]   ;;  %v16556_v26 = vld [vmem:[%s18862_s8 + $0xd48] ss:$16 sps:$4 sm:$0xff]  }
 0x1c4   : > { %11648 = vmatprep.subr.bf16.mxu0 %v16477_v27  ;;  %12796 = vmatprep.subr.bf16.mxu1 %v16480_v28  ;;  %v16561_v27 = vld [vmem:[%s18862_s8 + $0xd64] ss:$16 sps:$4 sm:$0xff]   ;;  %v16564_v28 = vld [vmem:[%s18862_s8 + $0xd6c] ss:$16 sps:$4 sm:$0xff]  }
 0x1c7   : > { %11649 = vmatpush1.bf16.msra.mxu0 %v16475_v29  ;;  %12797 = vmatpush1.bf16.msra.mxu1 %v16478_v30  ;;  %v16559_v29 = vld [vmem:[%s18862_s8 + $0xd60] ss:$16 sps:$4 sm:$0xff]   ;;  %v16562_v30 = vld [vmem:[%s18862_s8 + $0xd68] ss:$16 sps:$4 sm:$0xff]  }
 0x1c8   : > { %11650 = vmatprep.subr.bf16.mxu0 %v16483_v15  ;;  %12798 = vmatprep.subr.bf16.mxu1 %v16486_v31  ;;  %v16567_v15 = vld [vmem:[%s18862_s8 + $0xd84] ss:$16 sps:$4 sm:$0xff]   ;;  %v16570_v31 = vld [vmem:[%s18862_s8 + $0xd8c] ss:$16 sps:$4 sm:$0xff]  }
 0x1cb   : > { %11651 = vmatpush1.bf16.msra.mxu0 %v16481_v25  ;;  %12799 = vmatpush1.bf16.msra.mxu1 %v16484_v34  ;;  %v16573_v25 = vld [vmem:[%s18862_s8 + $0xda4] ss:$16 sps:$4 sm:$0xff]   ;;  %v16576_v34 = vld [vmem:[%s18862_s8 + $0xdac] ss:$16 sps:$4 sm:$0xff]  }
 0x1cc   : > { %11652 = vmatprep.subr.bf16.mxu0 %v16489_v36  ;;  %12800 = vmatprep.subr.bf16.mxu1 %v16492_v37  ;;  %v16571_v36 = vld [vmem:[%s18862_s8 + $0xda0] ss:$16 sps:$4 sm:$0xff]   ;;  %v16574_v37 = vld [vmem:[%s18862_s8 + $0xda8] ss:$16 sps:$4 sm:$0xff]  }
 0x1cf   : > { %11653 = vmatpush1.bf16.msra.mxu0 %v16487_v39  ;;  %12801 = vmatpush1.bf16.msra.mxu1 %v16490_v40  ;;  %v16579_v39 = vld [vmem:[%s18862_s8 + $0xdc4] ss:$16 sps:$4 sm:$0xff]   ;;  %v16582_v40 = vld [vmem:[%s18862_s8 + $0xdcc] ss:$16 sps:$4 sm:$0xff]  }
 0x1d0   : > { %11663 = vmatprep.subr.bf16.mxu0 %v16495_v21  ;;  %12811 = vmatprep.subr.bf16.mxu1 %v16498_v41  ;;  %v16577_v21 = vld [vmem:[%s18862_s8 + $0xdc0] ss:$16 sps:$4 sm:$0xff]   ;;  %v16580_v41 = vld [vmem:[%s18862_s8 + $0xdc8] ss:$16 sps:$4 sm:$0xff]  }
 0x1d2   : > { %11655 = vmatmul.mubr.bf16.vlgmr.msra.gmra.mrb[0].mxu0 %v2152_v44  ;;  %12803 = vmatmul.mubr.bf16.vlgmr.msra.gmra.mrb[0].mxu1 %v2152_v44  ;;  %v16588_v44 = vld [vmem:[%s18862_s8 + $0xdec] ss:$16 sps:$4 sm:$0xff]  }
 0x1d3   : > { %11664 = vmatpush1.bf16.msra.mxu0 %v16493_v35  ;;  %12812 = vmatpush1.bf16.msra.mxu1 %v16496_v45  ;;  %v16583_v35 = vld [vmem:[%s18862_s8 + $0xde0] ss:$16 sps:$4 sm:$0xff]   ;;  %v16586_v45 = vld [vmem:[%s18862_s8 + $0xde8] ss:$16 sps:$4 sm:$0xff]  }
 0x1d4   : > { %11665 = vmatprep.subr.bf16.mxu0 %v16501_v46  ;;  %12813 = vmatprep.subr.bf16.mxu1 %v16504_v47  ;;  %v16592_v46 = vld [vmem:[%s18862_s8 + $0xe04] ss:$16 sps:$4 sm:$0xff]   ;;  %v16595_v47 = vld [vmem:[%s18862_s8 + $0xe0c] ss:$16 sps:$4 sm:$0xff]  }
 0x1d5   : > { %11695 = vmatprep.mubr.bf16.mxu0 %v19337_v48  ;;  %12843 = vmatprep.mubr.bf16.mxu1 %v19337_v48 }
 0x1d7   : > { %11666 = vmatpush1.bf16.msra.mxu0 %v16499_v13  ;;  %12814 = vmatpush1.bf16.msra.mxu1 %v16502_v50  ;;  %v19403_v13 = vrot.slane %v19322_v38, %v18921_v49  ;;  %v16590_v50 = vld [vmem:[%s18862_s8 + $0xe00] ss:$16 sps:$4 sm:$0xff]  }
 0x1d8   : > { %11667 = vmatprep.subr.bf16.mxu0 %v16507_v51  ;;  %12815 = vmatprep.subr.bf16.mxu1 %v16510_v53  ;;  %v16593_v51 = vld [vmem:[%s18862_s8 + $0xe08] ss:$16 sps:$4 sm:$0xff]   ;;  %v16598_v53 = vld [vmem:[%s18862_s8 + $0xe24] ss:$16 sps:$4 sm:$0xff]   ;;  %v16596_v38 = vld [vmem:[%s18862_s8 + $0xe20] ss:$16 sps:$4 sm:$0xff]  }
 0x1db   : > { %11668 = vmatpush1.bf16.msra.mxu0 %v16505_v54  ;;  %12816 = vmatpush1.bf16.msra.mxu1 %v16508_v55  ;;  %v16601_v54 = vld [vmem:[%s18862_s8 + $0xe2c] ss:$16 sps:$4 sm:$0xff]   ;;  %v2155_v55 = vcombine.high %v19337_v48, %v19337_v48  ;;  %v16602_v48 = vld [vmem:[%s18862_s8 + $0xe40] ss:$16 sps:$4 sm:$0xff]  }
 0x1dc   : > { %11669 = vmatprep.subr.bf16.mxu0 %v16513_v56  ;;  %12817 = vmatprep.subr.bf16.mxu1 %v16516_v57  ;;  %v16599_v56 = vld [vmem:[%s18862_s8 + $0xe28] ss:$16 sps:$4 sm:$0xff]   ;;  %v16604_v57 = vld [vmem:[%s18862_s8 + $0xe44] ss:$16 sps:$4 sm:$0xff]  }
 0x1df   : > { %11670 = vmatpush1.bf16.msra.mxu0 %v16511_v58  ;;  %12818 = vmatpush1.bf16.msra.mxu1 %v16514_v59  ;;  %v16607_v58 = vld [vmem:[%s18862_s8 + $0xe4c] ss:$16 sps:$4 sm:$0xff]   ;;  %v16605_v59 = vld [vmem:[%s18862_s8 + $0xe48] ss:$16 sps:$4 sm:$0xff]  }
 0x1e0   : > { %11671 = vmatprep.subr.bf16.mxu0 %v16519_v60  ;;  %12819 = vmatprep.subr.bf16.mxu1 %v16522_v61  ;;  %v16610_v60 = vld [vmem:[%s18862_s8 + $0xe64] ss:$16 sps:$4 sm:$0xff]   ;;  %v16613_v61 = vld [vmem:[%s18862_s8 + $0xe6c] ss:$16 sps:$4 sm:$0xff]  }
 0x1e3   : > { %11672 = vmatpush1.bf16.msra.mxu0 %v16517_v62  ;;  %12820 = vmatpush1.bf16.msra.mxu1 %v16520_v63  ;;  %v16608_v62 = vld [vmem:[%s18862_s8 + $0xe60] ss:$16 sps:$4 sm:$0xff]   ;;  %v16611_v63 = vld [vmem:[%s18862_s8 + $0xe68] ss:$16 sps:$4 sm:$0xff]  }
 0x1e4   : > { %11673 = vmatprep.subr.bf16.mxu0 %v16525_v0  ;;  %12821 = vmatprep.subr.bf16.mxu1 %v16528_v1  ;;  %v16616_v0 = vld [vmem:[%s18862_s8 + $0xe84] ss:$16 sps:$4 sm:$0xff]   ;;  %v16619_v1 = vld [vmem:[%s18862_s8 + $0xe8c] ss:$16 sps:$4 sm:$0xff]  }
 0x1e7   : > { %11674 = vmatpush1.bf16.msra.mxu0 %v16523_v2  ;;  %12822 = vmatpush1.bf16.msra.mxu1 %v16526_v3  ;;  %v16614_v2 = vld [vmem:[%s18862_s8 + $0xe80] ss:$16 sps:$4 sm:$0xff]   ;;  %v16617_v3 = vld [vmem:[%s18862_s8 + $0xe88] ss:$16 sps:$4 sm:$0xff]  }
 0x1e8   : > { %11675 = vmatprep.subr.bf16.mxu0 %v16531_v4  ;;  %12823 = vmatprep.subr.bf16.mxu1 %v16534_v5  ;;  %v16622_v4 = vld [vmem:[%s18862_s8 + $0xea4] ss:$16 sps:$4 sm:$0xff]   ;;  %v16625_v5 = vld [vmem:[%s18862_s8 + $0xeac] ss:$16 sps:$4 sm:$0xff]  }
 0x1eb   : > { %11676 = vmatpush1.bf16.msra.mxu0 %v16529_v6  ;;  %12824 = vmatpush1.bf16.msra.mxu1 %v16532_v7  ;;  %v16620_v6 = vld [vmem:[%s18862_s8 + $0xea0] ss:$16 sps:$4 sm:$0xff]   ;;  %v16623_v7 = vld [vmem:[%s18862_s8 + $0xea8] ss:$16 sps:$4 sm:$0xff]  }
 0x1ec   : > { %11677 = vmatprep.subr.bf16.mxu0 %v16537_v8  ;;  %12825 = vmatprep.subr.bf16.mxu1 %v16540_v9  ;;  %v16628_v8 = vld [vmem:[%s18862_s8 + $0xec4] ss:$16 sps:$4 sm:$0xff]   ;;  %v16631_v9 = vld [vmem:[%s18862_s8 + $0xecc] ss:$16 sps:$4 sm:$0xff]  }
 0x1ef   : > { %11678 = vmatpush1.bf16.msra.mxu0 %v16535_v10  ;;  %12826 = vmatpush1.bf16.msra.mxu1 %v16538_v11  ;;  %v16626_v10 = vld [vmem:[%s18862_s8 + $0xec0] ss:$16 sps:$4 sm:$0xff]   ;;  %v16629_v11 = vld [vmem:[%s18862_s8 + $0xec8] ss:$16 sps:$4 sm:$0xff]  }
 0x1f0   : > { %11679 = vmatprep.subr.bf16.mxu0 %v16543_v12  ;;  %12827 = vmatprep.subr.bf16.mxu1 %v16546_v14  ;;  %v16634_v12 = vld [vmem:[%s18862_s8 + $0xee4] ss:$16 sps:$4 sm:$0xff]   ;;  %v16637_v14 = vld [vmem:[%s18862_s8 + $0xeec] ss:$16 sps:$4 sm:$0xff]  }
 0x1f3   : > { %11680 = vmatpush1.bf16.msra.mxu0 %v16541_v16  ;;  %12828 = vmatpush1.bf16.msra.mxu1 %v16544_v52  ;;  %v16632_v16 = vld [vmem:[%s18862_s8 + $0xee0] ss:$16 sps:$4 sm:$0xff]   ;;  %v16635_v52 = vld [vmem:[%s18862_s8 + $0xee8] ss:$16 sps:$4 sm:$0xff]  }
 0x1f4   : > { %11681 = vmatprep.subr.bf16.mxu0 %v16549_v17  ;;  %12829 = vmatprep.subr.bf16.mxu1 %v16552_v18  ;;  %v16640_v17 = vld [vmem:[%s18862_s8 + $0xf04] ss:$16 sps:$4 sm:$0xff]   ;;  %v16643_v18 = vld [vmem:[%s18862_s8 + $0xf0c] ss:$16 sps:$4 sm:$0xff]  }
 0x1f7   : > { %11682 = vmatpush1.bf16.msra.mxu0 %v16547_v19  ;;  %12830 = vmatpush1.bf16.msra.mxu1 %v16550_v20  ;;  %v16638_v19 = vld [vmem:[%s18862_s8 + $0xf00] ss:$16 sps:$4 sm:$0xff]   ;;  %v16641_v20 = vld [vmem:[%s18862_s8 + $0xf08] ss:$16 sps:$4 sm:$0xff]  }
 0x1f8   : > { %11683 = vmatprep.subr.bf16.mxu0 %v16555_v22  ;;  %12831 = vmatprep.subr.bf16.mxu1 %v16558_v23  ;;  %v16646_v22 = vld [vmem:[%s18862_s8 + $0xf24] ss:$16 sps:$4 sm:$0xff]   ;;  %v16649_v23 = vld [vmem:[%s18862_s8 + $0xf2c] ss:$16 sps:$4 sm:$0xff]  }
 0x1fb   : > { %11684 = vmatpush1.bf16.msra.mxu0 %v16553_v24  ;;  %12832 = vmatpush1.bf16.msra.mxu1 %v16556_v26  ;;  %v16644_v24 = vld [vmem:[%s18862_s8 + $0xf20] ss:$16 sps:$4 sm:$0xff]   ;;  %v16647_v26 = vld [vmem:[%s18862_s8 + $0xf28] ss:$16 sps:$4 sm:$0xff]  }
 0x1fc   : > { %11685 = vmatprep.subr.bf16.mxu0 %v16561_v27  ;;  %12833 = vmatprep.subr.bf16.mxu1 %v16564_v28  ;;  %v16652_v27 = vld [vmem:[%s18862_s8 + $0xf44] ss:$16 sps:$4 sm:$0xff]   ;;  %v16655_v28 = vld [vmem:[%s18862_s8 + $0xf4c] ss:$16 sps:$4 sm:$0xff]  }
 0x1ff   : > { %11686 = vmatpush1.bf16.msra.mxu0 %v16559_v29  ;;  %12834 = vmatpush1.bf16.msra.mxu1 %v16562_v30  ;;  %v16650_v29 = vld [vmem:[%s18862_s8 + $0xf40] ss:$16 sps:$4 sm:$0xff]   ;;  %v16653_v30 = vld [vmem:[%s18862_s8 + $0xf48] ss:$16 sps:$4 sm:$0xff]  }
 0x200   : > { %11687 = vmatprep.subr.bf16.mxu0 %v16567_v15  ;;  %12835 = vmatprep.subr.bf16.mxu1 %v16570_v31  ;;  %v16658_v15 = vld [vmem:[%s18862_s8 + $0xf64] ss:$16 sps:$4 sm:$0xff]   ;;  %v16661_v31 = vld [vmem:[%s18862_s8 + $0xf6c] ss:$16 sps:$4 sm:$0xff]  }
 0x203   : > { %11688 = vmatpush1.bf16.msra.mxu0 %v16565_v32  ;;  %12836 = vmatpush1.bf16.msra.mxu1 %v16568_v33  ;;  %v16656_v32 = vld [vmem:[%s18862_s8 + $0xf60] ss:$16 sps:$4 sm:$0xff]   ;;  %v16659_v33 = vld [vmem:[%s18862_s8 + $0xf68] ss:$16 sps:$4 sm:$0xff]  }
 0x204   : > { %11689 = vmatprep.subr.bf16.mxu0 %v16573_v25  ;;  %12837 = vmatprep.subr.bf16.mxu1 %v16576_v34  ;;  %v16664_v25 = vld [vmem:[%s18862_s8 + $0xf84] ss:$16 sps:$4 sm:$0xff]   ;;  %v16667_v34 = vld [vmem:[%s18862_s8 + $0xf8c] ss:$16 sps:$4 sm:$0xff]  }
 0x207   : > { %11690 = vmatpush1.bf16.msra.mxu0 %v16571_v36  ;;  %12838 = vmatpush1.bf16.msra.mxu1 %v16574_v37  ;;  %v16662_v36 = vld [vmem:[%s18862_s8 + $0xf80] ss:$16 sps:$4 sm:$0xff]   ;;  %v16665_v37 = vld [vmem:[%s18862_s8 + $0xf88] ss:$16 sps:$4 sm:$0xff]  }
 0x208   : > { %11691 = vmatprep.subr.bf16.mxu0 %v16579_v39  ;;  %12839 = vmatprep.subr.bf16.mxu1 %v16582_v40  ;;  %v16670_v39 = vld [vmem:[%s18862_s8 + $0xfa4] ss:$16 sps:$4 sm:$0xff]   ;;  %v16673_v40 = vld [vmem:[%s18862_s8 + $0xfac] ss:$16 sps:$4 sm:$0xff]  }
 0x20b   : > { %11692 = vmatpush1.bf16.msra.mxu0 %v16577_v21  ;;  %12840 = vmatpush1.bf16.msra.mxu1 %v16580_v41  ;;  %v16668_v21 = vld [vmem:[%s18862_s8 + $0xfa0] ss:$16 sps:$4 sm:$0xff]   ;;  %v16671_v41 = vld [vmem:[%s18862_s8 + $0xfa8] ss:$16 sps:$4 sm:$0xff]  }
 0x20c   : > { %11693 = vmatprep.subr.bf16.mxu0 %v16585_v43  ;;  %12841 = vmatprep.subr.bf16.mxu1 %v16588_v44  ;;  %v16676_v43 = vld [vmem:[%s18862_s8 + $0xfc4] ss:$16 sps:$4 sm:$0xff]   ;;  %v16679_v44 = vld [vmem:[%s18862_s8 + $0xfcc] ss:$16 sps:$4 sm:$0xff]  }
 0x20f   : > { %11694 = vmatpush1.bf16.msra.mxu0 %v16583_v35  ;;  %12842 = vmatpush1.bf16.msra.mxu1 %v16586_v45  ;;  %v19468_v35 = vld.sshfl [vmem:[%s21012_s0 + $0x10] sm:$0xff pattern:$0x75316420] }
 0x210   : > { %11704 = vmatprep.subr.bf16.mxu0 %v16592_v46  ;;  %12852 = vmatprep.subr.bf16.mxu1 %v16595_v47  ;;  %v16674_v45 = vld [vmem:[%s18862_s8 + $0xfc0] ss:$16 sps:$4 sm:$0xff]   ;;  %v16677_v46 = vld [vmem:[%s18862_s8 + $0xfc8] ss:$16 sps:$4 sm:$0xff]   ;;  %v16682_v47 = vld [vmem:[%s18862_s8 + $0xfe4] ss:$16 sps:$4 sm:$0xff]  }
 0x212   : > { %11696 = vmatmul.mubr.bf16.vlgmr.msra.gmra.mrb[0].mxu0 %v19403_v13  ;;  %12844 = vmatmul.mubr.bf16.vlgmr.msra.gmra.mrb[0].mxu1 %v19403_v13 }
 0x213   : > { %11705 = vmatpush1.bf16.msra.mxu0 %v16590_v50  ;;  %12853 = vmatpush1.bf16.msra.mxu1 %v16593_v51  ;;  %v16685_v50 = vld [vmem:[%s18862_s8 + $0xfec] ss:$16 sps:$4 sm:$0xff]   ;;  %v16680_v51 = vld [vmem:[%s18862_s8 + $0xfe0] ss:$16 sps:$4 sm:$0xff]  }
 0x214   : > { %11706 = vmatprep.subr.bf16.mxu0 %v16598_v53  ;;  %12854 = vmatprep.subr.bf16.mxu1 %v16601_v54  ;;  %v16683_v53 = vld [vmem:[%s18862_s8 + $0xfe8] ss:$16 sps:$4 sm:$0xff]   ;;  %v16688_v54 = vld [vmem:[%s18862_s8 + $0x1004] ss:$16 sps:$4 sm:$0xff]  }
 0x215   : > { %11736 = vmatprep.mubr.bf16.mxu0 %v2155_v55  ;;  %12884 = vmatprep.mubr.bf16.mxu1 %v2155_v55  ;;  %v16691_v55 = vld [vmem:[%s18862_s8 + $0x100c] ss:$16 sps:$4 sm:$0xff]  }
 0x217   : > { %11707 = vmatpush1.bf16.msra.mxu0 %v16596_v38  ;;  %12855 = vmatpush1.bf16.msra.mxu1 %v16599_v56  ;;  %v2171_v38 = vcombine.high %v19468_v35, %v19468_v35  ;;  %v2153_v56 = vcombine.high %v19403_v13, %v19403_v13  ;;  %v16692_v13 = vld [vmem:[%s18862_s8 + $0x1020] ss:$16 sps:$4 sm:$0xff]  }
 0x218   : > { %11708 = vmatprep.subr.bf16.mxu0 %v16604_v57  ;;  %12856 = vmatprep.subr.bf16.mxu1 %v16607_v58  ;;  %v16686_v57 = vld [vmem:[%s18862_s8 + $0x1000] ss:$16 sps:$4 sm:$0xff]   ;;  %v16689_v58 = vld [vmem:[%s18862_s8 + $0x1008] ss:$16 sps:$4 sm:$0xff]  }
 0x21b   : > { %11709 = vmatpush1.bf16.msra.mxu0 %v16602_v48  ;;  %12857 = vmatpush1.bf16.msra.mxu1 %v16605_v59  ;;  %v16694_v48 = vld [vmem:[%s18862_s8 + $0x1024] ss:$16 sps:$4 sm:$0xff]   ;;  %v16697_v59 = vld [vmem:[%s18862_s8 + $0x102c] ss:$16 sps:$4 sm:$0xff]  }
 0x21c   : > { %11710 = vmatprep.subr.bf16.mxu0 %v16610_v60  ;;  %12858 = vmatprep.subr.bf16.mxu1 %v16613_v61  ;;  %v19487_v60 = vrot.slane %v2171_v38, %v18921_v49  ;;  %v16695_v61 = vld [vmem:[%s18862_s8 + $0x1028] ss:$16 sps:$4 sm:$0xff]   ;;  %v16778_v38 = vld [vmem:[%s18862_s8 + $0x11e4] ss:$16 sps:$4 sm:$0xff]  }
 0x21f   : > { %11711 = vmatpush1.bf16.msra.mxu0 %v16608_v62  ;;  %12859 = vmatpush1.bf16.msra.mxu1 %v16611_v63  ;;  %v16700_v62 = vld [vmem:[%s18862_s8 + $0x1044] ss:$16 sps:$4 sm:$0xff]   ;;  %v16703_v63 = vld [vmem:[%s18862_s8 + $0x104c] ss:$16 sps:$4 sm:$0xff]  }
 0x220   : > { %11712 = vmatprep.subr.bf16.mxu0 %v16616_v0  ;;  %12860 = vmatprep.subr.bf16.mxu1 %v16619_v1  ;;  %v16698_v0 = vld [vmem:[%s18862_s8 + $0x1040] ss:$16 sps:$4 sm:$0xff]   ;;  %v16701_v1 = vld [vmem:[%s18862_s8 + $0x1048] ss:$16 sps:$4 sm:$0xff]  }
 0x223   : > { %11713 = vmatpush1.bf16.msra.mxu0 %v16614_v2  ;;  %12861 = vmatpush1.bf16.msra.mxu1 %v16617_v3  ;;  %v16706_v2 = vld [vmem:[%s18862_s8 + $0x1064] ss:$16 sps:$4 sm:$0xff]   ;;  %v16709_v3 = vld [vmem:[%s18862_s8 + $0x106c] ss:$16 sps:$4 sm:$0xff]  }
 0x224   : > { %11714 = vmatprep.subr.bf16.mxu0 %v16622_v4  ;;  %12862 = vmatprep.subr.bf16.mxu1 %v16625_v5  ;;  %v16704_v4 = vld [vmem:[%s18862_s8 + $0x1060] ss:$16 sps:$4 sm:$0xff]   ;;  %v16707_v5 = vld [vmem:[%s18862_s8 + $0x1068] ss:$16 sps:$4 sm:$0xff]  }
 0x227   : > { %11715 = vmatpush1.bf16.msra.mxu0 %v16620_v6  ;;  %12863 = vmatpush1.bf16.msra.mxu1 %v16623_v7  ;;  %v16712_v6 = vld [vmem:[%s18862_s8 + $0x1084] ss:$16 sps:$4 sm:$0xff]   ;;  %v16715_v7 = vld [vmem:[%s18862_s8 + $0x108c] ss:$16 sps:$4 sm:$0xff]  }
 0x228   : > { %11716 = vmatprep.subr.bf16.mxu0 %v16628_v8  ;;  %12864 = vmatprep.subr.bf16.mxu1 %v16631_v9  ;;  %v16710_v8 = vld [vmem:[%s18862_s8 + $0x1080] ss:$16 sps:$4 sm:$0xff]   ;;  %v16713_v9 = vld [vmem:[%s18862_s8 + $0x1088] ss:$16 sps:$4 sm:$0xff]  }
 0x22b   : > { %11717 = vmatpush1.bf16.msra.mxu0 %v16626_v10  ;;  %12865 = vmatpush1.bf16.msra.mxu1 %v16629_v11  ;;  %v16718_v10 = vld [vmem:[%s18862_s8 + $0x10a4] ss:$16 sps:$4 sm:$0xff]   ;;  %v16721_v11 = vld [vmem:[%s18862_s8 + $0x10ac] ss:$16 sps:$4 sm:$0xff]  }
 0x22c   : > { %11718 = vmatprep.subr.bf16.mxu0 %v16634_v12  ;;  %12866 = vmatprep.subr.bf16.mxu1 %v16637_v14  ;;  %v16716_v12 = vld [vmem:[%s18862_s8 + $0x10a0] ss:$16 sps:$4 sm:$0xff]   ;;  %v16719_v14 = vld [vmem:[%s18862_s8 + $0x10a8] ss:$16 sps:$4 sm:$0xff]  }
 0x22f   : > { %11719 = vmatpush1.bf16.msra.mxu0 %v16632_v16  ;;  %12867 = vmatpush1.bf16.msra.mxu1 %v16635_v52  ;;  %v16724_v16 = vld [vmem:[%s18862_s8 + $0x10c4] ss:$16 sps:$4 sm:$0xff]   ;;  %v16727_v52 = vld [vmem:[%s18862_s8 + $0x10cc] ss:$16 sps:$4 sm:$0xff]  }
 0x230   : > { %11720 = vmatprep.subr.bf16.mxu0 %v16640_v17  ;;  %12868 = vmatprep.subr.bf16.mxu1 %v16643_v18  ;;  %v16722_v17 = vld [vmem:[%s18862_s8 + $0x10c0] ss:$16 sps:$4 sm:$0xff]   ;;  %v16725_v18 = vld [vmem:[%s18862_s8 + $0x10c8] ss:$16 sps:$4 sm:$0xff]  }
 0x233   : > { %11721 = vmatpush1.bf16.msra.mxu0 %v16638_v19  ;;  %12869 = vmatpush1.bf16.msra.mxu1 %v16641_v20  ;;  %v16730_v19 = vld [vmem:[%s18862_s8 + $0x10e4] ss:$16 sps:$4 sm:$0xff]   ;;  %v16733_v20 = vld [vmem:[%s18862_s8 + $0x10ec] ss:$16 sps:$4 sm:$0xff]  }
 0x234   : > { %11722 = vmatprep.subr.bf16.mxu0 %v16646_v22  ;;  %12870 = vmatprep.subr.bf16.mxu1 %v16649_v23  ;;  %v16728_v22 = vld [vmem:[%s18862_s8 + $0x10e0] ss:$16 sps:$4 sm:$0xff]   ;;  %v16731_v23 = vld [vmem:[%s18862_s8 + $0x10e8] ss:$16 sps:$4 sm:$0xff]  }
 0x237   : > { %11723 = vmatpush1.bf16.msra.mxu0 %v16644_v24  ;;  %12871 = vmatpush1.bf16.msra.mxu1 %v16647_v26  ;;  %v16736_v24 = vld [vmem:[%s18862_s8 + $0x1104] ss:$16 sps:$4 sm:$0xff]   ;;  %v16739_v26 = vld [vmem:[%s18862_s8 + $0x110c] ss:$16 sps:$4 sm:$0xff]  }
 0x238   : > { %11724 = vmatprep.subr.bf16.mxu0 %v16652_v27  ;;  %12872 = vmatprep.subr.bf16.mxu1 %v16655_v28  ;;  %v16734_v27 = vld [vmem:[%s18862_s8 + $0x1100] ss:$16 sps:$4 sm:$0xff]   ;;  %v16737_v28 = vld [vmem:[%s18862_s8 + $0x1108] ss:$16 sps:$4 sm:$0xff]  }
 0x23b   : > { %11725 = vmatpush1.bf16.msra.mxu0 %v16650_v29  ;;  %12873 = vmatpush1.bf16.msra.mxu1 %v16653_v30  ;;  %v16742_v29 = vld [vmem:[%s18862_s8 + $0x1124] ss:$16 sps:$4 sm:$0xff]   ;;  %v16745_v30 = vld [vmem:[%s18862_s8 + $0x112c] ss:$16 sps:$4 sm:$0xff]  }
 0x23c   : > { %11726 = vmatprep.subr.bf16.mxu0 %v16658_v15  ;;  %12874 = vmatprep.subr.bf16.mxu1 %v16661_v31  ;;  %v16740_v15 = vld [vmem:[%s18862_s8 + $0x1120] ss:$16 sps:$4 sm:$0xff]   ;;  %v16743_v31 = vld [vmem:[%s18862_s8 + $0x1128] ss:$16 sps:$4 sm:$0xff]  }
 0x23f   : > { %11727 = vmatpush1.bf16.msra.mxu0 %v16656_v32  ;;  %12875 = vmatpush1.bf16.msra.mxu1 %v16659_v33  ;;  %v16748_v32 = vld [vmem:[%s18862_s8 + $0x1144] ss:$16 sps:$4 sm:$0xff]   ;;  %v16751_v33 = vld [vmem:[%s18862_s8 + $0x114c] ss:$16 sps:$4 sm:$0xff]  }
 0x240   : > { %11728 = vmatprep.subr.bf16.mxu0 %v16664_v25  ;;  %12876 = vmatprep.subr.bf16.mxu1 %v16667_v34  ;;  %v16746_v25 = vld [vmem:[%s18862_s8 + $0x1140] ss:$16 sps:$4 sm:$0xff]   ;;  %v16749_v34 = vld [vmem:[%s18862_s8 + $0x1148] ss:$16 sps:$4 sm:$0xff]  }
 0x243   : > { %11729 = vmatpush1.bf16.msra.mxu0 %v16662_v36  ;;  %12877 = vmatpush1.bf16.msra.mxu1 %v16665_v37  ;;  %v16754_v36 = vld [vmem:[%s18862_s8 + $0x1164] ss:$16 sps:$4 sm:$0xff]   ;;  %v16757_v37 = vld [vmem:[%s18862_s8 + $0x116c] ss:$16 sps:$4 sm:$0xff]  }
 0x244   : > { %11730 = vmatprep.subr.bf16.mxu0 %v16670_v39  ;;  %12878 = vmatprep.subr.bf16.mxu1 %v16673_v40  ;;  %v16752_v39 = vld [vmem:[%s18862_s8 + $0x1160] ss:$16 sps:$4 sm:$0xff]   ;;  %v16755_v40 = vld [vmem:[%s18862_s8 + $0x1168] ss:$16 sps:$4 sm:$0xff]  }
 0x247   : > { %11731 = vmatpush1.bf16.msra.mxu0 %v16668_v21  ;;  %12879 = vmatpush1.bf16.msra.mxu1 %v16671_v41  ;;  %v16760_v21 = vld [vmem:[%s18862_s8 + $0x1184] ss:$16 sps:$4 sm:$0xff]   ;;  %v16763_v41 = vld [vmem:[%s18862_s8 + $0x118c] ss:$16 sps:$4 sm:$0xff]  }
 0x248   : > { %11732 = vmatprep.subr.bf16.mxu0 %v16676_v43  ;;  %12880 = vmatprep.subr.bf16.mxu1 %v16679_v44  ;;  %v16758_v43 = vld [vmem:[%s18862_s8 + $0x1180] ss:$16 sps:$4 sm:$0xff]   ;;  %v16761_v44 = vld [vmem:[%s18862_s8 + $0x1188] ss:$16 sps:$4 sm:$0xff]  }
 0x24b   : > { %11733 = vmatpush1.bf16.msra.mxu0 %v16674_v45  ;;  %12881 = vmatpush1.bf16.msra.mxu1 %v16677_v46  ;;  %v16766_v45 = vld [vmem:[%s18862_s8 + $0x11a4] ss:$16 sps:$4 sm:$0xff]   ;;  %v16769_v46 = vld [vmem:[%s18862_s8 + $0x11ac] ss:$16 sps:$4 sm:$0xff]  }
 0x24c   : > { %11734 = vmatprep.subr.bf16.mxu0 %v16682_v47  ;;  %12882 = vmatprep.subr.bf16.mxu1 %v16685_v50  ;;  %v16764_v47 = vld [vmem:[%s18862_s8 + $0x11a0] ss:$16 sps:$4 sm:$0xff]   ;;  %v16767_v50 = vld [vmem:[%s18862_s8 + $0x11a8] ss:$16 sps:$4 sm:$0xff]  }
 0x24f   : > { %11735 = vmatpush1.bf16.msra.mxu0 %v16680_v51  ;;  %12883 = vmatpush1.bf16.msra.mxu1 %v16683_v53  ;;  %v16772_v51 = vld [vmem:[%s18862_s8 + $0x11c4] ss:$16 sps:$4 sm:$0xff]   ;;  %v16775_v53 = vld [vmem:[%s18862_s8 + $0x11cc] ss:$16 sps:$4 sm:$0xff]  }
 0x250   : > { %11745 = vmatprep.subr.bf16.mxu0 %v16688_v54  ;;  %12893 = vmatprep.subr.bf16.mxu1 %v16691_v55  ;;  %v16770_v54 = vld [vmem:[%s18862_s8 + $0x11c0] ss:$16 sps:$4 sm:$0xff]   ;;  %v16773_v55 = vld [vmem:[%s18862_s8 + $0x11c8] ss:$16 sps:$4 sm:$0xff]  }
 0x252   : > { %11737 = vmatmul.mubr.bf16.vlgmr.msra.gmra.mrb[0].mxu0 %v2153_v56  ;;  %12885 = vmatmul.mubr.bf16.vlgmr.msra.gmra.mrb[0].mxu1 %v2153_v56  ;;  %v16781_v56 = vld [vmem:[%s18862_s8 + $0x11ec] ss:$16 sps:$4 sm:$0xff]  }
 0x253   : > { %11746 = vmatpush1.bf16.msra.mxu0 %v16686_v57  ;;  %12894 = vmatpush1.bf16.msra.mxu1 %v16689_v58  ;;  %v16776_v57 = vld [vmem:[%s18862_s8 + $0x11e0] ss:$16 sps:$4 sm:$0xff]   ;;  %v16779_v58 = vld [vmem:[%s18862_s8 + $0x11e8] ss:$16 sps:$4 sm:$0xff]  }
 0x254   : > { %11747 = vmatprep.subr.bf16.mxu0 %v16694_v48  ;;  %12895 = vmatprep.subr.bf16.mxu1 %v16697_v59  ;;  %v16784_v48 = vld [vmem:[%s18862_s8 + $0x1204] ss:$16 sps:$4 sm:$0xff]   ;;  %v16787_v59 = vld [vmem:[%s18862_s8 + $0x120c] ss:$16 sps:$4 sm:$0xff]  }
 0x255   : > { %11777 = vmatprep.mubr.bf16.mxu0 %v19487_v60  ;;  %12925 = vmatprep.mubr.bf16.mxu1 %v19487_v60 }
 0x257   : > { %11748 = vmatpush1.bf16.msra.mxu0 %v16692_v13  ;;  %12896 = vmatpush1.bf16.msra.mxu1 %v16695_v61  ;;  %v19553_v13 = vrot.slane %v19468_v35, %v18921_v49  ;;  %v16782_v61 = vld [vmem:[%s18862_s8 + $0x1200] ss:$16 sps:$4 sm:$0xff]  }
 0x258   : > { %11749 = vmatprep.subr.bf16.mxu0 %v16700_v62  ;;  %12897 = vmatprep.subr.bf16.mxu1 %v16703_v63  ;;  %v16785_v62 = vld [vmem:[%s18862_s8 + $0x1208] ss:$16 sps:$4 sm:$0xff]   ;;  %v16790_v63 = vld [vmem:[%s18862_s8 + $0x1224] ss:$16 sps:$4 sm:$0xff]   ;;  %v16788_v35 = vld [vmem:[%s18862_s8 + $0x1220] ss:$16 sps:$4 sm:$0xff]  }
 0x25b   : > { %11750 = vmatpush1.bf16.msra.mxu0 %v16698_v0  ;;  %12898 = vmatpush1.bf16.msra.mxu1 %v16701_v1  ;;  %v16793_v0 = vld [vmem:[%s18862_s8 + $0x122c] ss:$16 sps:$4 sm:$0xff]   ;;  %v2203_v1 = vcombine.high %v19487_v60, %v19487_v60  ;;  %v16794_v60 = vld [vmem:[%s18862_s8 + $0x1240] ss:$16 sps:$4 sm:$0xff]  }
 0x25c   : > { %11751 = vmatprep.subr.bf16.mxu0 %v16706_v2  ;;  %12899 = vmatprep.subr.bf16.mxu1 %v16709_v3  ;;  %v16791_v2 = vld [vmem:[%s18862_s8 + $0x1228] ss:$16 sps:$4 sm:$0xff]   ;;  %v16796_v3 = vld [vmem:[%s18862_s8 + $0x1244] ss:$16 sps:$4 sm:$0xff]  }
 0x25f   : > { %11752 = vmatpush1.bf16.msra.mxu0 %v16704_v4  ;;  %12900 = vmatpush1.bf16.msra.mxu1 %v16707_v5  ;;  %v16799_v4 = vld [vmem:[%s18862_s8 + $0x124c] ss:$16 sps:$4 sm:$0xff]   ;;  %v16797_v5 = vld [vmem:[%s18862_s8 + $0x1248] ss:$16 sps:$4 sm:$0xff]  }
 0x260   : > { %11753 = vmatprep.subr.bf16.mxu0 %v16712_v6  ;;  %12901 = vmatprep.subr.bf16.mxu1 %v16715_v7  ;;  %v16802_v6 = vld [vmem:[%s18862_s8 + $0x1264] ss:$16 sps:$4 sm:$0xff]   ;;  %v16805_v7 = vld [vmem:[%s18862_s8 + $0x126c] ss:$16 sps:$4 sm:$0xff]  }
 0x263   : > { %11754 = vmatpush1.bf16.msra.mxu0 %v16710_v8  ;;  %12902 = vmatpush1.bf16.msra.mxu1 %v16713_v9  ;;  %v16800_v8 = vld [vmem:[%s18862_s8 + $0x1260] ss:$16 sps:$4 sm:$0xff]   ;;  %v16803_v9 = vld [vmem:[%s18862_s8 + $0x1268] ss:$16 sps:$4 sm:$0xff]  }
 0x264   : > { %11755 = vmatprep.subr.bf16.mxu0 %v16718_v10  ;;  %12903 = vmatprep.subr.bf16.mxu1 %v16721_v11  ;;  %v16808_v10 = vld [vmem:[%s18862_s8 + $0x1284] ss:$16 sps:$4 sm:$0xff]   ;;  %v16811_v11 = vld [vmem:[%s18862_s8 + $0x128c] ss:$16 sps:$4 sm:$0xff]  }
 0x267   : > { %11756 = vmatpush1.bf16.msra.mxu0 %v16716_v12  ;;  %12904 = vmatpush1.bf16.msra.mxu1 %v16719_v14  ;;  %v16806_v12 = vld [vmem:[%s18862_s8 + $0x1280] ss:$16 sps:$4 sm:$0xff]   ;;  %v16809_v14 = vld [vmem:[%s18862_s8 + $0x1288] ss:$16 sps:$4 sm:$0xff]  }
 0x268   : > { %11757 = vmatprep.subr.bf16.mxu0 %v16724_v16  ;;  %12905 = vmatprep.subr.bf16.mxu1 %v16727_v52  ;;  %v16814_v16 = vld [vmem:[%s18862_s8 + $0x12a4] ss:$16 sps:$4 sm:$0xff]   ;;  %v16817_v52 = vld [vmem:[%s18862_s8 + $0x12ac] ss:$16 sps:$4 sm:$0xff]  }
 0x26b   : > { %11758 = vmatpush1.bf16.msra.mxu0 %v16722_v17  ;;  %12906 = vmatpush1.bf16.msra.mxu1 %v16725_v18  ;;  %v16812_v17 = vld [vmem:[%s18862_s8 + $0x12a0] ss:$16 sps:$4 sm:$0xff]   ;;  %v16815_v18 = vld [vmem:[%s18862_s8 + $0x12a8] ss:$16 sps:$4 sm:$0xff]  }
 0x26c   : > { %11759 = vmatprep.subr.bf16.mxu0 %v16730_v19  ;;  %12907 = vmatprep.subr.bf16.mxu1 %v16733_v20  ;;  %v16820_v19 = vld [vmem:[%s18862_s8 + $0x12c4] ss:$16 sps:$4 sm:$0xff]   ;;  %v16823_v20 = vld [vmem:[%s18862_s8 + $0x12cc] ss:$16 sps:$4 sm:$0xff]  }
 0x26f   : > { %11760 = vmatpush1.bf16.msra.mxu0 %v16728_v22  ;;  %12908 = vmatpush1.bf16.msra.mxu1 %v16731_v23  ;;  %v16818_v22 = vld [vmem:[%s18862_s8 + $0x12c0] ss:$16 sps:$4 sm:$0xff]   ;;  %v16821_v23 = vld [vmem:[%s18862_s8 + $0x12c8] ss:$16 sps:$4 sm:$0xff]  }
 0x270   : > { %11761 = vmatprep.subr.bf16.mxu0 %v16736_v24  ;;  %12909 = vmatprep.subr.bf16.mxu1 %v16739_v26  ;;  %v16826_v24 = vld [vmem:[%s18862_s8 + $0x12e4] ss:$16 sps:$4 sm:$0xff]   ;;  %v16829_v26 = vld [vmem:[%s18862_s8 + $0x12ec] ss:$16 sps:$4 sm:$0xff]  }
 0x273   : > { %11762 = vmatpush1.bf16.msra.mxu0 %v16734_v27  ;;  %12910 = vmatpush1.bf16.msra.mxu1 %v16737_v28  ;;  %v16824_v27 = vld [vmem:[%s18862_s8 + $0x12e0] ss:$16 sps:$4 sm:$0xff]   ;;  %v16827_v28 = vld [vmem:[%s18862_s8 + $0x12e8] ss:$16 sps:$4 sm:$0xff]  }
 0x274   : > { %11763 = vmatprep.subr.bf16.mxu0 %v16742_v29  ;;  %12911 = vmatprep.subr.bf16.mxu1 %v16745_v30  ;;  %v16832_v29 = vld [vmem:[%s18862_s8 + $0x1304] ss:$16 sps:$4 sm:$0xff]   ;;  %v16835_v30 = vld [vmem:[%s18862_s8 + $0x130c] ss:$16 sps:$4 sm:$0xff]  }
 0x277   : > { %11764 = vmatpush1.bf16.msra.mxu0 %v16740_v15  ;;  %12912 = vmatpush1.bf16.msra.mxu1 %v16743_v31  ;;  %v16830_v15 = vld [vmem:[%s18862_s8 + $0x1300] ss:$16 sps:$4 sm:$0xff]   ;;  %v16833_v31 = vld [vmem:[%s18862_s8 + $0x1308] ss:$16 sps:$4 sm:$0xff]  }
 0x278   : > { %11765 = vmatprep.subr.bf16.mxu0 %v16748_v32  ;;  %12913 = vmatprep.subr.bf16.mxu1 %v16751_v33  ;;  %v16838_v32 = vld [vmem:[%s18862_s8 + $0x1324] ss:$16 sps:$4 sm:$0xff]   ;;  %v16841_v33 = vld [vmem:[%s18862_s8 + $0x132c] ss:$16 sps:$4 sm:$0xff]  }
 0x27b   : > { %11766 = vmatpush1.bf16.msra.mxu0 %v16746_v25  ;;  %12914 = vmatpush1.bf16.msra.mxu1 %v16749_v34  ;;  %v16836_v25 = vld [vmem:[%s18862_s8 + $0x1320] ss:$16 sps:$4 sm:$0xff]   ;;  %v16839_v34 = vld [vmem:[%s18862_s8 + $0x1328] ss:$16 sps:$4 sm:$0xff]  }
 0x27c   : > { %11767 = vmatprep.subr.bf16.mxu0 %v16754_v36  ;;  %12915 = vmatprep.subr.bf16.mxu1 %v16757_v37  ;;  %v16844_v36 = vld [vmem:[%s18862_s8 + $0x1344] ss:$16 sps:$4 sm:$0xff]   ;;  %v16847_v37 = vld [vmem:[%s18862_s8 + $0x134c] ss:$16 sps:$4 sm:$0xff]  }
 0x27f   : > { %11768 = vmatpush1.bf16.msra.mxu0 %v16752_v39  ;;  %12916 = vmatpush1.bf16.msra.mxu1 %v16755_v40  ;;  %v16842_v39 = vld [vmem:[%s18862_s8 + $0x1340] ss:$16 sps:$4 sm:$0xff]   ;;  %v16845_v40 = vld [vmem:[%s18862_s8 + $0x1348] ss:$16 sps:$4 sm:$0xff]  }
 0x280   : > { %11769 = vmatprep.subr.bf16.mxu0 %v16760_v21  ;;  %12917 = vmatprep.subr.bf16.mxu1 %v16763_v41  ;;  %v16850_v21 = vld [vmem:[%s18862_s8 + $0x1364] ss:$16 sps:$4 sm:$0xff]   ;;  %v16853_v41 = vld [vmem:[%s18862_s8 + $0x136c] ss:$16 sps:$4 sm:$0xff]  }
 0x283   : > { %11770 = vmatpush1.bf16.msra.mxu0 %v16758_v43  ;;  %12918 = vmatpush1.bf16.msra.mxu1 %v16761_v44  ;;  %v16848_v43 = vld [vmem:[%s18862_s8 + $0x1360] ss:$16 sps:$4 sm:$0xff]   ;;  %v16851_v44 = vld [vmem:[%s18862_s8 + $0x1368] ss:$16 sps:$4 sm:$0xff]  }
 0x284   : > { %11771 = vmatprep.subr.bf16.mxu0 %v16766_v45  ;;  %12919 = vmatprep.subr.bf16.mxu1 %v16769_v46  ;;  %v16856_v45 = vld [vmem:[%s18862_s8 + $0x1384] ss:$16 sps:$4 sm:$0xff]   ;;  %v16859_v46 = vld [vmem:[%s18862_s8 + $0x138c] ss:$16 sps:$4 sm:$0xff]  }
 0x287   : > { %11772 = vmatpush1.bf16.msra.mxu0 %v16764_v47  ;;  %12920 = vmatpush1.bf16.msra.mxu1 %v16767_v50  ;;  %v16854_v47 = vld [vmem:[%s18862_s8 + $0x1380] ss:$16 sps:$4 sm:$0xff]   ;;  %v16857_v50 = vld [vmem:[%s18862_s8 + $0x1388] ss:$16 sps:$4 sm:$0xff]  }
 0x288   : > { %11773 = vmatprep.subr.bf16.mxu0 %v16772_v51  ;;  %12921 = vmatprep.subr.bf16.mxu1 %v16775_v53  ;;  %v16862_v51 = vld [vmem:[%s18862_s8 + $0x13a4] ss:$16 sps:$4 sm:$0xff]   ;;  %v16865_v53 = vld [vmem:[%s18862_s8 + $0x13ac] ss:$16 sps:$4 sm:$0xff]  }
 0x28b   : > { %11774 = vmatpush1.bf16.msra.mxu0 %v16770_v54  ;;  %12922 = vmatpush1.bf16.msra.mxu1 %v16773_v55  ;;  %v16860_v54 = vld [vmem:[%s18862_s8 + $0x13a0] ss:$16 sps:$4 sm:$0xff]   ;;  %v16863_v55 = vld [vmem:[%s18862_s8 + $0x13a8] ss:$16 sps:$4 sm:$0xff]  }
 0x28c   : > { %11775 = vmatprep.subr.bf16.mxu0 %v16778_v38  ;;  %12923 = vmatprep.subr.bf16.mxu1 %v16781_v56  ;;  %v16868_v38 = vld [vmem:[%s18862_s8 + $0x13c4] ss:$16 sps:$4 sm:$0xff]   ;;  %v16871_v56 = vld [vmem:[%s18862_s8 + $0x13cc] ss:$16 sps:$4 sm:$0xff]  }
 0x28f   : > { %11776 = vmatpush1.bf16.msra.mxu0 %v16776_v57  ;;  %12924 = vmatpush1.bf16.msra.mxu1 %v16779_v58  ;;  %v18612_v57 = vld [vmem:[%s21012_s0 + $0x10] sm:$0xff] }
 0x290   : > { %11786 = vmatprep.subr.bf16.mxu0 %v16784_v48  ;;  %12934 = vmatprep.subr.bf16.mxu1 %v16787_v59  ;;  %v2156_v58 = vcombine.high %v18612_v57, %v18612_v57  ;;  %v16866_v48 = vld [vmem:[%s18862_s8 + $0x13c0] ss:$16 sps:$4 sm:$0xff]   ;;  %v16869_v59 = vld [vmem:[%s18862_s8 + $0x13c8] ss:$16 sps:$4 sm:$0xff]  }
 0x291   : > { %v16950_v57 = vld [vmem:[%s18862_s8 + $0x1580] ss:$16 sps:$4 sm:$0xff]  }
 0x292   : > { %11778 = vmatmul.mubr.bf16.vlgmr.msra.gmra.mrb[0].mxu0 %v19553_v13  ;;  %12926 = vmatmul.mubr.bf16.vlgmr.msra.gmra.mrb[0].mxu1 %v19553_v13 }
 0x293   : > { %11787 = vmatpush1.bf16.msra.mxu0 %v16782_v61  ;;  %12935 = vmatpush1.bf16.msra.mxu1 %v16785_v62  ;;  %v16874_v61 = vld [vmem:[%s18862_s8 + $0x13e4] ss:$16 sps:$4 sm:$0xff]   ;;  %v16877_v62 = vld [vmem:[%s18862_s8 + $0x13ec] ss:$16 sps:$4 sm:$0xff]  }
 0x294   : > { %11788 = vmatprep.subr.bf16.mxu0 %v16790_v63  ;;  %12936 = vmatprep.subr.bf16.mxu1 %v16793_v0  ;;  %v19623_v63 = vrot.slane %v2156_v58, %v18921_v49  ;;  %v16872_v0 = vld [vmem:[%s18862_s8 + $0x13e0] ss:$16 sps:$4 sm:$0xff]   ;;  %v16953_v58 = vld [vmem:[%s18862_s8 + $0x1588] ss:$16 sps:$4 sm:$0xff]  }
 0x295   : > { %11818 = vmatprep.mubr.bf16.mxu0 %v2203_v1  ;;  %12966 = vmatprep.mubr.bf16.mxu1 %v2203_v1  ;;  %v16875_v1 = vld [vmem:[%s18862_s8 + $0x13e8] ss:$16 sps:$4 sm:$0xff]  }
 0x297   : > { %11789 = vmatpush1.bf16.msra.mxu0 %v16788_v35  ;;  %12937 = vmatpush1.bf16.msra.mxu1 %v16791_v2  ;;  %v16880_v35 = vld [vmem:[%s18862_s8 + $0x1404] ss:$16 sps:$4 sm:$0xff]   ;;  %v16883_v2 = vld [vmem:[%s18862_s8 + $0x140c] ss:$16 sps:$4 sm:$0xff]  }
 0x298   : > { %11790 = vmatprep.subr.bf16.mxu0 %v16796_v3  ;;  %12938 = vmatprep.subr.bf16.mxu1 %v16799_v4  ;;  %v2172_v3 = vcombine.high %v19623_v63, %v19623_v63  ;;  %v2201_v4 = vcombine.high %v19553_v13, %v19553_v13  ;;  %v16884_v13 = vld [vmem:[%s18862_s8 + $0x1420] ss:$16 sps:$4 sm:$0xff]  }
 0x29b   : > { %11791 = vmatpush1.bf16.msra.mxu0 %v16794_v60  ;;  %12939 = vmatpush1.bf16.msra.mxu1 %v16797_v5  ;;  %v16878_v60 = vld [vmem:[%s18862_s8 + $0x1400] ss:$16 sps:$4 sm:$0xff]   ;;  %v16881_v5 = vld [vmem:[%s18862_s8 + $0x1408] ss:$16 sps:$4 sm:$0xff]  }
 0x29c   : > { %11792 = vmatprep.subr.bf16.mxu0 %v16802_v6  ;;  %12940 = vmatprep.subr.bf16.mxu1 %v16805_v7  ;;  %v16886_v6 = vld [vmem:[%s18862_s8 + $0x1424] ss:$16 sps:$4 sm:$0xff]   ;;  %v16889_v7 = vld [vmem:[%s18862_s8 + $0x142c] ss:$16 sps:$4 sm:$0xff]  }
 0x29f   : > { %11793 = vmatpush1.bf16.msra.mxu0 %v16800_v8  ;;  %12941 = vmatpush1.bf16.msra.mxu1 %v16803_v9  ;;  %v19638_v8 = vrot.slane %v2172_v3, %v18921_v49  ;;  %v16887_v9 = vld [vmem:[%s18862_s8 + $0x1428] ss:$16 sps:$4 sm:$0xff]   ;;  %v16970_v3 = vld [vmem:[%s18862_s8 + $0x15e4] ss:$16 sps:$4 sm:$0xff]  }
 0x2a0   : > { %11794 = vmatprep.subr.bf16.mxu0 %v16808_v10  ;;  %12942 = vmatprep.subr.bf16.mxu1 %v16811_v11  ;;  %v16892_v10 = vld [vmem:[%s18862_s8 + $0x1444] ss:$16 sps:$4 sm:$0xff]   ;;  %v16895_v11 = vld [vmem:[%s18862_s8 + $0x144c] ss:$16 sps:$4 sm:$0xff]  }
 0x2a3   : > { %11795 = vmatpush1.bf16.msra.mxu0 %v16806_v12  ;;  %12943 = vmatpush1.bf16.msra.mxu1 %v16809_v14  ;;  %v16890_v12 = vld [vmem:[%s18862_s8 + $0x1440] ss:$16 sps:$4 sm:$0xff]   ;;  %v16893_v14 = vld [vmem:[%s18862_s8 + $0x1448] ss:$16 sps:$4 sm:$0xff]  }
 0x2a4   : > { %11796 = vmatprep.subr.bf16.mxu0 %v16814_v16  ;;  %12944 = vmatprep.subr.bf16.mxu1 %v16817_v52  ;;  %v16898_v16 = vld [vmem:[%s18862_s8 + $0x1464] ss:$16 sps:$4 sm:$0xff]   ;;  %v16901_v52 = vld [vmem:[%s18862_s8 + $0x146c] ss:$16 sps:$4 sm:$0xff]  }
 0x2a7   : > { %11797 = vmatpush1.bf16.msra.mxu0 %v16812_v17  ;;  %12945 = vmatpush1.bf16.msra.mxu1 %v16815_v18  ;;  %v16896_v17 = vld [vmem:[%s18862_s8 + $0x1460] ss:$16 sps:$4 sm:$0xff]   ;;  %v16899_v18 = vld [vmem:[%s18862_s8 + $0x1468] ss:$16 sps:$4 sm:$0xff]  }
 0x2a8   : > { %11798 = vmatprep.subr.bf16.mxu0 %v16820_v19  ;;  %12946 = vmatprep.subr.bf16.mxu1 %v16823_v20  ;;  %v16904_v19 = vld [vmem:[%s18862_s8 + $0x1484] ss:$16 sps:$4 sm:$0xff]   ;;  %v16907_v20 = vld [vmem:[%s18862_s8 + $0x148c] ss:$16 sps:$4 sm:$0xff]  }
 0x2ab   : > { %11799 = vmatpush1.bf16.msra.mxu0 %v16818_v22  ;;  %12947 = vmatpush1.bf16.msra.mxu1 %v16821_v23  ;;  %v16902_v22 = vld [vmem:[%s18862_s8 + $0x1480] ss:$16 sps:$4 sm:$0xff]   ;;  %v16905_v23 = vld [vmem:[%s18862_s8 + $0x1488] ss:$16 sps:$4 sm:$0xff]  }
 0x2ac   : > { %11800 = vmatprep.subr.bf16.mxu0 %v16826_v24  ;;  %12948 = vmatprep.subr.bf16.mxu1 %v16829_v26  ;;  %v16910_v24 = vld [vmem:[%s18862_s8 + $0x14a4] ss:$16 sps:$4 sm:$0xff]   ;;  %v16913_v26 = vld [vmem:[%s18862_s8 + $0x14ac] ss:$16 sps:$4 sm:$0xff]  }
 0x2af   : > { %11801 = vmatpush1.bf16.msra.mxu0 %v16824_v27  ;;  %12949 = vmatpush1.bf16.msra.mxu1 %v16827_v28  ;;  %v16908_v27 = vld [vmem:[%s18862_s8 + $0x14a0] ss:$16 sps:$4 sm:$0xff]   ;;  %v16911_v28 = vld [vmem:[%s18862_s8 + $0x14a8] ss:$16 sps:$4 sm:$0xff]  }
 0x2b0   : > { %11802 = vmatprep.subr.bf16.mxu0 %v16832_v29  ;;  %12950 = vmatprep.subr.bf16.mxu1 %v16835_v30  ;;  %v16916_v29 = vld [vmem:[%s18862_s8 + $0x14c4] ss:$16 sps:$4 sm:$0xff]   ;;  %v16919_v30 = vld [vmem:[%s18862_s8 + $0x14cc] ss:$16 sps:$4 sm:$0xff]  }
 0x2b3   : > { %11803 = vmatpush1.bf16.msra.mxu0 %v16830_v15  ;;  %12951 = vmatpush1.bf16.msra.mxu1 %v16833_v31  ;;  %v16914_v15 = vld [vmem:[%s18862_s8 + $0x14c0] ss:$16 sps:$4 sm:$0xff]   ;;  %v16917_v31 = vld [vmem:[%s18862_s8 + $0x14c8] ss:$16 sps:$4 sm:$0xff]  }
 0x2b4   : > { %11804 = vmatprep.subr.bf16.mxu0 %v16838_v32  ;;  %12952 = vmatprep.subr.bf16.mxu1 %v16841_v33  ;;  %v16922_v32 = vld [vmem:[%s18862_s8 + $0x14e4] ss:$16 sps:$4 sm:$0xff]   ;;  %v16925_v33 = vld [vmem:[%s18862_s8 + $0x14ec] ss:$16 sps:$4 sm:$0xff]  }
 0x2b7   : > { %11805 = vmatpush1.bf16.msra.mxu0 %v16836_v25  ;;  %12953 = vmatpush1.bf16.msra.mxu1 %v16839_v34  ;;  %v16920_v25 = vld [vmem:[%s18862_s8 + $0x14e0] ss:$16 sps:$4 sm:$0xff]   ;;  %v16923_v34 = vld [vmem:[%s18862_s8 + $0x14e8] ss:$16 sps:$4 sm:$0xff]  }
 0x2b8   : > { %11806 = vmatprep.subr.bf16.mxu0 %v16844_v36  ;;  %12954 = vmatprep.subr.bf16.mxu1 %v16847_v37  ;;  %v16928_v36 = vld [vmem:[%s18862_s8 + $0x1504] ss:$16 sps:$4 sm:$0xff]   ;;  %v16931_v37 = vld [vmem:[%s18862_s8 + $0x150c] ss:$16 sps:$4 sm:$0xff]  }
 0x2bb   : > { %11807 = vmatpush1.bf16.msra.mxu0 %v16842_v39  ;;  %12955 = vmatpush1.bf16.msra.mxu1 %v16845_v40  ;;  %v16926_v39 = vld [vmem:[%s18862_s8 + $0x1500] ss:$16 sps:$4 sm:$0xff]   ;;  %v16929_v40 = vld [vmem:[%s18862_s8 + $0x1508] ss:$16 sps:$4 sm:$0xff]  }
 0x2bc   : > { %11808 = vmatprep.subr.bf16.mxu0 %v16850_v21  ;;  %12956 = vmatprep.subr.bf16.mxu1 %v16853_v41  ;;  %v16934_v21 = vld [vmem:[%s18862_s8 + $0x1524] ss:$16 sps:$4 sm:$0xff]   ;;  %v16937_v41 = vld [vmem:[%s18862_s8 + $0x152c] ss:$16 sps:$4 sm:$0xff]  }
 0x2bf   : > { %11809 = vmatpush1.bf16.msra.mxu0 %v16848_v43  ;;  %12957 = vmatpush1.bf16.msra.mxu1 %v16851_v44  ;;  %v16932_v43 = vld [vmem:[%s18862_s8 + $0x1520] ss:$16 sps:$4 sm:$0xff]   ;;  %v16935_v44 = vld [vmem:[%s18862_s8 + $0x1528] ss:$16 sps:$4 sm:$0xff]  }
 0x2c0   : > { %11810 = vmatprep.subr.bf16.mxu0 %v16856_v45  ;;  %12958 = vmatprep.subr.bf16.mxu1 %v16859_v46  ;;  %v16940_v45 = vld [vmem:[%s18862_s8 + $0x1544] ss:$16 sps:$4 sm:$0xff]   ;;  %v16943_v46 = vld [vmem:[%s18862_s8 + $0x154c] ss:$16 sps:$4 sm:$0xff]  }
 0x2c3   : > { %11811 = vmatpush1.bf16.msra.mxu0 %v16854_v47  ;;  %12959 = vmatpush1.bf16.msra.mxu1 %v16857_v50  ;;  %v16938_v47 = vld [vmem:[%s18862_s8 + $0x1540] ss:$16 sps:$4 sm:$0xff]   ;;  %v16941_v50 = vld [vmem:[%s18862_s8 + $0x1548] ss:$16 sps:$4 sm:$0xff]  }
 0x2c4   : > { %11812 = vmatprep.subr.bf16.mxu0 %v16862_v51  ;;  %12960 = vmatprep.subr.bf16.mxu1 %v16865_v53  ;;  %v16946_v51 = vld [vmem:[%s18862_s8 + $0x1564] ss:$16 sps:$4 sm:$0xff]   ;;  %v16949_v53 = vld [vmem:[%s18862_s8 + $0x156c] ss:$16 sps:$4 sm:$0xff]  }
 0x2c7   : > { %11813 = vmatpush1.bf16.msra.mxu0 %v16860_v54  ;;  %12961 = vmatpush1.bf16.msra.mxu1 %v16863_v55  ;;  %v16944_v54 = vld [vmem:[%s18862_s8 + $0x1560] ss:$16 sps:$4 sm:$0xff]   ;;  %v16947_v55 = vld [vmem:[%s18862_s8 + $0x1568] ss:$16 sps:$4 sm:$0xff]  }
 0x2c8   : > { %11814 = vmatprep.subr.bf16.mxu0 %v16868_v38  ;;  %12962 = vmatprep.subr.bf16.mxu1 %v16871_v56  ;;  %v16952_v38 = vld [vmem:[%s18862_s8 + $0x1584] ss:$16 sps:$4 sm:$0xff]   ;;  %v16955_v56 = vld [vmem:[%s18862_s8 + $0x158c] ss:$16 sps:$4 sm:$0xff]  }
 0x2cb   : > { %11815 = vmatpush1.bf16.msra.mxu0 %v16866_v48  ;;  %12963 = vmatpush1.bf16.msra.mxu1 %v16869_v59  ;;  %v16958_v48 = vld [vmem:[%s18862_s8 + $0x15a4] ss:$16 sps:$4 sm:$0xff]   ;;  %v16961_v59 = vld [vmem:[%s18862_s8 + $0x15ac] ss:$16 sps:$4 sm:$0xff]  }
 0x2cc   : > { %11816 = vmatprep.subr.bf16.mxu0 %v16874_v61  ;;  %12964 = vmatprep.subr.bf16.mxu1 %v16877_v62  ;;  %v16956_v61 = vld [vmem:[%s18862_s8 + $0x15a0] ss:$16 sps:$4 sm:$0xff]   ;;  %v16959_v62 = vld [vmem:[%s18862_s8 + $0x15a8] ss:$16 sps:$4 sm:$0xff]  }
 0x2cf   : > { %11817 = vmatpush1.bf16.msra.mxu0 %v16872_v0  ;;  %12965 = vmatpush1.bf16.msra.mxu1 %v16875_v1  ;;  %v16964_v0 = vld [vmem:[%s18862_s8 + $0x15c4] ss:$16 sps:$4 sm:$0xff]   ;;  %v16967_v1 = vld [vmem:[%s18862_s8 + $0x15cc] ss:$16 sps:$4 sm:$0xff]  }
 0x2d0   : > { %11827 = vmatprep.subr.bf16.mxu0 %v16880_v35  ;;  %12975 = vmatprep.subr.bf16.mxu1 %v16883_v2  ;;  %v16962_v35 = vld [vmem:[%s18862_s8 + $0x15c0] ss:$16 sps:$4 sm:$0xff]   ;;  %v16965_v2 = vld [vmem:[%s18862_s8 + $0x15c8] ss:$16 sps:$4 sm:$0xff]  }
 0x2d2   : > { %11819 = vmatmul.mubr.bf16.vlgmr.msra.gmra.mrb[0].mxu0 %v2201_v4  ;;  %12967 = vmatmul.mubr.bf16.vlgmr.msra.gmra.mrb[0].mxu1 %v2201_v4  ;;  %v16973_v4 = vld [vmem:[%s18862_s8 + $0x15ec] ss:$16 sps:$4 sm:$0xff]  }
 0x2d3   : > { %11828 = vmatpush1.bf16.msra.mxu0 %v16878_v60  ;;  %12976 = vmatpush1.bf16.msra.mxu1 %v16881_v5  ;;  %v16968_v60 = vld [vmem:[%s18862_s8 + $0x15e0] ss:$16 sps:$4 sm:$0xff]   ;;  %v16971_v5 = vld [vmem:[%s18862_s8 + $0x15e8] ss:$16 sps:$4 sm:$0xff]  }
 0x2d4   : > { %11829 = vmatprep.subr.bf16.mxu0 %v16886_v6  ;;  %12977 = vmatprep.subr.bf16.mxu1 %v16889_v7  ;;  %v16977_v6 = vld [vmem:[%s18862_s8 + $0x1604] ss:$16 sps:$4 sm:$0xff]   ;;  %v16980_v7 = vld [vmem:[%s18862_s8 + $0x160c] ss:$16 sps:$4 sm:$0xff]  }
 0x2d5   : > { %11859 = vmatprep.mubr.bf16.mxu0 %v19638_v8  ;;  %13007 = vmatprep.mubr.bf16.mxu1 %v19638_v8 }
 0x2d7   : > { %11830 = vmatpush1.bf16.msra.mxu0 %v16884_v13  ;;  %12978 = vmatpush1.bf16.msra.mxu1 %v16887_v9  ;;  %v19704_v13 = vrot.slane %v19623_v63, %v18921_v49  ;;  %v16975_v9 = vld [vmem:[%s18862_s8 + $0x1600] ss:$16 sps:$4 sm:$0xff]  }
 0x2d8   : > { %11831 = vmatprep.subr.bf16.mxu0 %v16892_v10  ;;  %12979 = vmatprep.subr.bf16.mxu1 %v16895_v11  ;;  %v16978_v10 = vld [vmem:[%s18862_s8 + $0x1608] ss:$16 sps:$4 sm:$0xff]   ;;  %v16983_v11 = vld [vmem:[%s18862_s8 + $0x1624] ss:$16 sps:$4 sm:$0xff]   ;;  %v16981_v63 = vld [vmem:[%s18862_s8 + $0x1620] ss:$16 sps:$4 sm:$0xff]  }
 0x2db   : > { %11832 = vmatpush1.bf16.msra.mxu0 %v16890_v12  ;;  %12980 = vmatpush1.bf16.msra.mxu1 %v16893_v14  ;;  %v16986_v12 = vld [vmem:[%s18862_s8 + $0x162c] ss:$16 sps:$4 sm:$0xff]   ;;  %v2204_v14 = vcombine.high %v19638_v8, %v19638_v8  ;;  %v16987_v8 = vld [vmem:[%s18862_s8 + $0x1640] ss:$16 sps:$4 sm:$0xff]  }
 0x2dc   : > { %11833 = vmatprep.subr.bf16.mxu0 %v16898_v16  ;;  %12981 = vmatprep.subr.bf16.mxu1 %v16901_v52  ;;  %v16984_v16 = vld [vmem:[%s18862_s8 + $0x1628] ss:$16 sps:$4 sm:$0xff]   ;;  %v16989_v52 = vld [vmem:[%s18862_s8 + $0x1644] ss:$16 sps:$4 sm:$0xff]  }
 0x2df   : > { %11834 = vmatpush1.bf16.msra.mxu0 %v16896_v17  ;;  %12982 = vmatpush1.bf16.msra.mxu1 %v16899_v18  ;;  %v16992_v17 = vld [vmem:[%s18862_s8 + $0x164c] ss:$16 sps:$4 sm:$0xff]   ;;  %v16990_v18 = vld [vmem:[%s18862_s8 + $0x1648] ss:$16 sps:$4 sm:$0xff]  }
 0x2e0   : > { %11835 = vmatprep.subr.bf16.mxu0 %v16904_v19  ;;  %12983 = vmatprep.subr.bf16.mxu1 %v16907_v20  ;;  %v16995_v19 = vld [vmem:[%s18862_s8 + $0x1664] ss:$16 sps:$4 sm:$0xff]   ;;  %v16998_v20 = vld [vmem:[%s18862_s8 + $0x166c] ss:$16 sps:$4 sm:$0xff]  }
 0x2e3   : > { %11836 = vmatpush1.bf16.msra.mxu0 %v16902_v22  ;;  %12984 = vmatpush1.bf16.msra.mxu1 %v16905_v23  ;;  %v16993_v22 = vld [vmem:[%s18862_s8 + $0x1660] ss:$16 sps:$4 sm:$0xff]   ;;  %v16996_v23 = vld [vmem:[%s18862_s8 + $0x1668] ss:$16 sps:$4 sm:$0xff]  }
 0x2e4   : > { %11837 = vmatprep.subr.bf16.mxu0 %v16910_v24  ;;  %12985 = vmatprep.subr.bf16.mxu1 %v16913_v26  ;;  %v17001_v24 = vld [vmem:[%s18862_s8 + $0x1684] ss:$16 sps:$4 sm:$0xff]   ;;  %v17004_v26 = vld [vmem:[%s18862_s8 + $0x168c] ss:$16 sps:$4 sm:$0xff]  }
 0x2e7   : > { %11838 = vmatpush1.bf16.msra.mxu0 %v16908_v27  ;;  %12986 = vmatpush1.bf16.msra.mxu1 %v16911_v28  ;;  %v16999_v27 = vld [vmem:[%s18862_s8 + $0x1680] ss:$16 sps:$4 sm:$0xff]   ;;  %v17002_v28 = vld [vmem:[%s18862_s8 + $0x1688] ss:$16 sps:$4 sm:$0xff]  }
 0x2e8   : > { %11839 = vmatprep.subr.bf16.mxu0 %v16916_v29  ;;  %12987 = vmatprep.subr.bf16.mxu1 %v16919_v30  ;;  %v17007_v29 = vld [vmem:[%s18862_s8 + $0x16a4] ss:$16 sps:$4 sm:$0xff]   ;;  %v17010_v30 = vld [vmem:[%s18862_s8 + $0x16ac] ss:$16 sps:$4 sm:$0xff]  }
 0x2eb   : > { %11840 = vmatpush1.bf16.msra.mxu0 %v16914_v15  ;;  %12988 = vmatpush1.bf16.msra.mxu1 %v16917_v31  ;;  %v17005_v15 = vld [vmem:[%s18862_s8 + $0x16a0] ss:$16 sps:$4 sm:$0xff]   ;;  %v17008_v31 = vld [vmem:[%s18862_s8 + $0x16a8] ss:$16 sps:$4 sm:$0xff]  }
 0x2ec   : > { %11841 = vmatprep.subr.bf16.mxu0 %v16922_v32  ;;  %12989 = vmatprep.subr.bf16.mxu1 %v16925_v33  ;;  %v17013_v32 = vld [vmem:[%s18862_s8 + $0x16c4] ss:$16 sps:$4 sm:$0xff]   ;;  %v17016_v33 = vld [vmem:[%s18862_s8 + $0x16cc] ss:$16 sps:$4 sm:$0xff]  }
 0x2ef   : > { %11842 = vmatpush1.bf16.msra.mxu0 %v16920_v25  ;;  %12990 = vmatpush1.bf16.msra.mxu1 %v16923_v34  ;;  %v17011_v25 = vld [vmem:[%s18862_s8 + $0x16c0] ss:$16 sps:$4 sm:$0xff]   ;;  %v17014_v34 = vld [vmem:[%s18862_s8 + $0x16c8] ss:$16 sps:$4 sm:$0xff]  }
 0x2f0   : > { %11843 = vmatprep.subr.bf16.mxu0 %v16928_v36  ;;  %12991 = vmatprep.subr.bf16.mxu1 %v16931_v37  ;;  %v17019_v36 = vld [vmem:[%s18862_s8 + $0x16e4] ss:$16 sps:$4 sm:$0xff]   ;;  %v17022_v37 = vld [vmem:[%s18862_s8 + $0x16ec] ss:$16 sps:$4 sm:$0xff]  }
 0x2f3   : > { %11844 = vmatpush1.bf16.msra.mxu0 %v16926_v39  ;;  %12992 = vmatpush1.bf16.msra.mxu1 %v16929_v40  ;;  %v17017_v39 = vld [vmem:[%s18862_s8 + $0x16e0] ss:$16 sps:$4 sm:$0xff]   ;;  %v17020_v40 = vld [vmem:[%s18862_s8 + $0x16e8] ss:$16 sps:$4 sm:$0xff]  }
 0x2f4   : > { %11845 = vmatprep.subr.bf16.mxu0 %v16934_v21  ;;  %12993 = vmatprep.subr.bf16.mxu1 %v16937_v41  ;;  %v17025_v21 = vld [vmem:[%s18862_s8 + $0x1704] ss:$16 sps:$4 sm:$0xff]   ;;  %v17028_v41 = vld [vmem:[%s18862_s8 + $0x170c] ss:$16 sps:$4 sm:$0xff]  }
 0x2f7   : > { %11846 = vmatpush1.bf16.msra.mxu0 %v16932_v43  ;;  %12994 = vmatpush1.bf16.msra.mxu1 %v16935_v44  ;;  %v17023_v43 = vld [vmem:[%s18862_s8 + $0x1700] ss:$16 sps:$4 sm:$0xff]   ;;  %v17026_v44 = vld [vmem:[%s18862_s8 + $0x1708] ss:$16 sps:$4 sm:$0xff]  }
 0x2f8   : > { %11847 = vmatprep.subr.bf16.mxu0 %v16940_v45  ;;  %12995 = vmatprep.subr.bf16.mxu1 %v16943_v46  ;;  %v17031_v45 = vld [vmem:[%s18862_s8 + $0x1724] ss:$16 sps:$4 sm:$0xff]   ;;  %v17034_v46 = vld [vmem:[%s18862_s8 + $0x172c] ss:$16 sps:$4 sm:$0xff]  }
 0x2fb   : > { %11848 = vmatpush1.bf16.msra.mxu0 %v16938_v47  ;;  %12996 = vmatpush1.bf16.msra.mxu1 %v16941_v50  ;;  %v17029_v47 = vld [vmem:[%s18862_s8 + $0x1720] ss:$16 sps:$4 sm:$0xff]   ;;  %v17032_v50 = vld [vmem:[%s18862_s8 + $0x1728] ss:$16 sps:$4 sm:$0xff]  }
 0x2fc   : > { %11849 = vmatprep.subr.bf16.mxu0 %v16946_v51  ;;  %12997 = vmatprep.subr.bf16.mxu1 %v16949_v53  ;;  %v17037_v51 = vld [vmem:[%s18862_s8 + $0x1744] ss:$16 sps:$4 sm:$0xff]   ;;  %v17040_v53 = vld [vmem:[%s18862_s8 + $0x174c] ss:$16 sps:$4 sm:$0xff]  }
 0x2ff   : > { %11850 = vmatpush1.bf16.msra.mxu0 %v16944_v54  ;;  %12998 = vmatpush1.bf16.msra.mxu1 %v16947_v55  ;;  %v17035_v54 = vld [vmem:[%s18862_s8 + $0x1740] ss:$16 sps:$4 sm:$0xff]   ;;  %v17038_v55 = vld [vmem:[%s18862_s8 + $0x1748] ss:$16 sps:$4 sm:$0xff]  }
 0x300   : > { %11851 = vmatprep.subr.bf16.mxu0 %v16952_v38  ;;  %12999 = vmatprep.subr.bf16.mxu1 %v16955_v56  ;;  %v17043_v38 = vld [vmem:[%s18862_s8 + $0x1764] ss:$16 sps:$4 sm:$0xff]   ;;  %v17046_v56 = vld [vmem:[%s18862_s8 + $0x176c] ss:$16 sps:$4 sm:$0xff]  }
 0x303   : > { %11852 = vmatpush1.bf16.msra.mxu0 %v16950_v57  ;;  %13000 = vmatpush1.bf16.msra.mxu1 %v16953_v58  ;;  %v17041_v57 = vld [vmem:[%s18862_s8 + $0x1760] ss:$16 sps:$4 sm:$0xff]   ;;  %v17044_v58 = vld [vmem:[%s18862_s8 + $0x1768] ss:$16 sps:$4 sm:$0xff]  }
 0x304   : > { %11853 = vmatprep.subr.bf16.mxu0 %v16958_v48  ;;  %13001 = vmatprep.subr.bf16.mxu1 %v16961_v59  ;;  %v17049_v48 = vld [vmem:[%s18862_s8 + $0x1784] ss:$16 sps:$4 sm:$0xff]   ;;  %v17052_v59 = vld [vmem:[%s18862_s8 + $0x178c] ss:$16 sps:$4 sm:$0xff]  }
 0x307   : > { %11854 = vmatpush1.bf16.msra.mxu0 %v16956_v61  ;;  %13002 = vmatpush1.bf16.msra.mxu1 %v16959_v62  ;;  %v17047_v61 = vld [vmem:[%s18862_s8 + $0x1780] ss:$16 sps:$4 sm:$0xff]   ;;  %v17050_v62 = vld [vmem:[%s18862_s8 + $0x1788] ss:$16 sps:$4 sm:$0xff]  }
 0x308   : > { %11855 = vmatprep.subr.bf16.mxu0 %v16964_v0  ;;  %13003 = vmatprep.subr.bf16.mxu1 %v16967_v1  ;;  %v17055_v0 = vld [vmem:[%s18862_s8 + $0x17a4] ss:$16 sps:$4 sm:$0xff]   ;;  %v17058_v1 = vld [vmem:[%s18862_s8 + $0x17ac] ss:$16 sps:$4 sm:$0xff]  }
 0x30b   : > { %11856 = vmatpush1.bf16.msra.mxu0 %v16962_v35  ;;  %13004 = vmatpush1.bf16.msra.mxu1 %v16965_v2  ;;  %v17053_v35 = vld [vmem:[%s18862_s8 + $0x17a0] ss:$16 sps:$4 sm:$0xff]   ;;  %v17056_v2 = vld [vmem:[%s18862_s8 + $0x17a8] ss:$16 sps:$4 sm:$0xff]  }
 0x30c   : > { %11857 = vmatprep.subr.bf16.mxu0 %v16970_v3  ;;  %13005 = vmatprep.subr.bf16.mxu1 %v16973_v4  ;;  %v17061_v3 = vld [vmem:[%s18862_s8 + $0x17c4] ss:$16 sps:$4 sm:$0xff]   ;;  %v17064_v4 = vld [vmem:[%s18862_s8 + $0x17cc] ss:$16 sps:$4 sm:$0xff]  }
 0x30f   : > { %11858 = vmatpush1.bf16.msra.mxu0 %v16968_v60  ;;  %13006 = vmatpush1.bf16.msra.mxu1 %v16971_v5  ;;  %v19769_v60 = vld.sshfl [vmem:[%s21012_s0 + $0x18] sm:$0xff pattern:$0x75316420]  ;;  %v17059_v5 = vld [vmem:[%s18862_s8 + $0x17c0] ss:$16 sps:$4 sm:$0xff]  }
 0x310   : > { %11868 = vmatprep.subr.bf16.mxu0 %v16977_v6  ;;  %13016 = vmatprep.subr.bf16.mxu1 %v16980_v7  ;;  %v17062_v6 = vld [vmem:[%s18862_s8 + $0x17c8] ss:$16 sps:$4 sm:$0xff]   ;;  %v17067_v7 = vld [vmem:[%s18862_s8 + $0x17e4] ss:$16 sps:$4 sm:$0xff]  }
 0x312   : > { %11860 = vmatmul.mubr.bf16.vlgmr.msra.gmra.mrb[0].mxu0 %v19704_v13  ;;  %13008 = vmatmul.mubr.bf16.vlgmr.msra.gmra.mrb[0].mxu1 %v19704_v13 }
 0x313   : > { %11869 = vmatpush1.bf16.msra.mxu0 %v16975_v9  ;;  %13017 = vmatpush1.bf16.msra.mxu1 %v16978_v10  ;;  %v17070_v9 = vld [vmem:[%s18862_s8 + $0x17ec] ss:$16 sps:$4 sm:$0xff]   ;;  %v17065_v10 = vld [vmem:[%s18862_s8 + $0x17e0] ss:$16 sps:$4 sm:$0xff]  }
 0x314   : > { %11870 = vmatprep.subr.bf16.mxu0 %v16983_v11  ;;  %13018 = vmatprep.subr.bf16.mxu1 %v16986_v12  ;;  %v17068_v11 = vld [vmem:[%s18862_s8 + $0x17e8] ss:$16 sps:$4 sm:$0xff]   ;;  %v17073_v12 = vld [vmem:[%s18862_s8 + $0x1804] ss:$16 sps:$4 sm:$0xff]  }
 0x315   : > { %11900 = vmatprep.mubr.bf16.mxu0 %v2204_v14  ;;  %13048 = vmatprep.mubr.bf16.mxu1 %v2204_v14  ;;  %v17076_v14 = vld [vmem:[%s18862_s8 + $0x180c] ss:$16 sps:$4 sm:$0xff]  }
 0x317   : > { %11871 = vmatpush1.bf16.msra.mxu0 %v16981_v63  ;;  %13019 = vmatpush1.bf16.msra.mxu1 %v16984_v16  ;;  %v2220_v63 = vcombine.high %v19769_v60, %v19769_v60  ;;  %v2202_v16 = vcombine.high %v19704_v13, %v19704_v13  ;;  %v17077_v13 = vld [vmem:[%s18862_s8 + $0x1820] ss:$16 sps:$4 sm:$0xff]  }
 0x318   : > { %11872 = vmatprep.subr.bf16.mxu0 %v16989_v52  ;;  %13020 = vmatprep.subr.bf16.mxu1 %v16992_v17  ;;  %v17071_v52 = vld [vmem:[%s18862_s8 + $0x1800] ss:$16 sps:$4 sm:$0xff]   ;;  %v17074_v17 = vld [vmem:[%s18862_s8 + $0x1808] ss:$16 sps:$4 sm:$0xff]  }
 0x31b   : > { %11873 = vmatpush1.bf16.msra.mxu0 %v16987_v8  ;;  %13021 = vmatpush1.bf16.msra.mxu1 %v16990_v18  ;;  %v17079_v8 = vld [vmem:[%s18862_s8 + $0x1824] ss:$16 sps:$4 sm:$0xff]   ;;  %v17082_v18 = vld [vmem:[%s18862_s8 + $0x182c] ss:$16 sps:$4 sm:$0xff]  }
 0x31c   : > { %11874 = vmatprep.subr.bf16.mxu0 %v16995_v19  ;;  %13022 = vmatprep.subr.bf16.mxu1 %v16998_v20  ;;  %v19788_v19 = vrot.slane %v2220_v63, %v18921_v49  ;;  %v17080_v20 = vld [vmem:[%s18862_s8 + $0x1828] ss:$16 sps:$4 sm:$0xff]   ;;  %v17163_v63 = vld [vmem:[%s18862_s8 + $0x19e4] ss:$16 sps:$4 sm:$0xff]  }
 0x31f   : > { %11875 = vmatpush1.bf16.msra.mxu0 %v16993_v22  ;;  %13023 = vmatpush1.bf16.msra.mxu1 %v16996_v23  ;;  %v17085_v22 = vld [vmem:[%s18862_s8 + $0x1844] ss:$16 sps:$4 sm:$0xff]   ;;  %v17088_v23 = vld [vmem:[%s18862_s8 + $0x184c] ss:$16 sps:$4 sm:$0xff]  }
 0x320   : > { %11876 = vmatprep.subr.bf16.mxu0 %v17001_v24  ;;  %13024 = vmatprep.subr.bf16.mxu1 %v17004_v26  ;;  %v17083_v24 = vld [vmem:[%s18862_s8 + $0x1840] ss:$16 sps:$4 sm:$0xff]   ;;  %v17086_v26 = vld [vmem:[%s18862_s8 + $0x1848] ss:$16 sps:$4 sm:$0xff]  }
 0x323   : > { %11877 = vmatpush1.bf16.msra.mxu0 %v16999_v27  ;;  %13025 = vmatpush1.bf16.msra.mxu1 %v17002_v28  ;;  %v17091_v27 = vld [vmem:[%s18862_s8 + $0x1864] ss:$16 sps:$4 sm:$0xff]   ;;  %v17094_v28 = vld [vmem:[%s18862_s8 + $0x186c] ss:$16 sps:$4 sm:$0xff]  }
 0x324   : > { %11878 = vmatprep.subr.bf16.mxu0 %v17007_v29  ;;  %13026 = vmatprep.subr.bf16.mxu1 %v17010_v30  ;;  %v17089_v29 = vld [vmem:[%s18862_s8 + $0x1860] ss:$16 sps:$4 sm:$0xff]   ;;  %v17092_v30 = vld [vmem:[%s18862_s8 + $0x1868] ss:$16 sps:$4 sm:$0xff]  }
 0x327   : > { %11879 = vmatpush1.bf16.msra.mxu0 %v17005_v15  ;;  %13027 = vmatpush1.bf16.msra.mxu1 %v17008_v31  ;;  %v17097_v15 = vld [vmem:[%s18862_s8 + $0x1884] ss:$16 sps:$4 sm:$0xff]   ;;  %v17100_v31 = vld [vmem:[%s18862_s8 + $0x188c] ss:$16 sps:$4 sm:$0xff]  }
 0x328   : > { %11880 = vmatprep.subr.bf16.mxu0 %v17013_v32  ;;  %13028 = vmatprep.subr.bf16.mxu1 %v17016_v33  ;;  %v17095_v32 = vld [vmem:[%s18862_s8 + $0x1880] ss:$16 sps:$4 sm:$0xff]   ;;  %v17098_v33 = vld [vmem:[%s18862_s8 + $0x1888] ss:$16 sps:$4 sm:$0xff]  }
 0x32b   : > { %11881 = vmatpush1.bf16.msra.mxu0 %v17011_v25  ;;  %13029 = vmatpush1.bf16.msra.mxu1 %v17014_v34  ;;  %v17103_v25 = vld [vmem:[%s18862_s8 + $0x18a4] ss:$16 sps:$4 sm:$0xff]   ;;  %v17106_v34 = vld [vmem:[%s18862_s8 + $0x18ac] ss:$16 sps:$4 sm:$0xff]  }
 0x32c   : > { %11882 = vmatprep.subr.bf16.mxu0 %v17019_v36  ;;  %13030 = vmatprep.subr.bf16.mxu1 %v17022_v37  ;;  %v17101_v36 = vld [vmem:[%s18862_s8 + $0x18a0] ss:$16 sps:$4 sm:$0xff]   ;;  %v17104_v37 = vld [vmem:[%s18862_s8 + $0x18a8] ss:$16 sps:$4 sm:$0xff]  }
 0x32f   : > { %11883 = vmatpush1.bf16.msra.mxu0 %v17017_v39  ;;  %13031 = vmatpush1.bf16.msra.mxu1 %v17020_v40  ;;  %v17109_v39 = vld [vmem:[%s18862_s8 + $0x18c4] ss:$16 sps:$4 sm:$0xff]   ;;  %v17112_v40 = vld [vmem:[%s18862_s8 + $0x18cc] ss:$16 sps:$4 sm:$0xff]  }
 0x330   : > { %11884 = vmatprep.subr.bf16.mxu0 %v17025_v21  ;;  %13032 = vmatprep.subr.bf16.mxu1 %v17028_v41  ;;  %v17107_v21 = vld [vmem:[%s18862_s8 + $0x18c0] ss:$16 sps:$4 sm:$0xff]   ;;  %v17110_v41 = vld [vmem:[%s18862_s8 + $0x18c8] ss:$16 sps:$4 sm:$0xff]  }
 0x333   : > { %11885 = vmatpush1.bf16.msra.mxu0 %v17023_v43  ;;  %13033 = vmatpush1.bf16.msra.mxu1 %v17026_v44  ;;  %v17115_v43 = vld [vmem:[%s18862_s8 + $0x18e4] ss:$16 sps:$4 sm:$0xff]   ;;  %v17118_v44 = vld [vmem:[%s18862_s8 + $0x18ec] ss:$16 sps:$4 sm:$0xff]  }
 0x334   : > { %11886 = vmatprep.subr.bf16.mxu0 %v17031_v45  ;;  %13034 = vmatprep.subr.bf16.mxu1 %v17034_v46  ;;  %v17113_v45 = vld [vmem:[%s18862_s8 + $0x18e0] ss:$16 sps:$4 sm:$0xff]   ;;  %v17116_v46 = vld [vmem:[%s18862_s8 + $0x18e8] ss:$16 sps:$4 sm:$0xff]  }
 0x337   : > { %11887 = vmatpush1.bf16.msra.mxu0 %v17029_v47  ;;  %13035 = vmatpush1.bf16.msra.mxu1 %v17032_v50  ;;  %v17121_v47 = vld [vmem:[%s18862_s8 + $0x1904] ss:$16 sps:$4 sm:$0xff]   ;;  %v17124_v50 = vld [vmem:[%s18862_s8 + $0x190c] ss:$16 sps:$4 sm:$0xff]  }
 0x338   : > { %11888 = vmatprep.subr.bf16.mxu0 %v17037_v51  ;;  %13036 = vmatprep.subr.bf16.mxu1 %v17040_v53  ;;  %v17119_v51 = vld [vmem:[%s18862_s8 + $0x1900] ss:$16 sps:$4 sm:$0xff]   ;;  %v17122_v53 = vld [vmem:[%s18862_s8 + $0x1908] ss:$16 sps:$4 sm:$0xff]  }
 0x33b   : > { %11889 = vmatpush1.bf16.msra.mxu0 %v17035_v54  ;;  %13037 = vmatpush1.bf16.msra.mxu1 %v17038_v55  ;;  %v17127_v54 = vld [vmem:[%s18862_s8 + $0x1924] ss:$16 sps:$4 sm:$0xff]   ;;  %v17130_v55 = vld [vmem:[%s18862_s8 + $0x192c] ss:$16 sps:$4 sm:$0xff]  }
 0x33c   : > { %11890 = vmatprep.subr.bf16.mxu0 %v17043_v38  ;;  %13038 = vmatprep.subr.bf16.mxu1 %v17046_v56  ;;  %v17125_v38 = vld [vmem:[%s18862_s8 + $0x1920] ss:$16 sps:$4 sm:$0xff]   ;;  %v17128_v56 = vld [vmem:[%s18862_s8 + $0x1928] ss:$16 sps:$4 sm:$0xff]  }
 0x33f   : > { %11891 = vmatpush1.bf16.msra.mxu0 %v17041_v57  ;;  %13039 = vmatpush1.bf16.msra.mxu1 %v17044_v58  ;;  %v17133_v57 = vld [vmem:[%s18862_s8 + $0x1944] ss:$16 sps:$4 sm:$0xff]   ;;  %v17136_v58 = vld [vmem:[%s18862_s8 + $0x194c] ss:$16 sps:$4 sm:$0xff]  }
 0x340   : > { %11892 = vmatprep.subr.bf16.mxu0 %v17049_v48  ;;  %13040 = vmatprep.subr.bf16.mxu1 %v17052_v59  ;;  %v17131_v48 = vld [vmem:[%s18862_s8 + $0x1940] ss:$16 sps:$4 sm:$0xff]   ;;  %v17134_v59 = vld [vmem:[%s18862_s8 + $0x1948] ss:$16 sps:$4 sm:$0xff]  }
 0x343   : > { %11893 = vmatpush1.bf16.msra.mxu0 %v17047_v61  ;;  %13041 = vmatpush1.bf16.msra.mxu1 %v17050_v62  ;;  %v17139_v61 = vld [vmem:[%s18862_s8 + $0x1964] ss:$16 sps:$4 sm:$0xff]   ;;  %v17142_v62 = vld [vmem:[%s18862_s8 + $0x196c] ss:$16 sps:$4 sm:$0xff]  }
 0x344   : > { %11894 = vmatprep.subr.bf16.mxu0 %v17055_v0  ;;  %13042 = vmatprep.subr.bf16.mxu1 %v17058_v1  ;;  %v17137_v0 = vld [vmem:[%s18862_s8 + $0x1960] ss:$16 sps:$4 sm:$0xff]   ;;  %v17140_v1 = vld [vmem:[%s18862_s8 + $0x1968] ss:$16 sps:$4 sm:$0xff]  }
 0x347   : > { %11895 = vmatpush1.bf16.msra.mxu0 %v17053_v35  ;;  %13043 = vmatpush1.bf16.msra.mxu1 %v17056_v2  ;;  %v17145_v35 = vld [vmem:[%s18862_s8 + $0x1984] ss:$16 sps:$4 sm:$0xff]   ;;  %v17148_v2 = vld [vmem:[%s18862_s8 + $0x198c] ss:$16 sps:$4 sm:$0xff]  }
 0x348   : > { %11896 = vmatprep.subr.bf16.mxu0 %v17061_v3  ;;  %13044 = vmatprep.subr.bf16.mxu1 %v17064_v4  ;;  %v17143_v3 = vld [vmem:[%s18862_s8 + $0x1980] ss:$16 sps:$4 sm:$0xff]   ;;  %v17146_v4 = vld [vmem:[%s18862_s8 + $0x1988] ss:$16 sps:$4 sm:$0xff]  }
 0x34b   : > { %11897 = vmatpush1.bf16.msra.mxu0 %v17059_v5  ;;  %13045 = vmatpush1.bf16.msra.mxu1 %v17062_v6  ;;  %v17151_v5 = vld [vmem:[%s18862_s8 + $0x19a4] ss:$16 sps:$4 sm:$0xff]   ;;  %v17154_v6 = vld [vmem:[%s18862_s8 + $0x19ac] ss:$16 sps:$4 sm:$0xff]  }
 0x34c   : > { %11898 = vmatprep.subr.bf16.mxu0 %v17067_v7  ;;  %13046 = vmatprep.subr.bf16.mxu1 %v17070_v9  ;;  %v17149_v7 = vld [vmem:[%s18862_s8 + $0x19a0] ss:$16 sps:$4 sm:$0xff]   ;;  %v17152_v9 = vld [vmem:[%s18862_s8 + $0x19a8] ss:$16 sps:$4 sm:$0xff]  }
 0x34f   : > { %11899 = vmatpush1.bf16.msra.mxu0 %v17065_v10  ;;  %13047 = vmatpush1.bf16.msra.mxu1 %v17068_v11  ;;  %v17157_v10 = vld [vmem:[%s18862_s8 + $0x19c4] ss:$16 sps:$4 sm:$0xff]   ;;  %v17160_v11 = vld [vmem:[%s18862_s8 + $0x19cc] ss:$16 sps:$4 sm:$0xff]  }
 0x350   : > { %11909 = vmatprep.subr.bf16.mxu0 %v17073_v12  ;;  %13057 = vmatprep.subr.bf16.mxu1 %v17076_v14  ;;  %v17155_v12 = vld [vmem:[%s18862_s8 + $0x19c0] ss:$16 sps:$4 sm:$0xff]   ;;  %v17158_v14 = vld [vmem:[%s18862_s8 + $0x19c8] ss:$16 sps:$4 sm:$0xff]  }
 0x352   : > { %11901 = vmatmul.mubr.bf16.vlgmr.msra.gmra.mrb[0].mxu0 %v2202_v16  ;;  %13049 = vmatmul.mubr.bf16.vlgmr.msra.gmra.mrb[0].mxu1 %v2202_v16  ;;  %v17166_v16 = vld [vmem:[%s18862_s8 + $0x19ec] ss:$16 sps:$4 sm:$0xff]  }
 0x353   : > { %11910 = vmatpush1.bf16.msra.mxu0 %v17071_v52  ;;  %13058 = vmatpush1.bf16.msra.mxu1 %v17074_v17  ;;  %v17161_v52 = vld [vmem:[%s18862_s8 + $0x19e0] ss:$16 sps:$4 sm:$0xff]   ;;  %v17164_v17 = vld [vmem:[%s18862_s8 + $0x19e8] ss:$16 sps:$4 sm:$0xff]  }
 0x354   : > { %11911 = vmatprep.subr.bf16.mxu0 %v17079_v8  ;;  %13059 = vmatprep.subr.bf16.mxu1 %v17082_v18  ;;  %v17169_v8 = vld [vmem:[%s18862_s8 + $0x1a04] ss:$16 sps:$4 sm:$0xff]   ;;  %v17172_v18 = vld [vmem:[%s18862_s8 + $0x1a0c] ss:$16 sps:$4 sm:$0xff]  }
 0x355   : > { %11941 = vmatprep.mubr.bf16.mxu0 %v19788_v19  ;;  %13089 = vmatprep.mubr.bf16.mxu1 %v19788_v19 }
 0x357   : > { %11912 = vmatpush1.bf16.msra.mxu0 %v17077_v13  ;;  %13060 = vmatpush1.bf16.msra.mxu1 %v17080_v20  ;;  %v19854_v13 = vrot.slane %v19769_v60, %v18921_v49  ;;  %v17167_v20 = vld [vmem:[%s18862_s8 + $0x1a00] ss:$16 sps:$4 sm:$0xff]  }
 0x358   : > { %11913 = vmatprep.subr.bf16.mxu0 %v17085_v22  ;;  %13061 = vmatprep.subr.bf16.mxu1 %v17088_v23  ;;  %v17170_v22 = vld [vmem:[%s18862_s8 + $0x1a08] ss:$16 sps:$4 sm:$0xff]   ;;  %v17175_v23 = vld [vmem:[%s18862_s8 + $0x1a24] ss:$16 sps:$4 sm:$0xff]   ;;  %v17173_v60 = vld [vmem:[%s18862_s8 + $0x1a20] ss:$16 sps:$4 sm:$0xff]  }
 0x35b   : > { %11914 = vmatpush1.bf16.msra.mxu0 %v17083_v24  ;;  %13062 = vmatpush1.bf16.msra.mxu1 %v17086_v26  ;;  %v17178_v24 = vld [vmem:[%s18862_s8 + $0x1a2c] ss:$16 sps:$4 sm:$0xff]   ;;  %v2252_v26 = vcombine.high %v19788_v19, %v19788_v19  ;;  %v17179_v19 = vld [vmem:[%s18862_s8 + $0x1a40] ss:$16 sps:$4 sm:$0xff]  }
 0x35c   : > { %11915 = vmatprep.subr.bf16.mxu0 %v17091_v27  ;;  %13063 = vmatprep.subr.bf16.mxu1 %v17094_v28  ;;  %v17176_v27 = vld [vmem:[%s18862_s8 + $0x1a28] ss:$16 sps:$4 sm:$0xff]   ;;  %v17181_v28 = vld [vmem:[%s18862_s8 + $0x1a44] ss:$16 sps:$4 sm:$0xff]  }
 0x35f   : > { %11916 = vmatpush1.bf16.msra.mxu0 %v17089_v29  ;;  %13064 = vmatpush1.bf16.msra.mxu1 %v17092_v30  ;;  %v17184_v29 = vld [vmem:[%s18862_s8 + $0x1a4c] ss:$16 sps:$4 sm:$0xff]   ;;  %v17182_v30 = vld [vmem:[%s18862_s8 + $0x1a48] ss:$16 sps:$4 sm:$0xff]  }
 0x360   : > { %11917 = vmatprep.subr.bf16.mxu0 %v17097_v15  ;;  %13065 = vmatprep.subr.bf16.mxu1 %v17100_v31  ;;  %v17187_v15 = vld [vmem:[%s18862_s8 + $0x1a64] ss:$16 sps:$4 sm:$0xff]   ;;  %v17190_v31 = vld [vmem:[%s18862_s8 + $0x1a6c] ss:$16 sps:$4 sm:$0xff]  }
 0x363   : > { %11918 = vmatpush1.bf16.msra.mxu0 %v17095_v32  ;;  %13066 = vmatpush1.bf16.msra.mxu1 %v17098_v33  ;;  %v17185_v32 = vld [vmem:[%s18862_s8 + $0x1a60] ss:$16 sps:$4 sm:$0xff]   ;;  %v17188_v33 = vld [vmem:[%s18862_s8 + $0x1a68] ss:$16 sps:$4 sm:$0xff]  }
 0x364   : > { %11919 = vmatprep.subr.bf16.mxu0 %v17103_v25  ;;  %13067 = vmatprep.subr.bf16.mxu1 %v17106_v34  ;;  %v17193_v25 = vld [vmem:[%s18862_s8 + $0x1a84] ss:$16 sps:$4 sm:$0xff]   ;;  %v17196_v34 = vld [vmem:[%s18862_s8 + $0x1a8c] ss:$16 sps:$4 sm:$0xff]  }
 0x367   : > { %11920 = vmatpush1.bf16.msra.mxu0 %v17101_v36  ;;  %13068 = vmatpush1.bf16.msra.mxu1 %v17104_v37  ;;  %v17191_v36 = vld [vmem:[%s18862_s8 + $0x1a80] ss:$16 sps:$4 sm:$0xff]   ;;  %v17194_v37 = vld [vmem:[%s18862_s8 + $0x1a88] ss:$16 sps:$4 sm:$0xff]  }
 0x368   : > { %11921 = vmatprep.subr.bf16.mxu0 %v17109_v39  ;;  %13069 = vmatprep.subr.bf16.mxu1 %v17112_v40  ;;  %v17199_v39 = vld [vmem:[%s18862_s8 + $0x1aa4] ss:$16 sps:$4 sm:$0xff]   ;;  %v17202_v40 = vld [vmem:[%s18862_s8 + $0x1aac] ss:$16 sps:$4 sm:$0xff]  }
 0x36b   : > { %11922 = vmatpush1.bf16.msra.mxu0 %v17107_v21  ;;  %13070 = vmatpush1.bf16.msra.mxu1 %v17110_v41  ;;  %v17197_v21 = vld [vmem:[%s18862_s8 + $0x1aa0] ss:$16 sps:$4 sm:$0xff]   ;;  %v17200_v41 = vld [vmem:[%s18862_s8 + $0x1aa8] ss:$16 sps:$4 sm:$0xff]  }
 0x36c   : > { %11923 = vmatprep.subr.bf16.mxu0 %v17115_v43  ;;  %13071 = vmatprep.subr.bf16.mxu1 %v17118_v44  ;;  %v17205_v43 = vld [vmem:[%s18862_s8 + $0x1ac4] ss:$16 sps:$4 sm:$0xff]   ;;  %v17208_v44 = vld [vmem:[%s18862_s8 + $0x1acc] ss:$16 sps:$4 sm:$0xff]  }
 0x36f   : > { %11924 = vmatpush1.bf16.msra.mxu0 %v17113_v45  ;;  %13072 = vmatpush1.bf16.msra.mxu1 %v17116_v46  ;;  %v17203_v45 = vld [vmem:[%s18862_s8 + $0x1ac0] ss:$16 sps:$4 sm:$0xff]   ;;  %v17206_v46 = vld [vmem:[%s18862_s8 + $0x1ac8] ss:$16 sps:$4 sm:$0xff]  }
 0x370   : > { %11925 = vmatprep.subr.bf16.mxu0 %v17121_v47  ;;  %13073 = vmatprep.subr.bf16.mxu1 %v17124_v50  ;;  %v17211_v47 = vld [vmem:[%s18862_s8 + $0x1ae4] ss:$16 sps:$4 sm:$0xff]   ;;  %v17214_v50 = vld [vmem:[%s18862_s8 + $0x1aec] ss:$16 sps:$4 sm:$0xff]  }
 0x373   : > { %11926 = vmatpush1.bf16.msra.mxu0 %v17119_v51  ;;  %13074 = vmatpush1.bf16.msra.mxu1 %v17122_v53  ;;  %v17209_v51 = vld [vmem:[%s18862_s8 + $0x1ae0] ss:$16 sps:$4 sm:$0xff]   ;;  %v17212_v53 = vld [vmem:[%s18862_s8 + $0x1ae8] ss:$16 sps:$4 sm:$0xff]  }
 0x374   : > { %11927 = vmatprep.subr.bf16.mxu0 %v17127_v54  ;;  %13075 = vmatprep.subr.bf16.mxu1 %v17130_v55  ;;  %v17217_v54 = vld [vmem:[%s18862_s8 + $0x1b04] ss:$16 sps:$4 sm:$0xff]   ;;  %v17220_v55 = vld [vmem:[%s18862_s8 + $0x1b0c] ss:$16 sps:$4 sm:$0xff]  }
 0x377   : > { %11928 = vmatpush1.bf16.msra.mxu0 %v17125_v38  ;;  %13076 = vmatpush1.bf16.msra.mxu1 %v17128_v56  ;;  %v17215_v38 = vld [vmem:[%s18862_s8 + $0x1b00] ss:$16 sps:$4 sm:$0xff]   ;;  %v17218_v56 = vld [vmem:[%s18862_s8 + $0x1b08] ss:$16 sps:$4 sm:$0xff]  }
 0x378   : > { %11929 = vmatprep.subr.bf16.mxu0 %v17133_v57  ;;  %13077 = vmatprep.subr.bf16.mxu1 %v17136_v58  ;;  %v17223_v57 = vld [vmem:[%s18862_s8 + $0x1b24] ss:$16 sps:$4 sm:$0xff]   ;;  %v17226_v58 = vld [vmem:[%s18862_s8 + $0x1b2c] ss:$16 sps:$4 sm:$0xff]  }
 0x37b   : > { %11930 = vmatpush1.bf16.msra.mxu0 %v17131_v48  ;;  %13078 = vmatpush1.bf16.msra.mxu1 %v17134_v59  ;;  %v17221_v48 = vld [vmem:[%s18862_s8 + $0x1b20] ss:$16 sps:$4 sm:$0xff]   ;;  %v17224_v59 = vld [vmem:[%s18862_s8 + $0x1b28] ss:$16 sps:$4 sm:$0xff]  }
 0x37c   : > { %11931 = vmatprep.subr.bf16.mxu0 %v17139_v61  ;;  %13079 = vmatprep.subr.bf16.mxu1 %v17142_v62  ;;  %v17229_v61 = vld [vmem:[%s18862_s8 + $0x1b44] ss:$16 sps:$4 sm:$0xff]   ;;  %v17232_v62 = vld [vmem:[%s18862_s8 + $0x1b4c] ss:$16 sps:$4 sm:$0xff]  }
 0x37f   : > { %11932 = vmatpush1.bf16.msra.mxu0 %v17137_v0  ;;  %13080 = vmatpush1.bf16.msra.mxu1 %v17140_v1  ;;  %v17227_v0 = vld [vmem:[%s18862_s8 + $0x1b40] ss:$16 sps:$4 sm:$0xff]   ;;  %v17230_v1 = vld [vmem:[%s18862_s8 + $0x1b48] ss:$16 sps:$4 sm:$0xff]  }
 0x380   : > { %11933 = vmatprep.subr.bf16.mxu0 %v17145_v35  ;;  %13081 = vmatprep.subr.bf16.mxu1 %v17148_v2  ;;  %v17235_v35 = vld [vmem:[%s18862_s8 + $0x1b64] ss:$16 sps:$4 sm:$0xff]   ;;  %v17238_v2 = vld [vmem:[%s18862_s8 + $0x1b6c] ss:$16 sps:$4 sm:$0xff]  }
 0x383   : > { %11934 = vmatpush1.bf16.msra.mxu0 %v17143_v3  ;;  %13082 = vmatpush1.bf16.msra.mxu1 %v17146_v4  ;;  %v17233_v3 = vld [vmem:[%s18862_s8 + $0x1b60] ss:$16 sps:$4 sm:$0xff]   ;;  %v17236_v4 = vld [vmem:[%s18862_s8 + $0x1b68] ss:$16 sps:$4 sm:$0xff]  }
 0x384   : > { %11935 = vmatprep.subr.bf16.mxu0 %v17151_v5  ;;  %13083 = vmatprep.subr.bf16.mxu1 %v17154_v6  ;;  %v17241_v5 = vld [vmem:[%s18862_s8 + $0x1b84] ss:$16 sps:$4 sm:$0xff]   ;;  %v17244_v6 = vld [vmem:[%s18862_s8 + $0x1b8c] ss:$16 sps:$4 sm:$0xff]  }
 0x387   : > { %11936 = vmatpush1.bf16.msra.mxu0 %v17149_v7  ;;  %13084 = vmatpush1.bf16.msra.mxu1 %v17152_v9  ;;  %v17239_v7 = vld [vmem:[%s18862_s8 + $0x1b80] ss:$16 sps:$4 sm:$0xff]   ;;  %v17242_v9 = vld [vmem:[%s18862_s8 + $0x1b88] ss:$16 sps:$4 sm:$0xff]  }
 0x388   : > { %11937 = vmatprep.subr.bf16.mxu0 %v17157_v10  ;;  %13085 = vmatprep.subr.bf16.mxu1 %v17160_v11  ;;  %v17247_v10 = vld [vmem:[%s18862_s8 + $0x1ba4] ss:$16 sps:$4 sm:$0xff]   ;;  %v17250_v11 = vld [vmem:[%s18862_s8 + $0x1bac] ss:$16 sps:$4 sm:$0xff]  }
 0x38b   : > { %11938 = vmatpush1.bf16.msra.mxu0 %v17155_v12  ;;  %13086 = vmatpush1.bf16.msra.mxu1 %v17158_v14  ;;  %v17245_v12 = vld [vmem:[%s18862_s8 + $0x1ba0] ss:$16 sps:$4 sm:$0xff]   ;;  %v17248_v14 = vld [vmem:[%s18862_s8 + $0x1ba8] ss:$16 sps:$4 sm:$0xff]  }
 0x38c   : > { %11939 = vmatprep.subr.bf16.mxu0 %v17163_v63  ;;  %13087 = vmatprep.subr.bf16.mxu1 %v17166_v16  ;;  %v17253_v63 = vld [vmem:[%s18862_s8 + $0x1bc4] ss:$16 sps:$4 sm:$0xff]   ;;  %v17256_v16 = vld [vmem:[%s18862_s8 + $0x1bcc] ss:$16 sps:$4 sm:$0xff]  }
 0x38f   : > { %11940 = vmatpush1.bf16.msra.mxu0 %v17161_v52  ;;  %13088 = vmatpush1.bf16.msra.mxu1 %v17164_v17  ;;  %v18613_v52 = vld [vmem:[%s21012_s0 + $0x18] sm:$0xff] }
 0x390   : > { %11950 = vmatprep.subr.bf16.mxu0 %v17169_v8  ;;  %13098 = vmatprep.subr.bf16.mxu1 %v17172_v18  ;;  %v2205_v17 = vcombine.high %v18613_v52, %v18613_v52  ;;  %v17251_v8 = vld [vmem:[%s18862_s8 + $0x1bc0] ss:$16 sps:$4 sm:$0xff]   ;;  %v17254_v18 = vld [vmem:[%s18862_s8 + $0x1bc8] ss:$16 sps:$4 sm:$0xff]  }
 0x391   : > { %v17335_v52 = vld [vmem:[%s18862_s8 + $0x1d80] ss:$16 sps:$4 sm:$0xff]  }
 0x392   : > { %11942 = vmatmul.mubr.bf16.vlgmr.msra.gmra.mrb[0].mxu0 %v19854_v13  ;;  %13090 = vmatmul.mubr.bf16.vlgmr.msra.gmra.mrb[0].mxu1 %v19854_v13 }
 0x393   : > { %11951 = vmatpush1.bf16.msra.mxu0 %v17167_v20  ;;  %13099 = vmatpush1.bf16.msra.mxu1 %v17170_v22  ;;  %v17259_v20 = vld [vmem:[%s18862_s8 + $0x1be4] ss:$16 sps:$4 sm:$0xff]   ;;  %v17262_v22 = vld [vmem:[%s18862_s8 + $0x1bec] ss:$16 sps:$4 sm:$0xff]  }
 0x394   : > { %11952 = vmatprep.subr.bf16.mxu0 %v17175_v23  ;;  %13100 = vmatprep.subr.bf16.mxu1 %v17178_v24  ;;  %v19924_v23 = vrot.slane %v2205_v17, %v18921_v49  ;;  %v17257_v24 = vld [vmem:[%s18862_s8 + $0x1be0] ss:$16 sps:$4 sm:$0xff]   ;;  %v17338_v17 = vld [vmem:[%s18862_s8 + $0x1d88] ss:$16 sps:$4 sm:$0xff]  }
 0x395   : > { %11982 = vmatprep.mubr.bf16.mxu0 %v2252_v26  ;;  %13130 = vmatprep.mubr.bf16.mxu1 %v2252_v26  ;;  %v17260_v26 = vld [vmem:[%s18862_s8 + $0x1be8] ss:$16 sps:$4 sm:$0xff]  }
 0x397   : > { %11953 = vmatpush1.bf16.msra.mxu0 %v17173_v60  ;;  %13101 = vmatpush1.bf16.msra.mxu1 %v17176_v27  ;;  %v17265_v60 = vld [vmem:[%s18862_s8 + $0x1c04] ss:$16 sps:$4 sm:$0xff]   ;;  %v17268_v27 = vld [vmem:[%s18862_s8 + $0x1c0c] ss:$16 sps:$4 sm:$0xff]  }
 0x398   : > { %11954 = vmatprep.subr.bf16.mxu0 %v17181_v28  ;;  %13102 = vmatprep.subr.bf16.mxu1 %v17184_v29  ;;  %v2221_v28 = vcombine.high %v19924_v23, %v19924_v23  ;;  %v2250_v29 = vcombine.high %v19854_v13, %v19854_v13  ;;  %v17269_v13 = vld [vmem:[%s18862_s8 + $0x1c20] ss:$16 sps:$4 sm:$0xff]  }
 0x39b   : > { %11955 = vmatpush1.bf16.msra.mxu0 %v17179_v19  ;;  %13103 = vmatpush1.bf16.msra.mxu1 %v17182_v30  ;;  %v17263_v19 = vld [vmem:[%s18862_s8 + $0x1c00] ss:$16 sps:$4 sm:$0xff]   ;;  %v17266_v30 = vld [vmem:[%s18862_s8 + $0x1c08] ss:$16 sps:$4 sm:$0xff]  }
 0x39c   : > { %11956 = vmatprep.subr.bf16.mxu0 %v17187_v15  ;;  %13104 = vmatprep.subr.bf16.mxu1 %v17190_v31  ;;  %v17271_v15 = vld [vmem:[%s18862_s8 + $0x1c24] ss:$16 sps:$4 sm:$0xff]   ;;  %v17274_v31 = vld [vmem:[%s18862_s8 + $0x1c2c] ss:$16 sps:$4 sm:$0xff]  }
 0x39f   : > { %11957 = vmatpush1.bf16.msra.mxu0 %v17185_v32  ;;  %13105 = vmatpush1.bf16.msra.mxu1 %v17188_v33  ;;  %v19939_v32 = vrot.slane %v2221_v28, %v18921_v49  ;;  %v17272_v33 = vld [vmem:[%s18862_s8 + $0x1c28] ss:$16 sps:$4 sm:$0xff]   ;;  %v17355_v28 = vld [vmem:[%s18862_s8 + $0x1de4] ss:$16 sps:$4 sm:$0xff]  }
 0x3a0   : > { %11958 = vmatprep.subr.bf16.mxu0 %v17193_v25  ;;  %13106 = vmatprep.subr.bf16.mxu1 %v17196_v34  ;;  %v17277_v25 = vld [vmem:[%s18862_s8 + $0x1c44] ss:$16 sps:$4 sm:$0xff]   ;;  %v17280_v34 = vld [vmem:[%s18862_s8 + $0x1c4c] ss:$16 sps:$4 sm:$0xff]  }
 0x3a3   : > { %11959 = vmatpush1.bf16.msra.mxu0 %v17191_v36  ;;  %13107 = vmatpush1.bf16.msra.mxu1 %v17194_v37  ;;  %v17275_v36 = vld [vmem:[%s18862_s8 + $0x1c40] ss:$16 sps:$4 sm:$0xff]   ;;  %v17278_v37 = vld [vmem:[%s18862_s8 + $0x1c48] ss:$16 sps:$4 sm:$0xff]  }
 0x3a4   : > { %11960 = vmatprep.subr.bf16.mxu0 %v17199_v39  ;;  %13108 = vmatprep.subr.bf16.mxu1 %v17202_v40  ;;  %v17283_v39 = vld [vmem:[%s18862_s8 + $0x1c64] ss:$16 sps:$4 sm:$0xff]   ;;  %v17286_v40 = vld [vmem:[%s18862_s8 + $0x1c6c] ss:$16 sps:$4 sm:$0xff]  }
 0x3a7   : > { %11961 = vmatpush1.bf16.msra.mxu0 %v17197_v21  ;;  %13109 = vmatpush1.bf16.msra.mxu1 %v17200_v41  ;;  %v17281_v21 = vld [vmem:[%s18862_s8 + $0x1c60] ss:$16 sps:$4 sm:$0xff]   ;;  %v17284_v41 = vld [vmem:[%s18862_s8 + $0x1c68] ss:$16 sps:$4 sm:$0xff]  }
 0x3a8   : > { %11962 = vmatprep.subr.bf16.mxu0 %v17205_v43  ;;  %13110 = vmatprep.subr.bf16.mxu1 %v17208_v44  ;;  %v17289_v43 = vld [vmem:[%s18862_s8 + $0x1c84] ss:$16 sps:$4 sm:$0xff]   ;;  %v17292_v44 = vld [vmem:[%s18862_s8 + $0x1c8c] ss:$16 sps:$4 sm:$0xff]  }
 0x3ab   : > { %11963 = vmatpush1.bf16.msra.mxu0 %v17203_v45  ;;  %13111 = vmatpush1.bf16.msra.mxu1 %v17206_v46  ;;  %v17287_v45 = vld [vmem:[%s18862_s8 + $0x1c80] ss:$16 sps:$4 sm:$0xff]   ;;  %v17290_v46 = vld [vmem:[%s18862_s8 + $0x1c88] ss:$16 sps:$4 sm:$0xff]  }
 0x3ac   : > { %11964 = vmatprep.subr.bf16.mxu0 %v17211_v47  ;;  %13112 = vmatprep.subr.bf16.mxu1 %v17214_v50  ;;  %v17295_v47 = vld [vmem:[%s18862_s8 + $0x1ca4] ss:$16 sps:$4 sm:$0xff]   ;;  %v17298_v50 = vld [vmem:[%s18862_s8 + $0x1cac] ss:$16 sps:$4 sm:$0xff]  }
 0x3af   : > { %11965 = vmatpush1.bf16.msra.mxu0 %v17209_v51  ;;  %13113 = vmatpush1.bf16.msra.mxu1 %v17212_v53  ;;  %v17293_v51 = vld [vmem:[%s18862_s8 + $0x1ca0] ss:$16 sps:$4 sm:$0xff]   ;;  %v17296_v53 = vld [vmem:[%s18862_s8 + $0x1ca8] ss:$16 sps:$4 sm:$0xff]  }
 0x3b0   : > { %11966 = vmatprep.subr.bf16.mxu0 %v17217_v54  ;;  %13114 = vmatprep.subr.bf16.mxu1 %v17220_v55  ;;  %v17301_v54 = vld [vmem:[%s18862_s8 + $0x1cc4] ss:$16 sps:$4 sm:$0xff]   ;;  %v17304_v55 = vld [vmem:[%s18862_s8 + $0x1ccc] ss:$16 sps:$4 sm:$0xff]  }
 0x3b3   : > { %11967 = vmatpush1.bf16.msra.mxu0 %v17215_v38  ;;  %13115 = vmatpush1.bf16.msra.mxu1 %v17218_v56  ;;  %v17299_v38 = vld [vmem:[%s18862_s8 + $0x1cc0] ss:$16 sps:$4 sm:$0xff]   ;;  %v17302_v56 = vld [vmem:[%s18862_s8 + $0x1cc8] ss:$16 sps:$4 sm:$0xff]  }
 0x3b4   : > { %11968 = vmatprep.subr.bf16.mxu0 %v17223_v57  ;;  %13116 = vmatprep.subr.bf16.mxu1 %v17226_v58  ;;  %v17307_v57 = vld [vmem:[%s18862_s8 + $0x1ce4] ss:$16 sps:$4 sm:$0xff]   ;;  %v17310_v58 = vld [vmem:[%s18862_s8 + $0x1cec] ss:$16 sps:$4 sm:$0xff]  }
 0x3b7   : > { %11969 = vmatpush1.bf16.msra.mxu0 %v17221_v48  ;;  %13117 = vmatpush1.bf16.msra.mxu1 %v17224_v59  ;;  %v17305_v48 = vld [vmem:[%s18862_s8 + $0x1ce0] ss:$16 sps:$4 sm:$0xff]   ;;  %v17308_v59 = vld [vmem:[%s18862_s8 + $0x1ce8] ss:$16 sps:$4 sm:$0xff]  }
 0x3b8   : > { %11970 = vmatprep.subr.bf16.mxu0 %v17229_v61  ;;  %13118 = vmatprep.subr.bf16.mxu1 %v17232_v62  ;;  %v17313_v61 = vld [vmem:[%s18862_s8 + $0x1d04] ss:$16 sps:$4 sm:$0xff]   ;;  %v17316_v62 = vld [vmem:[%s18862_s8 + $0x1d0c] ss:$16 sps:$4 sm:$0xff]  }
 0x3bb   : > { %11971 = vmatpush1.bf16.msra.mxu0 %v17227_v0  ;;  %13119 = vmatpush1.bf16.msra.mxu1 %v17230_v1  ;;  %v17311_v0 = vld [vmem:[%s18862_s8 + $0x1d00] ss:$16 sps:$4 sm:$0xff]   ;;  %v17314_v1 = vld [vmem:[%s18862_s8 + $0x1d08] ss:$16 sps:$4 sm:$0xff]  }
 0x3bc   : > { %11972 = vmatprep.subr.bf16.mxu0 %v17235_v35  ;;  %13120 = vmatprep.subr.bf16.mxu1 %v17238_v2  ;;  %v17319_v35 = vld [vmem:[%s18862_s8 + $0x1d24] ss:$16 sps:$4 sm:$0xff]   ;;  %v17322_v2 = vld [vmem:[%s18862_s8 + $0x1d2c] ss:$16 sps:$4 sm:$0xff]  }
 0x3bf   : > { %11973 = vmatpush1.bf16.msra.mxu0 %v17233_v3  ;;  %13121 = vmatpush1.bf16.msra.mxu1 %v17236_v4  ;;  %v17317_v3 = vld [vmem:[%s18862_s8 + $0x1d20] ss:$16 sps:$4 sm:$0xff]   ;;  %v17320_v4 = vld [vmem:[%s18862_s8 + $0x1d28] ss:$16 sps:$4 sm:$0xff]  }
 0x3c0   : > { %11974 = vmatprep.subr.bf16.mxu0 %v17241_v5  ;;  %13122 = vmatprep.subr.bf16.mxu1 %v17244_v6  ;;  %v17325_v5 = vld [vmem:[%s18862_s8 + $0x1d44] ss:$16 sps:$4 sm:$0xff]   ;;  %v17328_v6 = vld [vmem:[%s18862_s8 + $0x1d4c] ss:$16 sps:$4 sm:$0xff]  }
 0x3c3   : > { %11975 = vmatpush1.bf16.msra.mxu0 %v17239_v7  ;;  %13123 = vmatpush1.bf16.msra.mxu1 %v17242_v9  ;;  %v17323_v7 = vld [vmem:[%s18862_s8 + $0x1d40] ss:$16 sps:$4 sm:$0xff]   ;;  %v17326_v9 = vld [vmem:[%s18862_s8 + $0x1d48] ss:$16 sps:$4 sm:$0xff]  }
 0x3c4   : > { %11976 = vmatprep.subr.bf16.mxu0 %v17247_v10  ;;  %13124 = vmatprep.subr.bf16.mxu1 %v17250_v11  ;;  %v17331_v10 = vld [vmem:[%s18862_s8 + $0x1d64] ss:$16 sps:$4 sm:$0xff]   ;;  %v17334_v11 = vld [vmem:[%s18862_s8 + $0x1d6c] ss:$16 sps:$4 sm:$0xff]  }
 0x3c7   : > { %11977 = vmatpush1.bf16.msra.mxu0 %v17245_v12  ;;  %13125 = vmatpush1.bf16.msra.mxu1 %v17248_v14  ;;  %v17329_v12 = vld [vmem:[%s18862_s8 + $0x1d60] ss:$16 sps:$4 sm:$0xff]   ;;  %v17332_v14 = vld [vmem:[%s18862_s8 + $0x1d68] ss:$16 sps:$4 sm:$0xff]  }
 0x3c8   : > { %11978 = vmatprep.subr.bf16.mxu0 %v17253_v63  ;;  %13126 = vmatprep.subr.bf16.mxu1 %v17256_v16  ;;  %v17337_v63 = vld [vmem:[%s18862_s8 + $0x1d84] ss:$16 sps:$4 sm:$0xff]   ;;  %v17340_v16 = vld [vmem:[%s18862_s8 + $0x1d8c] ss:$16 sps:$4 sm:$0xff]  }
 0x3cb   : > { %11979 = vmatpush1.bf16.msra.mxu0 %v17251_v8  ;;  %13127 = vmatpush1.bf16.msra.mxu1 %v17254_v18  ;;  %v17343_v8 = vld [vmem:[%s18862_s8 + $0x1da4] ss:$16 sps:$4 sm:$0xff]   ;;  %v17346_v18 = vld [vmem:[%s18862_s8 + $0x1dac] ss:$16 sps:$4 sm:$0xff]  }
 0x3cc   : > { %11980 = vmatprep.subr.bf16.mxu0 %v17259_v20  ;;  %13128 = vmatprep.subr.bf16.mxu1 %v17262_v22  ;;  %v17341_v20 = vld [vmem:[%s18862_s8 + $0x1da0] ss:$16 sps:$4 sm:$0xff]   ;;  %v17344_v22 = vld [vmem:[%s18862_s8 + $0x1da8] ss:$16 sps:$4 sm:$0xff]  }
 0x3cf   : > { %11981 = vmatpush1.bf16.msra.mxu0 %v17257_v24  ;;  %13129 = vmatpush1.bf16.msra.mxu1 %v17260_v26  ;;  %v17349_v24 = vld [vmem:[%s18862_s8 + $0x1dc4] ss:$16 sps:$4 sm:$0xff]   ;;  %v17352_v26 = vld [vmem:[%s18862_s8 + $0x1dcc] ss:$16 sps:$4 sm:$0xff]  }
 0x3d0   : > { %11991 = vmatprep.subr.bf16.mxu0 %v17265_v60  ;;  %13139 = vmatprep.subr.bf16.mxu1 %v17268_v27  ;;  %v17347_v60 = vld [vmem:[%s18862_s8 + $0x1dc0] ss:$16 sps:$4 sm:$0xff]   ;;  %v17350_v27 = vld [vmem:[%s18862_s8 + $0x1dc8] ss:$16 sps:$4 sm:$0xff]  }
 0x3d2   : > { %11983 = vmatmul.mubr.bf16.vlgmr.msra.gmra.mrb[0].mxu0 %v2250_v29  ;;  %13131 = vmatmul.mubr.bf16.vlgmr.msra.gmra.mrb[0].mxu1 %v2250_v29  ;;  %v17358_v29 = vld [vmem:[%s18862_s8 + $0x1dec] ss:$16 sps:$4 sm:$0xff]  }
 0x3d3   : > { %11992 = vmatpush1.bf16.msra.mxu0 %v17263_v19  ;;  %13140 = vmatpush1.bf16.msra.mxu1 %v17266_v30  ;;  %v17353_v19 = vld [vmem:[%s18862_s8 + $0x1de0] ss:$16 sps:$4 sm:$0xff]   ;;  %v17356_v30 = vld [vmem:[%s18862_s8 + $0x1de8] ss:$16 sps:$4 sm:$0xff]  }
 0x3d4   : > { %11993 = vmatprep.subr.bf16.mxu0 %v17271_v15  ;;  %13141 = vmatprep.subr.bf16.mxu1 %v17274_v31  ;;  %v17362_v15 = vld [vmem:[%s18862_s8 + $0x1e04] ss:$16 sps:$4 sm:$0xff]   ;;  %v17365_v31 = vld [vmem:[%s18862_s8 + $0x1e0c] ss:$16 sps:$4 sm:$0xff]  }
 0x3d5   : > { %12023 = vmatprep.mubr.bf16.mxu0 %v19939_v32  ;;  %13171 = vmatprep.mubr.bf16.mxu1 %v19939_v32 }
 0x3d7   : > { %11994 = vmatpush1.bf16.msra.mxu0 %v17269_v13  ;;  %13142 = vmatpush1.bf16.msra.mxu1 %v17272_v33  ;;  %v20005_v13 = vrot.slane %v19924_v23, %v18921_v49  ;;  %v17360_v33 = vld [vmem:[%s18862_s8 + $0x1e00] ss:$16 sps:$4 sm:$0xff]  }
 0x3d8   : > { %11995 = vmatprep.subr.bf16.mxu0 %v17277_v25  ;;  %13143 = vmatprep.subr.bf16.mxu1 %v17280_v34  ;;  %v17363_v25 = vld [vmem:[%s18862_s8 + $0x1e08] ss:$16 sps:$4 sm:$0xff]   ;;  %v17368_v34 = vld [vmem:[%s18862_s8 + $0x1e24] ss:$16 sps:$4 sm:$0xff]   ;;  %v17366_v23 = vld [vmem:[%s18862_s8 + $0x1e20] ss:$16 sps:$4 sm:$0xff]  }
 0x3db   : > { %11996 = vmatpush1.bf16.msra.mxu0 %v17275_v36  ;;  %13144 = vmatpush1.bf16.msra.mxu1 %v17278_v37  ;;  %v17371_v36 = vld [vmem:[%s18862_s8 + $0x1e2c] ss:$16 sps:$4 sm:$0xff]   ;;  %v2253_v37 = vcombine.high %v19939_v32, %v19939_v32  ;;  %v17372_v32 = vld [vmem:[%s18862_s8 + $0x1e40] ss:$16 sps:$4 sm:$0xff]  }
 0x3dc   : > { %11997 = vmatprep.subr.bf16.mxu0 %v17283_v39  ;;  %13145 = vmatprep.subr.bf16.mxu1 %v17286_v40  ;;  %v17369_v39 = vld [vmem:[%s18862_s8 + $0x1e28] ss:$16 sps:$4 sm:$0xff]   ;;  %v17374_v40 = vld [vmem:[%s18862_s8 + $0x1e44] ss:$16 sps:$4 sm:$0xff]  }
 0x3df   : > { %11998 = vmatpush1.bf16.msra.mxu0 %v17281_v21  ;;  %13146 = vmatpush1.bf16.msra.mxu1 %v17284_v41  ;;  %v17377_v21 = vld [vmem:[%s18862_s8 + $0x1e4c] ss:$16 sps:$4 sm:$0xff]   ;;  %v17375_v41 = vld [vmem:[%s18862_s8 + $0x1e48] ss:$16 sps:$4 sm:$0xff]  }
 0x3e0   : > { %11999 = vmatprep.subr.bf16.mxu0 %v17289_v43  ;;  %13147 = vmatprep.subr.bf16.mxu1 %v17292_v44  ;;  %v17380_v43 = vld [vmem:[%s18862_s8 + $0x1e64] ss:$16 sps:$4 sm:$0xff]   ;;  %v17383_v44 = vld [vmem:[%s18862_s8 + $0x1e6c] ss:$16 sps:$4 sm:$0xff]  }
 0x3e3   : > { %12000 = vmatpush1.bf16.msra.mxu0 %v17287_v45  ;;  %13148 = vmatpush1.bf16.msra.mxu1 %v17290_v46  ;;  %v17378_v45 = vld [vmem:[%s18862_s8 + $0x1e60] ss:$16 sps:$4 sm:$0xff]   ;;  %v17381_v46 = vld [vmem:[%s18862_s8 + $0x1e68] ss:$16 sps:$4 sm:$0xff]  }
 0x3e4   : > { %12001 = vmatprep.subr.bf16.mxu0 %v17295_v47  ;;  %13149 = vmatprep.subr.bf16.mxu1 %v17298_v50  ;;  %v17386_v47 = vld [vmem:[%s18862_s8 + $0x1e84] ss:$16 sps:$4 sm:$0xff]   ;;  %v17389_v50 = vld [vmem:[%s18862_s8 + $0x1e8c] ss:$16 sps:$4 sm:$0xff]  }
 0x3e7   : > { %12002 = vmatpush1.bf16.msra.mxu0 %v17293_v51  ;;  %13150 = vmatpush1.bf16.msra.mxu1 %v17296_v53  ;;  %v17384_v51 = vld [vmem:[%s18862_s8 + $0x1e80] ss:$16 sps:$4 sm:$0xff]   ;;  %v17387_v53 = vld [vmem:[%s18862_s8 + $0x1e88] ss:$16 sps:$4 sm:$0xff]  }
 0x3e8   : > { %12003 = vmatprep.subr.bf16.mxu0 %v17301_v54  ;;  %13151 = vmatprep.subr.bf16.mxu1 %v17304_v55  ;;  %v17392_v54 = vld [vmem:[%s18862_s8 + $0x1ea4] ss:$16 sps:$4 sm:$0xff]   ;;  %v17395_v55 = vld [vmem:[%s18862_s8 + $0x1eac] ss:$16 sps:$4 sm:$0xff]  }
 0x3eb   : > { %12004 = vmatpush1.bf16.msra.mxu0 %v17299_v38  ;;  %13152 = vmatpush1.bf16.msra.mxu1 %v17302_v56  ;;  %v17390_v38 = vld [vmem:[%s18862_s8 + $0x1ea0] ss:$16 sps:$4 sm:$0xff]   ;;  %v17393_v56 = vld [vmem:[%s18862_s8 + $0x1ea8] ss:$16 sps:$4 sm:$0xff]  }
 0x3ec   : > { %12005 = vmatprep.subr.bf16.mxu0 %v17307_v57  ;;  %13153 = vmatprep.subr.bf16.mxu1 %v17310_v58  ;;  %v17398_v57 = vld [vmem:[%s18862_s8 + $0x1ec4] ss:$16 sps:$4 sm:$0xff]   ;;  %v17401_v58 = vld [vmem:[%s18862_s8 + $0x1ecc] ss:$16 sps:$4 sm:$0xff]  }
 0x3ef   : > { %12006 = vmatpush1.bf16.msra.mxu0 %v17305_v48  ;;  %13154 = vmatpush1.bf16.msra.mxu1 %v17308_v59  ;;  %v17396_v48 = vld [vmem:[%s18862_s8 + $0x1ec0] ss:$16 sps:$4 sm:$0xff]   ;;  %v17399_v59 = vld [vmem:[%s18862_s8 + $0x1ec8] ss:$16 sps:$4 sm:$0xff]  }
 0x3f0   : > { %12007 = vmatprep.subr.bf16.mxu0 %v17313_v61  ;;  %13155 = vmatprep.subr.bf16.mxu1 %v17316_v62  ;;  %v17404_v61 = vld [vmem:[%s18862_s8 + $0x1ee4] ss:$16 sps:$4 sm:$0xff]   ;;  %v17407_v62 = vld [vmem:[%s18862_s8 + $0x1eec] ss:$16 sps:$4 sm:$0xff]  }
 0x3f3   : > { %12008 = vmatpush1.bf16.msra.mxu0 %v17311_v0  ;;  %13156 = vmatpush1.bf16.msra.mxu1 %v17314_v1  ;;  %v17402_v0 = vld [vmem:[%s18862_s8 + $0x1ee0] ss:$16 sps:$4 sm:$0xff]   ;;  %v17405_v1 = vld [vmem:[%s18862_s8 + $0x1ee8] ss:$16 sps:$4 sm:$0xff]  }
 0x3f4   : > { %12009 = vmatprep.subr.bf16.mxu0 %v17319_v35  ;;  %13157 = vmatprep.subr.bf16.mxu1 %v17322_v2  ;;  %v17410_v35 = vld [vmem:[%s18862_s8 + $0x1f04] ss:$16 sps:$4 sm:$0xff]   ;;  %v17413_v2 = vld [vmem:[%s18862_s8 + $0x1f0c] ss:$16 sps:$4 sm:$0xff]  }
 0x3f7   : > { %12010 = vmatpush1.bf16.msra.mxu0 %v17317_v3  ;;  %13158 = vmatpush1.bf16.msra.mxu1 %v17320_v4  ;;  %v17408_v3 = vld [vmem:[%s18862_s8 + $0x1f00] ss:$16 sps:$4 sm:$0xff]   ;;  %v17411_v4 = vld [vmem:[%s18862_s8 + $0x1f08] ss:$16 sps:$4 sm:$0xff]  }
 0x3f8   : > { %12011 = vmatprep.subr.bf16.mxu0 %v17325_v5  ;;  %13159 = vmatprep.subr.bf16.mxu1 %v17328_v6  ;;  %v17416_v5 = vld [vmem:[%s18862_s8 + $0x1f24] ss:$16 sps:$4 sm:$0xff]   ;;  %v17419_v6 = vld [vmem:[%s18862_s8 + $0x1f2c] ss:$16 sps:$4 sm:$0xff]  }
 0x3fb   : > { %12012 = vmatpush1.bf16.msra.mxu0 %v17323_v7  ;;  %13160 = vmatpush1.bf16.msra.mxu1 %v17326_v9  ;;  %v17414_v7 = vld [vmem:[%s18862_s8 + $0x1f20] ss:$16 sps:$4 sm:$0xff]   ;;  %v17417_v9 = vld [vmem:[%s18862_s8 + $0x1f28] ss:$16 sps:$4 sm:$0xff]  }
 0x3fc   : > { %12013 = vmatprep.subr.bf16.mxu0 %v17331_v10  ;;  %13161 = vmatprep.subr.bf16.mxu1 %v17334_v11  ;;  %v17422_v10 = vld [vmem:[%s18862_s8 + $0x1f44] ss:$16 sps:$4 sm:$0xff]   ;;  %v17425_v11 = vld [vmem:[%s18862_s8 + $0x1f4c] ss:$16 sps:$4 sm:$0xff]  }
 0x3ff   : > { %12014 = vmatpush1.bf16.msra.mxu0 %v17329_v12  ;;  %13162 = vmatpush1.bf16.msra.mxu1 %v17332_v14  ;;  %v17420_v12 = vld [vmem:[%s18862_s8 + $0x1f40] ss:$16 sps:$4 sm:$0xff]   ;;  %v17423_v14 = vld [vmem:[%s18862_s8 + $0x1f48] ss:$16 sps:$4 sm:$0xff]  }
 0x400   : > { %12015 = vmatprep.subr.bf16.mxu0 %v17337_v63  ;;  %13163 = vmatprep.subr.bf16.mxu1 %v17340_v16  ;;  %v17428_v63 = vld [vmem:[%s18862_s8 + $0x1f64] ss:$16 sps:$4 sm:$0xff]   ;;  %v17431_v16 = vld [vmem:[%s18862_s8 + $0x1f6c] ss:$16 sps:$4 sm:$0xff]  }
 0x403   : > { %12016 = vmatpush1.bf16.msra.mxu0 %v17335_v52  ;;  %13164 = vmatpush1.bf16.msra.mxu1 %v17338_v17  ;;  %v17426_v52 = vld [vmem:[%s18862_s8 + $0x1f60] ss:$16 sps:$4 sm:$0xff]   ;;  %v17429_v17 = vld [vmem:[%s18862_s8 + $0x1f68] ss:$16 sps:$4 sm:$0xff]  }
 0x404   : > { %12017 = vmatprep.subr.bf16.mxu0 %v17343_v8  ;;  %13165 = vmatprep.subr.bf16.mxu1 %v17346_v18  ;;  %v17434_v8 = vld [vmem:[%s18862_s8 + $0x1f84] ss:$16 sps:$4 sm:$0xff]   ;;  %v17437_v18 = vld [vmem:[%s18862_s8 + $0x1f8c] ss:$16 sps:$4 sm:$0xff]  }
 0x407   : > { %12018 = vmatpush1.bf16.msra.mxu0 %v17341_v20  ;;  %13166 = vmatpush1.bf16.msra.mxu1 %v17344_v22  ;;  %v17432_v20 = vld [vmem:[%s18862_s8 + $0x1f80] ss:$16 sps:$4 sm:$0xff]   ;;  %v17435_v22 = vld [vmem:[%s18862_s8 + $0x1f88] ss:$16 sps:$4 sm:$0xff]  }
 0x408   : > { %12019 = vmatprep.subr.bf16.mxu0 %v17349_v24  ;;  %13167 = vmatprep.subr.bf16.mxu1 %v17352_v26  ;;  %v17440_v24 = vld [vmem:[%s18862_s8 + $0x1fa4] ss:$16 sps:$4 sm:$0xff]   ;;  %v17443_v26 = vld [vmem:[%s18862_s8 + $0x1fac] ss:$16 sps:$4 sm:$0xff]  }
 0x40b   : > { %12020 = vmatpush1.bf16.msra.mxu0 %v17347_v60  ;;  %13168 = vmatpush1.bf16.msra.mxu1 %v17350_v27  ;;  %v17438_v60 = vld [vmem:[%s18862_s8 + $0x1fa0] ss:$16 sps:$4 sm:$0xff]   ;;  %v17441_v27 = vld [vmem:[%s18862_s8 + $0x1fa8] ss:$16 sps:$4 sm:$0xff]  }
 0x40c   : > { %12021 = vmatprep.subr.bf16.mxu0 %v17355_v28  ;;  %13169 = vmatprep.subr.bf16.mxu1 %v17358_v29  ;;  %v17446_v28 = vld [vmem:[%s18862_s8 + $0x1fc4] ss:$16 sps:$4 sm:$0xff]   ;;  %v17449_v29 = vld [vmem:[%s18862_s8 + $0x1fcc] ss:$16 sps:$4 sm:$0xff]  }
 0x40f   : > { %12022 = vmatpush1.bf16.msra.mxu0 %v17353_v19  ;;  %13170 = vmatpush1.bf16.msra.mxu1 %v17356_v30  ;;  %v20070_v19 = vld [vmem:[%s21012_s0 + $0x20] sm:$0xff] }
 0x410   : > { %12032 = vmatprep.subr.bf16.mxu0 %v17362_v15  ;;  %13180 = vmatprep.subr.bf16.mxu1 %v17365_v31  ;;  %v17444_v30 = vld [vmem:[%s18862_s8 + $0x1fc0] ss:$16 sps:$4 sm:$0xff]   ;;  %v17447_v15 = vld [vmem:[%s18862_s8 + $0x1fc8] ss:$16 sps:$4 sm:$0xff]   ;;  %v17452_v31 = vld [vmem:[%s18862_s8 + $0x1fe4] ss:$16 sps:$4 sm:$0xff]  }
 0x412   : > { %12024 = vmatmul.mubr.bf16.vlgmr.msra.gmra.mrb[0].mxu0 %v20005_v13  ;;  %13172 = vmatmul.mubr.bf16.vlgmr.msra.gmra.mrb[0].mxu1 %v20005_v13 }
 0x413   : > { %12033 = vmatpush1.bf16.msra.mxu0 %v17360_v33  ;;  %13181 = vmatpush1.bf16.msra.mxu1 %v17363_v25  ;;  %v17455_v33 = vld [vmem:[%s18862_s8 + $0x1fec] ss:$16 sps:$4 sm:$0xff]   ;;  %v20078_v25 = vrot.slane %v20070_v19, %v18921_v49 }
 0x414   : > { %12034 = vmatprep.subr.bf16.mxu0 %v17368_v34  ;;  %13182 = vmatprep.subr.bf16.mxu1 %v17371_v36  ;;  %v17450_v34 = vld [vmem:[%s18862_s8 + $0x1fe0] ss:$16 sps:$4 sm:$0xff]   ;;  %v17453_v36 = vld [vmem:[%s18862_s8 + $0x1fe8] ss:$16 sps:$4 sm:$0xff]  }
 0x415   : > { %12064 = vmatprep.mubr.bf16.mxu0 %v2253_v37  ;;  %13212 = vmatprep.mubr.bf16.mxu1 %v2253_v37  ;;  %v17458_v37 = vld [vmem:[%s18862_s8 + $0x2004] ss:$16 sps:$4 sm:$0xff]  }
 0x417   : > { %12035 = vmatpush1.bf16.msra.mxu0 %v17366_v23  ;;  %13183 = vmatpush1.bf16.msra.mxu1 %v17369_v39  ;;  %v17461_v23 = vld [vmem:[%s18862_s8 + $0x200c] ss:$16 sps:$4 sm:$0xff]   ;;  %v2269_v39 = vcombine.high %v20078_v25, %v20078_v25 }
 0x418   : > { %12036 = vmatprep.subr.bf16.mxu0 %v17374_v40  ;;  %13184 = vmatprep.subr.bf16.mxu1 %v17377_v21  ;;  %v2251_v40 = vcombine.high %v20005_v13, %v20005_v13  ;;  %v17456_v21 = vld [vmem:[%s18862_s8 + $0x2000] ss:$16 sps:$4 sm:$0xff]  }
 0x419   : > { %v17462_v13 = vld [vmem:[%s18862_s8 + $0x2020] ss:$16 sps:$4 sm:$0xff]  }
 0x41b   : > { %12037 = vmatpush1.bf16.msra.mxu0 %v17372_v32  ;;  %13185 = vmatpush1.bf16.msra.mxu1 %v17375_v41  ;;  %v17459_v32 = vld [vmem:[%s18862_s8 + $0x2008] ss:$16 sps:$4 sm:$0xff]   ;;  %v17464_v41 = vld [vmem:[%s18862_s8 + $0x2024] ss:$16 sps:$4 sm:$0xff]  }
 0x41c   : > { %12038 = vmatprep.subr.bf16.mxu0 %v17380_v43  ;;  %13186 = vmatprep.subr.bf16.mxu1 %v17383_v44  ;;  %v17467_v43 = vld [vmem:[%s18862_s8 + $0x202c] ss:$16 sps:$4 sm:$0xff]   ;;  %v20093_v44 = vrot.slane %v2269_v39, %v18921_v49  ;;  %v17543_v39 = vld [vmem:[%s18862_s8 + $0x21c8] ss:$16 sps:$4 sm:$0xff]  }
 0x41f   : > { %12039 = vmatpush1.bf16.msra.mxu0 %v17378_v45  ;;  %13187 = vmatpush1.bf16.msra.mxu1 %v17381_v46  ;;  %v17465_v45 = vld [vmem:[%s18862_s8 + $0x2028] ss:$16 sps:$4 sm:$0xff]   ;;  %v17470_v46 = vld [vmem:[%s18862_s8 + $0x2044] ss:$16 sps:$4 sm:$0xff]  }
 0x420   : > { %12040 = vmatprep.subr.bf16.mxu0 %v17386_v47  ;;  %13188 = vmatprep.subr.bf16.mxu1 %v17389_v50  ;;  %v17473_v47 = vld [vmem:[%s18862_s8 + $0x204c] ss:$16 sps:$4 sm:$0xff]   ;;  %v17468_v50 = vld [vmem:[%s18862_s8 + $0x2040] ss:$16 sps:$4 sm:$0xff]  }
 0x423   : > { %12041 = vmatpush1.bf16.msra.mxu0 %v17384_v51  ;;  %13189 = vmatpush1.bf16.msra.mxu1 %v17387_v53  ;;  %v17471_v51 = vld [vmem:[%s18862_s8 + $0x2048] ss:$16 sps:$4 sm:$0xff]   ;;  %v17476_v53 = vld [vmem:[%s18862_s8 + $0x2064] ss:$16 sps:$4 sm:$0xff]  }
 0x424   : > { %12042 = vmatprep.subr.bf16.mxu0 %v17392_v54  ;;  %13190 = vmatprep.subr.bf16.mxu1 %v17395_v55  ;;  %v17479_v54 = vld [vmem:[%s18862_s8 + $0x206c] ss:$16 sps:$4 sm:$0xff]   ;;  %v17474_v55 = vld [vmem:[%s18862_s8 + $0x2060] ss:$16 sps:$4 sm:$0xff]  }
 0x427   : > { %12043 = vmatpush1.bf16.msra.mxu0 %v17390_v38  ;;  %13191 = vmatpush1.bf16.msra.mxu1 %v17393_v56  ;;  %v17477_v38 = vld [vmem:[%s18862_s8 + $0x2068] ss:$16 sps:$4 sm:$0xff]   ;;  %v17482_v56 = vld [vmem:[%s18862_s8 + $0x2084] ss:$16 sps:$4 sm:$0xff]  }
 0x428   : > { %12044 = vmatprep.subr.bf16.mxu0 %v17398_v57  ;;  %13192 = vmatprep.subr.bf16.mxu1 %v17401_v58  ;;  %v17485_v57 = vld [vmem:[%s18862_s8 + $0x208c] ss:$16 sps:$4 sm:$0xff]   ;;  %v17480_v58 = vld [vmem:[%s18862_s8 + $0x2080] ss:$16 sps:$4 sm:$0xff]  }
 0x42b   : > { %12045 = vmatpush1.bf16.msra.mxu0 %v17396_v48  ;;  %13193 = vmatpush1.bf16.msra.mxu1 %v17399_v59  ;;  %v17483_v48 = vld [vmem:[%s18862_s8 + $0x2088] ss:$16 sps:$4 sm:$0xff]   ;;  %v17488_v59 = vld [vmem:[%s18862_s8 + $0x20a4] ss:$16 sps:$4 sm:$0xff]  }
 0x42c   : > { %12046 = vmatprep.subr.bf16.mxu0 %v17404_v61  ;;  %13194 = vmatprep.subr.bf16.mxu1 %v17407_v62  ;;  %v17491_v61 = vld [vmem:[%s18862_s8 + $0x20ac] ss:$16 sps:$4 sm:$0xff]   ;;  %v17486_v62 = vld [vmem:[%s18862_s8 + $0x20a0] ss:$16 sps:$4 sm:$0xff]  }
 0x42f   : > { %12047 = vmatpush1.bf16.msra.mxu0 %v17402_v0  ;;  %13195 = vmatpush1.bf16.msra.mxu1 %v17405_v1  ;;  %v17489_v0 = vld [vmem:[%s18862_s8 + $0x20a8] ss:$16 sps:$4 sm:$0xff]   ;;  %v17494_v1 = vld [vmem:[%s18862_s8 + $0x20c4] ss:$16 sps:$4 sm:$0xff]  }
 0x430   : > { %12048 = vmatprep.subr.bf16.mxu0 %v17410_v35  ;;  %13196 = vmatprep.subr.bf16.mxu1 %v17413_v2  ;;  %v17497_v35 = vld [vmem:[%s18862_s8 + $0x20cc] ss:$16 sps:$4 sm:$0xff]   ;;  %v17492_v2 = vld [vmem:[%s18862_s8 + $0x20c0] ss:$16 sps:$4 sm:$0xff]  }
 0x433   : > { %12049 = vmatpush1.bf16.msra.mxu0 %v17408_v3  ;;  %13197 = vmatpush1.bf16.msra.mxu1 %v17411_v4  ;;  %v17495_v3 = vld [vmem:[%s18862_s8 + $0x20c8] ss:$16 sps:$4 sm:$0xff]   ;;  %v17500_v4 = vld [vmem:[%s18862_s8 + $0x20e4] ss:$16 sps:$4 sm:$0xff]  }
 0x434   : > { %12050 = vmatprep.subr.bf16.mxu0 %v17416_v5  ;;  %13198 = vmatprep.subr.bf16.mxu1 %v17419_v6  ;;  %v17503_v5 = vld [vmem:[%s18862_s8 + $0x20ec] ss:$16 sps:$4 sm:$0xff]   ;;  %v17498_v6 = vld [vmem:[%s18862_s8 + $0x20e0] ss:$16 sps:$4 sm:$0xff]  }
 0x437   : > { %12051 = vmatpush1.bf16.msra.mxu0 %v17414_v7  ;;  %13199 = vmatpush1.bf16.msra.mxu1 %v17417_v9  ;;  %v17501_v7 = vld [vmem:[%s18862_s8 + $0x20e8] ss:$16 sps:$4 sm:$0xff]   ;;  %v17506_v9 = vld [vmem:[%s18862_s8 + $0x2104] ss:$16 sps:$4 sm:$0xff]  }
 0x438   : > { %12052 = vmatprep.subr.bf16.mxu0 %v17422_v10  ;;  %13200 = vmatprep.subr.bf16.mxu1 %v17425_v11  ;;  %v17509_v10 = vld [vmem:[%s18862_s8 + $0x210c] ss:$16 sps:$4 sm:$0xff]   ;;  %v17504_v11 = vld [vmem:[%s18862_s8 + $0x2100] ss:$16 sps:$4 sm:$0xff]  }
 0x43b   : > { %12053 = vmatpush1.bf16.msra.mxu0 %v17420_v12  ;;  %13201 = vmatpush1.bf16.msra.mxu1 %v17423_v14  ;;  %v17507_v12 = vld [vmem:[%s18862_s8 + $0x2108] ss:$16 sps:$4 sm:$0xff]   ;;  %v17512_v14 = vld [vmem:[%s18862_s8 + $0x2124] ss:$16 sps:$4 sm:$0xff]  }
 0x43c   : > { %12054 = vmatprep.subr.bf16.mxu0 %v17428_v63  ;;  %13202 = vmatprep.subr.bf16.mxu1 %v17431_v16  ;;  %v17515_v63 = vld [vmem:[%s18862_s8 + $0x212c] ss:$16 sps:$4 sm:$0xff]   ;;  %v17510_v16 = vld [vmem:[%s18862_s8 + $0x2120] ss:$16 sps:$4 sm:$0xff]  }
 0x43f   : > { %12055 = vmatpush1.bf16.msra.mxu0 %v17426_v52  ;;  %13203 = vmatpush1.bf16.msra.mxu1 %v17429_v17  ;;  %v17513_v52 = vld [vmem:[%s18862_s8 + $0x2128] ss:$16 sps:$4 sm:$0xff]   ;;  %v17518_v17 = vld [vmem:[%s18862_s8 + $0x2144] ss:$16 sps:$4 sm:$0xff]  }
 0x440   : > { %12056 = vmatprep.subr.bf16.mxu0 %v17434_v8  ;;  %13204 = vmatprep.subr.bf16.mxu1 %v17437_v18  ;;  %v17521_v8 = vld [vmem:[%s18862_s8 + $0x214c] ss:$16 sps:$4 sm:$0xff]   ;;  %v17516_v18 = vld [vmem:[%s18862_s8 + $0x2140] ss:$16 sps:$4 sm:$0xff]  }
 0x443   : > { %12057 = vmatpush1.bf16.msra.mxu0 %v17432_v20  ;;  %13205 = vmatpush1.bf16.msra.mxu1 %v17435_v22  ;;  %v17519_v20 = vld [vmem:[%s18862_s8 + $0x2148] ss:$16 sps:$4 sm:$0xff]   ;;  %v17524_v22 = vld [vmem:[%s18862_s8 + $0x2164] ss:$16 sps:$4 sm:$0xff]  }
 0x444   : > { %12058 = vmatprep.subr.bf16.mxu0 %v17440_v24  ;;  %13206 = vmatprep.subr.bf16.mxu1 %v17443_v26  ;;  %v17527_v24 = vld [vmem:[%s18862_s8 + $0x216c] ss:$16 sps:$4 sm:$0xff]   ;;  %v17522_v26 = vld [vmem:[%s18862_s8 + $0x2160] ss:$16 sps:$4 sm:$0xff]  }
 0x447   : > { %12059 = vmatpush1.bf16.msra.mxu0 %v17438_v60  ;;  %13207 = vmatpush1.bf16.msra.mxu1 %v17441_v27  ;;  %v17525_v60 = vld [vmem:[%s18862_s8 + $0x2168] ss:$16 sps:$4 sm:$0xff]   ;;  %v17530_v27 = vld [vmem:[%s18862_s8 + $0x2184] ss:$16 sps:$4 sm:$0xff]  }
 0x448   : > { %12060 = vmatprep.subr.bf16.mxu0 %v17446_v28  ;;  %13208 = vmatprep.subr.bf16.mxu1 %v17449_v29  ;;  %v17533_v28 = vld [vmem:[%s18862_s8 + $0x218c] ss:$16 sps:$4 sm:$0xff]   ;;  %v17528_v29 = vld [vmem:[%s18862_s8 + $0x2180] ss:$16 sps:$4 sm:$0xff]  }
 0x44b   : > { %12061 = vmatpush1.bf16.msra.mxu0 %v17444_v30  ;;  %13209 = vmatpush1.bf16.msra.mxu1 %v17447_v15  ;;  %v17531_v30 = vld [vmem:[%s18862_s8 + $0x2188] ss:$16 sps:$4 sm:$0xff]   ;;  %v17536_v15 = vld [vmem:[%s18862_s8 + $0x21a4] ss:$16 sps:$4 sm:$0xff]  }
 0x44c   : > { %12062 = vmatprep.subr.bf16.mxu0 %v17452_v31  ;;  %13210 = vmatprep.subr.bf16.mxu1 %v17455_v33  ;;  %v17539_v31 = vld [vmem:[%s18862_s8 + $0x21ac] ss:$16 sps:$4 sm:$0xff]   ;;  %v17534_v33 = vld [vmem:[%s18862_s8 + $0x21a0] ss:$16 sps:$4 sm:$0xff]  }
 0x44f   : > { %12063 = vmatpush1.bf16.msra.mxu0 %v17450_v34  ;;  %13211 = vmatpush1.bf16.msra.mxu1 %v17453_v36  ;;  %v17537_v34 = vld [vmem:[%s18862_s8 + $0x21a8] ss:$16 sps:$4 sm:$0xff]   ;;  %v17542_v36 = vld [vmem:[%s18862_s8 + $0x21c4] ss:$16 sps:$4 sm:$0xff]  }
 0x450   : > { %12073 = vmatprep.subr.bf16.mxu0 %v17458_v37  ;;  %13221 = vmatprep.subr.bf16.mxu1 %v17461_v23  ;;  %v17545_v37 = vld [vmem:[%s18862_s8 + $0x21cc] ss:$16 sps:$4 sm:$0xff]   ;;  %v17540_v23 = vld [vmem:[%s18862_s8 + $0x21c0] ss:$16 sps:$4 sm:$0xff]  }
 0x452   : > { %12065 = vmatmul.mubr.bf16.vlgmr.msra.gmra.mrb[0].mxu0 %v2251_v40  ;;  %13213 = vmatmul.mubr.bf16.vlgmr.msra.gmra.mrb[0].mxu1 %v2251_v40  ;;  %v17548_v40 = vld [vmem:[%s18862_s8 + $0x21e4] ss:$16 sps:$4 sm:$0xff]  }
 0x453   : > { %12074 = vmatpush1.bf16.msra.mxu0 %v17456_v21  ;;  %13222 = vmatpush1.bf16.msra.mxu1 %v17459_v32  ;;  %v17551_v21 = vld [vmem:[%s18862_s8 + $0x21ec] ss:$16 sps:$4 sm:$0xff]   ;;  %v17546_v32 = vld [vmem:[%s18862_s8 + $0x21e0] ss:$16 sps:$4 sm:$0xff]  }
 0x454   : > { %12075 = vmatprep.subr.bf16.mxu0 %v17464_v41  ;;  %13223 = vmatprep.subr.bf16.mxu1 %v17467_v43  ;;  %v17549_v41 = vld [vmem:[%s18862_s8 + $0x21e8] ss:$16 sps:$4 sm:$0xff]   ;;  %v17554_v43 = vld [vmem:[%s18862_s8 + $0x2204] ss:$16 sps:$4 sm:$0xff]  }
 0x455   : > { %12105 = vmatprep.mubr.bf16.mxu0 %v20093_v44  ;;  %13253 = vmatprep.mubr.bf16.mxu1 %v20093_v44 }
 0x457   : > { %12076 = vmatpush1.bf16.msra.mxu0 %v17462_v13  ;;  %13224 = vmatpush1.bf16.msra.mxu1 %v17465_v45  ;;  %v17557_v13 = vld [vmem:[%s18862_s8 + $0x220c] ss:$16 sps:$4 sm:$0xff]   ;;  %v20159_v45 = vrot.slane %v20078_v25, %v18921_v49  ;;  %v17558_v25 = vld [vmem:[%s18862_s8 + $0x2220] ss:$16 sps:$4 sm:$0xff]  }
 0x458   : > { %12077 = vmatprep.subr.bf16.mxu0 %v17470_v46  ;;  %13225 = vmatprep.subr.bf16.mxu1 %v17473_v47  ;;  %v17552_v46 = vld [vmem:[%s18862_s8 + $0x2200] ss:$16 sps:$4 sm:$0xff]   ;;  %v17555_v47 = vld [vmem:[%s18862_s8 + $0x2208] ss:$16 sps:$4 sm:$0xff]  }
 0x45b   : > { %12078 = vmatpush1.bf16.msra.mxu0 %v17468_v50  ;;  %13226 = vmatpush1.bf16.msra.mxu1 %v17471_v51  ;;  %v17560_v50 = vld [vmem:[%s18862_s8 + $0x2224] ss:$16 sps:$4 sm:$0xff]   ;;  %v17563_v51 = vld [vmem:[%s18862_s8 + $0x222c] ss:$16 sps:$4 sm:$0xff]  }
 0x45c   : > { %12079 = vmatprep.subr.bf16.mxu0 %v17476_v53  ;;  %13227 = vmatprep.subr.bf16.mxu1 %v17479_v54  ;;  %v2301_v53 = vcombine.high %v20093_v44, %v20093_v44  ;;  %v17561_v54 = vld [vmem:[%s18862_s8 + $0x2228] ss:$16 sps:$4 sm:$0xff]   ;;  %v17564_v44 = vld [vmem:[%s18862_s8 + $0x2240] ss:$16 sps:$4 sm:$0xff]  }
 0x45f   : > { %12080 = vmatpush1.bf16.msra.mxu0 %v17474_v55  ;;  %13228 = vmatpush1.bf16.msra.mxu1 %v17477_v38  ;;  %v17566_v55 = vld [vmem:[%s18862_s8 + $0x2244] ss:$16 sps:$4 sm:$0xff]   ;;  %v17569_v38 = vld [vmem:[%s18862_s8 + $0x224c] ss:$16 sps:$4 sm:$0xff]  }
 0x460   : > { %12081 = vmatprep.subr.bf16.mxu0 %v17482_v56  ;;  %13229 = vmatprep.subr.bf16.mxu1 %v17485_v57  ;;  %v17567_v56 = vld [vmem:[%s18862_s8 + $0x2248] ss:$16 sps:$4 sm:$0xff]   ;;  %v17572_v57 = vld [vmem:[%s18862_s8 + $0x2264] ss:$16 sps:$4 sm:$0xff]  }
 0x463   : > { %12082 = vmatpush1.bf16.msra.mxu0 %v17480_v58  ;;  %13230 = vmatpush1.bf16.msra.mxu1 %v17483_v48  ;;  %v17575_v58 = vld [vmem:[%s18862_s8 + $0x226c] ss:$16 sps:$4 sm:$0xff]   ;;  %v17570_v48 = vld [vmem:[%s18862_s8 + $0x2260] ss:$16 sps:$4 sm:$0xff]  }
 0x464   : > { %12083 = vmatprep.subr.bf16.mxu0 %v17488_v59  ;;  %13231 = vmatprep.subr.bf16.mxu1 %v17491_v61  ;;  %v17573_v59 = vld [vmem:[%s18862_s8 + $0x2268] ss:$16 sps:$4 sm:$0xff]   ;;  %v17578_v61 = vld [vmem:[%s18862_s8 + $0x2284] ss:$16 sps:$4 sm:$0xff]  }
 0x467   : > { %12084 = vmatpush1.bf16.msra.mxu0 %v17486_v62  ;;  %13232 = vmatpush1.bf16.msra.mxu1 %v17489_v0  ;;  %v17581_v62 = vld [vmem:[%s18862_s8 + $0x228c] ss:$16 sps:$4 sm:$0xff]   ;;  %v17576_v0 = vld [vmem:[%s18862_s8 + $0x2280] ss:$16 sps:$4 sm:$0xff]  }
 0x468   : > { %12085 = vmatprep.subr.bf16.mxu0 %v17494_v1  ;;  %13233 = vmatprep.subr.bf16.mxu1 %v17497_v35  ;;  %v17579_v1 = vld [vmem:[%s18862_s8 + $0x2288] ss:$16 sps:$4 sm:$0xff]   ;;  %v17584_v35 = vld [vmem:[%s18862_s8 + $0x22a4] ss:$16 sps:$4 sm:$0xff]  }
 0x46b   : > { %12086 = vmatpush1.bf16.msra.mxu0 %v17492_v2  ;;  %13234 = vmatpush1.bf16.msra.mxu1 %v17495_v3  ;;  %v17587_v2 = vld [vmem:[%s18862_s8 + $0x22ac] ss:$16 sps:$4 sm:$0xff]   ;;  %v17582_v3 = vld [vmem:[%s18862_s8 + $0x22a0] ss:$16 sps:$4 sm:$0xff]  }
 0x46c   : > { %12087 = vmatprep.subr.bf16.mxu0 %v17500_v4  ;;  %13235 = vmatprep.subr.bf16.mxu1 %v17503_v5  ;;  %v17585_v4 = vld [vmem:[%s18862_s8 + $0x22a8] ss:$16 sps:$4 sm:$0xff]   ;;  %v17590_v5 = vld [vmem:[%s18862_s8 + $0x22c4] ss:$16 sps:$4 sm:$0xff]  }
 0x46f   : > { %12088 = vmatpush1.bf16.msra.mxu0 %v17498_v6  ;;  %13236 = vmatpush1.bf16.msra.mxu1 %v17501_v7  ;;  %v17593_v6 = vld [vmem:[%s18862_s8 + $0x22cc] ss:$16 sps:$4 sm:$0xff]   ;;  %v17588_v7 = vld [vmem:[%s18862_s8 + $0x22c0] ss:$16 sps:$4 sm:$0xff]  }
 0x470   : > { %12089 = vmatprep.subr.bf16.mxu0 %v17506_v9  ;;  %13237 = vmatprep.subr.bf16.mxu1 %v17509_v10  ;;  %v17591_v9 = vld [vmem:[%s18862_s8 + $0x22c8] ss:$16 sps:$4 sm:$0xff]   ;;  %v17596_v10 = vld [vmem:[%s18862_s8 + $0x22e4] ss:$16 sps:$4 sm:$0xff]  }
 0x473   : > { %12090 = vmatpush1.bf16.msra.mxu0 %v17504_v11  ;;  %13238 = vmatpush1.bf16.msra.mxu1 %v17507_v12  ;;  %v17599_v11 = vld [vmem:[%s18862_s8 + $0x22ec] ss:$16 sps:$4 sm:$0xff]   ;;  %v17594_v12 = vld [vmem:[%s18862_s8 + $0x22e0] ss:$16 sps:$4 sm:$0xff]  }
 0x474   : > { %12091 = vmatprep.subr.bf16.mxu0 %v17512_v14  ;;  %13239 = vmatprep.subr.bf16.mxu1 %v17515_v63  ;;  %v17597_v14 = vld [vmem:[%s18862_s8 + $0x22e8] ss:$16 sps:$4 sm:$0xff]   ;;  %v17602_v63 = vld [vmem:[%s18862_s8 + $0x2304] ss:$16 sps:$4 sm:$0xff]  }
 0x477   : > { %12092 = vmatpush1.bf16.msra.mxu0 %v17510_v16  ;;  %13240 = vmatpush1.bf16.msra.mxu1 %v17513_v52  ;;  %v17605_v16 = vld [vmem:[%s18862_s8 + $0x230c] ss:$16 sps:$4 sm:$0xff]   ;;  %v17600_v52 = vld [vmem:[%s18862_s8 + $0x2300] ss:$16 sps:$4 sm:$0xff]  }
 0x478   : > { %12093 = vmatprep.subr.bf16.mxu0 %v17518_v17  ;;  %13241 = vmatprep.subr.bf16.mxu1 %v17521_v8  ;;  %v17603_v17 = vld [vmem:[%s18862_s8 + $0x2308] ss:$16 sps:$4 sm:$0xff]   ;;  %v17608_v8 = vld [vmem:[%s18862_s8 + $0x2324] ss:$16 sps:$4 sm:$0xff]  }
 0x47b   : > { %12094 = vmatpush1.bf16.msra.mxu0 %v17516_v18  ;;  %13242 = vmatpush1.bf16.msra.mxu1 %v17519_v20  ;;  %v17611_v18 = vld [vmem:[%s18862_s8 + $0x232c] ss:$16 sps:$4 sm:$0xff]   ;;  %v17606_v20 = vld [vmem:[%s18862_s8 + $0x2320] ss:$16 sps:$4 sm:$0xff]  }
 0x47c   : > { %12095 = vmatprep.subr.bf16.mxu0 %v17524_v22  ;;  %13243 = vmatprep.subr.bf16.mxu1 %v17527_v24  ;;  %v17609_v22 = vld [vmem:[%s18862_s8 + $0x2328] ss:$16 sps:$4 sm:$0xff]   ;;  %v17614_v24 = vld [vmem:[%s18862_s8 + $0x2344] ss:$16 sps:$4 sm:$0xff]  }
 0x47f   : > { %12096 = vmatpush1.bf16.msra.mxu0 %v17522_v26  ;;  %13244 = vmatpush1.bf16.msra.mxu1 %v17525_v60  ;;  %v17617_v26 = vld [vmem:[%s18862_s8 + $0x234c] ss:$16 sps:$4 sm:$0xff]   ;;  %v17612_v60 = vld [vmem:[%s18862_s8 + $0x2340] ss:$16 sps:$4 sm:$0xff]  }
 0x480   : > { %12097 = vmatprep.subr.bf16.mxu0 %v17530_v27  ;;  %13245 = vmatprep.subr.bf16.mxu1 %v17533_v28  ;;  %v17615_v27 = vld [vmem:[%s18862_s8 + $0x2348] ss:$16 sps:$4 sm:$0xff]   ;;  %v17620_v28 = vld [vmem:[%s18862_s8 + $0x2364] ss:$16 sps:$4 sm:$0xff]  }
 0x483   : > { %12098 = vmatpush1.bf16.msra.mxu0 %v17528_v29  ;;  %13246 = vmatpush1.bf16.msra.mxu1 %v17531_v30  ;;  %v17623_v29 = vld [vmem:[%s18862_s8 + $0x236c] ss:$16 sps:$4 sm:$0xff]   ;;  %v17618_v30 = vld [vmem:[%s18862_s8 + $0x2360] ss:$16 sps:$4 sm:$0xff]  }
 0x484   : > { %12099 = vmatprep.subr.bf16.mxu0 %v17536_v15  ;;  %13247 = vmatprep.subr.bf16.mxu1 %v17539_v31  ;;  %v17621_v15 = vld [vmem:[%s18862_s8 + $0x2368] ss:$16 sps:$4 sm:$0xff]   ;;  %v17626_v31 = vld [vmem:[%s18862_s8 + $0x2384] ss:$16 sps:$4 sm:$0xff]  }
 0x487   : > { %12100 = vmatpush1.bf16.msra.mxu0 %v17534_v33  ;;  %13248 = vmatpush1.bf16.msra.mxu1 %v17537_v34  ;;  %v17629_v33 = vld [vmem:[%s18862_s8 + $0x238c] ss:$16 sps:$4 sm:$0xff]   ;;  %v17624_v34 = vld [vmem:[%s18862_s8 + $0x2380] ss:$16 sps:$4 sm:$0xff]  }
 0x488   : > { %12101 = vmatprep.subr.bf16.mxu0 %v17542_v36  ;;  %13249 = vmatprep.subr.bf16.mxu1 %v17545_v37  ;;  %v17627_v36 = vld [vmem:[%s18862_s8 + $0x2388] ss:$16 sps:$4 sm:$0xff]   ;;  %v17632_v37 = vld [vmem:[%s18862_s8 + $0x23a4] ss:$16 sps:$4 sm:$0xff]  }
 0x48b   : > { %12102 = vmatpush1.bf16.msra.mxu0 %v17540_v23  ;;  %13250 = vmatpush1.bf16.msra.mxu1 %v17543_v39  ;;  %v17635_v23 = vld [vmem:[%s18862_s8 + $0x23ac] ss:$16 sps:$4 sm:$0xff]   ;;  %v17630_v39 = vld [vmem:[%s18862_s8 + $0x23a0] ss:$16 sps:$4 sm:$0xff]  }
 0x48c   : > { %12103 = vmatprep.subr.bf16.mxu0 %v17548_v40  ;;  %13251 = vmatprep.subr.bf16.mxu1 %v17551_v21  ;;  %v17633_v40 = vld [vmem:[%s18862_s8 + $0x23a8] ss:$16 sps:$4 sm:$0xff]   ;;  %v17638_v21 = vld [vmem:[%s18862_s8 + $0x23c4] ss:$16 sps:$4 sm:$0xff]  }
 0x48f   : > { %12104 = vmatpush1.bf16.msra.mxu0 %v17546_v32  ;;  %13252 = vmatpush1.bf16.msra.mxu1 %v17549_v41  ;;  %v17641_v32 = vld [vmem:[%s18862_s8 + $0x23cc] ss:$16 sps:$4 sm:$0xff]   ;;  %v2254_v41 = vcombine.high %v20070_v19, %v20070_v19  ;;  %v17642_v19 = vld [vmem:[%s18862_s8 + $0x23e0] ss:$16 sps:$4 sm:$0xff]  }
 0x490   : > { %12114 = vmatprep.subr.bf16.mxu0 %v17554_v43  ;;  %13262 = vmatprep.subr.bf16.mxu1 %v17557_v13  ;;  %v17636_v43 = vld [vmem:[%s18862_s8 + $0x23c0] ss:$16 sps:$4 sm:$0xff]   ;;  %v17639_v13 = vld [vmem:[%s18862_s8 + $0x23c8] ss:$16 sps:$4 sm:$0xff]  }
 0x492   : > { %12106 = vmatmul.mubr.bf16.vlgmr.msra.gmra.mrb[0].mxu0 %v20159_v45  ;;  %13254 = vmatmul.mubr.bf16.vlgmr.msra.gmra.mrb[0].mxu1 %v20159_v45 }
 0x493   : > { %12115 = vmatpush1.bf16.msra.mxu0 %v17552_v46  ;;  %13263 = vmatpush1.bf16.msra.mxu1 %v17555_v47  ;;  %v17644_v46 = vld [vmem:[%s18862_s8 + $0x23e4] ss:$16 sps:$4 sm:$0xff]   ;;  %v17647_v47 = vld [vmem:[%s18862_s8 + $0x23ec] ss:$16 sps:$4 sm:$0xff]  }
 0x494   : > { %12116 = vmatprep.subr.bf16.mxu0 %v17560_v50  ;;  %13264 = vmatprep.subr.bf16.mxu1 %v17563_v51  ;;  %v20228_v50 = vrot.slane %v2254_v41, %v18921_v49  ;;  %v17645_v51 = vld [vmem:[%s18862_s8 + $0x23e8] ss:$16 sps:$4 sm:$0xff]  }
 0x495   : > { %12146 = vmatprep.mubr.bf16.mxu0 %v2301_v53  ;;  %13294 = vmatprep.mubr.bf16.mxu1 %v2301_v53  ;;  %v17650_v53 = vld [vmem:[%s18862_s8 + $0x2404] ss:$16 sps:$4 sm:$0xff]   ;;  %v17723_v41 = vld [vmem:[%s18862_s8 + $0x2588] ss:$16 sps:$4 sm:$0xff]  }
 0x497   : > { %12117 = vmatpush1.bf16.msra.mxu0 %v17558_v25  ;;  %13265 = vmatpush1.bf16.msra.mxu1 %v17561_v54  ;;  %v17653_v25 = vld [vmem:[%s18862_s8 + $0x240c] ss:$16 sps:$4 sm:$0xff]   ;;  %v2270_v54 = vcombine.high %v20228_v50, %v20228_v50 }
 0x498   : > { %12118 = vmatprep.subr.bf16.mxu0 %v17566_v55  ;;  %13266 = vmatprep.subr.bf16.mxu1 %v17569_v38  ;;  %v2299_v55 = vcombine.high %v20159_v45, %v20159_v45  ;;  %v17648_v38 = vld [vmem:[%s18862_s8 + $0x2400] ss:$16 sps:$4 sm:$0xff]  }
 0x499   : > { %v17654_v45 = vld [vmem:[%s18862_s8 + $0x2420] ss:$16 sps:$4 sm:$0xff]  }
 0x49b   : > { %12119 = vmatpush1.bf16.msra.mxu0 %v17564_v44  ;;  %13267 = vmatpush1.bf16.msra.mxu1 %v17567_v56  ;;  %v17651_v44 = vld [vmem:[%s18862_s8 + $0x2408] ss:$16 sps:$4 sm:$0xff]   ;;  %v17656_v56 = vld [vmem:[%s18862_s8 + $0x2424] ss:$16 sps:$4 sm:$0xff]  }
 0x49c   : > { %12120 = vmatprep.subr.bf16.mxu0 %v17572_v57  ;;  %13268 = vmatprep.subr.bf16.mxu1 %v17575_v58  ;;  %v17659_v57 = vld [vmem:[%s18862_s8 + $0x242c] ss:$16 sps:$4 sm:$0xff]   ;;  %v20243_v58 = vrot.slane %v2270_v54, %v18921_v49  ;;  %v17740_v54 = vld [vmem:[%s18862_s8 + $0x25e4] ss:$16 sps:$4 sm:$0xff]  }
 0x49f   : > { %12121 = vmatpush1.bf16.msra.mxu0 %v17570_v48  ;;  %13269 = vmatpush1.bf16.msra.mxu1 %v17573_v59  ;;  %v17657_v48 = vld [vmem:[%s18862_s8 + $0x2428] ss:$16 sps:$4 sm:$0xff]   ;;  %v17662_v59 = vld [vmem:[%s18862_s8 + $0x2444] ss:$16 sps:$4 sm:$0xff]  }
 0x4a0   : > { %12122 = vmatprep.subr.bf16.mxu0 %v17578_v61  ;;  %13270 = vmatprep.subr.bf16.mxu1 %v17581_v62  ;;  %v17665_v61 = vld [vmem:[%s18862_s8 + $0x244c] ss:$16 sps:$4 sm:$0xff]   ;;  %v17660_v62 = vld [vmem:[%s18862_s8 + $0x2440] ss:$16 sps:$4 sm:$0xff]  }
 0x4a3   : > { %12123 = vmatpush1.bf16.msra.mxu0 %v17576_v0  ;;  %13271 = vmatpush1.bf16.msra.mxu1 %v17579_v1  ;;  %v17663_v0 = vld [vmem:[%s18862_s8 + $0x2448] ss:$16 sps:$4 sm:$0xff]   ;;  %v17668_v1 = vld [vmem:[%s18862_s8 + $0x2464] ss:$16 sps:$4 sm:$0xff]  }
 0x4a4   : > { %12124 = vmatprep.subr.bf16.mxu0 %v17584_v35  ;;  %13272 = vmatprep.subr.bf16.mxu1 %v17587_v2  ;;  %v17671_v35 = vld [vmem:[%s18862_s8 + $0x246c] ss:$16 sps:$4 sm:$0xff]   ;;  %v17666_v2 = vld [vmem:[%s18862_s8 + $0x2460] ss:$16 sps:$4 sm:$0xff]  }
 0x4a7   : > { %12125 = vmatpush1.bf16.msra.mxu0 %v17582_v3  ;;  %13273 = vmatpush1.bf16.msra.mxu1 %v17585_v4  ;;  %v17669_v3 = vld [vmem:[%s18862_s8 + $0x2468] ss:$16 sps:$4 sm:$0xff]   ;;  %v17674_v4 = vld [vmem:[%s18862_s8 + $0x2484] ss:$16 sps:$4 sm:$0xff]  }
 0x4a8   : > { %12126 = vmatprep.subr.bf16.mxu0 %v17590_v5  ;;  %13274 = vmatprep.subr.bf16.mxu1 %v17593_v6  ;;  %v17677_v5 = vld [vmem:[%s18862_s8 + $0x248c] ss:$16 sps:$4 sm:$0xff]   ;;  %v17672_v6 = vld [vmem:[%s18862_s8 + $0x2480] ss:$16 sps:$4 sm:$0xff]  }
 0x4ab   : > { %12127 = vmatpush1.bf16.msra.mxu0 %v17588_v7  ;;  %13275 = vmatpush1.bf16.msra.mxu1 %v17591_v9  ;;  %v17675_v7 = vld [vmem:[%s18862_s8 + $0x2488] ss:$16 sps:$4 sm:$0xff]   ;;  %v17680_v9 = vld [vmem:[%s18862_s8 + $0x24a4] ss:$16 sps:$4 sm:$0xff]  }
 0x4ac   : > { %12128 = vmatprep.subr.bf16.mxu0 %v17596_v10  ;;  %13276 = vmatprep.subr.bf16.mxu1 %v17599_v11  ;;  %v17683_v10 = vld [vmem:[%s18862_s8 + $0x24ac] ss:$16 sps:$4 sm:$0xff]   ;;  %v17678_v11 = vld [vmem:[%s18862_s8 + $0x24a0] ss:$16 sps:$4 sm:$0xff]  }
 0x4af   : > { %12129 = vmatpush1.bf16.msra.mxu0 %v17594_v12  ;;  %13277 = vmatpush1.bf16.msra.mxu1 %v17597_v14  ;;  %v17681_v12 = vld [vmem:[%s18862_s8 + $0x24a8] ss:$16 sps:$4 sm:$0xff]   ;;  %v17686_v14 = vld [vmem:[%s18862_s8 + $0x24c4] ss:$16 sps:$4 sm:$0xff]  }
 0x4b0   : > { %12130 = vmatprep.subr.bf16.mxu0 %v17602_v63  ;;  %13278 = vmatprep.subr.bf16.mxu1 %v17605_v16  ;;  %v17689_v63 = vld [vmem:[%s18862_s8 + $0x24cc] ss:$16 sps:$4 sm:$0xff]   ;;  %v17684_v16 = vld [vmem:[%s18862_s8 + $0x24c0] ss:$16 sps:$4 sm:$0xff]  }
 0x4b3   : > { %12131 = vmatpush1.bf16.msra.mxu0 %v17600_v52  ;;  %13279 = vmatpush1.bf16.msra.mxu1 %v17603_v17  ;;  %v17687_v52 = vld [vmem:[%s18862_s8 + $0x24c8] ss:$16 sps:$4 sm:$0xff]   ;;  %v17692_v17 = vld [vmem:[%s18862_s8 + $0x24e4] ss:$16 sps:$4 sm:$0xff]  }
 0x4b4   : > { %12132 = vmatprep.subr.bf16.mxu0 %v17608_v8  ;;  %13280 = vmatprep.subr.bf16.mxu1 %v17611_v18  ;;  %v17695_v8 = vld [vmem:[%s18862_s8 + $0x24ec] ss:$16 sps:$4 sm:$0xff]   ;;  %v17690_v18 = vld [vmem:[%s18862_s8 + $0x24e0] ss:$16 sps:$4 sm:$0xff]  }
 0x4b7   : > { %12133 = vmatpush1.bf16.msra.mxu0 %v17606_v20  ;;  %13281 = vmatpush1.bf16.msra.mxu1 %v17609_v22  ;;  %v17693_v20 = vld [vmem:[%s18862_s8 + $0x24e8] ss:$16 sps:$4 sm:$0xff]   ;;  %v17698_v22 = vld [vmem:[%s18862_s8 + $0x2504] ss:$16 sps:$4 sm:$0xff]  }
 0x4b8   : > { %12134 = vmatprep.subr.bf16.mxu0 %v17614_v24  ;;  %13282 = vmatprep.subr.bf16.mxu1 %v17617_v26  ;;  %v17701_v24 = vld [vmem:[%s18862_s8 + $0x250c] ss:$16 sps:$4 sm:$0xff]   ;;  %v17696_v26 = vld [vmem:[%s18862_s8 + $0x2500] ss:$16 sps:$4 sm:$0xff]  }
 0x4bb   : > { %12135 = vmatpush1.bf16.msra.mxu0 %v17612_v60  ;;  %13283 = vmatpush1.bf16.msra.mxu1 %v17615_v27  ;;  %v17699_v60 = vld [vmem:[%s18862_s8 + $0x2508] ss:$16 sps:$4 sm:$0xff]   ;;  %v17704_v27 = vld [vmem:[%s18862_s8 + $0x2524] ss:$16 sps:$4 sm:$0xff]  }
 0x4bc   : > { %12136 = vmatprep.subr.bf16.mxu0 %v17620_v28  ;;  %13284 = vmatprep.subr.bf16.mxu1 %v17623_v29  ;;  %v17707_v28 = vld [vmem:[%s18862_s8 + $0x252c] ss:$16 sps:$4 sm:$0xff]   ;;  %v17702_v29 = vld [vmem:[%s18862_s8 + $0x2520] ss:$16 sps:$4 sm:$0xff]  }
 0x4bf   : > { %12137 = vmatpush1.bf16.msra.mxu0 %v17618_v30  ;;  %13285 = vmatpush1.bf16.msra.mxu1 %v17621_v15  ;;  %v17705_v30 = vld [vmem:[%s18862_s8 + $0x2528] ss:$16 sps:$4 sm:$0xff]   ;;  %v17710_v15 = vld [vmem:[%s18862_s8 + $0x2544] ss:$16 sps:$4 sm:$0xff]  }
 0x4c0   : > { %12138 = vmatprep.subr.bf16.mxu0 %v17626_v31  ;;  %13286 = vmatprep.subr.bf16.mxu1 %v17629_v33  ;;  %v17713_v31 = vld [vmem:[%s18862_s8 + $0x254c] ss:$16 sps:$4 sm:$0xff]   ;;  %v17708_v33 = vld [vmem:[%s18862_s8 + $0x2540] ss:$16 sps:$4 sm:$0xff]  }
 0x4c3   : > { %12139 = vmatpush1.bf16.msra.mxu0 %v17624_v34  ;;  %13287 = vmatpush1.bf16.msra.mxu1 %v17627_v36  ;;  %v17711_v34 = vld [vmem:[%s18862_s8 + $0x2548] ss:$16 sps:$4 sm:$0xff]   ;;  %v17716_v36 = vld [vmem:[%s18862_s8 + $0x2564] ss:$16 sps:$4 sm:$0xff]  }
 0x4c4   : > { %12140 = vmatprep.subr.bf16.mxu0 %v17632_v37  ;;  %13288 = vmatprep.subr.bf16.mxu1 %v17635_v23  ;;  %v17719_v37 = vld [vmem:[%s18862_s8 + $0x256c] ss:$16 sps:$4 sm:$0xff]   ;;  %v17714_v23 = vld [vmem:[%s18862_s8 + $0x2560] ss:$16 sps:$4 sm:$0xff]  }
 0x4c7   : > { %12141 = vmatpush1.bf16.msra.mxu0 %v17630_v39  ;;  %13289 = vmatpush1.bf16.msra.mxu1 %v17633_v40  ;;  %v17717_v39 = vld [vmem:[%s18862_s8 + $0x2568] ss:$16 sps:$4 sm:$0xff]   ;;  %v17722_v40 = vld [vmem:[%s18862_s8 + $0x2584] ss:$16 sps:$4 sm:$0xff]  }
 0x4c8   : > { %12142 = vmatprep.subr.bf16.mxu0 %v17638_v21  ;;  %13290 = vmatprep.subr.bf16.mxu1 %v17641_v32  ;;  %v17725_v21 = vld [vmem:[%s18862_s8 + $0x258c] ss:$16 sps:$4 sm:$0xff]   ;;  %v17720_v32 = vld [vmem:[%s18862_s8 + $0x2580] ss:$16 sps:$4 sm:$0xff]  }
 0x4cb   : > { %12143 = vmatpush1.bf16.msra.mxu0 %v17636_v43  ;;  %13291 = vmatpush1.bf16.msra.mxu1 %v17639_v13  ;;  %v17728_v43 = vld [vmem:[%s18862_s8 + $0x25a4] ss:$16 sps:$4 sm:$0xff]   ;;  %v17731_v13 = vld [vmem:[%s18862_s8 + $0x25ac] ss:$16 sps:$4 sm:$0xff]  }
 0x4cc   : > { %12144 = vmatprep.subr.bf16.mxu0 %v17644_v46  ;;  %13292 = vmatprep.subr.bf16.mxu1 %v17647_v47  ;;  %v17726_v46 = vld [vmem:[%s18862_s8 + $0x25a0] ss:$16 sps:$4 sm:$0xff]   ;;  %v17729_v47 = vld [vmem:[%s18862_s8 + $0x25a8] ss:$16 sps:$4 sm:$0xff]  }
 0x4cf   : > { %12145 = vmatpush1.bf16.msra.mxu0 %v17642_v19  ;;  %13293 = vmatpush1.bf16.msra.mxu1 %v17645_v51  ;;  %v17734_v19 = vld [vmem:[%s18862_s8 + $0x25c4] ss:$16 sps:$4 sm:$0xff]   ;;  %v17737_v51 = vld [vmem:[%s18862_s8 + $0x25cc] ss:$16 sps:$4 sm:$0xff]  }
 0x4d0   : > { %12155 = vmatprep.subr.bf16.mxu0 %v17650_v53  ;;  %13303 = vmatprep.subr.bf16.mxu1 %v17653_v25  ;;  %v17732_v53 = vld [vmem:[%s18862_s8 + $0x25c0] ss:$16 sps:$4 sm:$0xff]   ;;  %v17735_v25 = vld [vmem:[%s18862_s8 + $0x25c8] ss:$16 sps:$4 sm:$0xff]  }
 0x4d2   : > { %12147 = vmatmul.mubr.bf16.vlgmr.msra.gmra.mrb[0].mxu0 %v2299_v55  ;;  %13295 = vmatmul.mubr.bf16.vlgmr.msra.gmra.mrb[0].mxu1 %v2299_v55  ;;  %v17743_v55 = vld [vmem:[%s18862_s8 + $0x25ec] ss:$16 sps:$4 sm:$0xff]  }
 0x4d3   : > { %12156 = vmatpush1.bf16.msra.mxu0 %v17648_v38  ;;  %13304 = vmatpush1.bf16.msra.mxu1 %v17651_v44  ;;  %v17738_v38 = vld [vmem:[%s18862_s8 + $0x25e0] ss:$16 sps:$4 sm:$0xff]   ;;  %v17741_v44 = vld [vmem:[%s18862_s8 + $0x25e8] ss:$16 sps:$4 sm:$0xff]  }
 0x4d4   : > { %12157 = vmatprep.subr.bf16.mxu0 %v17656_v56  ;;  %13305 = vmatprep.subr.bf16.mxu1 %v17659_v57  ;;  %v17747_v56 = vld [vmem:[%s18862_s8 + $0x2604] ss:$16 sps:$4 sm:$0xff]   ;;  %v17750_v57 = vld [vmem:[%s18862_s8 + $0x260c] ss:$16 sps:$4 sm:$0xff]  }
 0x4d5   : > { %12187 = vmatprep.mubr.bf16.mxu0 %v20243_v58  ;;  %13335 = vmatprep.mubr.bf16.mxu1 %v20243_v58 }
 0x4d7   : > { %12158 = vmatpush1.bf16.msra.mxu0 %v17654_v45  ;;  %13306 = vmatpush1.bf16.msra.mxu1 %v17657_v48  ;;  %v20309_v45 = vrot.slane %v20228_v50, %v18921_v49  ;;  %v17745_v48 = vld [vmem:[%s18862_s8 + $0x2600] ss:$16 sps:$4 sm:$0xff]  }
 0x4d8   : > { %12159 = vmatprep.subr.bf16.mxu0 %v17662_v59  ;;  %13307 = vmatprep.subr.bf16.mxu1 %v17665_v61  ;;  %v17748_v59 = vld [vmem:[%s18862_s8 + $0x2608] ss:$16 sps:$4 sm:$0xff]   ;;  %v17753_v61 = vld [vmem:[%s18862_s8 + $0x2624] ss:$16 sps:$4 sm:$0xff]   ;;  %v17751_v50 = vld [vmem:[%s18862_s8 + $0x2620] ss:$16 sps:$4 sm:$0xff]  }
 0x4db   : > { %12160 = vmatpush1.bf16.msra.mxu0 %v17660_v62  ;;  %13308 = vmatpush1.bf16.msra.mxu1 %v17663_v0  ;;  %v17756_v62 = vld [vmem:[%s18862_s8 + $0x262c] ss:$16 sps:$4 sm:$0xff]   ;;  %v2302_v0 = vcombine.high %v20243_v58, %v20243_v58  ;;  %v17757_v58 = vld [vmem:[%s18862_s8 + $0x2640] ss:$16 sps:$4 sm:$0xff]  }
 0x4dc   : > { %12161 = vmatprep.subr.bf16.mxu0 %v17668_v1  ;;  %13309 = vmatprep.subr.bf16.mxu1 %v17671_v35  ;;  %v17754_v1 = vld [vmem:[%s18862_s8 + $0x2628] ss:$16 sps:$4 sm:$0xff]   ;;  %v17759_v35 = vld [vmem:[%s18862_s8 + $0x2644] ss:$16 sps:$4 sm:$0xff]  }
 0x4df   : > { %12162 = vmatpush1.bf16.msra.mxu0 %v17666_v2  ;;  %13310 = vmatpush1.bf16.msra.mxu1 %v17669_v3  ;;  %v17762_v2 = vld [vmem:[%s18862_s8 + $0x264c] ss:$16 sps:$4 sm:$0xff]   ;;  %v17760_v3 = vld [vmem:[%s18862_s8 + $0x2648] ss:$16 sps:$4 sm:$0xff]  }
 0x4e0   : > { %12163 = vmatprep.subr.bf16.mxu0 %v17674_v4  ;;  %13311 = vmatprep.subr.bf16.mxu1 %v17677_v5  ;;  %v17765_v4 = vld [vmem:[%s18862_s8 + $0x2664] ss:$16 sps:$4 sm:$0xff]   ;;  %v17768_v5 = vld [vmem:[%s18862_s8 + $0x266c] ss:$16 sps:$4 sm:$0xff]  }
 0x4e3   : > { %12164 = vmatpush1.bf16.msra.mxu0 %v17672_v6  ;;  %13312 = vmatpush1.bf16.msra.mxu1 %v17675_v7  ;;  %v17763_v6 = vld [vmem:[%s18862_s8 + $0x2660] ss:$16 sps:$4 sm:$0xff]   ;;  %v17766_v7 = vld [vmem:[%s18862_s8 + $0x2668] ss:$16 sps:$4 sm:$0xff]  }
 0x4e4   : > { %12165 = vmatprep.subr.bf16.mxu0 %v17680_v9  ;;  %13313 = vmatprep.subr.bf16.mxu1 %v17683_v10  ;;  %v17771_v9 = vld [vmem:[%s18862_s8 + $0x2684] ss:$16 sps:$4 sm:$0xff]   ;;  %v17774_v10 = vld [vmem:[%s18862_s8 + $0x268c] ss:$16 sps:$4 sm:$0xff]  }
 0x4e7   : > { %12166 = vmatpush1.bf16.msra.mxu0 %v17678_v11  ;;  %13314 = vmatpush1.bf16.msra.mxu1 %v17681_v12  ;;  %v17769_v11 = vld [vmem:[%s18862_s8 + $0x2680] ss:$16 sps:$4 sm:$0xff]   ;;  %v17772_v12 = vld [vmem:[%s18862_s8 + $0x2688] ss:$16 sps:$4 sm:$0xff]  }
 0x4e8   : > { %12167 = vmatprep.subr.bf16.mxu0 %v17686_v14  ;;  %13315 = vmatprep.subr.bf16.mxu1 %v17689_v63  ;;  %v17777_v14 = vld [vmem:[%s18862_s8 + $0x26a4] ss:$16 sps:$4 sm:$0xff]   ;;  %v17780_v63 = vld [vmem:[%s18862_s8 + $0x26ac] ss:$16 sps:$4 sm:$0xff]  }
 0x4eb   : > { %12168 = vmatpush1.bf16.msra.mxu0 %v17684_v16  ;;  %13316 = vmatpush1.bf16.msra.mxu1 %v17687_v52  ;;  %v17775_v16 = vld [vmem:[%s18862_s8 + $0x26a0] ss:$16 sps:$4 sm:$0xff]   ;;  %v17778_v52 = vld [vmem:[%s18862_s8 + $0x26a8] ss:$16 sps:$4 sm:$0xff]  }
 0x4ec   : > { %12169 = vmatprep.subr.bf16.mxu0 %v17692_v17  ;;  %13317 = vmatprep.subr.bf16.mxu1 %v17695_v8  ;;  %v17783_v17 = vld [vmem:[%s18862_s8 + $0x26c4] ss:$16 sps:$4 sm:$0xff]   ;;  %v17786_v8 = vld [vmem:[%s18862_s8 + $0x26cc] ss:$16 sps:$4 sm:$0xff]  }
 0x4ef   : > { %12170 = vmatpush1.bf16.msra.mxu0 %v17690_v18  ;;  %13318 = vmatpush1.bf16.msra.mxu1 %v17693_v20  ;;  %v17781_v18 = vld [vmem:[%s18862_s8 + $0x26c0] ss:$16 sps:$4 sm:$0xff]   ;;  %v17784_v20 = vld [vmem:[%s18862_s8 + $0x26c8] ss:$16 sps:$4 sm:$0xff]  }
 0x4f0   : > { %12171 = vmatprep.subr.bf16.mxu0 %v17698_v22  ;;  %13319 = vmatprep.subr.bf16.mxu1 %v17701_v24  ;;  %v17789_v22 = vld [vmem:[%s18862_s8 + $0x26e4] ss:$16 sps:$4 sm:$0xff]   ;;  %v17792_v24 = vld [vmem:[%s18862_s8 + $0x26ec] ss:$16 sps:$4 sm:$0xff]  }
 0x4f3   : > { %12172 = vmatpush1.bf16.msra.mxu0 %v17696_v26  ;;  %13320 = vmatpush1.bf16.msra.mxu1 %v17699_v60  ;;  %v17787_v26 = vld [vmem:[%s18862_s8 + $0x26e0] ss:$16 sps:$4 sm:$0xff]   ;;  %v17790_v60 = vld [vmem:[%s18862_s8 + $0x26e8] ss:$16 sps:$4 sm:$0xff]  }
 0x4f4   : > { %12173 = vmatprep.subr.bf16.mxu0 %v17704_v27  ;;  %13321 = vmatprep.subr.bf16.mxu1 %v17707_v28  ;;  %v17795_v27 = vld [vmem:[%s18862_s8 + $0x2704] ss:$16 sps:$4 sm:$0xff]   ;;  %v17798_v28 = vld [vmem:[%s18862_s8 + $0x270c] ss:$16 sps:$4 sm:$0xff]  }
 0x4f7   : > { %12174 = vmatpush1.bf16.msra.mxu0 %v17702_v29  ;;  %13322 = vmatpush1.bf16.msra.mxu1 %v17705_v30  ;;  %v17793_v29 = vld [vmem:[%s18862_s8 + $0x2700] ss:$16 sps:$4 sm:$0xff]   ;;  %v17796_v30 = vld [vmem:[%s18862_s8 + $0x2708] ss:$16 sps:$4 sm:$0xff]  }
 0x4f8   : > { %12175 = vmatprep.subr.bf16.mxu0 %v17710_v15  ;;  %13323 = vmatprep.subr.bf16.mxu1 %v17713_v31  ;;  %v17801_v15 = vld [vmem:[%s18862_s8 + $0x2724] ss:$16 sps:$4 sm:$0xff]   ;;  %v17804_v31 = vld [vmem:[%s18862_s8 + $0x272c] ss:$16 sps:$4 sm:$0xff]  }
 0x4fb   : > { %12176 = vmatpush1.bf16.msra.mxu0 %v17708_v33  ;;  %13324 = vmatpush1.bf16.msra.mxu1 %v17711_v34  ;;  %v17799_v33 = vld [vmem:[%s18862_s8 + $0x2720] ss:$16 sps:$4 sm:$0xff]   ;;  %v17802_v34 = vld [vmem:[%s18862_s8 + $0x2728] ss:$16 sps:$4 sm:$0xff]  }
 0x4fc   : > { %12177 = vmatprep.subr.bf16.mxu0 %v17716_v36  ;;  %13325 = vmatprep.subr.bf16.mxu1 %v17719_v37  ;;  %v17807_v36 = vld [vmem:[%s18862_s8 + $0x2744] ss:$16 sps:$4 sm:$0xff]   ;;  %v17810_v37 = vld [vmem:[%s18862_s8 + $0x274c] ss:$16 sps:$4 sm:$0xff]  }
 0x4ff   : > { %12178 = vmatpush1.bf16.msra.mxu0 %v17714_v23  ;;  %13326 = vmatpush1.bf16.msra.mxu1 %v17717_v39  ;;  %v17805_v23 = vld [vmem:[%s18862_s8 + $0x2740] ss:$16 sps:$4 sm:$0xff]   ;;  %v17808_v39 = vld [vmem:[%s18862_s8 + $0x2748] ss:$16 sps:$4 sm:$0xff]  }
 0x500   : > { %12179 = vmatprep.subr.bf16.mxu0 %v17722_v40  ;;  %13327 = vmatprep.subr.bf16.mxu1 %v17725_v21  ;;  %v17813_v40 = vld [vmem:[%s18862_s8 + $0x2764] ss:$16 sps:$4 sm:$0xff]   ;;  %v17816_v21 = vld [vmem:[%s18862_s8 + $0x276c] ss:$16 sps:$4 sm:$0xff]  }
 0x503   : > { %12180 = vmatpush1.bf16.msra.mxu0 %v17720_v32  ;;  %13328 = vmatpush1.bf16.msra.mxu1 %v17723_v41  ;;  %v17811_v32 = vld [vmem:[%s18862_s8 + $0x2760] ss:$16 sps:$4 sm:$0xff]   ;;  %v17814_v41 = vld [vmem:[%s18862_s8 + $0x2768] ss:$16 sps:$4 sm:$0xff]  }
 0x504   : > { %12181 = vmatprep.subr.bf16.mxu0 %v17728_v43  ;;  %13329 = vmatprep.subr.bf16.mxu1 %v17731_v13  ;;  %v17819_v43 = vld [vmem:[%s18862_s8 + $0x2784] ss:$16 sps:$4 sm:$0xff]   ;;  %v17822_v13 = vld [vmem:[%s18862_s8 + $0x278c] ss:$16 sps:$4 sm:$0xff]  }
 0x507   : > { %12182 = vmatpush1.bf16.msra.mxu0 %v17726_v46  ;;  %13330 = vmatpush1.bf16.msra.mxu1 %v17729_v47  ;;  %v17817_v46 = vld [vmem:[%s18862_s8 + $0x2780] ss:$16 sps:$4 sm:$0xff]   ;;  %v17820_v47 = vld [vmem:[%s18862_s8 + $0x2788] ss:$16 sps:$4 sm:$0xff]  }
 0x508   : > { %12183 = vmatprep.subr.bf16.mxu0 %v17734_v19  ;;  %13331 = vmatprep.subr.bf16.mxu1 %v17737_v51  ;;  %v17825_v19 = vld [vmem:[%s18862_s8 + $0x27a4] ss:$16 sps:$4 sm:$0xff]   ;;  %v17828_v51 = vld [vmem:[%s18862_s8 + $0x27ac] ss:$16 sps:$4 sm:$0xff]  }
 0x50b   : > { %12184 = vmatpush1.bf16.msra.mxu0 %v17732_v53  ;;  %13332 = vmatpush1.bf16.msra.mxu1 %v17735_v25  ;;  %v17823_v53 = vld [vmem:[%s18862_s8 + $0x27a0] ss:$16 sps:$4 sm:$0xff]   ;;  %v17826_v25 = vld [vmem:[%s18862_s8 + $0x27a8] ss:$16 sps:$4 sm:$0xff]  }
 0x50c   : > { %12185 = vmatprep.subr.bf16.mxu0 %v17740_v54  ;;  %13333 = vmatprep.subr.bf16.mxu1 %v17743_v55  ;;  %v17831_v54 = vld [vmem:[%s18862_s8 + $0x27c4] ss:$16 sps:$4 sm:$0xff]   ;;  %v17834_v55 = vld [vmem:[%s18862_s8 + $0x27cc] ss:$16 sps:$4 sm:$0xff]  }
 0x50f   : > { %12186 = vmatpush1.bf16.msra.mxu0 %v17738_v38  ;;  %13334 = vmatpush1.bf16.msra.mxu1 %v17741_v44  ;;  %v20374_v38 = vld [vmem:[%s21012_s0 + $0x28] sm:$0xff]  ;;  %v17829_v44 = vld [vmem:[%s18862_s8 + $0x27c0] ss:$16 sps:$4 sm:$0xff]  }
 0x510   : > { %12196 = vmatprep.subr.bf16.mxu0 %v17747_v56  ;;  %13344 = vmatprep.subr.bf16.mxu1 %v17750_v57  ;;  %v17832_v56 = vld [vmem:[%s18862_s8 + $0x27c8] ss:$16 sps:$4 sm:$0xff]   ;;  %v17837_v57 = vld [vmem:[%s18862_s8 + $0x27e4] ss:$16 sps:$4 sm:$0xff]  }
 0x512   : > { %12188 = vmatmul.mubr.bf16.vlgmr.msra.gmra.mrb[0].mxu0 %v20309_v45  ;;  %13336 = vmatmul.mubr.bf16.vlgmr.msra.gmra.mrb[0].mxu1 %v20309_v45 }
 0x513   : > { %12197 = vmatpush1.bf16.msra.mxu0 %v17745_v48  ;;  %13345 = vmatpush1.bf16.msra.mxu1 %v17748_v59  ;;  %v17840_v48 = vld [vmem:[%s18862_s8 + $0x27ec] ss:$16 sps:$4 sm:$0xff]   ;;  %v20382_v59 = vrot.slane %v20374_v38, %v18921_v49 }
 0x514   : > { %12198 = vmatprep.subr.bf16.mxu0 %v17753_v61  ;;  %13346 = vmatprep.subr.bf16.mxu1 %v17756_v62  ;;  %v17835_v61 = vld [vmem:[%s18862_s8 + $0x27e0] ss:$16 sps:$4 sm:$0xff]   ;;  %v17838_v62 = vld [vmem:[%s18862_s8 + $0x27e8] ss:$16 sps:$4 sm:$0xff]  }
 0x515   : > { %12228 = vmatprep.mubr.bf16.mxu0 %v2302_v0  ;;  %13376 = vmatprep.mubr.bf16.mxu1 %v2302_v0  ;;  %v17843_v0 = vld [vmem:[%s18862_s8 + $0x2804] ss:$16 sps:$4 sm:$0xff]  }
 0x517   : > { %12199 = vmatpush1.bf16.msra.mxu0 %v17751_v50  ;;  %13347 = vmatpush1.bf16.msra.mxu1 %v17754_v1  ;;  %v17846_v50 = vld [vmem:[%s18862_s8 + $0x280c] ss:$16 sps:$4 sm:$0xff]   ;;  %v2318_v1 = vcombine.high %v20382_v59, %v20382_v59 }
 0x518   : > { %12200 = vmatprep.subr.bf16.mxu0 %v17759_v35  ;;  %13348 = vmatprep.subr.bf16.mxu1 %v17762_v2  ;;  %v2300_v35 = vcombine.high %v20309_v45, %v20309_v45  ;;  %v17841_v2 = vld [vmem:[%s18862_s8 + $0x2800] ss:$16 sps:$4 sm:$0xff]  }
 0x519   : > { %v17847_v45 = vld [vmem:[%s18862_s8 + $0x2820] ss:$16 sps:$4 sm:$0xff]  }
 0x51b   : > { %12201 = vmatpush1.bf16.msra.mxu0 %v17757_v58  ;;  %13349 = vmatpush1.bf16.msra.mxu1 %v17760_v3  ;;  %v17844_v58 = vld [vmem:[%s18862_s8 + $0x2808] ss:$16 sps:$4 sm:$0xff]   ;;  %v17849_v3 = vld [vmem:[%s18862_s8 + $0x2824] ss:$16 sps:$4 sm:$0xff]  }
 0x51c   : > { %12202 = vmatprep.subr.bf16.mxu0 %v17765_v4  ;;  %13350 = vmatprep.subr.bf16.mxu1 %v17768_v5  ;;  %v17852_v4 = vld [vmem:[%s18862_s8 + $0x282c] ss:$16 sps:$4 sm:$0xff]   ;;  %v20397_v5 = vrot.slane %v2318_v1, %v18921_v49  ;;  %v17928_v1 = vld [vmem:[%s18862_s8 + $0x29c8] ss:$16 sps:$4 sm:$0xff]  }
 0x51f   : > { %12203 = vmatpush1.bf16.msra.mxu0 %v17763_v6  ;;  %13351 = vmatpush1.bf16.msra.mxu1 %v17766_v7  ;;  %v17850_v6 = vld [vmem:[%s18862_s8 + $0x2828] ss:$16 sps:$4 sm:$0xff]   ;;  %v17855_v7 = vld [vmem:[%s18862_s8 + $0x2844] ss:$16 sps:$4 sm:$0xff]  }
 0x520   : > { %12204 = vmatprep.subr.bf16.mxu0 %v17771_v9  ;;  %13352 = vmatprep.subr.bf16.mxu1 %v17774_v10  ;;  %v17858_v9 = vld [vmem:[%s18862_s8 + $0x284c] ss:$16 sps:$4 sm:$0xff]   ;;  %v17853_v10 = vld [vmem:[%s18862_s8 + $0x2840] ss:$16 sps:$4 sm:$0xff]  }
 0x523   : > { %12205 = vmatpush1.bf16.msra.mxu0 %v17769_v11  ;;  %13353 = vmatpush1.bf16.msra.mxu1 %v17772_v12  ;;  %v17856_v11 = vld [vmem:[%s18862_s8 + $0x2848] ss:$16 sps:$4 sm:$0xff]   ;;  %v17861_v12 = vld [vmem:[%s18862_s8 + $0x2864] ss:$16 sps:$4 sm:$0xff]  }
 0x524   : > { %12206 = vmatprep.subr.bf16.mxu0 %v17777_v14  ;;  %13354 = vmatprep.subr.bf16.mxu1 %v17780_v63  ;;  %v17864_v14 = vld [vmem:[%s18862_s8 + $0x286c] ss:$16 sps:$4 sm:$0xff]   ;;  %v17859_v63 = vld [vmem:[%s18862_s8 + $0x2860] ss:$16 sps:$4 sm:$0xff]  }
 0x527   : > { %12207 = vmatpush1.bf16.msra.mxu0 %v17775_v16  ;;  %13355 = vmatpush1.bf16.msra.mxu1 %v17778_v52  ;;  %v17862_v16 = vld [vmem:[%s18862_s8 + $0x2868] ss:$16 sps:$4 sm:$0xff]   ;;  %v17867_v52 = vld [vmem:[%s18862_s8 + $0x2884] ss:$16 sps:$4 sm:$0xff]  }
 0x528   : > { %12208 = vmatprep.subr.bf16.mxu0 %v17783_v17  ;;  %13356 = vmatprep.subr.bf16.mxu1 %v17786_v8  ;;  %v17870_v17 = vld [vmem:[%s18862_s8 + $0x288c] ss:$16 sps:$4 sm:$0xff]   ;;  %v17865_v8 = vld [vmem:[%s18862_s8 + $0x2880] ss:$16 sps:$4 sm:$0xff]  }
 0x52b   : > { %12209 = vmatpush1.bf16.msra.mxu0 %v17781_v18  ;;  %13357 = vmatpush1.bf16.msra.mxu1 %v17784_v20  ;;  %v17868_v18 = vld [vmem:[%s18862_s8 + $0x2888] ss:$16 sps:$4 sm:$0xff]   ;;  %v17873_v20 = vld [vmem:[%s18862_s8 + $0x28a4] ss:$16 sps:$4 sm:$0xff]  }
 0x52c   : > { %12210 = vmatprep.subr.bf16.mxu0 %v17789_v22  ;;  %13358 = vmatprep.subr.bf16.mxu1 %v17792_v24  ;;  %v17876_v22 = vld [vmem:[%s18862_s8 + $0x28ac] ss:$16 sps:$4 sm:$0xff]   ;;  %v17871_v24 = vld [vmem:[%s18862_s8 + $0x28a0] ss:$16 sps:$4 sm:$0xff]  }
 0x52f   : > { %12211 = vmatpush1.bf16.msra.mxu0 %v17787_v26  ;;  %13359 = vmatpush1.bf16.msra.mxu1 %v17790_v60  ;;  %v17874_v26 = vld [vmem:[%s18862_s8 + $0x28a8] ss:$16 sps:$4 sm:$0xff]   ;;  %v17879_v60 = vld [vmem:[%s18862_s8 + $0x28c4] ss:$16 sps:$4 sm:$0xff]  }
 0x530   : > { %12212 = vmatprep.subr.bf16.mxu0 %v17795_v27  ;;  %13360 = vmatprep.subr.bf16.mxu1 %v17798_v28  ;;  %v17882_v27 = vld [vmem:[%s18862_s8 + $0x28cc] ss:$16 sps:$4 sm:$0xff]   ;;  %v17877_v28 = vld [vmem:[%s18862_s8 + $0x28c0] ss:$16 sps:$4 sm:$0xff]  }
 0x533   : > { %12213 = vmatpush1.bf16.msra.mxu0 %v17793_v29  ;;  %13361 = vmatpush1.bf16.msra.mxu1 %v17796_v30  ;;  %v17880_v29 = vld [vmem:[%s18862_s8 + $0x28c8] ss:$16 sps:$4 sm:$0xff]   ;;  %v17885_v30 = vld [vmem:[%s18862_s8 + $0x28e4] ss:$16 sps:$4 sm:$0xff]  }
 0x534   : > { %12214 = vmatprep.subr.bf16.mxu0 %v17801_v15  ;;  %13362 = vmatprep.subr.bf16.mxu1 %v17804_v31  ;;  %v17888_v15 = vld [vmem:[%s18862_s8 + $0x28ec] ss:$16 sps:$4 sm:$0xff]   ;;  %v17883_v31 = vld [vmem:[%s18862_s8 + $0x28e0] ss:$16 sps:$4 sm:$0xff]  }
 0x537   : > { %12215 = vmatpush1.bf16.msra.mxu0 %v17799_v33  ;;  %13363 = vmatpush1.bf16.msra.mxu1 %v17802_v34  ;;  %v17886_v33 = vld [vmem:[%s18862_s8 + $0x28e8] ss:$16 sps:$4 sm:$0xff]   ;;  %v17891_v34 = vld [vmem:[%s18862_s8 + $0x2904] ss:$16 sps:$4 sm:$0xff]  }
 0x538   : > { %12216 = vmatprep.subr.bf16.mxu0 %v17807_v36  ;;  %13364 = vmatprep.subr.bf16.mxu1 %v17810_v37  ;;  %v17894_v36 = vld [vmem:[%s18862_s8 + $0x290c] ss:$16 sps:$4 sm:$0xff]   ;;  %v17889_v37 = vld [vmem:[%s18862_s8 + $0x2900] ss:$16 sps:$4 sm:$0xff]  }
 0x53b   : > { %12217 = vmatpush1.bf16.msra.mxu0 %v17805_v23  ;;  %13365 = vmatpush1.bf16.msra.mxu1 %v17808_v39  ;;  %v17892_v23 = vld [vmem:[%s18862_s8 + $0x2908] ss:$16 sps:$4 sm:$0xff]   ;;  %v17897_v39 = vld [vmem:[%s18862_s8 + $0x2924] ss:$16 sps:$4 sm:$0xff]  }
 0x53c   : > { %12218 = vmatprep.subr.bf16.mxu0 %v17813_v40  ;;  %13366 = vmatprep.subr.bf16.mxu1 %v17816_v21  ;;  %v17900_v40 = vld [vmem:[%s18862_s8 + $0x292c] ss:$16 sps:$4 sm:$0xff]   ;;  %v17895_v21 = vld [vmem:[%s18862_s8 + $0x2920] ss:$16 sps:$4 sm:$0xff]  }
 0x53f   : > { %12219 = vmatpush1.bf16.msra.mxu0 %v17811_v32  ;;  %13367 = vmatpush1.bf16.msra.mxu1 %v17814_v41  ;;  %v17898_v32 = vld [vmem:[%s18862_s8 + $0x2928] ss:$16 sps:$4 sm:$0xff]   ;;  %v17903_v41 = vld [vmem:[%s18862_s8 + $0x2944] ss:$16 sps:$4 sm:$0xff]  }
 0x540   : > { %12220 = vmatprep.subr.bf16.mxu0 %v17819_v43  ;;  %13368 = vmatprep.subr.bf16.mxu1 %v17822_v13  ;;  %v17906_v43 = vld [vmem:[%s18862_s8 + $0x294c] ss:$16 sps:$4 sm:$0xff]   ;;  %v17901_v13 = vld [vmem:[%s18862_s8 + $0x2940] ss:$16 sps:$4 sm:$0xff]  }
 0x543   : > { %12221 = vmatpush1.bf16.msra.mxu0 %v17817_v46  ;;  %13369 = vmatpush1.bf16.msra.mxu1 %v17820_v47  ;;  %v17904_v46 = vld [vmem:[%s18862_s8 + $0x2948] ss:$16 sps:$4 sm:$0xff]   ;;  %v17909_v47 = vld [vmem:[%s18862_s8 + $0x2964] ss:$16 sps:$4 sm:$0xff]  }
 0x544   : > { %12222 = vmatprep.subr.bf16.mxu0 %v17825_v19  ;;  %13370 = vmatprep.subr.bf16.mxu1 %v17828_v51  ;;  %v17912_v19 = vld [vmem:[%s18862_s8 + $0x296c] ss:$16 sps:$4 sm:$0xff]   ;;  %v17907_v51 = vld [vmem:[%s18862_s8 + $0x2960] ss:$16 sps:$4 sm:$0xff]  }
 0x547   : > { %12223 = vmatpush1.bf16.msra.mxu0 %v17823_v53  ;;  %13371 = vmatpush1.bf16.msra.mxu1 %v17826_v25  ;;  %v17910_v53 = vld [vmem:[%s18862_s8 + $0x2968] ss:$16 sps:$4 sm:$0xff]   ;;  %v17915_v25 = vld [vmem:[%s18862_s8 + $0x2984] ss:$16 sps:$4 sm:$0xff]  }
 0x548   : > { %12224 = vmatprep.subr.bf16.mxu0 %v17831_v54  ;;  %13372 = vmatprep.subr.bf16.mxu1 %v17834_v55  ;;  %v17918_v54 = vld [vmem:[%s18862_s8 + $0x298c] ss:$16 sps:$4 sm:$0xff]   ;;  %v17913_v55 = vld [vmem:[%s18862_s8 + $0x2980] ss:$16 sps:$4 sm:$0xff]  }
 0x54b   : > { %12225 = vmatpush1.bf16.msra.mxu0 %v17829_v44  ;;  %13373 = vmatpush1.bf16.msra.mxu1 %v17832_v56  ;;  %v17916_v44 = vld [vmem:[%s18862_s8 + $0x2988] ss:$16 sps:$4 sm:$0xff]   ;;  %v17921_v56 = vld [vmem:[%s18862_s8 + $0x29a4] ss:$16 sps:$4 sm:$0xff]  }
 0x54c   : > { %12226 = vmatprep.subr.bf16.mxu0 %v17837_v57  ;;  %13374 = vmatprep.subr.bf16.mxu1 %v17840_v48  ;;  %v17924_v57 = vld [vmem:[%s18862_s8 + $0x29ac] ss:$16 sps:$4 sm:$0xff]   ;;  %v17919_v48 = vld [vmem:[%s18862_s8 + $0x29a0] ss:$16 sps:$4 sm:$0xff]  }
 0x54f   : > { %12227 = vmatpush1.bf16.msra.mxu0 %v17835_v61  ;;  %13375 = vmatpush1.bf16.msra.mxu1 %v17838_v62  ;;  %v17922_v61 = vld [vmem:[%s18862_s8 + $0x29a8] ss:$16 sps:$4 sm:$0xff]   ;;  %v17927_v62 = vld [vmem:[%s18862_s8 + $0x29c4] ss:$16 sps:$4 sm:$0xff]  }
 0x550   : > { %12237 = vmatprep.subr.bf16.mxu0 %v17843_v0  ;;  %13385 = vmatprep.subr.bf16.mxu1 %v17846_v50  ;;  %v17930_v0 = vld [vmem:[%s18862_s8 + $0x29cc] ss:$16 sps:$4 sm:$0xff]   ;;  %v17925_v50 = vld [vmem:[%s18862_s8 + $0x29c0] ss:$16 sps:$4 sm:$0xff]  }
 0x552   : > { %12229 = vmatmul.mubr.bf16.vlgmr.msra.gmra.mrb[0].mxu0 %v2300_v35  ;;  %13377 = vmatmul.mubr.bf16.vlgmr.msra.gmra.mrb[0].mxu1 %v2300_v35  ;;  %v17933_v35 = vld [vmem:[%s18862_s8 + $0x29e4] ss:$16 sps:$4 sm:$0xff]  }
 0x553   : > { %12238 = vmatpush1.bf16.msra.mxu0 %v17841_v2  ;;  %13386 = vmatpush1.bf16.msra.mxu1 %v17844_v58  ;;  %v17936_v2 = vld [vmem:[%s18862_s8 + $0x29ec] ss:$16 sps:$4 sm:$0xff]   ;;  %v17931_v58 = vld [vmem:[%s18862_s8 + $0x29e0] ss:$16 sps:$4 sm:$0xff]  }
 0x554   : > { %12239 = vmatprep.subr.bf16.mxu0 %v17849_v3  ;;  %13387 = vmatprep.subr.bf16.mxu1 %v17852_v4  ;;  %v17934_v3 = vld [vmem:[%s18862_s8 + $0x29e8] ss:$16 sps:$4 sm:$0xff]   ;;  %v17939_v4 = vld [vmem:[%s18862_s8 + $0x2a04] ss:$16 sps:$4 sm:$0xff]  }
 0x555   : > { %12269 = vmatprep.mubr.bf16.mxu0 %v20397_v5  ;;  %13417 = vmatprep.mubr.bf16.mxu1 %v20397_v5 }
 0x557   : > { %12240 = vmatpush1.bf16.msra.mxu0 %v17847_v45  ;;  %13388 = vmatpush1.bf16.msra.mxu1 %v17850_v6  ;;  %v17942_v45 = vld [vmem:[%s18862_s8 + $0x2a0c] ss:$16 sps:$4 sm:$0xff]   ;;  %v20463_v6 = vrot.slane %v20382_v59, %v18921_v49  ;;  %v17943_v59 = vld [vmem:[%s18862_s8 + $0x2a20] ss:$16 sps:$4 sm:$0xff]  }
 0x558   : > { %12241 = vmatprep.subr.bf16.mxu0 %v17855_v7  ;;  %13389 = vmatprep.subr.bf16.mxu1 %v17858_v9  ;;  %v17937_v7 = vld [vmem:[%s18862_s8 + $0x2a00] ss:$16 sps:$4 sm:$0xff]   ;;  %v17940_v9 = vld [vmem:[%s18862_s8 + $0x2a08] ss:$16 sps:$4 sm:$0xff]  }
 0x55b   : > { %12242 = vmatpush1.bf16.msra.mxu0 %v17853_v10  ;;  %13390 = vmatpush1.bf16.msra.mxu1 %v17856_v11  ;;  %v17945_v10 = vld [vmem:[%s18862_s8 + $0x2a24] ss:$16 sps:$4 sm:$0xff]   ;;  %v17948_v11 = vld [vmem:[%s18862_s8 + $0x2a2c] ss:$16 sps:$4 sm:$0xff]  }
 0x55c   : > { %12243 = vmatprep.subr.bf16.mxu0 %v17861_v12  ;;  %13391 = vmatprep.subr.bf16.mxu1 %v17864_v14  ;;  %v2350_v12 = vcombine.high %v20397_v5, %v20397_v5  ;;  %v17946_v14 = vld [vmem:[%s18862_s8 + $0x2a28] ss:$16 sps:$4 sm:$0xff]   ;;  %v17949_v5 = vld [vmem:[%s18862_s8 + $0x2a40] ss:$16 sps:$4 sm:$0xff]  }
 0x55f   : > { %12244 = vmatpush1.bf16.msra.mxu0 %v17859_v63  ;;  %13392 = vmatpush1.bf16.msra.mxu1 %v17862_v16  ;;  %v17951_v63 = vld [vmem:[%s18862_s8 + $0x2a44] ss:$16 sps:$4 sm:$0xff]   ;;  %v17954_v16 = vld [vmem:[%s18862_s8 + $0x2a4c] ss:$16 sps:$4 sm:$0xff]  }
 0x560   : > { %12245 = vmatprep.subr.bf16.mxu0 %v17867_v52  ;;  %13393 = vmatprep.subr.bf16.mxu1 %v17870_v17  ;;  %v17952_v52 = vld [vmem:[%s18862_s8 + $0x2a48] ss:$16 sps:$4 sm:$0xff]   ;;  %v17957_v17 = vld [vmem:[%s18862_s8 + $0x2a64] ss:$16 sps:$4 sm:$0xff]  }
 0x563   : > { %12246 = vmatpush1.bf16.msra.mxu0 %v17865_v8  ;;  %13394 = vmatpush1.bf16.msra.mxu1 %v17868_v18  ;;  %v17960_v8 = vld [vmem:[%s18862_s8 + $0x2a6c] ss:$16 sps:$4 sm:$0xff]   ;;  %v17955_v18 = vld [vmem:[%s18862_s8 + $0x2a60] ss:$16 sps:$4 sm:$0xff]  }
 0x564   : > { %12247 = vmatprep.subr.bf16.mxu0 %v17873_v20  ;;  %13395 = vmatprep.subr.bf16.mxu1 %v17876_v22  ;;  %v17958_v20 = vld [vmem:[%s18862_s8 + $0x2a68] ss:$16 sps:$4 sm:$0xff]   ;;  %v17963_v22 = vld [vmem:[%s18862_s8 + $0x2a84] ss:$16 sps:$4 sm:$0xff]  }
 0x567   : > { %12248 = vmatpush1.bf16.msra.mxu0 %v17871_v24  ;;  %13396 = vmatpush1.bf16.msra.mxu1 %v17874_v26  ;;  %v17966_v24 = vld [vmem:[%s18862_s8 + $0x2a8c] ss:$16 sps:$4 sm:$0xff]   ;;  %v17961_v26 = vld [vmem:[%s18862_s8 + $0x2a80] ss:$16 sps:$4 sm:$0xff]  }
 0x568   : > { %12249 = vmatprep.subr.bf16.mxu0 %v17879_v60  ;;  %13397 = vmatprep.subr.bf16.mxu1 %v17882_v27  ;;  %v17964_v60 = vld [vmem:[%s18862_s8 + $0x2a88] ss:$16 sps:$4 sm:$0xff]   ;;  %v17969_v27 = vld [vmem:[%s18862_s8 + $0x2aa4] ss:$16 sps:$4 sm:$0xff]  }
 0x56b   : > { %12250 = vmatpush1.bf16.msra.mxu0 %v17877_v28  ;;  %13398 = vmatpush1.bf16.msra.mxu1 %v17880_v29  ;;  %v17972_v28 = vld [vmem:[%s18862_s8 + $0x2aac] ss:$16 sps:$4 sm:$0xff]   ;;  %v17967_v29 = vld [vmem:[%s18862_s8 + $0x2aa0] ss:$16 sps:$4 sm:$0xff]  }
 0x56c   : > { %12251 = vmatprep.subr.bf16.mxu0 %v17885_v30  ;;  %13399 = vmatprep.subr.bf16.mxu1 %v17888_v15  ;;  %v17970_v30 = vld [vmem:[%s18862_s8 + $0x2aa8] ss:$16 sps:$4 sm:$0xff]   ;;  %v17975_v15 = vld [vmem:[%s18862_s8 + $0x2ac4] ss:$16 sps:$4 sm:$0xff]  }
 0x56f   : > { %12252 = vmatpush1.bf16.msra.mxu0 %v17883_v31  ;;  %13400 = vmatpush1.bf16.msra.mxu1 %v17886_v33  ;;  %v17978_v31 = vld [vmem:[%s18862_s8 + $0x2acc] ss:$16 sps:$4 sm:$0xff]   ;;  %v17973_v33 = vld [vmem:[%s18862_s8 + $0x2ac0] ss:$16 sps:$4 sm:$0xff]  }
 0x570   : > { %12253 = vmatprep.subr.bf16.mxu0 %v17891_v34  ;;  %13401 = vmatprep.subr.bf16.mxu1 %v17894_v36  ;;  %v17976_v34 = vld [vmem:[%s18862_s8 + $0x2ac8] ss:$16 sps:$4 sm:$0xff]   ;;  %v17981_v36 = vld [vmem:[%s18862_s8 + $0x2ae4] ss:$16 sps:$4 sm:$0xff]  }
 0x573   : > { %12254 = vmatpush1.bf16.msra.mxu0 %v17889_v37  ;;  %13402 = vmatpush1.bf16.msra.mxu1 %v17892_v23  ;;  %v17984_v37 = vld [vmem:[%s18862_s8 + $0x2aec] ss:$16 sps:$4 sm:$0xff]   ;;  %v17979_v23 = vld [vmem:[%s18862_s8 + $0x2ae0] ss:$16 sps:$4 sm:$0xff]  }
 0x574   : > { %12255 = vmatprep.subr.bf16.mxu0 %v17897_v39  ;;  %13403 = vmatprep.subr.bf16.mxu1 %v17900_v40  ;;  %v17982_v39 = vld [vmem:[%s18862_s8 + $0x2ae8] ss:$16 sps:$4 sm:$0xff]   ;;  %v17987_v40 = vld [vmem:[%s18862_s8 + $0x2b04] ss:$16 sps:$4 sm:$0xff]  }
 0x577   : > { %12256 = vmatpush1.bf16.msra.mxu0 %v17895_v21  ;;  %13404 = vmatpush1.bf16.msra.mxu1 %v17898_v32  ;;  %v17990_v21 = vld [vmem:[%s18862_s8 + $0x2b0c] ss:$16 sps:$4 sm:$0xff]   ;;  %v17985_v32 = vld [vmem:[%s18862_s8 + $0x2b00] ss:$16 sps:$4 sm:$0xff]  }
 0x578   : > { %12257 = vmatprep.subr.bf16.mxu0 %v17903_v41  ;;  %13405 = vmatprep.subr.bf16.mxu1 %v17906_v43  ;;  %v17988_v41 = vld [vmem:[%s18862_s8 + $0x2b08] ss:$16 sps:$4 sm:$0xff]   ;;  %v17993_v43 = vld [vmem:[%s18862_s8 + $0x2b24] ss:$16 sps:$4 sm:$0xff]  }
 0x57b   : > { %12258 = vmatpush1.bf16.msra.mxu0 %v17901_v13  ;;  %13406 = vmatpush1.bf16.msra.mxu1 %v17904_v46  ;;  %v17996_v13 = vld [vmem:[%s18862_s8 + $0x2b2c] ss:$16 sps:$4 sm:$0xff]   ;;  %v17991_v46 = vld [vmem:[%s18862_s8 + $0x2b20] ss:$16 sps:$4 sm:$0xff]  }
 0x57c   : > { %12259 = vmatprep.subr.bf16.mxu0 %v17909_v47  ;;  %13407 = vmatprep.subr.bf16.mxu1 %v17912_v19  ;;  %v17994_v47 = vld [vmem:[%s18862_s8 + $0x2b28] ss:$16 sps:$4 sm:$0xff]   ;;  %v17999_v19 = vld [vmem:[%s18862_s8 + $0x2b44] ss:$16 sps:$4 sm:$0xff]  }
 0x57f   : > { %12260 = vmatpush1.bf16.msra.mxu0 %v17907_v51  ;;  %13408 = vmatpush1.bf16.msra.mxu1 %v17910_v53  ;;  %v18002_v51 = vld [vmem:[%s18862_s8 + $0x2b4c] ss:$16 sps:$4 sm:$0xff]   ;;  %v17997_v53 = vld [vmem:[%s18862_s8 + $0x2b40] ss:$16 sps:$4 sm:$0xff]  }
 0x580   : > { %12261 = vmatprep.subr.bf16.mxu0 %v17915_v25  ;;  %13409 = vmatprep.subr.bf16.mxu1 %v17918_v54  ;;  %v18000_v25 = vld [vmem:[%s18862_s8 + $0x2b48] ss:$16 sps:$4 sm:$0xff]   ;;  %v18005_v54 = vld [vmem:[%s18862_s8 + $0x2b64] ss:$16 sps:$4 sm:$0xff]  }
 0x583   : > { %12262 = vmatpush1.bf16.msra.mxu0 %v17913_v55  ;;  %13410 = vmatpush1.bf16.msra.mxu1 %v17916_v44  ;;  %v18008_v55 = vld [vmem:[%s18862_s8 + $0x2b6c] ss:$16 sps:$4 sm:$0xff]   ;;  %v18003_v44 = vld [vmem:[%s18862_s8 + $0x2b60] ss:$16 sps:$4 sm:$0xff]  }
 0x584   : > { %12263 = vmatprep.subr.bf16.mxu0 %v17921_v56  ;;  %13411 = vmatprep.subr.bf16.mxu1 %v17924_v57  ;;  %v18006_v56 = vld [vmem:[%s18862_s8 + $0x2b68] ss:$16 sps:$4 sm:$0xff]   ;;  %v18011_v57 = vld [vmem:[%s18862_s8 + $0x2b84] ss:$16 sps:$4 sm:$0xff]  }
 0x587   : > { %12264 = vmatpush1.bf16.msra.mxu0 %v17919_v48  ;;  %13412 = vmatpush1.bf16.msra.mxu1 %v17922_v61  ;;  %v18014_v48 = vld [vmem:[%s18862_s8 + $0x2b8c] ss:$16 sps:$4 sm:$0xff]   ;;  %v18009_v61 = vld [vmem:[%s18862_s8 + $0x2b80] ss:$16 sps:$4 sm:$0xff]  }
 0x588   : > { %12265 = vmatprep.subr.bf16.mxu0 %v17927_v62  ;;  %13413 = vmatprep.subr.bf16.mxu1 %v17930_v0  ;;  %v18012_v62 = vld [vmem:[%s18862_s8 + $0x2b88] ss:$16 sps:$4 sm:$0xff]   ;;  %v18017_v0 = vld [vmem:[%s18862_s8 + $0x2ba4] ss:$16 sps:$4 sm:$0xff]  }
 0x58b   : > { %12266 = vmatpush1.bf16.msra.mxu0 %v17925_v50  ;;  %13414 = vmatpush1.bf16.msra.mxu1 %v17928_v1  ;;  %v18020_v50 = vld [vmem:[%s18862_s8 + $0x2bac] ss:$16 sps:$4 sm:$0xff]   ;;  %v18015_v1 = vld [vmem:[%s18862_s8 + $0x2ba0] ss:$16 sps:$4 sm:$0xff]  }
 0x58c   : > { %12267 = vmatprep.subr.bf16.mxu0 %v17933_v35  ;;  %13415 = vmatprep.subr.bf16.mxu1 %v17936_v2  ;;  %v18018_v35 = vld [vmem:[%s18862_s8 + $0x2ba8] ss:$16 sps:$4 sm:$0xff]   ;;  %v18023_v2 = vld [vmem:[%s18862_s8 + $0x2bc4] ss:$16 sps:$4 sm:$0xff]  }
 0x58f   : > { %12268 = vmatpush1.bf16.msra.mxu0 %v17931_v58  ;;  %13416 = vmatpush1.bf16.msra.mxu1 %v17934_v3  ;;  %v18026_v58 = vld [vmem:[%s18862_s8 + $0x2bcc] ss:$16 sps:$4 sm:$0xff]   ;;  %v2303_v3 = vcombine.high %v20374_v38, %v20374_v38  ;;  %v18027_v38 = vld [vmem:[%s18862_s8 + $0x2be0] ss:$16 sps:$4 sm:$0xff]  }
 0x590   : > { %12278 = vmatprep.subr.bf16.mxu0 %v17939_v4  ;;  %13426 = vmatprep.subr.bf16.mxu1 %v17942_v45  ;;  %v18021_v4 = vld [vmem:[%s18862_s8 + $0x2bc0] ss:$16 sps:$4 sm:$0xff]   ;;  %v18024_v45 = vld [vmem:[%s18862_s8 + $0x2bc8] ss:$16 sps:$4 sm:$0xff]  }
 0x592   : > { %12270 = vmatmul.mubr.bf16.vlgmr.msra.gmra.mrb[0].mxu0 %v20463_v6  ;;  %13418 = vmatmul.mubr.bf16.vlgmr.msra.gmra.mrb[0].mxu1 %v20463_v6 }
 0x593   : > { %12279 = vmatpush1.bf16.msra.mxu0 %v17937_v7  ;;  %13427 = vmatpush1.bf16.msra.mxu1 %v17940_v9  ;;  %v18029_v7 = vld [vmem:[%s18862_s8 + $0x2be4] ss:$16 sps:$4 sm:$0xff]   ;;  %v18032_v9 = vld [vmem:[%s18862_s8 + $0x2bec] ss:$16 sps:$4 sm:$0xff]  }
 0x594   : > { %12280 = vmatprep.subr.bf16.mxu0 %v17945_v10  ;;  %13428 = vmatprep.subr.bf16.mxu1 %v17948_v11  ;;  %v20532_v10 = vrot.slane %v2303_v3, %v18921_v49  ;;  %v18030_v11 = vld [vmem:[%s18862_s8 + $0x2be8] ss:$16 sps:$4 sm:$0xff]  }
 0x595   : > { %12310 = vmatprep.mubr.bf16.mxu0 %v2350_v12  ;;  %13458 = vmatprep.mubr.bf16.mxu1 %v2350_v12  ;;  %v18035_v12 = vld [vmem:[%s18862_s8 + $0x2c04] ss:$16 sps:$4 sm:$0xff]   ;;  %v18108_v3 = vld [vmem:[%s18862_s8 + $0x2d88] ss:$16 sps:$4 sm:$0xff]  }
 0x597   : > { %12281 = vmatpush1.bf16.msra.mxu0 %v17943_v59  ;;  %13429 = vmatpush1.bf16.msra.mxu1 %v17946_v14  ;;  %v18038_v59 = vld [vmem:[%s18862_s8 + $0x2c0c] ss:$16 sps:$4 sm:$0xff]   ;;  %v2319_v14 = vcombine.high %v20532_v10, %v20532_v10 }
 0x598   : > { %12282 = vmatprep.subr.bf16.mxu0 %v17951_v63  ;;  %13430 = vmatprep.subr.bf16.mxu1 %v17954_v16  ;;  %v2348_v63 = vcombine.high %v20463_v6, %v20463_v6  ;;  %v18033_v16 = vld [vmem:[%s18862_s8 + $0x2c00] ss:$16 sps:$4 sm:$0xff]  }
 0x599   : > { %v18039_v6 = vld [vmem:[%s18862_s8 + $0x2c20] ss:$16 sps:$4 sm:$0xff]  }
 0x59b   : > { %12283 = vmatpush1.bf16.msra.mxu0 %v17949_v5  ;;  %13431 = vmatpush1.bf16.msra.mxu1 %v17952_v52  ;;  %v18036_v5 = vld [vmem:[%s18862_s8 + $0x2c08] ss:$16 sps:$4 sm:$0xff]   ;;  %v18041_v52 = vld [vmem:[%s18862_s8 + $0x2c24] ss:$16 sps:$4 sm:$0xff]  }
 0x59c   : > { %12284 = vmatprep.subr.bf16.mxu0 %v17957_v17  ;;  %13432 = vmatprep.subr.bf16.mxu1 %v17960_v8  ;;  %v18044_v17 = vld [vmem:[%s18862_s8 + $0x2c2c] ss:$16 sps:$4 sm:$0xff]   ;;  %v20547_v8 = vrot.slane %v2319_v14, %v18921_v49  ;;  %v18125_v14 = vld [vmem:[%s18862_s8 + $0x2de4] ss:$16 sps:$4 sm:$0xff]  }
 0x59f   : > { %12285 = vmatpush1.bf16.msra.mxu0 %v17955_v18  ;;  %13433 = vmatpush1.bf16.msra.mxu1 %v17958_v20  ;;  %v18042_v18 = vld [vmem:[%s18862_s8 + $0x2c28] ss:$16 sps:$4 sm:$0xff]   ;;  %v18047_v20 = vld [vmem:[%s18862_s8 + $0x2c44] ss:$16 sps:$4 sm:$0xff]  }
 0x5a0   : > { %12286 = vmatprep.subr.bf16.mxu0 %v17963_v22  ;;  %13434 = vmatprep.subr.bf16.mxu1 %v17966_v24  ;;  %v18050_v22 = vld [vmem:[%s18862_s8 + $0x2c4c] ss:$16 sps:$4 sm:$0xff]   ;;  %v18045_v24 = vld [vmem:[%s18862_s8 + $0x2c40] ss:$16 sps:$4 sm:$0xff]  }
 0x5a3   : > { %12287 = vmatpush1.bf16.msra.mxu0 %v17961_v26  ;;  %13435 = vmatpush1.bf16.msra.mxu1 %v17964_v60  ;;  %v18048_v26 = vld [vmem:[%s18862_s8 + $0x2c48] ss:$16 sps:$4 sm:$0xff]   ;;  %v18053_v60 = vld [vmem:[%s18862_s8 + $0x2c64] ss:$16 sps:$4 sm:$0xff]  }
 0x5a4   : > { %12288 = vmatprep.subr.bf16.mxu0 %v17969_v27  ;;  %13436 = vmatprep.subr.bf16.mxu1 %v17972_v28  ;;  %v18056_v27 = vld [vmem:[%s18862_s8 + $0x2c6c] ss:$16 sps:$4 sm:$0xff]   ;;  %v18051_v28 = vld [vmem:[%s18862_s8 + $0x2c60] ss:$16 sps:$4 sm:$0xff]  }
 0x5a7   : > { %12289 = vmatpush1.bf16.msra.mxu0 %v17967_v29  ;;  %13437 = vmatpush1.bf16.msra.mxu1 %v17970_v30  ;;  %v18054_v29 = vld [vmem:[%s18862_s8 + $0x2c68] ss:$16 sps:$4 sm:$0xff]   ;;  %v18059_v30 = vld [vmem:[%s18862_s8 + $0x2c84] ss:$16 sps:$4 sm:$0xff]  }
 0x5a8   : > { %12290 = vmatprep.subr.bf16.mxu0 %v17975_v15  ;;  %13438 = vmatprep.subr.bf16.mxu1 %v17978_v31  ;;  %v18062_v15 = vld [vmem:[%s18862_s8 + $0x2c8c] ss:$16 sps:$4 sm:$0xff]   ;;  %v18057_v31 = vld [vmem:[%s18862_s8 + $0x2c80] ss:$16 sps:$4 sm:$0xff]  }
 0x5ab   : > { %12291 = vmatpush1.bf16.msra.mxu0 %v17973_v33  ;;  %13439 = vmatpush1.bf16.msra.mxu1 %v17976_v34  ;;  %v18060_v33 = vld [vmem:[%s18862_s8 + $0x2c88] ss:$16 sps:$4 sm:$0xff]   ;;  %v18065_v34 = vld [vmem:[%s18862_s8 + $0x2ca4] ss:$16 sps:$4 sm:$0xff]  }
 0x5ac   : > { %12292 = vmatprep.subr.bf16.mxu0 %v17981_v36  ;;  %13440 = vmatprep.subr.bf16.mxu1 %v17984_v37  ;;  %v18068_v36 = vld [vmem:[%s18862_s8 + $0x2cac] ss:$16 sps:$4 sm:$0xff]   ;;  %v18063_v37 = vld [vmem:[%s18862_s8 + $0x2ca0] ss:$16 sps:$4 sm:$0xff]  }
 0x5af   : > { %12293 = vmatpush1.bf16.msra.mxu0 %v17979_v23  ;;  %13441 = vmatpush1.bf16.msra.mxu1 %v17982_v39  ;;  %v18066_v23 = vld [vmem:[%s18862_s8 + $0x2ca8] ss:$16 sps:$4 sm:$0xff]   ;;  %v18071_v39 = vld [vmem:[%s18862_s8 + $0x2cc4] ss:$16 sps:$4 sm:$0xff]  }
 0x5b0   : > { %12294 = vmatprep.subr.bf16.mxu0 %v17987_v40  ;;  %13442 = vmatprep.subr.bf16.mxu1 %v17990_v21  ;;  %v18074_v40 = vld [vmem:[%s18862_s8 + $0x2ccc] ss:$16 sps:$4 sm:$0xff]   ;;  %v18069_v21 = vld [vmem:[%s18862_s8 + $0x2cc0] ss:$16 sps:$4 sm:$0xff]  }
 0x5b3   : > { %12295 = vmatpush1.bf16.msra.mxu0 %v17985_v32  ;;  %13443 = vmatpush1.bf16.msra.mxu1 %v17988_v41  ;;  %v18072_v32 = vld [vmem:[%s18862_s8 + $0x2cc8] ss:$16 sps:$4 sm:$0xff]   ;;  %v18077_v41 = vld [vmem:[%s18862_s8 + $0x2ce4] ss:$16 sps:$4 sm:$0xff]  }
 0x5b4   : > { %12296 = vmatprep.subr.bf16.mxu0 %v17993_v43  ;;  %13444 = vmatprep.subr.bf16.mxu1 %v17996_v13  ;;  %v18080_v43 = vld [vmem:[%s18862_s8 + $0x2cec] ss:$16 sps:$4 sm:$0xff]   ;;  %v18075_v13 = vld [vmem:[%s18862_s8 + $0x2ce0] ss:$16 sps:$4 sm:$0xff]  }
 0x5b7   : > { %12297 = vmatpush1.bf16.msra.mxu0 %v17991_v46  ;;  %13445 = vmatpush1.bf16.msra.mxu1 %v17994_v47  ;;  %v18078_v46 = vld [vmem:[%s18862_s8 + $0x2ce8] ss:$16 sps:$4 sm:$0xff]   ;;  %v18083_v47 = vld [vmem:[%s18862_s8 + $0x2d04] ss:$16 sps:$4 sm:$0xff]  }
 0x5b8   : > { %12298 = vmatprep.subr.bf16.mxu0 %v17999_v19  ;;  %13446 = vmatprep.subr.bf16.mxu1 %v18002_v51  ;;  %v18086_v19 = vld [vmem:[%s18862_s8 + $0x2d0c] ss:$16 sps:$4 sm:$0xff]   ;;  %v18081_v51 = vld [vmem:[%s18862_s8 + $0x2d00] ss:$16 sps:$4 sm:$0xff]  }
 0x5bb   : > { %12299 = vmatpush1.bf16.msra.mxu0 %v17997_v53  ;;  %13447 = vmatpush1.bf16.msra.mxu1 %v18000_v25  ;;  %v18084_v53 = vld [vmem:[%s18862_s8 + $0x2d08] ss:$16 sps:$4 sm:$0xff]   ;;  %v18089_v25 = vld [vmem:[%s18862_s8 + $0x2d24] ss:$16 sps:$4 sm:$0xff]  }
 0x5bc   : > { %12300 = vmatprep.subr.bf16.mxu0 %v18005_v54  ;;  %13448 = vmatprep.subr.bf16.mxu1 %v18008_v55  ;;  %v18092_v54 = vld [vmem:[%s18862_s8 + $0x2d2c] ss:$16 sps:$4 sm:$0xff]   ;;  %v18087_v55 = vld [vmem:[%s18862_s8 + $0x2d20] ss:$16 sps:$4 sm:$0xff]  }
 0x5bf   : > { %12301 = vmatpush1.bf16.msra.mxu0 %v18003_v44  ;;  %13449 = vmatpush1.bf16.msra.mxu1 %v18006_v56  ;;  %v18090_v44 = vld [vmem:[%s18862_s8 + $0x2d28] ss:$16 sps:$4 sm:$0xff]   ;;  %v18095_v56 = vld [vmem:[%s18862_s8 + $0x2d44] ss:$16 sps:$4 sm:$0xff]  }
 0x5c0   : > { %12302 = vmatprep.subr.bf16.mxu0 %v18011_v57  ;;  %13450 = vmatprep.subr.bf16.mxu1 %v18014_v48  ;;  %v18098_v57 = vld [vmem:[%s18862_s8 + $0x2d4c] ss:$16 sps:$4 sm:$0xff]   ;;  %v18093_v48 = vld [vmem:[%s18862_s8 + $0x2d40] ss:$16 sps:$4 sm:$0xff]  }
 0x5c3   : > { %12303 = vmatpush1.bf16.msra.mxu0 %v18009_v61  ;;  %13451 = vmatpush1.bf16.msra.mxu1 %v18012_v62  ;;  %v18096_v61 = vld [vmem:[%s18862_s8 + $0x2d48] ss:$16 sps:$4 sm:$0xff]   ;;  %v18101_v62 = vld [vmem:[%s18862_s8 + $0x2d64] ss:$16 sps:$4 sm:$0xff]  }
 0x5c4   : > { %12304 = vmatprep.subr.bf16.mxu0 %v18017_v0  ;;  %13452 = vmatprep.subr.bf16.mxu1 %v18020_v50  ;;  %v18104_v0 = vld [vmem:[%s18862_s8 + $0x2d6c] ss:$16 sps:$4 sm:$0xff]   ;;  %v18099_v50 = vld [vmem:[%s18862_s8 + $0x2d60] ss:$16 sps:$4 sm:$0xff]  }
 0x5c7   : > { %12305 = vmatpush1.bf16.msra.mxu0 %v18015_v1  ;;  %13453 = vmatpush1.bf16.msra.mxu1 %v18018_v35  ;;  %v18102_v1 = vld [vmem:[%s18862_s8 + $0x2d68] ss:$16 sps:$4 sm:$0xff]   ;;  %v18107_v35 = vld [vmem:[%s18862_s8 + $0x2d84] ss:$16 sps:$4 sm:$0xff]  }
 0x5c8   : > { %12306 = vmatprep.subr.bf16.mxu0 %v18023_v2  ;;  %13454 = vmatprep.subr.bf16.mxu1 %v18026_v58  ;;  %v18110_v2 = vld [vmem:[%s18862_s8 + $0x2d8c] ss:$16 sps:$4 sm:$0xff]   ;;  %v18105_v58 = vld [vmem:[%s18862_s8 + $0x2d80] ss:$16 sps:$4 sm:$0xff]  }
 0x5cb   : > { %12307 = vmatpush1.bf16.msra.mxu0 %v18021_v4  ;;  %13455 = vmatpush1.bf16.msra.mxu1 %v18024_v45  ;;  %v18113_v4 = vld [vmem:[%s18862_s8 + $0x2da4] ss:$16 sps:$4 sm:$0xff]   ;;  %v18116_v45 = vld [vmem:[%s18862_s8 + $0x2dac] ss:$16 sps:$4 sm:$0xff]  }
 0x5cc   : > { %12308 = vmatprep.subr.bf16.mxu0 %v18029_v7  ;;  %13456 = vmatprep.subr.bf16.mxu1 %v18032_v9  ;;  %v18111_v7 = vld [vmem:[%s18862_s8 + $0x2da0] ss:$16 sps:$4 sm:$0xff]   ;;  %v18114_v9 = vld [vmem:[%s18862_s8 + $0x2da8] ss:$16 sps:$4 sm:$0xff]  }
 0x5cf   : > { %12309 = vmatpush1.bf16.msra.mxu0 %v18027_v38  ;;  %13457 = vmatpush1.bf16.msra.mxu1 %v18030_v11  ;;  %v18119_v38 = vld [vmem:[%s18862_s8 + $0x2dc4] ss:$16 sps:$4 sm:$0xff]   ;;  %v18122_v11 = vld [vmem:[%s18862_s8 + $0x2dcc] ss:$16 sps:$4 sm:$0xff]  }
 0x5d0   : > { %12319 = vmatprep.subr.bf16.mxu0 %v18035_v12  ;;  %13467 = vmatprep.subr.bf16.mxu1 %v18038_v59  ;;  %v18117_v12 = vld [vmem:[%s18862_s8 + $0x2dc0] ss:$16 sps:$4 sm:$0xff]   ;;  %v18120_v59 = vld [vmem:[%s18862_s8 + $0x2dc8] ss:$16 sps:$4 sm:$0xff]  }
 0x5d2   : > { %12311 = vmatmul.mubr.bf16.vlgmr.msra.gmra.mrb[0].mxu0 %v2348_v63  ;;  %13459 = vmatmul.mubr.bf16.vlgmr.msra.gmra.mrb[0].mxu1 %v2348_v63  ;;  %v18128_v63 = vld [vmem:[%s18862_s8 + $0x2dec] ss:$16 sps:$4 sm:$0xff]  }
 0x5d3   : > { %12320 = vmatpush1.bf16.msra.mxu0 %v18033_v16  ;;  %13468 = vmatpush1.bf16.msra.mxu1 %v18036_v5  ;;  %v18123_v16 = vld [vmem:[%s18862_s8 + $0x2de0] ss:$16 sps:$4 sm:$0xff]   ;;  %v18126_v5 = vld [vmem:[%s18862_s8 + $0x2de8] ss:$16 sps:$4 sm:$0xff]  }
 0x5d4   : > { %12321 = vmatprep.subr.bf16.mxu0 %v18041_v52  ;;  %13469 = vmatprep.subr.bf16.mxu1 %v18044_v17  ;;  %v18132_v52 = vld [vmem:[%s18862_s8 + $0x2e04] ss:$16 sps:$4 sm:$0xff]   ;;  %v18135_v17 = vld [vmem:[%s18862_s8 + $0x2e0c] ss:$16 sps:$4 sm:$0xff]  }
 0x5d5   : > { %12351 = vmatprep.mubr.bf16.mxu0 %v20547_v8  ;;  %13499 = vmatprep.mubr.bf16.mxu1 %v20547_v8 }
 0x5d7   : > { %12322 = vmatpush1.bf16.msra.mxu0 %v18039_v6  ;;  %13470 = vmatpush1.bf16.msra.mxu1 %v18042_v18  ;;  %v20613_v6 = vrot.slane %v20532_v10, %v18921_v49  ;;  %v18130_v18 = vld [vmem:[%s18862_s8 + $0x2e00] ss:$16 sps:$4 sm:$0xff]  }
 0x5d8   : > { %12323 = vmatprep.subr.bf16.mxu0 %v18047_v20  ;;  %13471 = vmatprep.subr.bf16.mxu1 %v18050_v22  ;;  %v18133_v20 = vld [vmem:[%s18862_s8 + $0x2e08] ss:$16 sps:$4 sm:$0xff]   ;;  %v18138_v22 = vld [vmem:[%s18862_s8 + $0x2e24] ss:$16 sps:$4 sm:$0xff]   ;;  %v18136_v10 = vld [vmem:[%s18862_s8 + $0x2e20] ss:$16 sps:$4 sm:$0xff]  }
 0x5db   : > { %12324 = vmatpush1.bf16.msra.mxu0 %v18045_v24  ;;  %13472 = vmatpush1.bf16.msra.mxu1 %v18048_v26  ;;  %v18141_v24 = vld [vmem:[%s18862_s8 + $0x2e2c] ss:$16 sps:$4 sm:$0xff]   ;;  %v2351_v26 = vcombine.high %v20547_v8, %v20547_v8  ;;  %v18142_v8 = vld [vmem:[%s18862_s8 + $0x2e40] ss:$16 sps:$4 sm:$0xff]  }
 0x5dc   : > { %12325 = vmatprep.subr.bf16.mxu0 %v18053_v60  ;;  %13473 = vmatprep.subr.bf16.mxu1 %v18056_v27  ;;  %v18139_v60 = vld [vmem:[%s18862_s8 + $0x2e28] ss:$16 sps:$4 sm:$0xff]   ;;  %v18144_v27 = vld [vmem:[%s18862_s8 + $0x2e44] ss:$16 sps:$4 sm:$0xff]  }
 0x5df   : > { %12326 = vmatpush1.bf16.msra.mxu0 %v18051_v28  ;;  %13474 = vmatpush1.bf16.msra.mxu1 %v18054_v29  ;;  %v18147_v28 = vld [vmem:[%s18862_s8 + $0x2e4c] ss:$16 sps:$4 sm:$0xff]   ;;  %v18145_v29 = vld [vmem:[%s18862_s8 + $0x2e48] ss:$16 sps:$4 sm:$0xff]  }
 0x5e0   : > { %12327 = vmatprep.subr.bf16.mxu0 %v18059_v30  ;;  %13475 = vmatprep.subr.bf16.mxu1 %v18062_v15  ;;  %v18150_v30 = vld [vmem:[%s18862_s8 + $0x2e64] ss:$16 sps:$4 sm:$0xff]   ;;  %v18153_v15 = vld [vmem:[%s18862_s8 + $0x2e6c] ss:$16 sps:$4 sm:$0xff]  }
 0x5e3   : > { %12328 = vmatpush1.bf16.msra.mxu0 %v18057_v31  ;;  %13476 = vmatpush1.bf16.msra.mxu1 %v18060_v33  ;;  %v18148_v31 = vld [vmem:[%s18862_s8 + $0x2e60] ss:$16 sps:$4 sm:$0xff]   ;;  %v18151_v33 = vld [vmem:[%s18862_s8 + $0x2e68] ss:$16 sps:$4 sm:$0xff]  }
 0x5e4   : > { %12329 = vmatprep.subr.bf16.mxu0 %v18065_v34  ;;  %13477 = vmatprep.subr.bf16.mxu1 %v18068_v36  ;;  %v18156_v34 = vld [vmem:[%s18862_s8 + $0x2e84] ss:$16 sps:$4 sm:$0xff]   ;;  %v18159_v36 = vld [vmem:[%s18862_s8 + $0x2e8c] ss:$16 sps:$4 sm:$0xff]  }
 0x5e7   : > { %12330 = vmatpush1.bf16.msra.mxu0 %v18063_v37  ;;  %13478 = vmatpush1.bf16.msra.mxu1 %v18066_v23  ;;  %v18154_v37 = vld [vmem:[%s18862_s8 + $0x2e80] ss:$16 sps:$4 sm:$0xff]   ;;  %v18157_v23 = vld [vmem:[%s18862_s8 + $0x2e88] ss:$16 sps:$4 sm:$0xff]  }
 0x5e8   : > { %12331 = vmatprep.subr.bf16.mxu0 %v18071_v39  ;;  %13479 = vmatprep.subr.bf16.mxu1 %v18074_v40  ;;  %v18162_v39 = vld [vmem:[%s18862_s8 + $0x2ea4] ss:$16 sps:$4 sm:$0xff]   ;;  %v18165_v40 = vld [vmem:[%s18862_s8 + $0x2eac] ss:$16 sps:$4 sm:$0xff]  }
 0x5eb   : > { %12332 = vmatpush1.bf16.msra.mxu0 %v18069_v21  ;;  %13480 = vmatpush1.bf16.msra.mxu1 %v18072_v32  ;;  %v18160_v21 = vld [vmem:[%s18862_s8 + $0x2ea0] ss:$16 sps:$4 sm:$0xff]   ;;  %v18163_v32 = vld [vmem:[%s18862_s8 + $0x2ea8] ss:$16 sps:$4 sm:$0xff]  }
 0x5ec   : > { %12333 = vmatprep.subr.bf16.mxu0 %v18077_v41  ;;  %13481 = vmatprep.subr.bf16.mxu1 %v18080_v43  ;;  %v18168_v41 = vld [vmem:[%s18862_s8 + $0x2ec4] ss:$16 sps:$4 sm:$0xff]   ;;  %v18171_v43 = vld [vmem:[%s18862_s8 + $0x2ecc] ss:$16 sps:$4 sm:$0xff]  }
 0x5ef   : > { %12334 = vmatpush1.bf16.msra.mxu0 %v18075_v13  ;;  %13482 = vmatpush1.bf16.msra.mxu1 %v18078_v46  ;;  %v18166_v13 = vld [vmem:[%s18862_s8 + $0x2ec0] ss:$16 sps:$4 sm:$0xff]   ;;  %v18169_v46 = vld [vmem:[%s18862_s8 + $0x2ec8] ss:$16 sps:$4 sm:$0xff]  }
 0x5f0   : > { %12335 = vmatprep.subr.bf16.mxu0 %v18083_v47  ;;  %13483 = vmatprep.subr.bf16.mxu1 %v18086_v19  ;;  %v18174_v47 = vld [vmem:[%s18862_s8 + $0x2ee4] ss:$16 sps:$4 sm:$0xff]   ;;  %v18177_v19 = vld [vmem:[%s18862_s8 + $0x2eec] ss:$16 sps:$4 sm:$0xff]  }
 0x5f3   : > { %12336 = vmatpush1.bf16.msra.mxu0 %v18081_v51  ;;  %13484 = vmatpush1.bf16.msra.mxu1 %v18084_v53  ;;  %v18172_v51 = vld [vmem:[%s18862_s8 + $0x2ee0] ss:$16 sps:$4 sm:$0xff]   ;;  %v18175_v53 = vld [vmem:[%s18862_s8 + $0x2ee8] ss:$16 sps:$4 sm:$0xff]  }
 0x5f4   : > { %12337 = vmatprep.subr.bf16.mxu0 %v18089_v25  ;;  %13485 = vmatprep.subr.bf16.mxu1 %v18092_v54  ;;  %v18180_v25 = vld [vmem:[%s18862_s8 + $0x2f04] ss:$16 sps:$4 sm:$0xff]   ;;  %v18183_v54 = vld [vmem:[%s18862_s8 + $0x2f0c] ss:$16 sps:$4 sm:$0xff]  }
 0x5f7   : > { %12338 = vmatpush1.bf16.msra.mxu0 %v18087_v55  ;;  %13486 = vmatpush1.bf16.msra.mxu1 %v18090_v44  ;;  %v18178_v55 = vld [vmem:[%s18862_s8 + $0x2f00] ss:$16 sps:$4 sm:$0xff]   ;;  %v18181_v44 = vld [vmem:[%s18862_s8 + $0x2f08] ss:$16 sps:$4 sm:$0xff]  }
 0x5f8   : > { %12339 = vmatprep.subr.bf16.mxu0 %v18095_v56  ;;  %13487 = vmatprep.subr.bf16.mxu1 %v18098_v57  ;;  %v18186_v56 = vld [vmem:[%s18862_s8 + $0x2f24] ss:$16 sps:$4 sm:$0xff]   ;;  %v18189_v57 = vld [vmem:[%s18862_s8 + $0x2f2c] ss:$16 sps:$4 sm:$0xff]  }
 0x5fb   : > { %12340 = vmatpush1.bf16.msra.mxu0 %v18093_v48  ;;  %13488 = vmatpush1.bf16.msra.mxu1 %v18096_v61  ;;  %v18184_v48 = vld [vmem:[%s18862_s8 + $0x2f20] ss:$16 sps:$4 sm:$0xff]   ;;  %v18187_v61 = vld [vmem:[%s18862_s8 + $0x2f28] ss:$16 sps:$4 sm:$0xff]  }
 0x5fc   : > { %12341 = vmatprep.subr.bf16.mxu0 %v18101_v62  ;;  %13489 = vmatprep.subr.bf16.mxu1 %v18104_v0  ;;  %v18192_v62 = vld [vmem:[%s18862_s8 + $0x2f44] ss:$16 sps:$4 sm:$0xff]   ;;  %v18195_v0 = vld [vmem:[%s18862_s8 + $0x2f4c] ss:$16 sps:$4 sm:$0xff]  }
 0x5ff   : > { %12342 = vmatpush1.bf16.msra.mxu0 %v18099_v50  ;;  %13490 = vmatpush1.bf16.msra.mxu1 %v18102_v1  ;;  %v18190_v50 = vld [vmem:[%s18862_s8 + $0x2f40] ss:$16 sps:$4 sm:$0xff]   ;;  %v18193_v1 = vld [vmem:[%s18862_s8 + $0x2f48] ss:$16 sps:$4 sm:$0xff]  }
 0x600   : > { %12343 = vmatprep.subr.bf16.mxu0 %v18107_v35  ;;  %13491 = vmatprep.subr.bf16.mxu1 %v18110_v2  ;;  %v18198_v35 = vld [vmem:[%s18862_s8 + $0x2f64] ss:$16 sps:$4 sm:$0xff]   ;;  %v18201_v2 = vld [vmem:[%s18862_s8 + $0x2f6c] ss:$16 sps:$4 sm:$0xff]  }
 0x603   : > { %12344 = vmatpush1.bf16.msra.mxu0 %v18105_v58  ;;  %13492 = vmatpush1.bf16.msra.mxu1 %v18108_v3  ;;  %v18196_v58 = vld [vmem:[%s18862_s8 + $0x2f60] ss:$16 sps:$4 sm:$0xff]   ;;  %v18199_v3 = vld [vmem:[%s18862_s8 + $0x2f68] ss:$16 sps:$4 sm:$0xff]  }
 0x604   : > { %12345 = vmatprep.subr.bf16.mxu0 %v18113_v4  ;;  %13493 = vmatprep.subr.bf16.mxu1 %v18116_v45  ;;  %v18204_v4 = vld [vmem:[%s18862_s8 + $0x2f84] ss:$16 sps:$4 sm:$0xff]   ;;  %v18207_v45 = vld [vmem:[%s18862_s8 + $0x2f8c] ss:$16 sps:$4 sm:$0xff]  }
 0x607   : > { %12346 = vmatpush1.bf16.msra.mxu0 %v18111_v7  ;;  %13494 = vmatpush1.bf16.msra.mxu1 %v18114_v9  ;;  %v18202_v7 = vld [vmem:[%s18862_s8 + $0x2f80] ss:$16 sps:$4 sm:$0xff]   ;;  %v18205_v9 = vld [vmem:[%s18862_s8 + $0x2f88] ss:$16 sps:$4 sm:$0xff]  }
 0x608   : > { %12347 = vmatprep.subr.bf16.mxu0 %v18119_v38  ;;  %13495 = vmatprep.subr.bf16.mxu1 %v18122_v11  ;;  %v18210_v38 = vld [vmem:[%s18862_s8 + $0x2fa4] ss:$16 sps:$4 sm:$0xff]   ;;  %v18213_v11 = vld [vmem:[%s18862_s8 + $0x2fac] ss:$16 sps:$4 sm:$0xff]  }
 0x60b   : > { %12348 = vmatpush1.bf16.msra.mxu0 %v18117_v12  ;;  %13496 = vmatpush1.bf16.msra.mxu1 %v18120_v59  ;;  %v18208_v12 = vld [vmem:[%s18862_s8 + $0x2fa0] ss:$16 sps:$4 sm:$0xff]   ;;  %v18211_v59 = vld [vmem:[%s18862_s8 + $0x2fa8] ss:$16 sps:$4 sm:$0xff]  }
 0x60c   : > { %12349 = vmatprep.subr.bf16.mxu0 %v18125_v14  ;;  %13497 = vmatprep.subr.bf16.mxu1 %v18128_v63  ;;  %v18216_v14 = vld [vmem:[%s18862_s8 + $0x2fc4] ss:$16 sps:$4 sm:$0xff]   ;;  %v18219_v63 = vld [vmem:[%s18862_s8 + $0x2fcc] ss:$16 sps:$4 sm:$0xff]  }
 0x60f   : > { %12350 = vmatpush1.bf16.msra.mxu0 %v18123_v16  ;;  %13498 = vmatpush1.bf16.msra.mxu1 %v18126_v5  ;;  %v20678_v16 = vld [vmem:[%s21012_s0 + $0x30] sm:$0xff] }
 0x610   : > { %12360 = vmatprep.subr.bf16.mxu0 %v18132_v52  ;;  %13508 = vmatprep.subr.bf16.mxu1 %v18135_v17  ;;  %v18214_v5 = vld [vmem:[%s18862_s8 + $0x2fc0] ss:$16 sps:$4 sm:$0xff]   ;;  %v18217_v52 = vld [vmem:[%s18862_s8 + $0x2fc8] ss:$16 sps:$4 sm:$0xff]   ;;  %v18222_v17 = vld [vmem:[%s18862_s8 + $0x2fe4] ss:$16 sps:$4 sm:$0xff]  }
 0x612   : > { %12352 = vmatmul.mubr.bf16.vlgmr.msra.gmra.mrb[0].mxu0 %v20613_v6  ;;  %13500 = vmatmul.mubr.bf16.vlgmr.msra.gmra.mrb[0].mxu1 %v20613_v6 }
 0x613   : > { %12361 = vmatpush1.bf16.msra.mxu0 %v18130_v18  ;;  %13509 = vmatpush1.bf16.msra.mxu1 %v18133_v20  ;;  %v18225_v18 = vld [vmem:[%s18862_s8 + $0x2fec] ss:$16 sps:$4 sm:$0xff]   ;;  %v20686_v20 = vrot.slane %v20678_v16, %v18921_v49 }
 0x614   : > { %12362 = vmatprep.subr.bf16.mxu0 %v18138_v22  ;;  %13510 = vmatprep.subr.bf16.mxu1 %v18141_v24  ;;  %v18220_v22 = vld [vmem:[%s18862_s8 + $0x2fe0] ss:$16 sps:$4 sm:$0xff]   ;;  %v18223_v24 = vld [vmem:[%s18862_s8 + $0x2fe8] ss:$16 sps:$4 sm:$0xff]  }
 0x615   : > { %12392 = vmatprep.mubr.bf16.mxu0 %v2351_v26  ;;  %13540 = vmatprep.mubr.bf16.mxu1 %v2351_v26  ;;  %v18228_v26 = vld [vmem:[%s18862_s8 + $0x3004] ss:$16 sps:$4 sm:$0xff]  }
 0x617   : > { %12363 = vmatpush1.bf16.msra.mxu0 %v18136_v10  ;;  %13511 = vmatpush1.bf16.msra.mxu1 %v18139_v60  ;;  %v18231_v10 = vld [vmem:[%s18862_s8 + $0x300c] ss:$16 sps:$4 sm:$0xff]   ;;  %v2367_v60 = vcombine.high %v20686_v20, %v20686_v20 }
 0x618   : > { %12364 = vmatprep.subr.bf16.mxu0 %v18144_v27  ;;  %13512 = vmatprep.subr.bf16.mxu1 %v18147_v28  ;;  %v2349_v27 = vcombine.high %v20613_v6, %v20613_v6  ;;  %v18226_v28 = vld [vmem:[%s18862_s8 + $0x3000] ss:$16 sps:$4 sm:$0xff]  }
 0x619   : > { %v18232_v6 = vld [vmem:[%s18862_s8 + $0x3020] ss:$16 sps:$4 sm:$0xff]  }
 0x61b   : > { %12365 = vmatpush1.bf16.msra.mxu0 %v18142_v8  ;;  %13513 = vmatpush1.bf16.msra.mxu1 %v18145_v29  ;;  %v18229_v8 = vld [vmem:[%s18862_s8 + $0x3008] ss:$16 sps:$4 sm:$0xff]   ;;  %v18234_v29 = vld [vmem:[%s18862_s8 + $0x3024] ss:$16 sps:$4 sm:$0xff]  }
 0x61c   : > { %12366 = vmatprep.subr.bf16.mxu0 %v18150_v30  ;;  %13514 = vmatprep.subr.bf16.mxu1 %v18153_v15  ;;  %v18237_v30 = vld [vmem:[%s18862_s8 + $0x302c] ss:$16 sps:$4 sm:$0xff]   ;;  %v20701_v15 = vrot.slane %v2367_v60, %v18921_v49  ;;  %v18313_v60 = vld [vmem:[%s18862_s8 + $0x31c8] ss:$16 sps:$4 sm:$0xff]  }
 0x61f   : > { %12367 = vmatpush1.bf16.msra.mxu0 %v18148_v31  ;;  %13515 = vmatpush1.bf16.msra.mxu1 %v18151_v33  ;;  %v18235_v31 = vld [vmem:[%s18862_s8 + $0x3028] ss:$16 sps:$4 sm:$0xff]   ;;  %v18240_v33 = vld [vmem:[%s18862_s8 + $0x3044] ss:$16 sps:$4 sm:$0xff]  }
 0x620   : > { %12368 = vmatprep.subr.bf16.mxu0 %v18156_v34  ;;  %13516 = vmatprep.subr.bf16.mxu1 %v18159_v36  ;;  %v18243_v34 = vld [vmem:[%s18862_s8 + $0x304c] ss:$16 sps:$4 sm:$0xff]   ;;  %v18238_v36 = vld [vmem:[%s18862_s8 + $0x3040] ss:$16 sps:$4 sm:$0xff]  }
 0x623   : > { %12369 = vmatpush1.bf16.msra.mxu0 %v18154_v37  ;;  %13517 = vmatpush1.bf16.msra.mxu1 %v18157_v23  ;;  %v18241_v37 = vld [vmem:[%s18862_s8 + $0x3048] ss:$16 sps:$4 sm:$0xff]   ;;  %v18246_v23 = vld [vmem:[%s18862_s8 + $0x3064] ss:$16 sps:$4 sm:$0xff]  }
 0x624   : > { %12370 = vmatprep.subr.bf16.mxu0 %v18162_v39  ;;  %13518 = vmatprep.subr.bf16.mxu1 %v18165_v40  ;;  %v18249_v39 = vld [vmem:[%s18862_s8 + $0x306c] ss:$16 sps:$4 sm:$0xff]   ;;  %v18244_v40 = vld [vmem:[%s18862_s8 + $0x3060] ss:$16 sps:$4 sm:$0xff]  }
 0x627   : > { %12371 = vmatpush1.bf16.msra.mxu0 %v18160_v21  ;;  %13519 = vmatpush1.bf16.msra.mxu1 %v18163_v32  ;;  %v18247_v21 = vld [vmem:[%s18862_s8 + $0x3068] ss:$16 sps:$4 sm:$0xff]   ;;  %v18252_v32 = vld [vmem:[%s18862_s8 + $0x3084] ss:$16 sps:$4 sm:$0xff]  }
 0x628   : > { %12372 = vmatprep.subr.bf16.mxu0 %v18168_v41  ;;  %13520 = vmatprep.subr.bf16.mxu1 %v18171_v43  ;;  %v18255_v41 = vld [vmem:[%s18862_s8 + $0x308c] ss:$16 sps:$4 sm:$0xff]   ;;  %v18250_v43 = vld [vmem:[%s18862_s8 + $0x3080] ss:$16 sps:$4 sm:$0xff]  }
 0x62b   : > { %12373 = vmatpush1.bf16.msra.mxu0 %v18166_v13  ;;  %13521 = vmatpush1.bf16.msra.mxu1 %v18169_v46  ;;  %v18253_v13 = vld [vmem:[%s18862_s8 + $0x3088] ss:$16 sps:$4 sm:$0xff]   ;;  %v18258_v46 = vld [vmem:[%s18862_s8 + $0x30a4] ss:$16 sps:$4 sm:$0xff]  }
 0x62c   : > { %12374 = vmatprep.subr.bf16.mxu0 %v18174_v47  ;;  %13522 = vmatprep.subr.bf16.mxu1 %v18177_v19  ;;  %v18261_v47 = vld [vmem:[%s18862_s8 + $0x30ac] ss:$16 sps:$4 sm:$0xff]   ;;  %v18256_v19 = vld [vmem:[%s18862_s8 + $0x30a0] ss:$16 sps:$4 sm:$0xff]  }
 0x62f   : > { %12375 = vmatpush1.bf16.msra.mxu0 %v18172_v51  ;;  %13523 = vmatpush1.bf16.msra.mxu1 %v18175_v53  ;;  %v18259_v51 = vld [vmem:[%s18862_s8 + $0x30a8] ss:$16 sps:$4 sm:$0xff]   ;;  %v18264_v53 = vld [vmem:[%s18862_s8 + $0x30c4] ss:$16 sps:$4 sm:$0xff]  }
 0x630   : > { %12376 = vmatprep.subr.bf16.mxu0 %v18180_v25  ;;  %13524 = vmatprep.subr.bf16.mxu1 %v18183_v54  ;;  %v18267_v25 = vld [vmem:[%s18862_s8 + $0x30cc] ss:$16 sps:$4 sm:$0xff]   ;;  %v18262_v54 = vld [vmem:[%s18862_s8 + $0x30c0] ss:$16 sps:$4 sm:$0xff]  }
 0x633   : > { %12377 = vmatpush1.bf16.msra.mxu0 %v18178_v55  ;;  %13525 = vmatpush1.bf16.msra.mxu1 %v18181_v44  ;;  %v18265_v55 = vld [vmem:[%s18862_s8 + $0x30c8] ss:$16 sps:$4 sm:$0xff]   ;;  %v18270_v44 = vld [vmem:[%s18862_s8 + $0x30e4] ss:$16 sps:$4 sm:$0xff]  }
 0x634   : > { %12378 = vmatprep.subr.bf16.mxu0 %v18186_v56  ;;  %13526 = vmatprep.subr.bf16.mxu1 %v18189_v57  ;;  %v18273_v56 = vld [vmem:[%s18862_s8 + $0x30ec] ss:$16 sps:$4 sm:$0xff]   ;;  %v18268_v57 = vld [vmem:[%s18862_s8 + $0x30e0] ss:$16 sps:$4 sm:$0xff]  }
 0x637   : > { %12379 = vmatpush1.bf16.msra.mxu0 %v18184_v48  ;;  %13527 = vmatpush1.bf16.msra.mxu1 %v18187_v61  ;;  %v18271_v48 = vld [vmem:[%s18862_s8 + $0x30e8] ss:$16 sps:$4 sm:$0xff]   ;;  %v18276_v61 = vld [vmem:[%s18862_s8 + $0x3104] ss:$16 sps:$4 sm:$0xff]  }
 0x638   : > { %12380 = vmatprep.subr.bf16.mxu0 %v18192_v62  ;;  %13528 = vmatprep.subr.bf16.mxu1 %v18195_v0  ;;  %v18279_v62 = vld [vmem:[%s18862_s8 + $0x310c] ss:$16 sps:$4 sm:$0xff]   ;;  %v18274_v0 = vld [vmem:[%s18862_s8 + $0x3100] ss:$16 sps:$4 sm:$0xff]  }
 0x63b   : > { %12381 = vmatpush1.bf16.msra.mxu0 %v18190_v50  ;;  %13529 = vmatpush1.bf16.msra.mxu1 %v18193_v1  ;;  %v18277_v50 = vld [vmem:[%s18862_s8 + $0x3108] ss:$16 sps:$4 sm:$0xff]   ;;  %v18282_v1 = vld [vmem:[%s18862_s8 + $0x3124] ss:$16 sps:$4 sm:$0xff]  }
 0x63c   : > { %12382 = vmatprep.subr.bf16.mxu0 %v18198_v35  ;;  %13530 = vmatprep.subr.bf16.mxu1 %v18201_v2  ;;  %v18285_v35 = vld [vmem:[%s18862_s8 + $0x312c] ss:$16 sps:$4 sm:$0xff]   ;;  %v18280_v2 = vld [vmem:[%s18862_s8 + $0x3120] ss:$16 sps:$4 sm:$0xff]  }
 0x63f   : > { %12383 = vmatpush1.bf16.msra.mxu0 %v18196_v58  ;;  %13531 = vmatpush1.bf16.msra.mxu1 %v18199_v3  ;;  %v18283_v58 = vld [vmem:[%s18862_s8 + $0x3128] ss:$16 sps:$4 sm:$0xff]   ;;  %v18288_v3 = vld [vmem:[%s18862_s8 + $0x3144] ss:$16 sps:$4 sm:$0xff]  }
 0x640   : > { %12384 = vmatprep.subr.bf16.mxu0 %v18204_v4  ;;  %13532 = vmatprep.subr.bf16.mxu1 %v18207_v45  ;;  %v18291_v4 = vld [vmem:[%s18862_s8 + $0x314c] ss:$16 sps:$4 sm:$0xff]   ;;  %v18286_v45 = vld [vmem:[%s18862_s8 + $0x3140] ss:$16 sps:$4 sm:$0xff]  }
 0x643   : > { %12385 = vmatpush1.bf16.msra.mxu0 %v18202_v7  ;;  %13533 = vmatpush1.bf16.msra.mxu1 %v18205_v9  ;;  %v18289_v7 = vld [vmem:[%s18862_s8 + $0x3148] ss:$16 sps:$4 sm:$0xff]   ;;  %v18294_v9 = vld [vmem:[%s18862_s8 + $0x3164] ss:$16 sps:$4 sm:$0xff]  }
 0x644   : > { %12386 = vmatprep.subr.bf16.mxu0 %v18210_v38  ;;  %13534 = vmatprep.subr.bf16.mxu1 %v18213_v11  ;;  %v18297_v38 = vld [vmem:[%s18862_s8 + $0x316c] ss:$16 sps:$4 sm:$0xff]   ;;  %v18292_v11 = vld [vmem:[%s18862_s8 + $0x3160] ss:$16 sps:$4 sm:$0xff]  }
 0x647   : > { %12387 = vmatpush1.bf16.msra.mxu0 %v18208_v12  ;;  %13535 = vmatpush1.bf16.msra.mxu1 %v18211_v59  ;;  %v18295_v12 = vld [vmem:[%s18862_s8 + $0x3168] ss:$16 sps:$4 sm:$0xff]   ;;  %v18300_v59 = vld [vmem:[%s18862_s8 + $0x3184] ss:$16 sps:$4 sm:$0xff]  }
 0x648   : > { %12388 = vmatprep.subr.bf16.mxu0 %v18216_v14  ;;  %13536 = vmatprep.subr.bf16.mxu1 %v18219_v63  ;;  %v18303_v14 = vld [vmem:[%s18862_s8 + $0x318c] ss:$16 sps:$4 sm:$0xff]   ;;  %v18298_v63 = vld [vmem:[%s18862_s8 + $0x3180] ss:$16 sps:$4 sm:$0xff]  }
 0x64b   : > { %12389 = vmatpush1.bf16.msra.mxu0 %v18214_v5  ;;  %13537 = vmatpush1.bf16.msra.mxu1 %v18217_v52  ;;  %v18301_v5 = vld [vmem:[%s18862_s8 + $0x3188] ss:$16 sps:$4 sm:$0xff]   ;;  %v18306_v52 = vld [vmem:[%s18862_s8 + $0x31a4] ss:$16 sps:$4 sm:$0xff]  }
 0x64c   : > { %12390 = vmatprep.subr.bf16.mxu0 %v18222_v17  ;;  %13538 = vmatprep.subr.bf16.mxu1 %v18225_v18  ;;  %v18309_v17 = vld [vmem:[%s18862_s8 + $0x31ac] ss:$16 sps:$4 sm:$0xff]   ;;  %v18304_v18 = vld [vmem:[%s18862_s8 + $0x31a0] ss:$16 sps:$4 sm:$0xff]  }
 0x64f   : > { %12391 = vmatpush1.bf16.msra.mxu0 %v18220_v22  ;;  %13539 = vmatpush1.bf16.msra.mxu1 %v18223_v24  ;;  %v18307_v22 = vld [vmem:[%s18862_s8 + $0x31a8] ss:$16 sps:$4 sm:$0xff]   ;;  %v18312_v24 = vld [vmem:[%s18862_s8 + $0x31c4] ss:$16 sps:$4 sm:$0xff]  }
 0x650   : > { %12401 = vmatprep.subr.bf16.mxu0 %v18228_v26  ;;  %13549 = vmatprep.subr.bf16.mxu1 %v18231_v10  ;;  %v18315_v26 = vld [vmem:[%s18862_s8 + $0x31cc] ss:$16 sps:$4 sm:$0xff]   ;;  %v18310_v10 = vld [vmem:[%s18862_s8 + $0x31c0] ss:$16 sps:$4 sm:$0xff]  }
 0x652   : > { %12393 = vmatmul.mubr.bf16.vlgmr.msra.gmra.mrb[0].mxu0 %v2349_v27  ;;  %13541 = vmatmul.mubr.bf16.vlgmr.msra.gmra.mrb[0].mxu1 %v2349_v27  ;;  %v18318_v27 = vld [vmem:[%s18862_s8 + $0x31e4] ss:$16 sps:$4 sm:$0xff]  }
 0x653   : > { %12402 = vmatpush1.bf16.msra.mxu0 %v18226_v28  ;;  %13550 = vmatpush1.bf16.msra.mxu1 %v18229_v8  ;;  %v18321_v28 = vld [vmem:[%s18862_s8 + $0x31ec] ss:$16 sps:$4 sm:$0xff]   ;;  %v18316_v8 = vld [vmem:[%s18862_s8 + $0x31e0] ss:$16 sps:$4 sm:$0xff]  }
 0x654   : > { %12403 = vmatprep.subr.bf16.mxu0 %v18234_v29  ;;  %13551 = vmatprep.subr.bf16.mxu1 %v18237_v30  ;;  %v18319_v29 = vld [vmem:[%s18862_s8 + $0x31e8] ss:$16 sps:$4 sm:$0xff]   ;;  %v18324_v30 = vld [vmem:[%s18862_s8 + $0x3204] ss:$16 sps:$4 sm:$0xff]  }
 0x655   : > { %12433 = vmatprep.mubr.bf16.mxu0 %v20701_v15  ;;  %13581 = vmatprep.mubr.bf16.mxu1 %v20701_v15 }
 0x657   : > { %12404 = vmatpush1.bf16.msra.mxu0 %v18232_v6  ;;  %13552 = vmatpush1.bf16.msra.mxu1 %v18235_v31  ;;  %v18327_v6 = vld [vmem:[%s18862_s8 + $0x320c] ss:$16 sps:$4 sm:$0xff]   ;;  %v20767_v31 = vrot.slane %v20686_v20, %v18921_v49  ;;  %v18328_v20 = vld [vmem:[%s18862_s8 + $0x3220] ss:$16 sps:$4 sm:$0xff]  }
 0x658   : > { %12405 = vmatprep.subr.bf16.mxu0 %v18240_v33  ;;  %13553 = vmatprep.subr.bf16.mxu1 %v18243_v34  ;;  %v18322_v33 = vld [vmem:[%s18862_s8 + $0x3200] ss:$16 sps:$4 sm:$0xff]   ;;  %v18325_v34 = vld [vmem:[%s18862_s8 + $0x3208] ss:$16 sps:$4 sm:$0xff]  }
 0x65b   : > { %12406 = vmatpush1.bf16.msra.mxu0 %v18238_v36  ;;  %13554 = vmatpush1.bf16.msra.mxu1 %v18241_v37  ;;  %v18330_v36 = vld [vmem:[%s18862_s8 + $0x3224] ss:$16 sps:$4 sm:$0xff]   ;;  %v18333_v37 = vld [vmem:[%s18862_s8 + $0x322c] ss:$16 sps:$4 sm:$0xff]  }
 0x65c   : > { %12407 = vmatprep.subr.bf16.mxu0 %v18246_v23  ;;  %13555 = vmatprep.subr.bf16.mxu1 %v18249_v39  ;;  %v2399_v23 = vcombine.high %v20701_v15, %v20701_v15  ;;  %v18331_v39 = vld [vmem:[%s18862_s8 + $0x3228] ss:$16 sps:$4 sm:$0xff]   ;;  %v18334_v15 = vld [vmem:[%s18862_s8 + $0x3240] ss:$16 sps:$4 sm:$0xff]  }
 0x65f   : > { %12408 = vmatpush1.bf16.msra.mxu0 %v18244_v40  ;;  %13556 = vmatpush1.bf16.msra.mxu1 %v18247_v21  ;;  %v18336_v40 = vld [vmem:[%s18862_s8 + $0x3244] ss:$16 sps:$4 sm:$0xff]   ;;  %v18339_v21 = vld [vmem:[%s18862_s8 + $0x324c] ss:$16 sps:$4 sm:$0xff]  }
 0x660   : > { %12409 = vmatprep.subr.bf16.mxu0 %v18252_v32  ;;  %13557 = vmatprep.subr.bf16.mxu1 %v18255_v41  ;;  %v18337_v32 = vld [vmem:[%s18862_s8 + $0x3248] ss:$16 sps:$4 sm:$0xff]   ;;  %v18342_v41 = vld [vmem:[%s18862_s8 + $0x3264] ss:$16 sps:$4 sm:$0xff]  }
 0x663   : > { %12410 = vmatpush1.bf16.msra.mxu0 %v18250_v43  ;;  %13558 = vmatpush1.bf16.msra.mxu1 %v18253_v13  ;;  %v18345_v43 = vld [vmem:[%s18862_s8 + $0x326c] ss:$16 sps:$4 sm:$0xff]   ;;  %v18340_v13 = vld [vmem:[%s18862_s8 + $0x3260] ss:$16 sps:$4 sm:$0xff]  }
 0x664   : > { %12411 = vmatprep.subr.bf16.mxu0 %v18258_v46  ;;  %13559 = vmatprep.subr.bf16.mxu1 %v18261_v47  ;;  %v18343_v46 = vld [vmem:[%s18862_s8 + $0x3268] ss:$16 sps:$4 sm:$0xff]   ;;  %v18348_v47 = vld [vmem:[%s18862_s8 + $0x3284] ss:$16 sps:$4 sm:$0xff]  }
 0x667   : > { %12412 = vmatpush1.bf16.msra.mxu0 %v18256_v19  ;;  %13560 = vmatpush1.bf16.msra.mxu1 %v18259_v51  ;;  %v18351_v19 = vld [vmem:[%s18862_s8 + $0x328c] ss:$16 sps:$4 sm:$0xff]   ;;  %v18346_v51 = vld [vmem:[%s18862_s8 + $0x3280] ss:$16 sps:$4 sm:$0xff]  }
 0x668   : > { %12413 = vmatprep.subr.bf16.mxu0 %v18264_v53  ;;  %13561 = vmatprep.subr.bf16.mxu1 %v18267_v25  ;;  %v18349_v53 = vld [vmem:[%s18862_s8 + $0x3288] ss:$16 sps:$4 sm:$0xff]   ;;  %v18354_v25 = vld [vmem:[%s18862_s8 + $0x32a4] ss:$16 sps:$4 sm:$0xff]  }
 0x66b   : > { %12414 = vmatpush1.bf16.msra.mxu0 %v18262_v54  ;;  %13562 = vmatpush1.bf16.msra.mxu1 %v18265_v55  ;;  %v18357_v54 = vld [vmem:[%s18862_s8 + $0x32ac] ss:$16 sps:$4 sm:$0xff]   ;;  %v18352_v55 = vld [vmem:[%s18862_s8 + $0x32a0] ss:$16 sps:$4 sm:$0xff]  }
 0x66c   : > { %12415 = vmatprep.subr.bf16.mxu0 %v18270_v44  ;;  %13563 = vmatprep.subr.bf16.mxu1 %v18273_v56  ;;  %v18355_v44 = vld [vmem:[%s18862_s8 + $0x32a8] ss:$16 sps:$4 sm:$0xff]   ;;  %v18360_v56 = vld [vmem:[%s18862_s8 + $0x32c4] ss:$16 sps:$4 sm:$0xff]  }
 0x66f   : > { %12416 = vmatpush1.bf16.msra.mxu0 %v18268_v57  ;;  %13564 = vmatpush1.bf16.msra.mxu1 %v18271_v48  ;;  %v18363_v57 = vld [vmem:[%s18862_s8 + $0x32cc] ss:$16 sps:$4 sm:$0xff]   ;;  %v18358_v48 = vld [vmem:[%s18862_s8 + $0x32c0] ss:$16 sps:$4 sm:$0xff]  }
 0x670   : > { %12417 = vmatprep.subr.bf16.mxu0 %v18276_v61  ;;  %13565 = vmatprep.subr.bf16.mxu1 %v18279_v62  ;;  %v18361_v61 = vld [vmem:[%s18862_s8 + $0x32c8] ss:$16 sps:$4 sm:$0xff]   ;;  %v18366_v62 = vld [vmem:[%s18862_s8 + $0x32e4] ss:$16 sps:$4 sm:$0xff]  }
 0x673   : > { %12418 = vmatpush1.bf16.msra.mxu0 %v18274_v0  ;;  %13566 = vmatpush1.bf16.msra.mxu1 %v18277_v50  ;;  %v18369_v0 = vld [vmem:[%s18862_s8 + $0x32ec] ss:$16 sps:$4 sm:$0xff]   ;;  %v18364_v50 = vld [vmem:[%s18862_s8 + $0x32e0] ss:$16 sps:$4 sm:$0xff]  }
 0x674   : > { %12419 = vmatprep.subr.bf16.mxu0 %v18282_v1  ;;  %13567 = vmatprep.subr.bf16.mxu1 %v18285_v35  ;;  %v18367_v1 = vld [vmem:[%s18862_s8 + $0x32e8] ss:$16 sps:$4 sm:$0xff]   ;;  %v18372_v35 = vld [vmem:[%s18862_s8 + $0x3304] ss:$16 sps:$4 sm:$0xff]  }
 0x677   : > { %12420 = vmatpush1.bf16.msra.mxu0 %v18280_v2  ;;  %13568 = vmatpush1.bf16.msra.mxu1 %v18283_v58  ;;  %v18375_v2 = vld [vmem:[%s18862_s8 + $0x330c] ss:$16 sps:$4 sm:$0xff]   ;;  %v18370_v58 = vld [vmem:[%s18862_s8 + $0x3300] ss:$16 sps:$4 sm:$0xff]  }
 0x678   : > { %12421 = vmatprep.subr.bf16.mxu0 %v18288_v3  ;;  %13569 = vmatprep.subr.bf16.mxu1 %v18291_v4  ;;  %v18373_v3 = vld [vmem:[%s18862_s8 + $0x3308] ss:$16 sps:$4 sm:$0xff]   ;;  %v18378_v4 = vld [vmem:[%s18862_s8 + $0x3324] ss:$16 sps:$4 sm:$0xff]  }
 0x67b   : > { %12422 = vmatpush1.bf16.msra.mxu0 %v18286_v45  ;;  %13570 = vmatpush1.bf16.msra.mxu1 %v18289_v7  ;;  %v18381_v45 = vld [vmem:[%s18862_s8 + $0x332c] ss:$16 sps:$4 sm:$0xff]   ;;  %v18376_v7 = vld [vmem:[%s18862_s8 + $0x3320] ss:$16 sps:$4 sm:$0xff]  }
 0x67c   : > { %12423 = vmatprep.subr.bf16.mxu0 %v18294_v9  ;;  %13571 = vmatprep.subr.bf16.mxu1 %v18297_v38  ;;  %v18379_v9 = vld [vmem:[%s18862_s8 + $0x3328] ss:$16 sps:$4 sm:$0xff]   ;;  %v18384_v38 = vld [vmem:[%s18862_s8 + $0x3344] ss:$16 sps:$4 sm:$0xff]  }
 0x67f   : > { %12424 = vmatpush1.bf16.msra.mxu0 %v18292_v11  ;;  %13572 = vmatpush1.bf16.msra.mxu1 %v18295_v12  ;;  %v18387_v11 = vld [vmem:[%s18862_s8 + $0x334c] ss:$16 sps:$4 sm:$0xff]   ;;  %v18382_v12 = vld [vmem:[%s18862_s8 + $0x3340] ss:$16 sps:$4 sm:$0xff]  }
 0x680   : > { %12425 = vmatprep.subr.bf16.mxu0 %v18300_v59  ;;  %13573 = vmatprep.subr.bf16.mxu1 %v18303_v14  ;;  %v18385_v59 = vld [vmem:[%s18862_s8 + $0x3348] ss:$16 sps:$4 sm:$0xff]   ;;  %v18390_v14 = vld [vmem:[%s18862_s8 + $0x3364] ss:$16 sps:$4 sm:$0xff]  }
 0x683   : > { %12426 = vmatpush1.bf16.msra.mxu0 %v18298_v63  ;;  %13574 = vmatpush1.bf16.msra.mxu1 %v18301_v5  ;;  %v18393_v63 = vld [vmem:[%s18862_s8 + $0x336c] ss:$16 sps:$4 sm:$0xff]   ;;  %v18388_v5 = vld [vmem:[%s18862_s8 + $0x3360] ss:$16 sps:$4 sm:$0xff]  }
 0x684   : > { %12427 = vmatprep.subr.bf16.mxu0 %v18306_v52  ;;  %13575 = vmatprep.subr.bf16.mxu1 %v18309_v17  ;;  %v18391_v52 = vld [vmem:[%s18862_s8 + $0x3368] ss:$16 sps:$4 sm:$0xff]   ;;  %v18396_v17 = vld [vmem:[%s18862_s8 + $0x3384] ss:$16 sps:$4 sm:$0xff]  }
 0x687   : > { %12428 = vmatpush1.bf16.msra.mxu0 %v18304_v18  ;;  %13576 = vmatpush1.bf16.msra.mxu1 %v18307_v22  ;;  %v18399_v18 = vld [vmem:[%s18862_s8 + $0x338c] ss:$16 sps:$4 sm:$0xff]   ;;  %v18394_v22 = vld [vmem:[%s18862_s8 + $0x3380] ss:$16 sps:$4 sm:$0xff]  }
 0x688   : > { %12429 = vmatprep.subr.bf16.mxu0 %v18312_v24  ;;  %13577 = vmatprep.subr.bf16.mxu1 %v18315_v26  ;;  %v18397_v24 = vld [vmem:[%s18862_s8 + $0x3388] ss:$16 sps:$4 sm:$0xff]   ;;  %v18402_v26 = vld [vmem:[%s18862_s8 + $0x33a4] ss:$16 sps:$4 sm:$0xff]  }
 0x68b   : > { %12430 = vmatpush1.bf16.msra.mxu0 %v18310_v10  ;;  %13578 = vmatpush1.bf16.msra.mxu1 %v18313_v60  ;;  %v18405_v10 = vld [vmem:[%s18862_s8 + $0x33ac] ss:$16 sps:$4 sm:$0xff]   ;;  %v18400_v60 = vld [vmem:[%s18862_s8 + $0x33a0] ss:$16 sps:$4 sm:$0xff]  }
 0x68c   : > { %12431 = vmatprep.subr.bf16.mxu0 %v18318_v27  ;;  %13579 = vmatprep.subr.bf16.mxu1 %v18321_v28  ;;  %v18403_v27 = vld [vmem:[%s18862_s8 + $0x33a8] ss:$16 sps:$4 sm:$0xff]   ;;  %v18408_v28 = vld [vmem:[%s18862_s8 + $0x33c4] ss:$16 sps:$4 sm:$0xff]  }
 0x68f   : > { %12432 = vmatpush1.bf16.msra.mxu0 %v18316_v8  ;;  %13580 = vmatpush1.bf16.msra.mxu1 %v18319_v29  ;;  %v18411_v8 = vld [vmem:[%s18862_s8 + $0x33cc] ss:$16 sps:$4 sm:$0xff]   ;;  %v2352_v29 = vcombine.high %v20678_v16, %v20678_v16  ;;  %v18412_v16 = vld [vmem:[%s18862_s8 + $0x33e0] ss:$16 sps:$4 sm:$0xff]  }
 0x690   : > { %12442 = vmatprep.subr.bf16.mxu0 %v18324_v30  ;;  %13590 = vmatprep.subr.bf16.mxu1 %v18327_v6  ;;  %v18406_v30 = vld [vmem:[%s18862_s8 + $0x33c0] ss:$16 sps:$4 sm:$0xff]   ;;  %v18409_v6 = vld [vmem:[%s18862_s8 + $0x33c8] ss:$16 sps:$4 sm:$0xff]  }
 0x692   : > { %12434 = vmatmul.mubr.bf16.vlgmr.msra.gmra.mrb[0].mxu0 %v20767_v31  ;;  %13582 = vmatmul.mubr.bf16.vlgmr.msra.gmra.mrb[0].mxu1 %v20767_v31 }
 0x693   : > { %12443 = vmatpush1.bf16.msra.mxu0 %v18322_v33  ;;  %13591 = vmatpush1.bf16.msra.mxu1 %v18325_v34  ;;  %v18414_v33 = vld [vmem:[%s18862_s8 + $0x33e4] ss:$16 sps:$4 sm:$0xff]   ;;  %v18417_v34 = vld [vmem:[%s18862_s8 + $0x33ec] ss:$16 sps:$4 sm:$0xff]  }
 0x694   : > { %12444 = vmatprep.subr.bf16.mxu0 %v18330_v36  ;;  %13592 = vmatprep.subr.bf16.mxu1 %v18333_v37  ;;  %v20836_v36 = vrot.slane %v2352_v29, %v18921_v49  ;;  %v18415_v37 = vld [vmem:[%s18862_s8 + $0x33e8] ss:$16 sps:$4 sm:$0xff]  }
 0x695   : > { %12474 = vmatprep.mubr.bf16.mxu0 %v2399_v23  ;;  %13622 = vmatprep.mubr.bf16.mxu1 %v2399_v23  ;;  %v18420_v23 = vld [vmem:[%s18862_s8 + $0x3404] ss:$16 sps:$4 sm:$0xff]   ;;  %v18493_v29 = vld [vmem:[%s18862_s8 + $0x3588] ss:$16 sps:$4 sm:$0xff]  }
 0x697   : > { %12445 = vmatpush1.bf16.msra.mxu0 %v18328_v20  ;;  %13593 = vmatpush1.bf16.msra.mxu1 %v18331_v39  ;;  %v18423_v20 = vld [vmem:[%s18862_s8 + $0x340c] ss:$16 sps:$4 sm:$0xff]   ;;  %v2368_v39 = vcombine.high %v20836_v36, %v20836_v36 }
 0x698   : > { %12446 = vmatprep.subr.bf16.mxu0 %v18336_v40  ;;  %13594 = vmatprep.subr.bf16.mxu1 %v18339_v21  ;;  %v2397_v40 = vcombine.high %v20767_v31, %v20767_v31  ;;  %v18418_v21 = vld [vmem:[%s18862_s8 + $0x3400] ss:$16 sps:$4 sm:$0xff]  }
 0x699   : > { %v18424_v31 = vld [vmem:[%s18862_s8 + $0x3420] ss:$16 sps:$4 sm:$0xff]  }
 0x69b   : > { %12447 = vmatpush1.bf16.msra.mxu0 %v18334_v15  ;;  %13595 = vmatpush1.bf16.msra.mxu1 %v18337_v32  ;;  %v18421_v15 = vld [vmem:[%s18862_s8 + $0x3408] ss:$16 sps:$4 sm:$0xff]   ;;  %v18426_v32 = vld [vmem:[%s18862_s8 + $0x3424] ss:$16 sps:$4 sm:$0xff]  }
 0x69c   : > { %12448 = vmatprep.subr.bf16.mxu0 %v18342_v41  ;;  %13596 = vmatprep.subr.bf16.mxu1 %v18345_v43  ;;  %v18429_v41 = vld [vmem:[%s18862_s8 + $0x342c] ss:$16 sps:$4 sm:$0xff]   ;;  %v20851_v43 = vrot.slane %v2368_v39, %v18921_v49  ;;  %v18510_v39 = vld [vmem:[%s18862_s8 + $0x35e4] ss:$16 sps:$4 sm:$0xff]  }
 0x69f   : > { %12449 = vmatpush1.bf16.msra.mxu0 %v18340_v13  ;;  %13597 = vmatpush1.bf16.msra.mxu1 %v18343_v46  ;;  %v18427_v13 = vld [vmem:[%s18862_s8 + $0x3428] ss:$16 sps:$4 sm:$0xff]   ;;  %v18432_v46 = vld [vmem:[%s18862_s8 + $0x3444] ss:$16 sps:$4 sm:$0xff]  }
 0x6a0   : > { %12450 = vmatprep.subr.bf16.mxu0 %v18348_v47  ;;  %13598 = vmatprep.subr.bf16.mxu1 %v18351_v19  ;;  %v18435_v47 = vld [vmem:[%s18862_s8 + $0x344c] ss:$16 sps:$4 sm:$0xff]   ;;  %v18430_v19 = vld [vmem:[%s18862_s8 + $0x3440] ss:$16 sps:$4 sm:$0xff]  }
 0x6a3   : > { %12451 = vmatpush1.bf16.msra.mxu0 %v18346_v51  ;;  %13599 = vmatpush1.bf16.msra.mxu1 %v18349_v53  ;;  %v18433_v51 = vld [vmem:[%s18862_s8 + $0x3448] ss:$16 sps:$4 sm:$0xff]   ;;  %v18438_v53 = vld [vmem:[%s18862_s8 + $0x3464] ss:$16 sps:$4 sm:$0xff]  }
 0x6a4   : > { %12452 = vmatprep.subr.bf16.mxu0 %v18354_v25  ;;  %13600 = vmatprep.subr.bf16.mxu1 %v18357_v54  ;;  %v18441_v25 = vld [vmem:[%s18862_s8 + $0x346c] ss:$16 sps:$4 sm:$0xff]   ;;  %v18436_v54 = vld [vmem:[%s18862_s8 + $0x3460] ss:$16 sps:$4 sm:$0xff]  }
 0x6a7   : > { %12453 = vmatpush1.bf16.msra.mxu0 %v18352_v55  ;;  %13601 = vmatpush1.bf16.msra.mxu1 %v18355_v44  ;;  %v18439_v55 = vld [vmem:[%s18862_s8 + $0x3468] ss:$16 sps:$4 sm:$0xff]   ;;  %v18444_v44 = vld [vmem:[%s18862_s8 + $0x3484] ss:$16 sps:$4 sm:$0xff]  }
 0x6a8   : > { %12454 = vmatprep.subr.bf16.mxu0 %v18360_v56  ;;  %13602 = vmatprep.subr.bf16.mxu1 %v18363_v57  ;;  %v18447_v56 = vld [vmem:[%s18862_s8 + $0x348c] ss:$16 sps:$4 sm:$0xff]   ;;  %v18442_v57 = vld [vmem:[%s18862_s8 + $0x3480] ss:$16 sps:$4 sm:$0xff]  }
 0x6ab   : > { %12455 = vmatpush1.bf16.msra.mxu0 %v18358_v48  ;;  %13603 = vmatpush1.bf16.msra.mxu1 %v18361_v61  ;;  %v18445_v48 = vld [vmem:[%s18862_s8 + $0x3488] ss:$16 sps:$4 sm:$0xff]   ;;  %v18450_v61 = vld [vmem:[%s18862_s8 + $0x34a4] ss:$16 sps:$4 sm:$0xff]  }
 0x6ac   : > { %12456 = vmatprep.subr.bf16.mxu0 %v18366_v62  ;;  %13604 = vmatprep.subr.bf16.mxu1 %v18369_v0  ;;  %v18453_v62 = vld [vmem:[%s18862_s8 + $0x34ac] ss:$16 sps:$4 sm:$0xff]   ;;  %v18448_v0 = vld [vmem:[%s18862_s8 + $0x34a0] ss:$16 sps:$4 sm:$0xff]  }
 0x6af   : > { %12457 = vmatpush1.bf16.msra.mxu0 %v18364_v50  ;;  %13605 = vmatpush1.bf16.msra.mxu1 %v18367_v1  ;;  %v18451_v50 = vld [vmem:[%s18862_s8 + $0x34a8] ss:$16 sps:$4 sm:$0xff]   ;;  %v18456_v1 = vld [vmem:[%s18862_s8 + $0x34c4] ss:$16 sps:$4 sm:$0xff]  }
 0x6b0   : > { %12458 = vmatprep.subr.bf16.mxu0 %v18372_v35  ;;  %13606 = vmatprep.subr.bf16.mxu1 %v18375_v2  ;;  %v18459_v35 = vld [vmem:[%s18862_s8 + $0x34cc] ss:$16 sps:$4 sm:$0xff]   ;;  %v18454_v2 = vld [vmem:[%s18862_s8 + $0x34c0] ss:$16 sps:$4 sm:$0xff]  }
 0x6b3   : > { %12459 = vmatpush1.bf16.msra.mxu0 %v18370_v58  ;;  %13607 = vmatpush1.bf16.msra.mxu1 %v18373_v3  ;;  %v18457_v58 = vld [vmem:[%s18862_s8 + $0x34c8] ss:$16 sps:$4 sm:$0xff]   ;;  %v18462_v3 = vld [vmem:[%s18862_s8 + $0x34e4] ss:$16 sps:$4 sm:$0xff]  }
 0x6b4   : > { %12460 = vmatprep.subr.bf16.mxu0 %v18378_v4  ;;  %13608 = vmatprep.subr.bf16.mxu1 %v18381_v45  ;;  %v18465_v4 = vld [vmem:[%s18862_s8 + $0x34ec] ss:$16 sps:$4 sm:$0xff]   ;;  %v18460_v45 = vld [vmem:[%s18862_s8 + $0x34e0] ss:$16 sps:$4 sm:$0xff]  }
 0x6b7   : > { %12461 = vmatpush1.bf16.msra.mxu0 %v18376_v7  ;;  %13609 = vmatpush1.bf16.msra.mxu1 %v18379_v9  ;;  %v18463_v7 = vld [vmem:[%s18862_s8 + $0x34e8] ss:$16 sps:$4 sm:$0xff]   ;;  %v18468_v9 = vld [vmem:[%s18862_s8 + $0x3504] ss:$16 sps:$4 sm:$0xff]  }
 0x6b8   : > { %12462 = vmatprep.subr.bf16.mxu0 %v18384_v38  ;;  %13610 = vmatprep.subr.bf16.mxu1 %v18387_v11  ;;  %v18471_v38 = vld [vmem:[%s18862_s8 + $0x350c] ss:$16 sps:$4 sm:$0xff]   ;;  %v18466_v11 = vld [vmem:[%s18862_s8 + $0x3500] ss:$16 sps:$4 sm:$0xff]  }
 0x6bb   : > { %12463 = vmatpush1.bf16.msra.mxu0 %v18382_v12  ;;  %13611 = vmatpush1.bf16.msra.mxu1 %v18385_v59  ;;  %v18469_v12 = vld [vmem:[%s18862_s8 + $0x3508] ss:$16 sps:$4 sm:$0xff]   ;;  %v18474_v59 = vld [vmem:[%s18862_s8 + $0x3524] ss:$16 sps:$4 sm:$0xff]  }
 0x6bc   : > { %12464 = vmatprep.subr.bf16.mxu0 %v18390_v14  ;;  %13612 = vmatprep.subr.bf16.mxu1 %v18393_v63  ;;  %v18477_v14 = vld [vmem:[%s18862_s8 + $0x352c] ss:$16 sps:$4 sm:$0xff]   ;;  %v18472_v63 = vld [vmem:[%s18862_s8 + $0x3520] ss:$16 sps:$4 sm:$0xff]  }
 0x6bf   : > { %12465 = vmatpush1.bf16.msra.mxu0 %v18388_v5  ;;  %13613 = vmatpush1.bf16.msra.mxu1 %v18391_v52  ;;  %v18475_v5 = vld [vmem:[%s18862_s8 + $0x3528] ss:$16 sps:$4 sm:$0xff]   ;;  %v18480_v52 = vld [vmem:[%s18862_s8 + $0x3544] ss:$16 sps:$4 sm:$0xff]  }
 0x6c0   : > { %12466 = vmatprep.subr.bf16.mxu0 %v18396_v17  ;;  %13614 = vmatprep.subr.bf16.mxu1 %v18399_v18  ;;  %v18483_v17 = vld [vmem:[%s18862_s8 + $0x354c] ss:$16 sps:$4 sm:$0xff]   ;;  %v18478_v18 = vld [vmem:[%s18862_s8 + $0x3540] ss:$16 sps:$4 sm:$0xff]  }
 0x6c3   : > { %12467 = vmatpush1.bf16.msra.mxu0 %v18394_v22  ;;  %13615 = vmatpush1.bf16.msra.mxu1 %v18397_v24  ;;  %v18481_v22 = vld [vmem:[%s18862_s8 + $0x3548] ss:$16 sps:$4 sm:$0xff]   ;;  %v18486_v24 = vld [vmem:[%s18862_s8 + $0x3564] ss:$16 sps:$4 sm:$0xff]  }
 0x6c4   : > { %12468 = vmatprep.subr.bf16.mxu0 %v18402_v26  ;;  %13616 = vmatprep.subr.bf16.mxu1 %v18405_v10  ;;  %v18489_v26 = vld [vmem:[%s18862_s8 + $0x356c] ss:$16 sps:$4 sm:$0xff]   ;;  %v18484_v10 = vld [vmem:[%s18862_s8 + $0x3560] ss:$16 sps:$4 sm:$0xff]  }
 0x6c7   : > { %12469 = vmatpush1.bf16.msra.mxu0 %v18400_v60  ;;  %13617 = vmatpush1.bf16.msra.mxu1 %v18403_v27  ;;  %v18487_v60 = vld [vmem:[%s18862_s8 + $0x3568] ss:$16 sps:$4 sm:$0xff]   ;;  %v18492_v27 = vld [vmem:[%s18862_s8 + $0x3584] ss:$16 sps:$4 sm:$0xff]  }
 0x6c8   : > { %12470 = vmatprep.subr.bf16.mxu0 %v18408_v28  ;;  %13618 = vmatprep.subr.bf16.mxu1 %v18411_v8  ;;  %v18495_v28 = vld [vmem:[%s18862_s8 + $0x358c] ss:$16 sps:$4 sm:$0xff]   ;;  %v18490_v8 = vld [vmem:[%s18862_s8 + $0x3580] ss:$16 sps:$4 sm:$0xff]  }
 0x6cb   : > { %12471 = vmatpush1.bf16.msra.mxu0 %v18406_v30  ;;  %13619 = vmatpush1.bf16.msra.mxu1 %v18409_v6  ;;  %v18498_v30 = vld [vmem:[%s18862_s8 + $0x35a4] ss:$16 sps:$4 sm:$0xff]   ;;  %v18501_v6 = vld [vmem:[%s18862_s8 + $0x35ac] ss:$16 sps:$4 sm:$0xff]  }
 0x6cc   : > { %12472 = vmatprep.subr.bf16.mxu0 %v18414_v33  ;;  %13620 = vmatprep.subr.bf16.mxu1 %v18417_v34  ;;  %v18496_v33 = vld [vmem:[%s18862_s8 + $0x35a0] ss:$16 sps:$4 sm:$0xff]   ;;  %v18499_v34 = vld [vmem:[%s18862_s8 + $0x35a8] ss:$16 sps:$4 sm:$0xff]  }
 0x6cf   : > { %12473 = vmatpush1.bf16.msra.mxu0 %v18412_v16  ;;  %13621 = vmatpush1.bf16.msra.mxu1 %v18415_v37  ;;  %v18504_v16 = vld [vmem:[%s18862_s8 + $0x35c4] ss:$16 sps:$4 sm:$0xff]   ;;  %v18507_v37 = vld [vmem:[%s18862_s8 + $0x35cc] ss:$16 sps:$4 sm:$0xff]  }
 0x6d0   : > { %12483 = vmatprep.subr.bf16.mxu0 %v18420_v23  ;;  %13631 = vmatprep.subr.bf16.mxu1 %v18423_v20  ;;  %v18502_v23 = vld [vmem:[%s18862_s8 + $0x35c0] ss:$16 sps:$4 sm:$0xff]   ;;  %v18505_v20 = vld [vmem:[%s18862_s8 + $0x35c8] ss:$16 sps:$4 sm:$0xff]  }
 0x6d2   : > { %12475 = vmatmul.mubr.bf16.vlgmr.msra.gmra.mrb[0].mxu0 %v2397_v40  ;;  %13623 = vmatmul.mubr.bf16.vlgmr.msra.gmra.mrb[0].mxu1 %v2397_v40  ;;  %v18513_v40 = vld [vmem:[%s18862_s8 + $0x35ec] ss:$16 sps:$4 sm:$0xff]  }
 0x6d3   : > { %12484 = vmatpush1.bf16.msra.mxu0 %v18418_v21  ;;  %13632 = vmatpush1.bf16.msra.mxu1 %v18421_v15  ;;  %v18508_v21 = vld [vmem:[%s18862_s8 + $0x35e0] ss:$16 sps:$4 sm:$0xff]   ;;  %v18511_v15 = vld [vmem:[%s18862_s8 + $0x35e8] ss:$16 sps:$4 sm:$0xff]  }
 0x6d4   : > { %12485 = vmatprep.subr.bf16.mxu0 %v18426_v32  ;;  %13633 = vmatprep.subr.bf16.mxu1 %v18429_v41  ;;  %v18517_v32 = vld [vmem:[%s18862_s8 + $0x3604] ss:$16 sps:$4 sm:$0xff]   ;;  %v18520_v41 = vld [vmem:[%s18862_s8 + $0x360c] ss:$16 sps:$4 sm:$0xff]  }
 0x6d5   : > { %12515 = vmatprep.mubr.bf16.mxu0 %v20851_v43  ;;  %13663 = vmatprep.mubr.bf16.mxu1 %v20851_v43 }
 0x6d7   : > { %12486 = vmatpush1.bf16.msra.mxu0 %v18424_v31  ;;  %13634 = vmatpush1.bf16.msra.mxu1 %v18427_v13  ;;  %v20917_v31 = vrot.slane %v20836_v36, %v18921_v49  ;;  %v18515_v13 = vld [vmem:[%s18862_s8 + $0x3600] ss:$16 sps:$4 sm:$0xff]  }
 0x6d8   : > { %12487 = vmatprep.subr.bf16.mxu0 %v18432_v46  ;;  %13635 = vmatprep.subr.bf16.mxu1 %v18435_v47  ;;  %v18518_v46 = vld [vmem:[%s18862_s8 + $0x3608] ss:$16 sps:$4 sm:$0xff]   ;;  %v18523_v47 = vld [vmem:[%s18862_s8 + $0x3624] ss:$16 sps:$4 sm:$0xff]   ;;  %v18521_v36 = vld [vmem:[%s18862_s8 + $0x3620] ss:$16 sps:$4 sm:$0xff]  }
 0x6db   : > { %12488 = vmatpush1.bf16.msra.mxu0 %v18430_v19  ;;  %13636 = vmatpush1.bf16.msra.mxu1 %v18433_v51  ;;  %v18526_v19 = vld [vmem:[%s18862_s8 + $0x362c] ss:$16 sps:$4 sm:$0xff]   ;;  %v2400_v51 = vcombine.high %v20851_v43, %v20851_v43  ;;  %v18527_v43 = vld [vmem:[%s18862_s8 + $0x3640] ss:$16 sps:$4 sm:$0xff]  }
 0x6dc   : > { %12489 = vmatprep.subr.bf16.mxu0 %v18438_v53  ;;  %13637 = vmatprep.subr.bf16.mxu1 %v18441_v25  ;;  %v18524_v53 = vld [vmem:[%s18862_s8 + $0x3628] ss:$16 sps:$4 sm:$0xff]   ;;  %v18529_v25 = vld [vmem:[%s18862_s8 + $0x3644] ss:$16 sps:$4 sm:$0xff]  }
 0x6df   : > { %12490 = vmatpush1.bf16.msra.mxu0 %v18436_v54  ;;  %13638 = vmatpush1.bf16.msra.mxu1 %v18439_v55  ;;  %v18532_v54 = vld [vmem:[%s18862_s8 + $0x364c] ss:$16 sps:$4 sm:$0xff]   ;;  %v18530_v55 = vld [vmem:[%s18862_s8 + $0x3648] ss:$16 sps:$4 sm:$0xff]  }
 0x6e0   : > { %12491 = vmatprep.subr.bf16.mxu0 %v18444_v44  ;;  %13639 = vmatprep.subr.bf16.mxu1 %v18447_v56  ;;  %v18535_v44 = vld [vmem:[%s18862_s8 + $0x3664] ss:$16 sps:$4 sm:$0xff]   ;;  %v18538_v56 = vld [vmem:[%s18862_s8 + $0x366c] ss:$16 sps:$4 sm:$0xff]  }
 0x6e3   : > { %12492 = vmatpush1.bf16.msra.mxu0 %v18442_v57  ;;  %13640 = vmatpush1.bf16.msra.mxu1 %v18445_v48  ;;  %v18533_v57 = vld [vmem:[%s18862_s8 + $0x3660] ss:$16 sps:$4 sm:$0xff]   ;;  %v18536_v48 = vld [vmem:[%s18862_s8 + $0x3668] ss:$16 sps:$4 sm:$0xff]  }
 0x6e4   : > { %12493 = vmatprep.subr.bf16.mxu0 %v18450_v61  ;;  %13641 = vmatprep.subr.bf16.mxu1 %v18453_v62  ;;  %v18541_v61 = vld [vmem:[%s18862_s8 + $0x3684] ss:$16 sps:$4 sm:$0xff]   ;;  %v18544_v62 = vld [vmem:[%s18862_s8 + $0x368c] ss:$16 sps:$4 sm:$0xff]  }
 0x6e7   : > { %12494 = vmatpush1.bf16.msra.mxu0 %v18448_v0  ;;  %13642 = vmatpush1.bf16.msra.mxu1 %v18451_v50  ;;  %v18539_v0 = vld [vmem:[%s18862_s8 + $0x3680] ss:$16 sps:$4 sm:$0xff]   ;;  %v18542_v50 = vld [vmem:[%s18862_s8 + $0x3688] ss:$16 sps:$4 sm:$0xff]  }
 0x6e8   : > { %12495 = vmatprep.subr.bf16.mxu0 %v18456_v1  ;;  %13643 = vmatprep.subr.bf16.mxu1 %v18459_v35  ;;  %v18547_v1 = vld [vmem:[%s18862_s8 + $0x36a4] ss:$16 sps:$4 sm:$0xff]   ;;  %v18550_v35 = vld [vmem:[%s18862_s8 + $0x36ac] ss:$16 sps:$4 sm:$0xff]  }
 0x6eb   : > { %12496 = vmatpush1.bf16.msra.mxu0 %v18454_v2  ;;  %13644 = vmatpush1.bf16.msra.mxu1 %v18457_v58  ;;  %v18545_v2 = vld [vmem:[%s18862_s8 + $0x36a0] ss:$16 sps:$4 sm:$0xff]   ;;  %v18548_v58 = vld [vmem:[%s18862_s8 + $0x36a8] ss:$16 sps:$4 sm:$0xff]  }
 0x6ec   : > { %12497 = vmatprep.subr.bf16.mxu0 %v18462_v3  ;;  %13645 = vmatprep.subr.bf16.mxu1 %v18465_v4  ;;  %v18553_v3 = vld [vmem:[%s18862_s8 + $0x36c4] ss:$16 sps:$4 sm:$0xff]   ;;  %v18556_v4 = vld [vmem:[%s18862_s8 + $0x36cc] ss:$16 sps:$4 sm:$0xff]  }
 0x6ef   : > { %12498 = vmatpush1.bf16.msra.mxu0 %v18460_v45  ;;  %13646 = vmatpush1.bf16.msra.mxu1 %v18463_v7  ;;  %v18551_v45 = vld [vmem:[%s18862_s8 + $0x36c0] ss:$16 sps:$4 sm:$0xff]   ;;  %v18554_v7 = vld [vmem:[%s18862_s8 + $0x36c8] ss:$16 sps:$4 sm:$0xff]  }
 0x6f0   : > { %12499 = vmatprep.subr.bf16.mxu0 %v18468_v9  ;;  %13647 = vmatprep.subr.bf16.mxu1 %v18471_v38  ;;  %v18559_v9 = vld [vmem:[%s18862_s8 + $0x36e4] ss:$16 sps:$4 sm:$0xff]   ;;  %v18562_v38 = vld [vmem:[%s18862_s8 + $0x36ec] ss:$16 sps:$4 sm:$0xff]  }
 0x6f3   : > { %12500 = vmatpush1.bf16.msra.mxu0 %v18466_v11  ;;  %13648 = vmatpush1.bf16.msra.mxu1 %v18469_v12  ;;  %v18557_v11 = vld [vmem:[%s18862_s8 + $0x36e0] ss:$16 sps:$4 sm:$0xff]   ;;  %v18560_v12 = vld [vmem:[%s18862_s8 + $0x36e8] ss:$16 sps:$4 sm:$0xff]  }
 0x6f4   : > { %12501 = vmatprep.subr.bf16.mxu0 %v18474_v59  ;;  %13649 = vmatprep.subr.bf16.mxu1 %v18477_v14  ;;  %v18565_v59 = vld [vmem:[%s18862_s8 + $0x3704] ss:$16 sps:$4 sm:$0xff]   ;;  %v18568_v14 = vld [vmem:[%s18862_s8 + $0x370c] ss:$16 sps:$4 sm:$0xff]  }
 0x6f7   : > { %12502 = vmatpush1.bf16.msra.mxu0 %v18472_v63  ;;  %13650 = vmatpush1.bf16.msra.mxu1 %v18475_v5  ;;  %v18563_v63 = vld [vmem:[%s18862_s8 + $0x3700] ss:$16 sps:$4 sm:$0xff]   ;;  %v18566_v5 = vld [vmem:[%s18862_s8 + $0x3708] ss:$16 sps:$4 sm:$0xff]  }
 0x6f8   : > { %12503 = vmatprep.subr.bf16.mxu0 %v18480_v52  ;;  %13651 = vmatprep.subr.bf16.mxu1 %v18483_v17  ;;  %v18571_v52 = vld [vmem:[%s18862_s8 + $0x3724] ss:$16 sps:$4 sm:$0xff]   ;;  %v18574_v17 = vld [vmem:[%s18862_s8 + $0x372c] ss:$16 sps:$4 sm:$0xff]  }
 0x6fb   : > { %12504 = vmatpush1.bf16.msra.mxu0 %v18478_v18  ;;  %13652 = vmatpush1.bf16.msra.mxu1 %v18481_v22  ;;  %v18569_v18 = vld [vmem:[%s18862_s8 + $0x3720] ss:$16 sps:$4 sm:$0xff]   ;;  %v18572_v22 = vld [vmem:[%s18862_s8 + $0x3728] ss:$16 sps:$4 sm:$0xff]  }
 0x6fc   : > { %12505 = vmatprep.subr.bf16.mxu0 %v18486_v24  ;;  %13653 = vmatprep.subr.bf16.mxu1 %v18489_v26  ;;  %v18577_v24 = vld [vmem:[%s18862_s8 + $0x3744] ss:$16 sps:$4 sm:$0xff]   ;;  %v18580_v26 = vld [vmem:[%s18862_s8 + $0x374c] ss:$16 sps:$4 sm:$0xff]  }
 0x6ff   : > { %12506 = vmatpush1.bf16.msra.mxu0 %v18484_v10  ;;  %13654 = vmatpush1.bf16.msra.mxu1 %v18487_v60  ;;  %v18575_v10 = vld [vmem:[%s18862_s8 + $0x3740] ss:$16 sps:$4 sm:$0xff]   ;;  %v18578_v60 = vld [vmem:[%s18862_s8 + $0x3748] ss:$16 sps:$4 sm:$0xff]  }
 0x700   : > { %12507 = vmatprep.subr.bf16.mxu0 %v18492_v27  ;;  %13655 = vmatprep.subr.bf16.mxu1 %v18495_v28  ;;  %v18583_v27 = vld [vmem:[%s18862_s8 + $0x3764] ss:$16 sps:$4 sm:$0xff]   ;;  %v18586_v28 = vld [vmem:[%s18862_s8 + $0x376c] ss:$16 sps:$4 sm:$0xff]  }
 0x703   : > { %12508 = vmatpush1.bf16.msra.mxu0 %v18490_v8  ;;  %13656 = vmatpush1.bf16.msra.mxu1 %v18493_v29  ;;  %v18581_v8 = vld [vmem:[%s18862_s8 + $0x3760] ss:$16 sps:$4 sm:$0xff]   ;;  %v18584_v29 = vld [vmem:[%s18862_s8 + $0x3768] ss:$16 sps:$4 sm:$0xff]  }
 0x704   : > { %12509 = vmatprep.subr.bf16.mxu0 %v18498_v30  ;;  %13657 = vmatprep.subr.bf16.mxu1 %v18501_v6  ;;  %v18589_v30 = vld [vmem:[%s18862_s8 + $0x3784] ss:$16 sps:$4 sm:$0xff]   ;;  %v18592_v6 = vld [vmem:[%s18862_s8 + $0x378c] ss:$16 sps:$4 sm:$0xff]  }
 0x707   : > { %12510 = vmatpush1.bf16.msra.mxu0 %v18496_v33  ;;  %13658 = vmatpush1.bf16.msra.mxu1 %v18499_v34  ;;  %v18587_v33 = vld [vmem:[%s18862_s8 + $0x3780] ss:$16 sps:$4 sm:$0xff]   ;;  %v18590_v34 = vld [vmem:[%s18862_s8 + $0x3788] ss:$16 sps:$4 sm:$0xff]  }
 0x708   : > { %12511 = vmatprep.subr.bf16.mxu0 %v18504_v16  ;;  %13659 = vmatprep.subr.bf16.mxu1 %v18507_v37  ;;  %v18595_v16 = vld [vmem:[%s18862_s8 + $0x37a4] ss:$16 sps:$4 sm:$0xff]   ;;  %v18598_v37 = vld [vmem:[%s18862_s8 + $0x37ac] ss:$16 sps:$4 sm:$0xff]  }
 0x70b   : > { %12512 = vmatpush1.bf16.msra.mxu0 %v18502_v23  ;;  %13660 = vmatpush1.bf16.msra.mxu1 %v18505_v20  ;;  %v18593_v23 = vld [vmem:[%s18862_s8 + $0x37a0] ss:$16 sps:$4 sm:$0xff]   ;;  %v18596_v20 = vld [vmem:[%s18862_s8 + $0x37a8] ss:$16 sps:$4 sm:$0xff]  }
 0x70c   : > { %12513 = vmatprep.subr.bf16.mxu0 %v18510_v39  ;;  %13661 = vmatprep.subr.bf16.mxu1 %v18513_v40  ;;  %v18601_v39 = vld [vmem:[%s18862_s8 + $0x37c4] ss:$16 sps:$4 sm:$0xff]   ;;  %v18604_v40 = vld [vmem:[%s18862_s8 + $0x37cc] ss:$16 sps:$4 sm:$0xff]  }
 0x70f   : > { %12514 = vmatpush1.bf16.msra.mxu0 %v18508_v21  ;;  %13662 = vmatpush1.bf16.msra.mxu1 %v18511_v15  ;;  %v18599_v21 = vld [vmem:[%s18862_s8 + $0x37c0] ss:$16 sps:$4 sm:$0xff]   ;;  %v18602_v15 = vld [vmem:[%s18862_s8 + $0x37c8] ss:$16 sps:$4 sm:$0xff]  }
 0x710   : > { %12524 = vmatprep.subr.bf16.mxu0 %v18517_v32  ;;  %13672 = vmatprep.subr.bf16.mxu1 %v18520_v41  ;;  %v18607_v32 = vld [vmem:[%s18862_s8 + $0x37e4] ss:$16 sps:$4 sm:$0xff]   ;;  %v18610_v41 = vld [vmem:[%s18862_s8 + $0x37ec] ss:$16 sps:$4 sm:$0xff]  }
 0x712   : > { %12516 = vmatmul.mubr.bf16.vlgmr.msra.gmra.mrb[0].mxu0 %v20917_v31  ;;  %13664 = vmatmul.mubr.bf16.vlgmr.msra.gmra.mrb[0].mxu1 %v20917_v31 }
 0x713   : > { %12525 = vmatpush1.bf16.msra.mxu0 %v18515_v13  ;;  %13673 = vmatpush1.bf16.msra.mxu1 %v18518_v46  ;;  %v18605_v13 = vld [vmem:[%s18862_s8 + $0x37e0] ss:$16 sps:$4 sm:$0xff]   ;;  %v18608_v46 = vld [vmem:[%s18862_s8 + $0x37e8] ss:$16 sps:$4 sm:$0xff]   ;;  %s13846_s8 = sshll.u32 %s13835_s16, 2 }
 0x714   : > { %12526 = vmatprep.subr.bf16.mxu0 %v18523_v47  ;;  %13674 = vmatprep.subr.bf16.mxu1 %v18526_v19  ;;  %v2398_v47 = vcombine.high %v20917_v31, %v20917_v31  ;;  %v2033_v19 = vsub.s32 0, %v18913_v42  ;;  %p226_p7 = scmp.lt.s32.totalorder %s13846_s8, 7 }
 0x715   : > { %12556 = vmatprep.mubr.bf16.mxu0 %v2400_v51  ;;  %13704 = vmatprep.mubr.bf16.mxu1 %v2400_v51  ;;  %v2041_v51 = vsub.s32 2, %v18913_v42 }
 0x716   : > { %s21027_s8 = smov (!%p226_p7, %s13846_s8), 7 }
 0x717   : > { %12527 = vmatpush1.bf16.msra.mxu0 %v18521_v36  ;;  %13675 = vmatpush1.bf16.msra.mxu1 %v18524_v53  ;;  %v2029_v36 = vld [vmem:[%s18868_s30] sm:$0xf]  ;;  %v2037_v53 = vsub.s32 1, %v18913_v42  ;;  %s228_s30 = scalar_lea.vmem %s21015_s3, %s21027_s8 }
 0x718   : > { %12528 = vmatprep.subr.bf16.mxu0 %v18529_v25  ;;  %13676 = vmatprep.subr.bf16.mxu1 %v18532_v54  ;;  %v2045_v25 = vsub.s32 3, %v18913_v42  ;;  %v2034_v54 = vrot.slane %v2029_v36, %v2033_v19 }
 0x71b   : > { %12529 = vmatpush1.bf16.msra.mxu0 %v18527_v43  ;;  %13677 = vmatpush1.bf16.msra.mxu1 %v18530_v55  ;;  %v2042_v43 = vrot.slane %v2029_v36, %v2041_v51  ;;  %v2038_v55 = vrot.slane %v2029_v36, %v2037_v53 }
 0x71c   : > { %12530 = vmatprep.subr.bf16.mxu0 %v18535_v44  ;;  %13678 = vmatprep.subr.bf16.mxu1 %v18538_v56  ;;  %v2046_v44 = vrot.slane %v2029_v36, %v2045_v25 }
 0x71f   : > { %12531 = vmatpush1.bf16.msra.mxu0 %v18533_v57  ;;  %13679 = vmatpush1.bf16.msra.mxu1 %v18536_v48 }
 0x720   : > { %12532 = vmatprep.subr.bf16.mxu0 %v18541_v61  ;;  %13680 = vmatprep.subr.bf16.mxu1 %v18544_v62 }
 0x723   : > { %12533 = vmatpush1.bf16.msra.mxu0 %v18539_v0  ;;  %13681 = vmatpush1.bf16.msra.mxu1 %v18542_v50 }
 0x724   : > { %12534 = vmatprep.subr.bf16.mxu0 %v18547_v1  ;;  %13682 = vmatprep.subr.bf16.mxu1 %v18550_v35 }
 0x727   : > { %12535 = vmatpush1.bf16.msra.mxu0 %v18545_v2  ;;  %13683 = vmatpush1.bf16.msra.mxu1 %v18548_v58 }
 0x728   : > { %12536 = vmatprep.subr.bf16.mxu0 %v18553_v3  ;;  %13684 = vmatprep.subr.bf16.mxu1 %v18556_v4 }
 0x72b   : > { %12537 = vmatpush1.bf16.msra.mxu0 %v18551_v45  ;;  %13685 = vmatpush1.bf16.msra.mxu1 %v18554_v7 }
 0x72c   : > { %12538 = vmatprep.subr.bf16.mxu0 %v18559_v9  ;;  %13686 = vmatprep.subr.bf16.mxu1 %v18562_v38 }
 0x72f   : > { %12539 = vmatpush1.bf16.msra.mxu0 %v18557_v11  ;;  %13687 = vmatpush1.bf16.msra.mxu1 %v18560_v12 }
 0x730   : > { %12540 = vmatprep.subr.bf16.mxu0 %v18565_v59  ;;  %13688 = vmatprep.subr.bf16.mxu1 %v18568_v14 }
 0x733   : > { %12541 = vmatpush1.bf16.msra.mxu0 %v18563_v63  ;;  %13689 = vmatpush1.bf16.msra.mxu1 %v18566_v5 }
 0x734   : > { %12542 = vmatprep.subr.bf16.mxu0 %v18571_v52  ;;  %13690 = vmatprep.subr.bf16.mxu1 %v18574_v17 }
 0x737   : > { %12543 = vmatpush1.bf16.msra.mxu0 %v18569_v18  ;;  %13691 = vmatpush1.bf16.msra.mxu1 %v18572_v22 }
 0x738   : > { %12544 = vmatprep.subr.bf16.mxu0 %v18577_v24  ;;  %13692 = vmatprep.subr.bf16.mxu1 %v18580_v26 }
 0x73b   : > { %12545 = vmatpush1.bf16.msra.mxu0 %v18575_v10  ;;  %13693 = vmatpush1.bf16.msra.mxu1 %v18578_v60 }
 0x73c   : > { %12546 = vmatprep.subr.bf16.mxu0 %v18583_v27  ;;  %13694 = vmatprep.subr.bf16.mxu1 %v18586_v28 }
 0x73f   : > { %12547 = vmatpush1.bf16.msra.mxu0 %v18581_v8  ;;  %13695 = vmatpush1.bf16.msra.mxu1 %v18584_v29 }
 0x740   : > { %12548 = vmatprep.subr.bf16.mxu0 %v18589_v30  ;;  %13696 = vmatprep.subr.bf16.mxu1 %v18592_v6 }
 0x743   : > { %12549 = vmatpush1.bf16.msra.mxu0 %v18587_v33  ;;  %13697 = vmatpush1.bf16.msra.mxu1 %v18590_v34 }
 0x744   : > { %12550 = vmatprep.subr.bf16.mxu0 %v18595_v16  ;;  %13698 = vmatprep.subr.bf16.mxu1 %v18598_v37 }
 0x747   : > { %12551 = vmatpush1.bf16.msra.mxu0 %v18593_v23  ;;  %13699 = vmatpush1.bf16.msra.mxu1 %v18596_v20 }
 0x748   : > { %12552 = vmatprep.subr.bf16.mxu0 %v18601_v39  ;;  %13700 = vmatprep.subr.bf16.mxu1 %v18604_v40 }
 0x74b   : > { %12553 = vmatpush1.bf16.msra.mxu0 %v18599_v21  ;;  %13701 = vmatpush1.bf16.msra.mxu1 %v18602_v15 }
 0x74c   : > { %12554 = vmatprep.subr.bf16.mxu0 %v18607_v32  ;;  %13702 = vmatprep.subr.bf16.mxu1 %v18610_v41 }
 0x74f   : > { %12555 = vmatpush1.bf16.msra.mxu0 %v18605_v13  ;;  %13703 = vmatpush1.bf16.msra.mxu1 %v18608_v46 }
 0x752   : > { %12557 = vmatmul.mubr.bf16.vlgmr.msra.gmra.mrb[0].mxu0 %v2398_v47  ;;  %13705 = vmatmul.mubr.bf16.vlgmr.msra.gmra.mrb[0].mxu1 %v2398_v47 }
 0x825   : > { %v12558_v31 = vpop.f32.mrb[0].mxu0  ;;  %v13706_v56 = vpop.f32.mrb[0].mxu1 }
 0x826   : > { %v15646_v57 = vadd.f32 %v12558_v31, %v2034_v54  ;;  %v15648_v48 = vadd.f32 %v13706_v56, %v2042_v43  ;;  %v12560_v61 = vpop.f32.mrb[1].mxu0  ;;  %v13708_v62 = vpop.f32.mrb[1].mxu1 }
 0x827   : > { %v15647_v0 = vadd.f32 %v12560_v61, %v2038_v55  ;;  %v15649_v50 = vadd.f32 %v13708_v62, %v2046_v44  ;;  %v12562_v1 = vpop.f32.mrb[2].mxu0  ;;  %v13710_v35 = vpop.f32.mrb[2].mxu1 }
 0x828   : > { %v13713_v2 = vmax.f32 %v15646_v57, 0.0  ;;  %v13715_v58 = vmax.f32 %v15648_v48, 0.0  ;;  %v12563_v42 = vpop.f32.mrb[3].mxu0  ;;  %v13711_v3 = vpop.f32.mrb[3].mxu1 }
 0x829   : > { %v13714_v4 = vmax.f32 %v15647_v0, 0.0  ;;  %v13716_v45 = vmax.f32 %v15649_v50, 0.0 }
 0x82b   : > { %v15639_v7 = vpack.c.bf16 %v13714_v4, %v13713_v2  ;;  %v15640_v9 = vpack.c.bf16 %v13716_v45, %v13715_v58 }
 0x82d   : > { %v13733_v38 = vrot.slane %v15639_v7, %v18921_v49  ;;  %v13740_v11 = vrot.slane %v15640_v9, %v18921_v49 }
 0x82f   : > { %v13741_v12 = vcombine.low %v13733_v38, %v13740_v11 }
 0x831   : > { %15641 = vst.sshfl [vmem:[%s228_s30] sm:$0x55 pattern:$0x73625140] %v13741_v12 }
 0x832 PF: > { %p16_p8 = scmp.ge.s32.totalorder %s18763_s17, 4   ;;  %s21022_s12 = smov %s18707_s13 }
 0x833   : > { %s21023_s13 = smov %s18711_s14  ;;  %s21024_s14 = smov %s18773_s20 }
 0x834   : > { %s21025_s15 = smov %s18763_s17  ;;  %18 = sbr.rel (!%p16_p8) target bundleno = 5 (0x5), region = 85 }
 0x83b   :  { %13771 = vsyncpa [#allocation3], 1 }
 0x83c   :  { %13773 = vsyncpa [#allocation3 + $0x1], 1 }
 0x83d   :  { %13774 = vsyncpa [#allocation5], 1 }
 0x83e   :  { %13776 = vsyncpa [#allocation5 + $0x1], 1 }

</bundles_post_ra>
